<compile_context>
chip_gen: v7x
topology: tpu7x:2x2x1
jax: 0.10.0
libtpu: 0.0.40
codegen_flags: <defaults>
</compile_context>

<pallas_src>
import functools

import jax
import jax.numpy as jnp
from jax.experimental import pallas as pl
from jax.experimental.pallas import tpu as pltpu


def _round_up(x, m):
    return ((x + m - 1) // m) * m


def _disentangled_attn_kernel(c_ref, p_ref,
                              wc_ref, bc_ref, wp_ref, bp_ref,
                              rsum_ref, bcast_ref, wo_ref, bo_ref,
                              o_ref, *, num_heads, dp):
    H = num_heads
    Ep = H * dp

    # Fused projections (MXU): content -> [c_q | c_k | c_v], position -> [p_q | p_k].
    cp = jnp.dot(c_ref[...], wc_ref[...],
                 preferred_element_type=jnp.float32) + bc_ref[...]   # [T, 3Ep]
    pp = jnp.dot(p_ref[...], wp_ref[...],
                 preferred_element_type=jnp.float32) + bp_ref[...]   # [T, 2Ep]

    # Lane-aligned slices (dp and Ep are multiples of 128) -> free vreg views.
    cq = cp[:, 0 * Ep:1 * Ep]
    ck = cp[:, 1 * Ep:2 * Ep]
    cv = cp[:, 2 * Ep:3 * Ep]
    pq = pp[:, 0 * Ep:1 * Ep]
    pk = pp[:, 1 * Ep:2 * Ep]

    rsum = rsum_ref[...]        # [Ep, H]  block-sum matrix, softmax scale folded in
    bcast = bcast_ref[...]      # [H, Ep]  block-broadcast matrix

    # Per-token H x H attention, one diagonal at a time.  Rolling keys/values by
    # r whole head blocks pairs query head h with key head sigma_r(h); since the
    # SAME permutation is applied to K and V, correctness does not depend on the
    # roll sign convention.  The segment reduction is an MXU matmul (no XLU
    # cross-lane sums); scores come out lane-dense as [T, H] per diagonal.
    sdiags = []
    for r in range(H):
        ck_r = ck if r == 0 else pltpu.roll(ck, shift=r * dp, axis=1)
        pk_r = pk if r == 0 else pltpu.roll(pk, shift=r * dp, axis=1)
        prod = cq * ck_r + pq * pk_r                                  # [T, Ep] VPU
        sdiags.append(jnp.dot(prod, rsum,
                              preferred_element_type=jnp.float32))    # [T, H]

    # Numerically-stable softmax across the H diagonals (lane-dense VPU/EUP).
    m = sdiags[0]
    for s in sdiags[1:]:
        m = jnp.maximum(m, s)
    exps = [jnp.exp(s - m) for s in sdiags]
    denom = exps[0]
    for e in exps[1:]:
        denom = denom + e
    # Exact divide keeps tight parity with the f32 reference; for production use
    # pl.reciprocal(denom, approx=True) (EUP slot, ~2^-12 relative error).
    inv = 1.0 / denom                                                 # [T, H]

    # attn @ V: broadcast each diagonal's weights across its head block with a
    # tiny MXU matmul, multiply with the identically-rolled values, accumulate.
    out_full = None
    for r in range(H):
        a = exps[r] * inv                                             # [T, H]
        a_exp = jnp.dot(a, bcast,
                        preferred_element_type=jnp.float32)           # [T, Ep]
        cv_r = cv if r == 0 else pltpu.roll(cv, shift=r * dp, axis=1)
        term = a_exp * cv_r
        out_full = term if out_full is None else out_full + term      # [T, Ep]

    # Output projection (padded value lanes hit zero rows of wo_ref).
    y = jnp.dot(out_full, wo_ref[...],
                preferred_element_type=jnp.float32) + bo_ref[...]
    o_ref[...] = y.astype(o_ref.dtype)


def prepare_params(wcq, bcq, wck, bck, wcv, bcv, wpq, bpq, wpk, bpk, wo, bo,
                   num_heads):
    """One-time parameter prep (hoisted off the per-call path).

    - PyTorch nn.Linear stores W as [out, in]; transpose to [in, out].
    - Pad every head's D output columns up to Dp = round_up(D, 128) with zeros
      so head blocks are lane-aligned in the kernel.
    - Fuse content Q/K/V and position Q/K column-wise (2 projection matmuls).
    - Build the [Ep, H] block-sum matrix (softmax 1/sqrt(D) folded in) and the
      [H, Ep] block-broadcast matrix used by the in-kernel MXU reductions.
    """
    E = wcq.shape[0]
    assert E % num_heads == 0
    H = num_heads
    D = E // H
    Dp = _round_up(D, 128)
    Ep = H * Dp

    def pad_out_cols(w, b):
        wt = jnp.asarray(w).T.reshape(E, H, D)
        wt = jnp.pad(wt, ((0, 0), (0, 0), (0, Dp - D))).reshape(E, Ep)
        bp_ = jnp.pad(jnp.asarray(b).reshape(H, D),
                      ((0, 0), (0, Dp - D))).reshape(Ep)
        return wt, bp_

    wcqP, bcqP = pad_out_cols(wcq, bcq)
    wckP, bckP = pad_out_cols(wck, bck)
    wcvP, bcvP = pad_out_cols(wcv, bcv)
    wpqP, bpqP = pad_out_cols(wpq, bpq)
    wpkP, bpkP = pad_out_cols(wpk, bpk)

    wc = jnp.concatenate([wcqP, wckP, wcvP], axis=1)               # [E, 3Ep]
    bc = jnp.concatenate([bcqP, bckP, bcvP]).reshape(1, -1)        # [1, 3Ep]
    wp = jnp.concatenate([wpqP, wpkP], axis=1)                     # [E, 2Ep]
    bp = jnp.concatenate([bpqP, bpkP]).reshape(1, -1)              # [1, 2Ep]

    # Output projection with zero rows at the padded head lanes: [Ep, E].
    wo_pad = jnp.pad(jnp.asarray(wo).T.reshape(H, D, E),
                     ((0, 0), (0, Dp - D), (0, 0))).reshape(Ep, E)
    bo2 = jnp.asarray(bo).reshape(1, -1)

    scale = 1.0 / (D ** 0.5)
    eye = jnp.eye(H, dtype=jnp.float32)
    rsum = scale * jnp.repeat(eye, Dp, axis=0)                     # [Ep, H]
    bcast = jnp.repeat(eye, Dp, axis=1)                            # [H, Ep]

    # TODO(synk): for production, cast wc/wp/wo_pad (and the row tiles) to bf16
    # for 2x MXU throughput / half the weight VMEM (breaks 1e-4 parity).
    return (wc, bc, wp, bp, rsum, bcast, wo_pad, bo2)


def disentangled_attention_forward(content, position, params, num_heads,
                                   *, block_rows=256,
                                   vmem_budget_bytes=56 * 1024 * 1024):
    """Fused Pallas forward. content/position: [B, S, E] float32."""
    wc, bc, wp, bp, rsum, bcast, wo_pad, bo2 = params
    B, S, E = content.shape
    H = num_heads
    Ep = wo_pad.shape[0]
    Dp = Ep // H
    N = B * S

    c2 = content.reshape(N, E)
    p2 = position.reshape(N, E)

    # Row tile: multiple of 8 sublanes; keep >= 2 grid steps when possible so
    # both v7x TensorCores get work.  No HBM-level padding: grid = cdiv(N, tb)
    # and Mosaic masks the ragged last tile (rows are fully independent).
    tb = min(block_rows, _round_up(N, 8))
    if N > 8:
        tb = min(tb, _round_up(pl.cdiv(N, 2), 8))
    tb = max(8, (tb // 8) * 8)

    # Rough live-VMEM estimate (single-buffered weights + activation temps);
    # shrink the row tile until it fits the budget (safe under v7x 64 MiB/TC).
    weight_bytes = 4 * sum(int(a.size)
                           for a in (wc, bc, wp, bp, rsum, bcast, wo_pad, bo2))

    def _est(t):
        return weight_bytes + 4 * t * (6 * E + 13 * Ep)

    while tb > 8 and _est(tb) > vmem_budget_bytes:
        tb = max(8, ((tb // 2) // 8) * 8)

    grid = (pl.cdiv(N, tb),)
    row_spec = pl.BlockSpec((tb, E), lambda i: (i, 0))
    # Weights/biases: whole array resident in VMEM, single-buffered (no per-step
    # re-DMA, half the VMEM of a double-buffered constant-index BlockSpec).
    resident = pl.BlockSpec(memory_space=pltpu.MemorySpace.VMEM)

    out = pl.pallas_call(
        functools.partial(_disentangled_attn_kernel, num_heads=H, dp=Dp),
        out_shape=jax.ShapeDtypeStruct((N, E), jnp.float32),
        grid=grid,
        in_specs=[row_spec, row_spec] + [resident] * 8,
        out_specs=row_spec,
        compiler_params=pltpu.CompilerParams(
            dimension_semantics=("parallel",),
            vmem_limit_bytes=int(vmem_budget_bytes)),
    )(c2, p2, wc, bc, wp, bp, rsum, bcast, wo_pad, bo2)

    return out.reshape(B, S, E)


def _reference(content, position, weights, num_heads):
    """Pure-JAX reference matching the PyTorch module exactly (no head/seq
    transpose before the matmuls)."""
    (wcq, bcq, wck, bck, wcv, bcv, wpq, bpq, wpk, bpk, wo, bo) = weights
    B, S, E = content.shape
    D = E // num_heads

    def lin(x, w, b):
        return x @ w.T + b

    c_q = lin(content, wcq, bcq).reshape(B, S, num_heads, D)
    c_k = lin(content, wck, bck).reshape(B, S, num_heads, D)
    c_v = lin(content, wcv, bcv).reshape(B, S, num_heads, D)
    p_q = lin(position, wpq, bpq).reshape(B, S, num_heads, D)
    p_k = lin(position, wpk, bpk).reshape(B, S, num_heads, D)

    attn = (jnp.einsum('bshd,bsgd->bshg', c_q, c_k)
            + jnp.einsum('bshd,bsgd->bshg', p_q, p_k))
    attn = jax.nn.softmax(attn / (D ** 0.5), axis=-1)
    out = jnp.einsum('bshg,bsgd->bshd', attn, c_v).reshape(B, S, E)
    return out @ wo.T + bo


if __name__ == "__main__":
    # Keep the pure-JAX reference matmuls in full f32 so the comparison with the
    # (f32-accumulating) Pallas kernel is apples-to-apples.
    jax.config.update("jax_default_matmul_precision", "highest")

    B, S, HIDDEN, HEADS = 2, 8, 32, 4

    key = jax.random.PRNGKey(0)
    keys = jax.random.split(key, 14)

    content = jax.random.normal(keys[0], (B, S, HIDDEN), dtype=jnp.float32)
    position = jax.random.normal(keys[1], (B, S, HIDDEN), dtype=jnp.float32)

    lim = 1.0 / (HIDDEN ** 0.5)

    def lin_init(kw, kb):
        w = jax.random.uniform(kw, (HIDDEN, HIDDEN),
                               minval=-lim, maxval=lim, dtype=jnp.float32)
        b = jax.random.uniform(kb, (HIDDEN,),
                               minval=-lim, maxval=lim, dtype=jnp.float32)
        return w, b

    wcq, bcq = lin_init(keys[2], keys[3])
    wck, bck = lin_init(keys[4], keys[5])
    wcv, bcv = lin_init(keys[6], keys[7])
    wpq, bpq = lin_init(keys[8], keys[9])
    wpk, bpk = lin_init(keys[10], keys[11])
    wo, bo = lin_init(keys[12], keys[13])

    # One-time parameter prep (transposes / padding / fusion hoisted off the
    # per-call path).
    params = prepare_params(wcq, bcq, wck, bck, wcv, bcv,
                            wpq, bpq, wpk, bpk, wo, bo, HEADS)
    params = jax.block_until_ready(params)

    fwd = jax.jit(lambda c, p, prm:
                  disentangled_attention_forward(c, p, prm, HEADS))
    out = jax.block_until_ready(fwd(content, position, params))

    ref = _reference(content, position,
                     (wcq, bcq, wck, bck, wcv, bcv, wpq, bpq, wpk, bpk, wo, bo),
                     HEADS)

    assert out.shape == (B, S, HIDDEN)
    max_err = float(jnp.max(jnp.abs(out - ref)))
    assert jnp.allclose(out, ref, atol=1e-4, rtol=1e-4), \
        f"mismatch vs JAX reference (max abs err {max_err})"

    print("KERNEL_OK")
</pallas_src>

<mosaic_0001>
module attributes {stable_mosaic.version = 11 : i64} {
  func.func @_disentangled_attn_kernel(%arg0: i32, %arg1: memref<8x32xf32, #tpu.memory_space<vmem>>, %arg2: memref<8x32xf32, #tpu.memory_space<vmem>>, %arg3: memref<32x1536xf32, #tpu.memory_space<vmem>>, %arg4: memref<1x1536xf32, #tpu.memory_space<vmem>>, %arg5: memref<32x1024xf32, #tpu.memory_space<vmem>>, %arg6: memref<1x1024xf32, #tpu.memory_space<vmem>>, %arg7: memref<512x4xf32, #tpu.memory_space<vmem>>, %arg8: memref<4x512xf32, #tpu.memory_space<vmem>>, %arg9: memref<512x32xf32, #tpu.memory_space<vmem>>, %arg10: memref<1x32xf32, #tpu.memory_space<vmem>>, %arg11: memref<8x32xf32, #tpu.memory_space<vmem>>) attributes {dimension_semantics = [#tpu.dimension_semantics<parallel>], iteration_bounds = array<i64: 2>, scalar_prefetch = 0 : i64, scratch_operands = 0 : i64, tpu.core_type = #tpu.core_type<tc>, window_params = [{transform_indices = @transform_0, window_bounds = array<i64: 8, 32>}, {transform_indices = @transform_1, window_bounds = array<i64: 8, 32>}, {pipeline_mode = #tpu.pipeline_mode<synchronous>, transform_indices = @transform_2, window_bounds = array<i64: 32, 1536>}, {pipeline_mode = #tpu.pipeline_mode<synchronous>, transform_indices = @transform_3, window_bounds = array<i64: 1, 1536>}, {pipeline_mode = #tpu.pipeline_mode<synchronous>, transform_indices = @transform_4, window_bounds = array<i64: 32, 1024>}, {pipeline_mode = #tpu.pipeline_mode<synchronous>, transform_indices = @transform_5, window_bounds = array<i64: 1, 1024>}, {pipeline_mode = #tpu.pipeline_mode<synchronous>, transform_indices = @transform_6, window_bounds = array<i64: 512, 4>}, {pipeline_mode = #tpu.pipeline_mode<synchronous>, transform_indices = @transform_7, window_bounds = array<i64: 4, 512>}, {pipeline_mode = #tpu.pipeline_mode<synchronous>, transform_indices = @transform_8, window_bounds = array<i64: 512, 32>}, {pipeline_mode = #tpu.pipeline_mode<synchronous>, transform_indices = @transform_9, window_bounds = array<i64: 1, 32>}, {transform_indices = @transform_10, window_bounds = array<i64: 8, 32>}]} {
    %c0 = arith.constant 0 : index
    %c0_0 = arith.constant 0 : index
    %0 = vector.load %arg1[%c0, %c0_0] : memref<8x32xf32, #tpu.memory_space<vmem>>, vector<8x32xf32>
    %c0_1 = arith.constant 0 : index
    %c0_2 = arith.constant 0 : index
    %1 = vector.load %arg3[%c0_1, %c0_2] : memref<32x1536xf32, #tpu.memory_space<vmem>>, vector<32x1536xf32>
    %cst = arith.constant dense<0.000000e+00> : vector<8x1536xf32>
    %2 = tpu.matmul %0, %1, %cst {dimension_numbers = #tpu.dot_dimension_numbers<[1], [0], [0], [1], [0, 0, 1, 1], [], []>, precision = #tpu.contract_precision<fp32>} : vector<8x32xf32>, vector<32x1536xf32>, vector<8x1536xf32> -> vector<8x1536xf32>
    %c0_3 = arith.constant 0 : index
    %c0_4 = arith.constant 0 : index
    %3 = vector.load %arg4[%c0_3, %c0_4] : memref<1x1536xf32, #tpu.memory_space<vmem>>, vector<1x1536xf32>
    %4 = vector.broadcast %3 : vector<1x1536xf32> to vector<8x1536xf32>
    %5 = arith.addf %2, %4 : vector<8x1536xf32>
    %c0_5 = arith.constant 0 : index
    %c0_6 = arith.constant 0 : index
    %6 = vector.load %arg2[%c0_5, %c0_6] : memref<8x32xf32, #tpu.memory_space<vmem>>, vector<8x32xf32>
    %c0_7 = arith.constant 0 : index
    %c0_8 = arith.constant 0 : index
    %7 = vector.load %arg5[%c0_7, %c0_8] : memref<32x1024xf32, #tpu.memory_space<vmem>>, vector<32x1024xf32>
    %cst_9 = arith.constant dense<0.000000e+00> : vector<8x1024xf32>
    %8 = tpu.matmul %6, %7, %cst_9 {dimension_numbers = #tpu.dot_dimension_numbers<[1], [0], [0], [1], [0, 0, 1, 1], [], []>, precision = #tpu.contract_precision<fp32>} : vector<8x32xf32>, vector<32x1024xf32>, vector<8x1024xf32> -> vector<8x1024xf32>
    %c0_10 = arith.constant 0 : index
    %c0_11 = arith.constant 0 : index
    %9 = vector.load %arg6[%c0_10, %c0_11] : memref<1x1024xf32, #tpu.memory_space<vmem>>, vector<1x1024xf32>
    %10 = vector.broadcast %9 : vector<1x1024xf32> to vector<8x1024xf32>
    %11 = arith.addf %8, %10 : vector<8x1024xf32>
    %12 = vector.extract_strided_slice %5 {offsets = [0, 0], sizes = [8, 512], strides = [1, 1]} : vector<8x1536xf32> to vector<8x512xf32>
    %13 = vector.extract_strided_slice %5 {offsets = [0, 512], sizes = [8, 512], strides = [1, 1]} : vector<8x1536xf32> to vector<8x512xf32>
    %14 = vector.extract_strided_slice %5 {offsets = [0, 1024], sizes = [8, 512], strides = [1, 1]} : vector<8x1536xf32> to vector<8x512xf32>
    %15 = vector.extract_strided_slice %11 {offsets = [0, 0], sizes = [8, 512], strides = [1, 1]} : vector<8x1024xf32> to vector<8x512xf32>
    %16 = vector.extract_strided_slice %11 {offsets = [0, 512], sizes = [8, 512], strides = [1, 1]} : vector<8x1024xf32> to vector<8x512xf32>
    %c0_12 = arith.constant 0 : index
    %c0_13 = arith.constant 0 : index
    %17 = vector.load %arg7[%c0_12, %c0_13] : memref<512x4xf32, #tpu.memory_space<vmem>>, vector<512x4xf32>
    %c0_14 = arith.constant 0 : index
    %c0_15 = arith.constant 0 : index
    %18 = vector.load %arg8[%c0_14, %c0_15] : memref<4x512xf32, #tpu.memory_space<vmem>>, vector<4x512xf32>
    %19 = arith.mulf %12, %13 : vector<8x512xf32>
    %20 = arith.mulf %15, %16 : vector<8x512xf32>
    %21 = arith.addf %19, %20 : vector<8x512xf32>
    %cst_16 = arith.constant dense<0.000000e+00> : vector<8x4xf32>
    %22 = tpu.matmul %21, %17, %cst_16 {dimension_numbers = #tpu.dot_dimension_numbers<[1], [0], [0], [1], [0, 0, 1, 1], [], []>, precision = #tpu.contract_precision<fp32>} : vector<8x512xf32>, vector<512x4xf32>, vector<8x4xf32> -> vector<8x4xf32>
    %c128_i32 = arith.constant 128 : i32
    %23 = tpu.dynamic_rotate %13 by %c128_i32 dim 1 : vector<8x512xf32>, i32 -> vector<8x512xf32>
    %c128_i32_17 = arith.constant 128 : i32
    %24 = tpu.dynamic_rotate %16 by %c128_i32_17 dim 1 : vector<8x512xf32>, i32 -> vector<8x512xf32>
    %25 = arith.mulf %12, %23 : vector<8x512xf32>
    %26 = arith.mulf %15, %24 : vector<8x512xf32>
    %27 = arith.addf %25, %26 : vector<8x512xf32>
    %cst_18 = arith.constant dense<0.000000e+00> : vector<8x4xf32>
    %28 = tpu.matmul %27, %17, %cst_18 {dimension_numbers = #tpu.dot_dimension_numbers<[1], [0], [0], [1], [0, 0, 1, 1], [], []>, precision = #tpu.contract_precision<fp32>} : vector<8x512xf32>, vector<512x4xf32>, vector<8x4xf32> -> vector<8x4xf32>
    %c256_i32 = arith.constant 256 : i32
    %29 = tpu.dynamic_rotate %13 by %c256_i32 dim 1 : vector<8x512xf32>, i32 -> vector<8x512xf32>
    %c256_i32_19 = arith.constant 256 : i32
    %30 = tpu.dynamic_rotate %16 by %c256_i32_19 dim 1 : vector<8x512xf32>, i32 -> vector<8x512xf32>
    %31 = arith.mulf %12, %29 : vector<8x512xf32>
    %32 = arith.mulf %15, %30 : vector<8x512xf32>
    %33 = arith.addf %31, %32 : vector<8x512xf32>
    %cst_20 = arith.constant dense<0.000000e+00> : vector<8x4xf32>
    %34 = tpu.matmul %33, %17, %cst_20 {dimension_numbers = #tpu.dot_dimension_numbers<[1], [0], [0], [1], [0, 0, 1, 1], [], []>, precision = #tpu.contract_precision<fp32>} : vector<8x512xf32>, vector<512x4xf32>, vector<8x4xf32> -> vector<8x4xf32>
    %c384_i32 = arith.constant 384 : i32
    %35 = tpu.dynamic_rotate %13 by %c384_i32 dim 1 : vector<8x512xf32>, i32 -> vector<8x512xf32>
    %c384_i32_21 = arith.constant 384 : i32
    %36 = tpu.dynamic_rotate %16 by %c384_i32_21 dim 1 : vector<8x512xf32>, i32 -> vector<8x512xf32>
    %37 = arith.mulf %12, %35 : vector<8x512xf32>
    %38 = arith.mulf %15, %36 : vector<8x512xf32>
    %39 = arith.addf %37, %38 : vector<8x512xf32>
    %cst_22 = arith.constant dense<0.000000e+00> : vector<8x4xf32>
    %40 = tpu.matmul %39, %17, %cst_22 {dimension_numbers = #tpu.dot_dimension_numbers<[1], [0], [0], [1], [0, 0, 1, 1], [], []>, precision = #tpu.contract_precision<fp32>} : vector<8x512xf32>, vector<512x4xf32>, vector<8x4xf32> -> vector<8x4xf32>
    %41 = arith.maximumf %22, %28 : vector<8x4xf32>
    %42 = arith.maximumf %41, %34 : vector<8x4xf32>
    %43 = arith.maximumf %42, %40 : vector<8x4xf32>
    %44 = arith.subf %22, %43 : vector<8x4xf32>
    %45 = math.exp %44 : vector<8x4xf32>
    %46 = arith.subf %28, %43 : vector<8x4xf32>
    %47 = math.exp %46 : vector<8x4xf32>
    %48 = arith.subf %34, %43 : vector<8x4xf32>
    %49 = math.exp %48 : vector<8x4xf32>
    %50 = arith.subf %40, %43 : vector<8x4xf32>
    %51 = math.exp %50 : vector<8x4xf32>
    %52 = arith.addf %45, %47 : vector<8x4xf32>
    %53 = arith.addf %52, %49 : vector<8x4xf32>
    %54 = arith.addf %53, %51 : vector<8x4xf32>
    %cst_23 = arith.constant 1.000000e+00 : f32
    %55 = vector.broadcast %cst_23 : f32 to vector<8x4xf32>
    %56 = arith.divf %55, %54 : vector<8x4xf32>
    %57 = arith.mulf %45, %56 : vector<8x4xf32>
    %cst_24 = arith.constant dense<0.000000e+00> : vector<8x512xf32>
    %58 = tpu.matmul %57, %18, %cst_24 {dimension_numbers = #tpu.dot_dimension_numbers<[1], [0], [0], [1], [0, 0, 1, 1], [], []>, precision = #tpu.contract_precision<fp32>} : vector<8x4xf32>, vector<4x512xf32>, vector<8x512xf32> -> vector<8x512xf32>
    %59 = arith.mulf %58, %14 : vector<8x512xf32>
    %60 = arith.mulf %47, %56 : vector<8x4xf32>
    %cst_25 = arith.constant dense<0.000000e+00> : vector<8x512xf32>
    %61 = tpu.matmul %60, %18, %cst_25 {dimension_numbers = #tpu.dot_dimension_numbers<[1], [0], [0], [1], [0, 0, 1, 1], [], []>, precision = #tpu.contract_precision<fp32>} : vector<8x4xf32>, vector<4x512xf32>, vector<8x512xf32> -> vector<8x512xf32>
    %c128_i32_26 = arith.constant 128 : i32
    %62 = tpu.dynamic_rotate %14 by %c128_i32_26 dim 1 : vector<8x512xf32>, i32 -> vector<8x512xf32>
    %63 = arith.mulf %61, %62 : vector<8x512xf32>
    %64 = arith.addf %59, %63 : vector<8x512xf32>
    %65 = arith.mulf %49, %56 : vector<8x4xf32>
    %cst_27 = arith.constant dense<0.000000e+00> : vector<8x512xf32>
    %66 = tpu.matmul %65, %18, %cst_27 {dimension_numbers = #tpu.dot_dimension_numbers<[1], [0], [0], [1], [0, 0, 1, 1], [], []>, precision = #tpu.contract_precision<fp32>} : vector<8x4xf32>, vector<4x512xf32>, vector<8x512xf32> -> vector<8x512xf32>
    %c256_i32_28 = arith.constant 256 : i32
    %67 = tpu.dynamic_rotate %14 by %c256_i32_28 dim 1 : vector<8x512xf32>, i32 -> vector<8x512xf32>
    %68 = arith.mulf %66, %67 : vector<8x512xf32>
    %69 = arith.addf %64, %68 : vector<8x512xf32>
    %70 = arith.mulf %51, %56 : vector<8x4xf32>
    %cst_29 = arith.constant dense<0.000000e+00> : vector<8x512xf32>
    %71 = tpu.matmul %70, %18, %cst_29 {dimension_numbers = #tpu.dot_dimension_numbers<[1], [0], [0], [1], [0, 0, 1, 1], [], []>, precision = #tpu.contract_precision<fp32>} : vector<8x4xf32>, vector<4x512xf32>, vector<8x512xf32> -> vector<8x512xf32>
    %c384_i32_30 = arith.constant 384 : i32
    %72 = tpu.dynamic_rotate %14 by %c384_i32_30 dim 1 : vector<8x512xf32>, i32 -> vector<8x512xf32>
    %73 = arith.mulf %71, %72 : vector<8x512xf32>
    %74 = arith.addf %69, %73 : vector<8x512xf32>
    %c0_31 = arith.constant 0 : index
    %c0_32 = arith.constant 0 : index
    %75 = vector.load %arg9[%c0_31, %c0_32] : memref<512x32xf32, #tpu.memory_space<vmem>>, vector<512x32xf32>
    %cst_33 = arith.constant dense<0.000000e+00> : vector<8x32xf32>
    %76 = tpu.matmul %74, %75, %cst_33 {dimension_numbers = #tpu.dot_dimension_numbers<[1], [0], [0], [1], [0, 0, 1, 1], [], []>, precision = #tpu.contract_precision<fp32>} : vector<8x512xf32>, vector<512x32xf32>, vector<8x32xf32> -> vector<8x32xf32>
    %c0_34 = arith.constant 0 : index
    %c0_35 = arith.constant 0 : index
    %77 = vector.load %arg10[%c0_34, %c0_35] : memref<1x32xf32, #tpu.memory_space<vmem>>, vector<1x32xf32>
    %78 = vector.broadcast %77 : vector<1x32xf32> to vector<8x32xf32>
    %79 = arith.addf %76, %78 : vector<8x32xf32>
    %c0_36 = arith.constant 0 : index
    %c0_37 = arith.constant 0 : index
    %80 = vector.load %arg11[%c0_36, %c0_37] : memref<8x32xf32, #tpu.memory_space<vmem>>, vector<8x32xf32>
    tpu.vector_store %arg11[%c0_36, %c0_37], %79 {strides = array<i32>} : memref<8x32xf32, #tpu.memory_space<vmem>>, vector<8x32xf32>,
    return
  }
  func.func @transform_0(%arg0: i32) -> (i32, i32) {
    %c0_i32 = arith.constant 0 : i32
    %c0_i32_0 = arith.constant 0 : i32
    return %arg0, %c0_i32 : i32, i32
  }
  func.func @transform_1(%arg0: i32) -> (i32, i32) {
    %c0_i32 = arith.constant 0 : i32
    %c0_i32_0 = arith.constant 0 : i32
    return %arg0, %c0_i32 : i32, i32
  }
  func.func @transform_2(%arg0: i32) -> (i32, i32) {
    %c0_i32 = arith.constant 0 : i32
    %c0_i32_0 = arith.constant 0 : i32
    %c0_i32_1 = arith.constant 0 : i32
    return %c0_i32, %c0_i32_0 : i32, i32
  }
  func.func @transform_3(%arg0: i32) -> (i32, i32) {
    %c0_i32 = arith.constant 0 : i32
    %c0_i32_0 = arith.constant 0 : i32
    %c0_i32_1 = arith.constant 0 : i32
    return %c0_i32, %c0_i32_0 : i32, i32
  }
  func.func @transform_4(%arg0: i32) -> (i32, i32) {
    %c0_i32 = arith.constant 0 : i32
    %c0_i32_0 = arith.constant 0 : i32
    %c0_i32_1 = arith.constant 0 : i32
    return %c0_i32, %c0_i32_0 : i32, i32
  }
  func.func @transform_5(%arg0: i32) -> (i32, i32) {
    %c0_i32 = arith.constant 0 : i32
    %c0_i32_0 = arith.constant 0 : i32
    %c0_i32_1 = arith.constant 0 : i32
    return %c0_i32, %c0_i32_0 : i32, i32
  }
  func.func @transform_6(%arg0: i32) -> (i32, i32) {
    %c0_i32 = arith.constant 0 : i32
    %c0_i32_0 = arith.constant 0 : i32
    %c0_i32_1 = arith.constant 0 : i32
    return %c0_i32, %c0_i32_0 : i32, i32
  }
  func.func @transform_7(%arg0: i32) -> (i32, i32) {
    %c0_i32 = arith.constant 0 : i32
    %c0_i32_0 = arith.constant 0 : i32
    %c0_i32_1 = arith.constant 0 : i32
    return %c0_i32, %c0_i32_0 : i32, i32
  }
  func.func @transform_8(%arg0: i32) -> (i32, i32) {
    %c0_i32 = arith.constant 0 : i32
    %c0_i32_0 = arith.constant 0 : i32
    %c0_i32_1 = arith.constant 0 : i32
    return %c0_i32, %c0_i32_0 : i32, i32
  }
  func.func @transform_9(%arg0: i32) -> (i32, i32) {
    %c0_i32 = arith.constant 0 : i32
    %c0_i32_0 = arith.constant 0 : i32
    %c0_i32_1 = arith.constant 0 : i32
    return %c0_i32, %c0_i32_0 : i32, i32
  }
  func.func @transform_10(%arg0: i32) -> (i32, i32) {
    %c0_i32 = arith.constant 0 : i32
    %c0_i32_0 = arith.constant 0 : i32
    return %arg0, %c0_i32 : i32, i32
  }
}

</mosaic_0001>

<bundles_post_ra>
// kernel: _lambda_.1
= control target key start
LH: loop header
LB: loop body
LE: loop exit
PB: predicated region body
PF: predicated region fallthrough
CT: control target
= control target key end

     0   :  { %15 = vsyncpa [#allocation3], 0  ;;  %s29200_s0 = inlined_call_operand.vmem [shape: f32[16,32], index: 0, kind: input, shape index: {}]   ;;  %s29201_s1 = inlined_call_operand.vmem [shape: f32[16,32], index: 1, kind: input, shape index: {}]   ;;  %s29202_s2 = inlined_call_operand.vmem [shape: f32[32,1536], index: 2, kind: input, shape index: {}]   ;;  %s29203_s3 = inlined_call_operand.vmem [shape: f32[1,1536], index: 3, kind: input, shape index: {}]   ;;  %s29204_s4 = inlined_call_operand.vmem [shape: f32[32,1024], index: 4, kind: input, shape index: {}]   ;;  %s29205_s5 = inlined_call_operand.vmem [shape: f32[1,1024], index: 5, kind: input, shape index: {}]   ;;  %s29206_s6 = inlined_call_operand.vmem [shape: f32[512,4], index: 6, kind: input, shape index: {}]   ;;  %s29207_s7 = inlined_call_operand.vmem [shape: f32[4,512], index: 7, kind: input, shape index: {}]   ;;  %s29208_s8 = inlined_call_operand.vmem [shape: f32[512,32], index: 8, kind: input, shape index: {}]   ;;  %s29209_s9 = inlined_call_operand.vmem [shape: f32[1,32], index: 9, kind: input, shape index: {}]   ;;  %s29210_s10 = inlined_call_operand.hbm [shape: f32[16,32], index: 10, kind: output, shape index: {}]  }
   0x1   :  { %17 = vsyncpa [#allocation3 + $0x1], 0  ;;  %s23571_s13 = smov 0   ;;  %s23573_s14 = smov 0  }
   0x2   :  { %s23575_s15 = smov 0   ;;  %s23577_s16 = smov 0  }
   0x3 LB: > { %s23592_s17 = sadd.s32 4294967295, %s23512_s16   ;;  %s18686_s18 = sadd.s32 4294967294, %s23512_s16   ;;  %s23512_s16 = sphi %s23577_s16, %s30828_s16   ;;  %s23508_s15 = sphi %s23575_s15, %s30827_s15   ;;  %s23504_s14 = sphi %s23573_s14, %s30826_s14   ;;  %s23500_s13 = sphi %s23571_s13, %s30825_s13  }
   0x4   : > { %s23596_s19 = sadd.s32 1, %s23512_s16   ;;  %s250_s20 = sadd.s32 1, %s23508_s15 }
   0x5   : > { %s247_s21 = ssub.s32 %s23512_s16, %s23596_s19  ;;  %p260_p0 = scmp.ne.s32.totalorder %s23508_s15, %s23504_s14 }
   0x6   : > { %p248_p1 = scmp.eq.s32.totalorder %s247_s21, 0  ;;  %p261_p2 = scmp.eq.s32.totalorder %s23592_s17, 1 }
   0x7   : > { %p266_p3 = scmp.ne.s32.totalorder %s23504_s14, %s23500_s13  ;;  %p267_p4 = scmp.eq.s32.totalorder %s18686_s18, 1 }
   0x8   : > { %s23607_s22 = scalar_select %p248_p1, %s23508_s15, %s250_s20  }
   0x9   : > { %p23609_p5 = por %p261_p2, %p260_p0  ;;  %p23613_p6 = por %p267_p4, %p266_p3 }
   0xa   : > { %p18689_p7 = scmp.ge.s32.totalorder %s23512_s16, 1  ;;  %p323_p8 = scmp.lt.s32.totalorder %s23512_s16, 3 }
   0xc   : > { %p324_p9 = pnand %p18689_p7, %p323_p8 }
   0xe   : > { %327 = sbr.rel (%p324_p9) target bundleno = 2320 (0x910), region = 60 }
  0x15   : > { %v374_v0 = vld [vmem:[%s29202_s2 + $0x8] sm:$0xff]  ;;  %v376_v2 = vld [vmem:[%s29202_s2 + $0x18] sm:$0xff]  ;;  %p364_p10 = scmp.lt.s32.totalorder %s23592_s17, 1  ;;  %v373_v7 = vld [vmem:[%s29202_s2] sm:$0xff]  ;;  %v29245_v9 = vmov 0.0   ;;  %vm485_vm0 = vcmask 261120  }
  0x16   : > { %v386_v1 = vld [vmem:[%s29202_s2 + $0x68] sm:$0xff]  ;;  %v489_v3 = vand.u32 4294901760, %v374_v0  ;;  %v388_v5 = vld [vmem:[%s29202_s2 + $0x78] sm:$0xff]  ;;  %v1032_v6 = vand.u32 4294901760, %v376_v2  ;;  %v385_v8 = vld [vmem:[%s29202_s2 + $0x60] sm:$0xff]  ;;  %561 = vmatprep.mubr.f32.mxu0 %v29245_v9  ;;  %1104 = vmatprep.mubr.f32.mxu1 %v29245_v9  ;;  %v491_v11 = vand.u32 4294901760, %v373_v7 }
  0x17   : > { %v493_v4 = vand.u32 4294901760, %v386_v1  ;;  %v1036_v10 = vand.u32 4294901760, %v388_v5  ;;  %v495_v12 = vand.u32 4294901760, %v385_v8  ;;  %v375_v13 = vld [vmem:[%s29202_s2 + $0x10] sm:$0xff]  ;;  %v398_v15 = vld [vmem:[%s29202_s2 + $0xc8] sm:$0xff]  ;;  %v400_v21 = vld [vmem:[%s29202_s2 + $0xd8] sm:$0xff] }
  0x18   : > { %v387_v14 = vld [vmem:[%s29202_s2 + $0x70] sm:$0xff]  ;;  %v23651_v17 = vsub.f32 %v374_v0, %v489_v3  ;;  %v23655_v19 = vsub.f32 %v376_v2, %v1032_v6  ;;  %v410_v20 = vld [vmem:[%s29202_s2 + $0x128] sm:$0xff]  ;;  %v412_v22 = vld [vmem:[%s29202_s2 + $0x138] sm:$0xff]  ;;  %s23669_s27 = scalar_select %p364_p10, %s23592_s17, 1  ;;  %v23677_v26 = vsub.f32 %v373_v7, %v491_v11  ;;  %v1034_v29 = vand.u32 4294901760, %v375_v13 }
  0x19   : > { %v23649_v16 = vpack.c.bf16 %v493_v4, %v489_v3  ;;  %v23653_v18 = vsub.f32 %v386_v1, %v493_v4  ;;  %v23671_v23 = vpack.c.bf16 %v1036_v10, %v1032_v6  ;;  %v23673_v24 = vsub.f32 %v388_v5, %v1036_v10  ;;  %v397_v27 = vld [vmem:[%s29202_s2 + $0xc0] sm:$0xff]  ;;  %v399_v37 = vld [vmem:[%s29202_s2 + $0xd0] sm:$0xff]  ;;  %s18695_s12 = sshll.u32 %s23592_s17, 7  ;;  %s23515_s17 = smov [#allocation2]  }
  0x1a   : > { %v23675_v25 = vpack.c.bf16 %v495_v12, %v491_v11  ;;  %v23683_v28 = vsub.f32 %v385_v8, %v495_v12  ;;  %v1038_v30 = vand.u32 4294901760, %v387_v14  ;;  %v497_v31 = vand.u32 4294901760, %v398_v15  ;;  %s18691_s30 = sshll.u32 %s23669_s27, 3  ;;  %v409_v35 = vld [vmem:[%s29202_s2 + $0x120] sm:$0xff]  ;;  %v411_v42 = vld [vmem:[%s29202_s2 + $0x130] sm:$0xff]  ;;  %s29157_s21 = scalar_lea.hbm %s29210_s10, %s18695_s12 }
  0x1b   : > { %20799 = vmatprep.subr.bf16.mxu0 %v23649_v16  ;;  %20847 = vmatprep.subr.bf16.mxu1 %v23671_v23  ;;  %v501_v32 = vand.u32 4294901760, %v410_v20  ;;  %v1040_v33 = vand.u32 4294901760, %v400_v21  ;;  %v1044_v34 = vand.u32 4294901760, %v412_v22  ;;  %v499_v36 = vand.u32 4294901760, %v397_v27  ;;  %s367_s29 = scalar_lea.vmem %s29200_s0, %s18691_s30  ;;  %s371_s26 = scalar_lea.vmem %s29201_s1, %s18691_s30 }
  0x1c   : > { %20801 = vmatpush1.bf16.msra.mxu0 %v23675_v25  ;;  %v23694_v38 = vpack.c.bf16 %v1038_v30, %v1034_v29  ;;  %v23696_v39 = vsub.f32 %v375_v13, %v1034_v29  ;;  %v23698_v40 = vsub.f32 %v387_v14, %v1038_v30  ;;  %v23700_v41 = vsub.f32 %v398_v15, %v497_v31  ;;  %v372_v55 = vld [vmem:[%s367_s29] sm:$0xff]  ;;  %s361_s29 = sand.u32 1, %s23504_s14   ;;  %s23454_s28 = sshll.u32 %s23515_s17, 4  ;;  %s23455_s28 = int_to_ptr.vmem [resolvable:$false] %s23454_s28 }
  0x1d   : > { %v23710_v43 = vpack.c.bf16 %v501_v32, %v497_v31  ;;  %v23712_v44 = vsub.f32 %v410_v20, %v501_v32  ;;  %v23714_v45 = vpack.c.bf16 %v1044_v34, %v1040_v33  ;;  %v23716_v46 = vsub.f32 %v400_v21, %v1040_v33  ;;  %s18690_s11 = sshll.u32 %s361_s29, 3  ;;  %s18602_s25 = scalar_lea.sflag [#allocation3], %s361_s29 }
  0x1e   : > { %20849 = vmatpush1.bf16.msra.mxu1 %v23694_v38  ;;  %v23719_v47 = vsub.f32 %v412_v22, %v1044_v34  ;;  %v503_v48 = vand.u32 4294901760, %v409_v35  ;;  %v23721_v49 = vsub.f32 %v397_v27, %v499_v36  ;;  %v1042_v50 = vand.u32 4294901760, %v399_v37  ;;  %s363_s27 = scalar_lea.vmem [#allocation2], %s18690_s11  ;;  %s23456_s11 = scalar_lea.vmem %s23455_s28, 256 }
  0x1f   : > { %20803 = vmatprep.subr.bf16.mxu0 %v23710_v43  ;;  %20851 = vmatprep.subr.bf16.mxu1 %v23714_v45  ;;  %v1046_v51 = vand.u32 4294901760, %v411_v42  ;;  %v575_v52 = vand.u32 4294901760, %v23651_v17  ;;  %v587_v53 = vand.u32 4294901760, %v23653_v18  ;;  %v1118_v54 = vand.u32 4294901760, %v23655_v19  ;;  %s18615_s30 = sshll.u32 %s363_s27, 4  ;;  %s29159_s30 = int_to_ptr.vmem [resolvable:$true] %s18615_s30 }
  0x20   : > { %v23728_v56 = vpack.c.bf16 %v503_v48, %v499_v36  ;;  %v23730_v57 = vsub.f32 %v409_v35, %v503_v48  ;;  %v23732_v58 = vsub.f32 %v399_v37, %v1042_v50  ;;  %v1130_v59 = vand.u32 4294901760, %v23673_v24  ;;  %p23457_p0 = scmp.lt.s32.totalorder %s29159_s30, %s23455_s28 }
  0x21   : > { %v23735_v60 = vpack.c.bf16 %v1046_v51, %v1042_v50  ;;  %v23737_v61 = vsub.f32 %v411_v42, %v1046_v51  ;;  %v576_v62 = vsub.f32 %v23651_v17, %v575_v52  ;;  %v588_v63 = vsub.f32 %v23653_v18, %v587_v53 }
  0x22   : > { %20805 = vmatpush1.bf16.msra.mxu0 %v23728_v56  ;;  %v1119_v0 = vsub.f32 %v23655_v19, %v1118_v54  ;;  %v1131_v1 = vsub.f32 %v23673_v24, %v1130_v59  ;;  %v487_v2 = vsel %vm485_vm0, %v372_v55, 0  ;;  %v581_v3 = vand.u32 4294901760, %v23677_v26 }
  0x23   : > { %20853 = vmatpush1.bf16.msra.mxu1 %v23735_v60  ;;  %v577_v4 = vand.u32 4294901760, %v576_v62  ;;  %v589_v5 = vand.u32 4294901760, %v588_v63  ;;  %v23755_v6 = vand.u32 4294901760, %v487_v2  ;;  %v593_v7 = vand.u32 4294901760, %v23683_v28 }
  0x24   : > { %v1120_v8 = vand.u32 4294901760, %v1119_v0  ;;  %v1132_v10 = vand.u32 4294901760, %v1131_v1  ;;  %v582_v11 = vsub.f32 %v23677_v26, %v581_v3  ;;  %v1124_v12 = vand.u32 4294901760, %v23696_v39 }
  0x25   : > { %v20806_v13 = vpack.c.bf16 %v589_v5, %v577_v4  ;;  %v23763_v14 = vsub.f32 %v487_v2, %v23755_v6  ;;  %v594_v15 = vsub.f32 %v23683_v28, %v593_v7  ;;  %v1136_v20 = vand.u32 4294901760, %v23698_v40 }
  0x26   : > { %v20854_v21 = vpack.c.bf16 %v1132_v10, %v1120_v8  ;;  %v583_v22 = vand.u32 4294901760, %v582_v11  ;;  %v1125_v27 = vsub.f32 %v23696_v39, %v1124_v12  ;;  %v599_v29 = vand.u32 4294901760, %v23700_v41 }
  0x27   : > { %20807 = vmatprep.subr.bf16.mxu0 %v20806_v13  ;;  %v23774_v30 = vand.u32 4294901760, %v23763_v14  ;;  %v595_v31 = vand.u32 4294901760, %v594_v15  ;;  %v1137_v32 = vsub.f32 %v23698_v40, %v1136_v20  ;;  %v611_v33 = vand.u32 4294901760, %v23712_v44 }
  0x28   : > { %20855 = vmatprep.subr.bf16.mxu1 %v20854_v21  ;;  %v1126_v34 = vand.u32 4294901760, %v1125_v27  ;;  %v600_v35 = vsub.f32 %v23700_v41, %v599_v29  ;;  %v1142_v36 = vand.u32 4294901760, %v23716_v46  ;;  %v1154_v37 = vand.u32 4294901760, %v23719_v47 }
  0x29   : > { %v565_v42 = vsub.f32 %v23763_v14, %v23774_v30  ;;  %v20808_v48 = vpack.c.bf16 %v595_v31, %v583_v22  ;;  %v1138_v50 = vand.u32 4294901760, %v1137_v32  ;;  %v612_v51 = vsub.f32 %v23712_v44, %v611_v33 }
  0x2a   : > { %v601_v55 = vand.u32 4294901760, %v600_v35  ;;  %v1143_v62 = vsub.f32 %v23716_v46, %v1142_v36  ;;  %v1155_v63 = vsub.f32 %v23719_v47, %v1154_v37  ;;  %v605_v0 = vand.u32 4294901760, %v23721_v49 }
  0x2b   : > { %v23797_v1 = vand.u32 4294901760, %v565_v42  ;;  %v20856_v2 = vpack.c.bf16 %v1138_v50, %v1126_v34  ;;  %v613_v4 = vand.u32 4294901760, %v612_v51  ;;  %v617_v5 = vand.u32 4294901760, %v23730_v57 }
  0x2c   : > { %v1144_v8 = vand.u32 4294901760, %v1143_v62  ;;  %v1156_v10 = vand.u32 4294901760, %v1155_v63  ;;  %v606_v11 = vsub.f32 %v23721_v49, %v605_v0  ;;  %v1148_v13 = vand.u32 4294901760, %v23732_v58 }
  0x2d   : > { %567 = vmatmul.mubr.f32.vlgmr.msra.gmra.mrb[0].mxu0 %v23797_v1  ;;  %1110 = vmatmul.mubr.f32.vlgmr.msra.gmra.mrb[0].mxu1 %v23797_v1  ;;  %v20810_v15 = vpack.c.bf16 %v613_v4, %v601_v55  ;;  %v618_v21 = vsub.f32 %v23730_v57, %v617_v5  ;;  %v1160_v22 = vand.u32 4294901760, %v23737_v61  ;;  %v20862_v55 = vpack.c.bf16 %v23673_v24, %v23655_v19  ;;  %v379_v24 = vld [vmem:[%s29202_s2 + $0x30] sm:$0xff] }
  0x2e   : > { %20809 = vmatpush1.bf16.msra.mxu0 %v20808_v48  ;;  %20857 = vmatpush1.bf16.msra.mxu1 %v20856_v2  ;;  %v20858_v27 = vpack.c.bf16 %v1156_v10, %v1144_v8  ;;  %v607_v31 = vand.u32 4294901760, %v606_v11  ;;  %v1149_v32 = vsub.f32 %v23732_v58, %v1148_v13  ;;  %v20814_v48 = vpack.c.bf16 %v23653_v18, %v23651_v17  ;;  %v392_v17 = vld [vmem:[%s29202_s2 + $0x98] sm:$0xff] }
  0x2f   : > { %20811 = vmatprep.subr.bf16.mxu0 %v20810_v15  ;;  %v619_v34 = vand.u32 4294901760, %v618_v21  ;;  %v1161_v35 = vsub.f32 %v23737_v61, %v1160_v22  ;;  %677 = vmatprep.mubr.f32.mxu0 %v29245_v9  ;;  %v20816_v63 = vpack.c.bf16 %v23683_v28, %v23677_v26  ;;  %v20818_v2 = vpack.c.bf16 %v23712_v44, %v23700_v41  ;;  %v378_v21 = vld [vmem:[%s29202_s2 + $0x28] sm:$0xff] }
  0x30   : > { %20859 = vmatprep.subr.bf16.mxu1 %v20858_v27  ;;  %v1150_v42 = vand.u32 4294901760, %v1149_v32  ;;  %1220 = vmatprep.mubr.f32.mxu1 %v29245_v9  ;;  %v20864_v4 = vpack.c.bf16 %v23698_v40, %v23696_v39  ;;  %v20866_v8 = vpack.c.bf16 %v23719_v47, %v23716_v46  ;;  %v20820_v10 = vpack.c.bf16 %v23730_v57, %v23721_v49  ;;  %v390_v27 = vld [vmem:[%s29202_s2 + $0x88] sm:$0xff]  ;;  %v404_v47 = vld [vmem:[%s29202_s2 + $0xf8] sm:$0xff] }
  0x31   : > { %v20812_v50 = vpack.c.bf16 %v619_v34, %v607_v31  ;;  %v1162_v51 = vand.u32 4294901760, %v1161_v35  ;;  %v20868_v11 = vpack.c.bf16 %v23737_v61, %v23732_v58  ;;  %v20830_v15 = vpack.c.bf16 %v587_v53, %v575_v52  ;;  %v380_v31 = vld [vmem:[%s29202_s2 + $0x38] sm:$0xff]  ;;  %v377_v52 = vld [vmem:[%s29202_s2 + $0x20] sm:$0xff]  ;;  %v402_v28 = vld [vmem:[%s29202_s2 + $0xe8] sm:$0xff] }
  0x32   : > { %v20878_v18 = vpack.c.bf16 %v1130_v59, %v1118_v54  ;;  %v389_v53 = vld [vmem:[%s29202_s2 + $0x80] sm:$0xff]  ;;  %v20832_v32 = vpack.c.bf16 %v593_v7, %v581_v3  ;;  %v1575_v34 = vand.u32 4294901760, %v378_v21  ;;  %v1579_v19 = vand.u32 4294901760, %v390_v27  ;;  %v391_v54 = vld [vmem:[%s29202_s2 + $0x90] sm:$0xff]  ;;  %v414_v3 = vld [vmem:[%s29202_s2 + $0x148] sm:$0xff] }
  0x33   : > { %20813 = vmatpush1.bf16.msra.mxu0 %v20812_v50  ;;  %v20860_v62 = vpack.c.bf16 %v1162_v51, %v1150_v42  ;;  %v20834_v59 = vpack.c.bf16 %v611_v33, %v599_v29  ;;  %v2118_v26 = vand.u32 4294901760, %v380_v31  ;;  %v2122_v35 = vand.u32 4294901760, %v392_v17 }
  0x34   : > { %20815 = vmatprep.subr.bf16.mxu0 %v20814_v48  ;;  %v20880_v41 = vpack.c.bf16 %v1136_v20, %v1124_v12  ;;  %v20882_v44 = vpack.c.bf16 %v1154_v37, %v1142_v36  ;;  %v1577_v7 = vand.u32 4294901760, %v377_v52  ;;  %v1581_v29 = vand.u32 4294901760, %v389_v53  ;;  %v416_v12 = vld [vmem:[%s29202_s2 + $0x158] sm:$0xff]  ;;  %v401_v20 = vld [vmem:[%s29202_s2 + $0xe0] sm:$0xff] }
  0x35   : > { %20861 = vmatpush1.bf16.msra.mxu1 %v20860_v62  ;;  %v20836_v33 = vpack.c.bf16 %v617_v5, %v605_v0  ;;  %v20884_v39 = vpack.c.bf16 %v1160_v22, %v1148_v13  ;;  %v2120_v40 = vand.u32 4294901760, %v379_v24  ;;  %v2124_v46 = vand.u32 4294901760, %v391_v54  ;;  %v413_v36 = vld [vmem:[%s29202_s2 + $0x140] sm:$0xff] }
  0x36   : > { %20863 = vmatprep.subr.bf16.mxu1 %v20862_v55  ;;  %679 = vmatmul.mubr.f32.vlgmr.msra.gmra.mrb[0].mxu0 %v23755_v6  ;;  %v23920_v49 = vpack.c.bf16 %v1579_v19, %v1575_v34  ;;  %v23922_v57 = vsub.f32 %v378_v21, %v1575_v34  ;;  %v1583_v58 = vand.u32 4294901760, %v402_v28  ;;  %v1587_v61 = vand.u32 4294901760, %v414_v3 }
  0x37   : > { %20817 = vmatpush1.bf16.msra.mxu0 %v20816_v63  ;;  %765 = vmatprep.mubr.f32.mxu0 %v29245_v9  ;;  %v23931_v37 = vsub.f32 %v390_v27, %v1579_v19  ;;  %v23933_v0 = vpack.c.bf16 %v2122_v35, %v2118_v26  ;;  %v23935_v5 = vsub.f32 %v380_v31, %v2118_v26  ;;  %v2126_v42 = vand.u32 4294901760, %v404_v47  ;;  %v23949_v63 = vld [vmem:[%s29202_s2 + $0xf0] sm:$0xff] }
  0x38   : > { %1222 = vmatmul.mubr.f32.vlgmr.msra.gmra.mrb[0].mxu1 %v23755_v6  ;;  %20819 = vmatprep.subr.bf16.mxu0 %v20818_v2  ;;  %v23938_v13 = vsub.f32 %v392_v17, %v2122_v35  ;;  %v23940_v22 = vpack.c.bf16 %v1581_v29, %v1577_v7  ;;  %v2130_v48 = vand.u32 4294901760, %v416_v12  ;;  %v23942_v50 = vsub.f32 %v377_v52, %v1577_v7  ;;  %v23954_v2 = vld [vmem:[%s29202_s2 + $0x150] sm:$0xff] }
  0x39   : > { %20865 = vmatpush1.bf16.msra.mxu1 %v20864_v4  ;;  %1308 = vmatprep.mubr.f32.mxu1 %v29245_v9  ;;  %v23944_v51 = vsub.f32 %v389_v53, %v1581_v29  ;;  %v1585_v55 = vand.u32 4294901760, %v401_v20  ;;  %v1589_v62 = vand.u32 4294901760, %v413_v36  ;;  %v23956_v4 = vpack.c.bf16 %v2124_v46, %v2120_v40 }
  0x3a   : > { %20867 = vmatprep.subr.bf16.mxu1 %v20866_v8  ;;  %v23958_v8 = vsub.f32 %v379_v24, %v2120_v40  ;;  %v23967_v21 = vsub.f32 %v414_v3, %v1587_v61  ;;  %v1661_v27 = vand.u32 4294901760, %v23922_v57  ;;  %v1673_v31 = vand.u32 4294901760, %v23931_v37 }
  0x3b   : > { %20821 = vmatpush1.bf16.msra.mxu0 %v20820_v10  ;;  %v23960_v10 = vsub.f32 %v391_v54, %v2124_v46  ;;  %v23971_v17 = vpack.c.bf16 %v2130_v48, %v2126_v42  ;;  %v2128_v52 = vand.u32 4294901760, %v23949_v63  ;;  %v2132_v53 = vand.u32 4294901760, %v23954_v2 }
  0x3c   : > { %20823 = vmatprep.subr.bf16.mxu0 %v23649_v16  ;;  %v2204_v34 = vand.u32 4294901760, %v23935_v5  ;;  %v2216_v19 = vand.u32 4294901760, %v23938_v13  ;;  %v23987_v24 = vsub.f32 %v401_v20, %v1585_v55  ;;  %v23989_v54 = vsub.f32 %v413_v36, %v1589_v62 }
  0x3d   : > { %20869 = vmatpush1.bf16.msra.mxu1 %v20868_v11  ;;  %v23962_v11 = vpack.c.bf16 %v1587_v61, %v1583_v58  ;;  %v1662_v26 = vsub.f32 %v23922_v57, %v1661_v27  ;;  %v24006_v3 = vsub.f32 %v23949_v63, %v2128_v52  ;;  %vm13036_vm1 = vcmask 1043456  }
  0x3e   : > { %20871 = vmatprep.subr.bf16.mxu1 %v23671_v23  ;;  %768 = vmatmul.mubr.f32.vlgmr.msra.gmra.mrb[0].mxu0 %v23763_v14  ;;  %v2205_v7 = vsub.f32 %v23935_v5, %v2204_v34  ;;  %v29213_v40 = vand.u32 4294901760, %v23987_v24  ;;  %v29214_v46 = vand.u32 4294901760, %v23989_v54  ;;  %vm13032_vm2 = vcmask 31744  }
  0x3f   : > { %20825 = vmatpush1.bf16.msra.mxu0 %v23675_v25  ;;  %846 = vmatprep.mubr.f32.mxu0 %v29245_v9  ;;  %v29215_v36 = vand.u32 4294901760, %v24006_v3 }
  0x40   : > { %1311 = vmatmul.mubr.f32.vlgmr.msra.gmra.mrb[0].mxu1 %v23763_v14  ;;  %20827 = vmatprep.subr.bf16.mxu0 %v23710_v43 }
  0x41   : > { %20873 = vmatpush1.bf16.msra.mxu1 %v23694_v38  ;;  %1389 = vmatprep.mubr.f32.mxu1 %v29245_v9 }
  0x42   : > { %20875 = vmatprep.subr.bf16.mxu1 %v23714_v45 }
  0x43   : > { %20829 = vmatpush1.bf16.msra.mxu0 %v23728_v56 }
  0x44   : > { %20831 = vmatprep.subr.bf16.mxu0 %v20830_v15  ;;  %v23965_v15 = vsub.f32 %v402_v28, %v1583_v58  ;;  %v1697_v28 = vand.u32 4294901760, %v23967_v21 }
  0x45   : > { %20877 = vmatpush1.bf16.msra.mxu1 %v23735_v60 }
  0x46   : > { %20879 = vmatprep.subr.bf16.mxu1 %v20878_v18  ;;  %850 = vmatmul.mubr.f32.vlgmr.msra.gmra.mrb[0].mxu0 %v23774_v30  ;;  %v23973_v18 = vsub.f32 %v404_v47, %v2126_v42  ;;  %v1685_v35 = vand.u32 4294901760, %v23965_v15  ;;  %v1663_v47 = vand.u32 4294901760, %v1662_v26  ;;  %v1698_v58 = vsub.f32 %v23967_v21, %v1697_v28 }
  0x47   : > { %20833 = vmatpush1.bf16.msra.mxu0 %v20832_v32  ;;  %944 = vmatprep.mubr.f32.mxu0 %v29245_v9  ;;  %v23981_v32 = vpack.c.bf16 %v1589_v62, %v1585_v55  ;;  %v1692_v26 = vsub.f32 %v23987_v24, %v29213_v40  ;;  %v2235_v40 = vsub.f32 %v24006_v3, %v29215_v36 }
  0x48   : > { %1393 = vmatmul.mubr.f32.vlgmr.msra.gmra.mrb[0].mxu1 %v23774_v30  ;;  %20835 = vmatprep.subr.bf16.mxu0 %v20834_v59  ;;  %v1679_v59 = vand.u32 4294901760, %v23944_v51  ;;  %v29212_v29 = vand.u32 4294901760, %v23973_v18 }
  0x49   : > { %20881 = vmatpush1.bf16.msra.mxu1 %v20880_v41  ;;  %1487 = vmatprep.mubr.f32.mxu1 %v29245_v9  ;;  %v2210_v41 = vand.u32 4294901760, %v23958_v8  ;;  %v2236_v36 = vand.u32 4294901760, %v2235_v40  ;;  %v20912_v40 = vpack.c.bf16 %v23944_v51, %v23942_v50 }
  0x4a   : > { %20883 = vmatprep.subr.bf16.mxu1 %v20882_v44  ;;  %v29216_v44 = vand.u32 4294901760, %v23960_v10 }
  0x4b   : > { %20837 = vmatpush1.bf16.msra.mxu0 %v20836_v33  ;;  %v2211_v61 = vsub.f32 %v23958_v8, %v2210_v41 }
  0x4c   : > { %20839 = vmatprep.subr.bf16.mxu0 %v23649_v16  ;;  %v23979_v16 = vsub.f32 %v416_v12, %v2130_v48  ;;  %v2223_v20 = vsub.f32 %v23960_v10, %v29216_v44  ;;  %v2206_v48 = vand.u32 4294901760, %v2205_v7  ;;  %v24065_v7 = vpack.c.bf16 %v2132_v53, %v2128_v52 }
  0x4d   : > { %20885 = vmatpush1.bf16.msra.mxu1 %v20884_v39 }
  0x4e   : > { %20887 = vmatprep.subr.bf16.mxu1 %v23671_v23  ;;  %946 = vmatmul.mubr.f32.vlgmr.msra.gmra.mrb[0].mxu0 %v23755_v6  ;;  %v1667_v23 = vand.u32 4294901760, %v23942_v50  ;;  %v29211_v33 = vand.u32 4294901760, %v23979_v16 }
  0x4f   : > { %20841 = vmatpush1.bf16.msra.mxu0 %v23675_v25  ;;  %1024 = vmatprep.mubr.f32.mxu0 %v29245_v9  ;;  %v1674_v25 = vsub.f32 %v23931_v37, %v1673_v31 }
  0x50   : > { %1489 = vmatmul.mubr.f32.vlgmr.msra.gmra.mrb[0].mxu1 %v23755_v6  ;;  %20843 = vmatprep.subr.bf16.mxu0 %v23710_v43  ;;  %v24009_v43 = vsub.f32 %v23954_v2, %v2132_v53  ;;  %v1668_v39 = vsub.f32 %v23942_v50, %v1667_v23  ;;  %v2241_v62 = vsub.f32 %v23979_v16, %v29211_v33  ;;  %v383_v50 = vld [vmem:[%s29202_s2 + $0x50] sm:$0xff] }
  0x51   : > { %20889 = vmatpush1.bf16.msra.mxu1 %v23694_v38  ;;  %1567 = vmatprep.mubr.f32.mxu1 %v29245_v9  ;;  %v2217_v38 = vsub.f32 %v23938_v13, %v2216_v19  ;;  %v1675_v12 = vand.u32 4294901760, %v1674_v25  ;;  %v1704_v25 = vsub.f32 %v23989_v54, %v29214_v46 }
  0x52   : > { %20891 = vmatprep.subr.bf16.mxu1 %v23714_v45  ;;  %v1680_v45 = vsub.f32 %v23944_v51, %v1679_v59  ;;  %v29217_v42 = vand.u32 4294901760, %v24009_v43  ;;  %v1669_v63 = vand.u32 4294901760, %v1668_v39  ;;  %v2212_v39 = vand.u32 4294901760, %v2211_v61  ;;  %v395_v51 = vld [vmem:[%s29202_s2 + $0xb0] sm:$0xff] }
  0x53   : > { %20845 = vmatpush1.bf16.msra.mxu0 %v23728_v56  ;;  %v1686_v56 = vsub.f32 %v23965_v15, %v1685_v35  ;;  %v2218_v55 = vand.u32 4294901760, %v2217_v38  ;;  %v20902_v38 = vpack.c.bf16 %v1675_v12, %v1663_v47  ;;  %v2242_v47 = vand.u32 4294901760, %v2241_v62  ;;  %v382_v62 = vld [vmem:[%s29202_s2 + $0x48] sm:$0xff] }
  0x54   : > { %20895 = vmatprep.subr.bf16.mxu0 %v23920_v49  ;;  %v1681_v2 = vand.u32 4294901760, %v1680_v45  ;;  %v2224_v45 = vand.u32 4294901760, %v2223_v20  ;;  %v2247_v46 = vsub.f32 %v24009_v43, %v29217_v42 }
  0x55   : > { %20893 = vmatpush1.bf16.msra.mxu1 %v23735_v60  ;;  %v2229_v60 = vsub.f32 %v23973_v18, %v29212_v29  ;;  %v1687_v33 = vand.u32 4294901760, %v1686_v56  ;;  %v1699_v29 = vand.u32 4294901760, %v1698_v58  ;;  %v20950_v52 = vpack.c.bf16 %v2218_v55, %v2206_v48 }
  0x56   : > { %20943 = vmatprep.subr.bf16.mxu1 %v23933_v0  ;;  %1026 = vmatmul.mubr.f32.vlgmr.msra.gmra.mrb[0].mxu0 %v23755_v6  ;;  %v20904_v12 = vpack.c.bf16 %v1681_v2, %v1669_v63  ;;  %v1693_v56 = vand.u32 4294901760, %v1692_v26  ;;  %v1705_v58 = vand.u32 4294901760, %v1704_v25  ;;  %v20952_v20 = vpack.c.bf16 %v2224_v45, %v2212_v39  ;;  %v394_v2 = vld [vmem:[%s29202_s2 + $0xa8] sm:$0xff]  ;;  %v384_v26 = vld [vmem:[%s29202_s2 + $0x58] sm:$0xff] }
  0x57   : > { %20897 = vmatpush1.bf16.msra.mxu0 %v23940_v22  ;;  %1647 = vmatprep.mubr.f32.mxu0 %v29245_v9  ;;  %v2230_v53 = vand.u32 4294901760, %v2229_v60  ;;  %v20906_v61 = vpack.c.bf16 %v1699_v29, %v1687_v33  ;;  %v2248_v44 = vand.u32 4294901760, %v2247_v46  ;;  %v20910_v55 = vpack.c.bf16 %v23931_v37, %v23922_v57  ;;  %v396_v25 = vld [vmem:[%s29202_s2 + $0xb8] sm:$0xff]  ;;  %v418_v45 = vld [vmem:[%s29202_s2 + $0x168] sm:$0xff] }
  0x58   : > { %1569 = vmatmul.mubr.f32.vlgmr.msra.gmra.mrb[0].mxu1 %v23755_v6  ;;  %20899 = vmatprep.subr.bf16.mxu0 %v23962_v11  ;;  %v20908_v48 = vpack.c.bf16 %v1705_v58, %v1693_v56  ;;  %v20958_v33 = vpack.c.bf16 %v23938_v13, %v23935_v5  ;;  %v20914_v46 = vpack.c.bf16 %v23967_v21, %v23965_v15  ;;  %v2661_v37 = vand.u32 4294901760, %v382_v62  ;;  %v393_v5 = vld [vmem:[%s29202_s2 + $0xa0] sm:$0xff]  ;;  %v420_v56 = vld [vmem:[%s29202_s2 + $0x178] sm:$0xff] }
  0x59   : > { %20945 = vmatpush1.bf16.msra.mxu1 %v23956_v4  ;;  %2190 = vmatprep.mubr.f32.mxu1 %v29245_v9  ;;  %v20954_v42 = vpack.c.bf16 %v2242_v47, %v2230_v53  ;;  %v20956_v29 = vpack.c.bf16 %v2248_v44, %v2236_v36  ;;  %v20960_v60 = vpack.c.bf16 %v23960_v10, %v23958_v8  ;;  %v29728_v15 = vand.u32 4294901760, %v23960_v10  ;;  %v405_v58 = vld [vmem:[%s29202_s2 + $0x100] sm:$0xff] }
  0x5a   : > { %20947 = vmatprep.subr.bf16.mxu1 %v23971_v17  ;;  %v20962_v44 = vpack.c.bf16 %v23979_v16, %v23973_v18  ;;  %v20916_v36 = vpack.c.bf16 %v23989_v54, %v23987_v24  ;;  %v20926_v63 = vpack.c.bf16 %v1673_v31, %v1661_v27  ;;  %v20974_v57 = vpack.c.bf16 %v2216_v19, %v2204_v34  ;;  %v381_v27 = vld [vmem:[%s29202_s2 + $0x40] sm:$0xff] }
  0x5b   : > { %20901 = vmatpush1.bf16.msra.mxu0 %v23981_v32  ;;  %v20928_v31 = vpack.c.bf16 %v1679_v59, %v1667_v23  ;;  %v20930_v13 = vpack.c.bf16 %v1697_v28, %v1685_v35  ;;  %v3204_v34 = vand.u32 4294901760, %v384_v26  ;;  %v3208_v19 = vand.u32 4294901760, %v396_v25  ;;  %v406_v23 = vld [vmem:[%s29202_s2 + $0x108] sm:$0xff] }
  0x5c   : > { %20903 = vmatprep.subr.bf16.mxu0 %v20902_v38  ;;  %v2665_v38 = vand.u32 4294901760, %v394_v2  ;;  %v20976_v21 = vpack.c.bf16 %v29728_v15, %v2210_v41  ;;  %v29729_v59 = vand.u32 4294901760, %v23973_v18  ;;  %v29730_v35 = vand.u32 4294901760, %v23979_v16 }
  0x5d   : > { %20949 = vmatpush1.bf16.msra.mxu1 %v24065_v7  ;;  %v2663_v39 = vand.u32 4294901760, %v381_v27  ;;  %v29732_v8 = vand.u32 4294901760, %v23989_v54  ;;  %v29733_v10 = vand.u32 4294901760, %v24006_v3  ;;  %v29734_v18 = vand.u32 4294901760, %v24009_v43 }
  0x5e   : > { %1653 = vmatmul.mubr.f32.vlgmr.msra.gmra.mrb[2].mxu0 %v23797_v1  ;;  %20951 = vmatprep.subr.bf16.mxu1 %v20950_v52  ;;  %v20978_v28 = vpack.c.bf16 %v29730_v35, %v29729_v59  ;;  %v29731_v52 = vand.u32 4294901760, %v23987_v24  ;;  %v24177_v16 = vsub.f32 %v382_v62, %v2661_v37  ;;  %v2667_v47 = vand.u32 4294901760, %v393_v5 }
  0x5f   : > { %20905 = vmatpush1.bf16.msra.mxu0 %v20904_v12  ;;  %1763 = vmatprep.mubr.f32.mxu0 %v29245_v9  ;;  %v20980_v41 = vpack.c.bf16 %v29734_v18, %v29733_v10  ;;  %v408_v12 = vld [vmem:[%s29202_s2 + $0x118] sm:$0xff]  ;;  %v24186_v24 = vpack.c.bf16 %v2665_v38, %v2661_v37  ;;  %v3206_v54 = vand.u32 4294901760, %v383_v50  ;;  %v2671_v62 = vand.u32 4294901760, %v405_v58 }
  0x60   : > { %2196 = vmatmul.mubr.f32.vlgmr.msra.gmra.mrb[2].mxu1 %v23797_v1  ;;  %20907 = vmatprep.subr.bf16.mxu0 %v20906_v61  ;;  %v20932_v53 = vpack.c.bf16 %v29732_v8, %v29731_v52  ;;  %v417_v61 = vld [vmem:[%s29202_s2 + $0x160] sm:$0xff] }
  0x61   : > { %20953 = vmatpush1.bf16.msra.mxu1 %v20952_v20  ;;  %2306 = vmatprep.mubr.f32.mxu1 %v29245_v9  ;;  %v24195_v20 = vsub.f32 %v394_v2, %v2665_v38  ;;  %v24218_v2 = vld [vmem:[%s29202_s2 + $0x170] sm:$0xff]  ;;  %v2747_v38 = vand.u32 4294901760, %v24177_v16 }
  0x62   : > { %20955 = vmatprep.subr.bf16.mxu1 %v20954_v42  ;;  %v20964_v42 = vpack.c.bf16 %v24009_v43, %v24006_v3  ;;  %v3210_v3 = vand.u32 4294901760, %v395_v51  ;;  %v2669_v43 = vand.u32 4294901760, %v406_v23 }
  0x63   : > { %20909 = vmatpush1.bf16.msra.mxu0 %v20908_v48  ;;  %v24197_v48 = vpack.c.bf16 %v3208_v19, %v3204_v34 }
  0x64   : > { %20911 = vmatprep.subr.bf16.mxu0 %v20910_v55  ;;  %v24199_v55 = vsub.f32 %v384_v26, %v3204_v34  ;;  %v24220_v26 = vpack.c.bf16 %v3210_v3, %v3206_v54  ;;  %v24226_v37 = vsub.f32 %v406_v23, %v2669_v43 }
  0x65   : > { %20957 = vmatpush1.bf16.msra.mxu1 %v20956_v29  ;;  %v2673_v29 = vand.u32 4294901760, %v418_v45 }
  0x66   : > { %1765 = vmatmul.mubr.f32.vlgmr.msra.gmra.mrb[2].mxu0 %v23755_v6  ;;  %20959 = vmatprep.subr.bf16.mxu1 %v20958_v33  ;;  %v24202_v33 = vsub.f32 %v396_v25, %v3208_v19  ;;  %v24222_v25 = vsub.f32 %v383_v50, %v3206_v54  ;;  %v3218_v50 = vand.u32 4294901760, %v24218_v2  ;;  %v3290_v23 = vand.u32 4294901760, %v24199_v55 }
  0x67   : > { %20913 = vmatpush1.bf16.msra.mxu0 %v20912_v40  ;;  %1851 = vmatprep.mubr.f32.mxu0 %v29245_v9  ;;  %v24204_v40 = vsub.f32 %v381_v27, %v2663_v39  ;;  %v24229_v27 = vsub.f32 %v418_v45, %v2673_v29 }
  0x68   : > { %2308 = vmatmul.mubr.f32.vlgmr.msra.gmra.mrb[2].mxu1 %v23755_v6  ;;  %20915 = vmatprep.subr.bf16.mxu0 %v20914_v46  ;;  %v3212_v46 = vand.u32 4294901760, %v408_v12  ;;  %v3302_v15 = vand.u32 4294901760, %v24202_v33  ;;  %v24275_v52 = vsub.f32 %v24218_v2, %v3218_v50  ;;  %v3296_v8 = vand.u32 4294901760, %v24222_v25 }
  0x69   : > { %20961 = vmatpush1.bf16.msra.mxu1 %v20960_v60  ;;  %2394 = vmatprep.mubr.f32.mxu1 %v29245_v9  ;;  %v3216_v60 = vand.u32 4294901760, %v420_v56  ;;  %v2753_v35 = vand.u32 4294901760, %v24204_v40  ;;  %v29222_v45 = vand.u32 4294901760, %v24229_v27 }
  0x6a   : > { %20963 = vmatprep.subr.bf16.mxu1 %v20962_v44  ;;  %v24209_v44 = vld [vmem:[%s29202_s2 + $0x110] sm:$0xff]  ;;  %v24238_v19 = vsub.f32 %v408_v12, %v3212_v46  ;;  %v3303_v10 = vsub.f32 %v24202_v33, %v3302_v15 }
  0x6b   : > { %20917 = vmatpush1.bf16.msra.mxu0 %v20916_v36  ;;  %v24211_v36 = vpack.c.bf16 %v2667_v47, %v2663_v39  ;;  %v24236_v34 = vpack.c.bf16 %v3216_v60, %v3212_v46  ;;  %v2771_v39 = vand.u32 4294901760, %v24226_v37  ;;  %v29224_v46 = vand.u32 4294901760, %v24275_v52 }
  0x6c   : > { %20919 = vmatprep.subr.bf16.mxu0 %v23920_v49  ;;  %v29219_v18 = vand.u32 4294901760, %v24238_v19 }
  0x6d   : > { %20965 = vmatpush1.bf16.msra.mxu1 %v20964_v42  ;;  %v24213_v42 = vsub.f32 %v393_v5, %v2667_v47  ;;  %v2759_v5 = vand.u32 4294901760, %v24195_v20  ;;  %v2754_v47 = vsub.f32 %v24204_v40, %v2753_v35 }
  0x6e   : > { %1854 = vmatmul.mubr.f32.vlgmr.msra.gmra.mrb[2].mxu0 %v23763_v14  ;;  %20967 = vmatprep.subr.bf16.mxu1 %v23933_v0 }
  0x6f   : > { %20921 = vmatpush1.bf16.msra.mxu0 %v23940_v22  ;;  %1932 = vmatprep.mubr.f32.mxu0 %v29245_v9  ;;  %v2755_v2 = vand.u32 4294901760, %v2754_v47 }
  0x70   : > { %2397 = vmatmul.mubr.f32.vlgmr.msra.gmra.mrb[2].mxu1 %v23763_v14  ;;  %20923 = vmatprep.subr.bf16.mxu0 %v23962_v11 }
  0x71   : > { %20969 = vmatpush1.bf16.msra.mxu1 %v23956_v4  ;;  %2475 = vmatprep.mubr.f32.mxu1 %v29245_v9 }
  0x72   : > { %20971 = vmatprep.subr.bf16.mxu1 %v23971_v17 }
  0x73   : > { %20925 = vmatpush1.bf16.msra.mxu0 %v23981_v32 }
  0x74   : > { %20927 = vmatprep.subr.bf16.mxu0 %v20926_v63  ;;  %v2675_v63 = vand.u32 4294901760, %v417_v61 }
  0x75   : > { %20973 = vmatpush1.bf16.msra.mxu1 %v24065_v7 }
  0x76   : > { %1936 = vmatmul.mubr.f32.vlgmr.msra.gmra.mrb[2].mxu0 %v23774_v30  ;;  %20975 = vmatprep.subr.bf16.mxu1 %v20974_v57  ;;  %v24224_v57 = vsub.f32 %v395_v51, %v3210_v3  ;;  %v24245_v51 = vpack.c.bf16 %v2675_v63, %v2671_v62  ;;  %v24253_v59 = vsub.f32 %v417_v61, %v2675_v63 }
  0x77   : > { %20929 = vmatpush1.bf16.msra.mxu0 %v20928_v31  ;;  %2030 = vmatprep.mubr.f32.mxu0 %v29245_v9  ;;  %v3214_v31 = vand.u32 4294901760, %v24209_v44 }
  0x78   : > { %2479 = vmatmul.mubr.f32.vlgmr.msra.gmra.mrb[2].mxu1 %v23774_v30  ;;  %20931 = vmatprep.subr.bf16.mxu0 %v20930_v13  ;;  %v24234_v13 = vpack.c.bf16 %v2673_v29, %v2669_v43  ;;  %v2784_v43 = vsub.f32 %v24229_v27, %v29222_v45  ;;  %v3333_v45 = vsub.f32 %v24275_v52, %v29224_v46 }
  0x79   : > { %20977 = vmatpush1.bf16.msra.mxu1 %v20976_v21  ;;  %2573 = vmatprep.mubr.f32.mxu1 %v29245_v9  ;;  %v24251_v21 = vsub.f32 %v405_v58, %v2671_v62  ;;  %v3297_v58 = vsub.f32 %v24222_v25, %v3296_v8  ;;  %v3304_v62 = vand.u32 4294901760, %v3303_v10  ;;  %v24333_v10 = vpack.c.bf16 %v3218_v50, %v3214_v31 }
  0x7a   : > { %20979 = vmatprep.subr.bf16.mxu1 %v20978_v28  ;;  %v2748_v28 = vsub.f32 %v24177_v16, %v2747_v38  ;;  %v2785_v47 = vand.u32 4294901760, %v2784_v43 }
  0x7b   : > { %20933 = vmatpush1.bf16.msra.mxu0 %v20932_v53  ;;  %v3308_v53 = vand.u32 4294901760, %v24224_v57  ;;  %v29220_v12 = vand.u32 4294901760, %v24251_v21 }
  0x7c   : > { %20935 = vmatprep.subr.bf16.mxu0 %v23920_v49  ;;  %v24243_v49 = vsub.f32 %v420_v56, %v3216_v60  ;;  %v29221_v56 = vand.u32 4294901760, %v24253_v59  ;;  %v2749_v54 = vand.u32 4294901760, %v2748_v28 }
  0x7d   : > { %20981 = vmatpush1.bf16.msra.mxu1 %v20980_v41  ;;  %v3309_v61 = vsub.f32 %v24224_v57, %v3308_v53 }
  0x7e   : > { %2032 = vmatmul.mubr.f32.vlgmr.msra.gmra.mrb[2].mxu0 %v23755_v6  ;;  %20983 = vmatprep.subr.bf16.mxu1 %v23933_v0  ;;  %v2765_v0 = vand.u32 4294901760, %v24213_v42  ;;  %v29218_v41 = vand.u32 4294901760, %v24243_v49 }
  0x7f   : > { %20937 = vmatpush1.bf16.msra.mxu0 %v23940_v22  ;;  %2110 = vmatprep.mubr.f32.mxu0 %v29245_v9  ;;  %v2760_v22 = vsub.f32 %v24195_v20, %v2759_v5 }
  0x80   : > { %2575 = vmatmul.mubr.f32.vlgmr.msra.gmra.mrb[2].mxu1 %v23755_v6  ;;  %20939 = vmatprep.subr.bf16.mxu0 %v23962_v11  ;;  %v24272_v11 = vsub.f32 %v24209_v44, %v3214_v31  ;;  %v3327_v63 = vsub.f32 %v24243_v49, %v29218_v41 }
  0x81   : > { %20985 = vmatpush1.bf16.msra.mxu1 %v23956_v4  ;;  %2653 = vmatprep.mubr.f32.mxu1 %v29245_v9  ;;  %v3291_v4 = vsub.f32 %v24199_v55, %v3290_v23  ;;  %v2761_v3 = vand.u32 4294901760, %v2760_v22  ;;  %v2778_v22 = vsub.f32 %v24251_v21, %v29220_v12  ;;  %v3310_v12 = vand.u32 4294901760, %v3309_v61 }
  0x82   : > { %20987 = vmatprep.subr.bf16.mxu1 %v23971_v17  ;;  %v2766_v17 = vsub.f32 %v24213_v42, %v2765_v0  ;;  %v29223_v29 = vand.u32 4294901760, %v24272_v11  ;;  %v3328_v50 = vand.u32 4294901760, %v3327_v63  ;;  %v3757_v63 = vld [vmem:[%s29204_s4 + $0x48] sm:$0xff] }
  0x83   : > { %20941 = vmatpush1.bf16.msra.mxu0 %v23981_v32  ;;  %v2772_v32 = vsub.f32 %v24226_v37, %v2771_v39  ;;  %v3292_v60 = vand.u32 4294901760, %v3291_v4  ;;  %v2790_v4 = vsub.f32 %v24253_v59, %v29221_v56  ;;  %v20998_v41 = vpack.c.bf16 %v2761_v3, %v2749_v54 }
  0x84   : > { %20991 = vmatprep.subr.bf16.mxu0 %v24186_v24  ;;  %v2767_v28 = vand.u32 4294901760, %v2766_v17  ;;  %v3298_v17 = vand.u32 4294901760, %v3297_v58  ;;  %v3321_v56 = vsub.f32 %v24272_v11, %v29223_v29  ;;  %v2779_v3 = vand.u32 4294901760, %v2778_v22  ;;  %v3759_v22 = vld [vmem:[%s29204_s4 + $0x58] sm:$0xff] }
  0x85   : > { %20989 = vmatpush1.bf16.msra.mxu1 %v24065_v7  ;;  %v3315_v7 = vsub.f32 %v24238_v19, %v29219_v18  ;;  %v2773_v18 = vand.u32 4294901760, %v2772_v32  ;;  %v21046_v44 = vpack.c.bf16 %v3304_v62, %v3292_v60  ;;  %v2791_v32 = vand.u32 4294901760, %v2790_v4 }
  0x86   : > { %2112 = vmatmul.mubr.f32.vlgmr.msra.gmra.mrb[2].mxu0 %v23755_v6  ;;  %21039 = vmatprep.subr.bf16.mxu1 %v24197_v48  ;;  %v21000_v54 = vpack.c.bf16 %v2767_v28, %v2755_v2  ;;  %v21048_v58 = vpack.c.bf16 %v3310_v12, %v3298_v17  ;;  %v3322_v61 = vand.u32 4294901760, %v3321_v56  ;;  %v3334_v29 = vand.u32 4294901760, %v3333_v45  ;;  %v3751_v2 = vld [vmem:[%s29204_s4 + $0x18] sm:$0xff]  ;;  %v3758_v17 = vld [vmem:[%s29204_s4 + $0x50] sm:$0xff] }
  0x87   : > { %20993 = vmatpush1.bf16.msra.mxu0 %v24211_v36  ;;  %2733 = vmatprep.mubr.f32.mxu0 %v29245_v9  ;;  %v3316_v31 = vand.u32 4294901760, %v3315_v7  ;;  %v21002_v43 = vpack.c.bf16 %v2785_v47, %v2773_v18  ;;  %v21004_v60 = vpack.c.bf16 %v2791_v32, %v2779_v3  ;;  %v21054_v45 = vpack.c.bf16 %v24202_v33, %v24199_v55  ;;  %v3749_v7 = vld [vmem:[%s29204_s4 + $0x8] sm:$0xff]  ;;  %v3750_v47 = vld [vmem:[%s29204_s4 + $0x10] sm:$0xff] }
  0x88   : > { %2655 = vmatmul.mubr.f32.vlgmr.msra.gmra.mrb[2].mxu1 %v23755_v6  ;;  %20995 = vmatprep.subr.bf16.mxu0 %v24234_v13  ;;  %v21052_v18 = vpack.c.bf16 %v3334_v29, %v3322_v61  ;;  %v21008_v12 = vpack.c.bf16 %v24213_v42, %v24204_v40  ;;  %v21056_v56 = vpack.c.bf16 %v24224_v57, %v24222_v25  ;;  %v3825_v4 = vand.u32 4294901760, %v3749_v7 }
  0x89   : > { %21041 = vmatpush1.bf16.msra.mxu1 %v24220_v26  ;;  %3276 = vmatprep.mubr.f32.mxu1 %v29245_v9  ;;  %v21050_v46 = vpack.c.bf16 %v3328_v50, %v3316_v31  ;;  %v21058_v29 = vpack.c.bf16 %v24243_v49, %v24238_v19  ;;  %v21060_v62 = vpack.c.bf16 %v24275_v52, %v24272_v11  ;;  %v29736_v31 = vand.u32 4294901760, %v24238_v19 }
  0x8a   : > { %21043 = vmatprep.subr.bf16.mxu1 %v24236_v34  ;;  %v21022_v28 = vpack.c.bf16 %v2759_v5, %v2747_v38  ;;  %v3829_v38 = vand.u32 4294901760, %v3757_v63  ;;  %v4368_v5 = vand.u32 4294901760, %v3751_v2  ;;  %v21024_v55 = vpack.c.bf16 %v2765_v0, %v2753_v35 }
  0x8b   : > { %20997 = vmatpush1.bf16.msra.mxu0 %v24245_v51  ;;  %v21072_v33 = vpack.c.bf16 %v3308_v53, %v3296_v8  ;;  %v29737_v50 = vand.u32 4294901760, %v24243_v49  ;;  %v29738_v42 = vand.u32 4294901760, %v24251_v21  ;;  %v29739_v35 = vand.u32 4294901760, %v24253_v59 }
  0x8c   : > { %20999 = vmatprep.subr.bf16.mxu0 %v20998_v41  ;;  %v21006_v41 = vpack.c.bf16 %v24195_v20, %v24177_v16  ;;  %v3756_v16 = vld [vmem:[%s29204_s4 + $0x40] sm:$0xff]  ;;  %v21070_v20 = vpack.c.bf16 %v3302_v15, %v3290_v23  ;;  %v29735_v23 = vand.u32 4294901760, %v24229_v27  ;;  %v29740_v19 = vand.u32 4294901760, %v24272_v11  ;;  %v3775_v11 = vld [vmem:[%s29204_s4 + $0xd8] sm:$0xff] }
  0x8d   : > { %21045 = vmatpush1.bf16.msra.mxu1 %v24333_v10  ;;  %v21074_v40 = vpack.c.bf16 %v29737_v50, %v29736_v31  ;;  %v21028_v25 = vpack.c.bf16 %v29739_v35, %v29738_v42  ;;  %v3831_v57 = vand.u32 4294901760, %v3756_v16  ;;  %v29741_v49 = vand.u32 4294901760, %v24275_v52 }
  0x8e   : > { %2739 = vmatmul.mubr.f32.vlgmr.msra.gmra.mrb[4].mxu0 %v23797_v1  ;;  %21047 = vmatprep.subr.bf16.mxu1 %v21046_v44  ;;  %v21026_v15 = vpack.c.bf16 %v29735_v23, %v2771_v39  ;;  %v4372_v44 = vand.u32 4294901760, %v3759_v22  ;;  %v3747_v39 = vld [vmem:[%s371_s26] sm:$0xff]  ;;  %v4370_v8 = vand.u32 4294901760, %v3750_v47  ;;  %v4374_v53 = vand.u32 4294901760, %v3758_v17  ;;  %s23450_s26 = scalar_lea.vmem %s29159_s30, 128 }
  0x8f   : > { %21001 = vmatpush1.bf16.msra.mxu0 %v21000_v54  ;;  %2849 = vmatprep.mubr.f32.mxu0 %v29245_v9  ;;  %v3767_v54 = vld [vmem:[%s29204_s4 + $0x98] sm:$0xff]  ;;  %v24455_v3 = vpack.c.bf16 %v3829_v38, %v3825_v4  ;;  %v24457_v32 = vsub.f32 %v3757_v63, %v3829_v38  ;;  %p23451_p11 = scmp.ne.s32.totalorder %s29159_s30, %s23450_s26  ;;  %p23458_p1 = scmp.lt.s32.totalorder %s23456_s11, %s23450_s26 }
  0x90   : > { %3282 = vmatmul.mubr.f32.vlgmr.msra.gmra.mrb[4].mxu1 %v23797_v1  ;;  %21003 = vmatprep.subr.bf16.mxu0 %v21002_v43  ;;  %v21010_v1 = vpack.c.bf16 %v24229_v27, %v24226_v37  ;;  %v3765_v37 = vld [vmem:[%s29204_s4 + $0x88] sm:$0xff]  ;;  %v24459_v43 = vsub.f32 %v3751_v2, %v4368_v5  ;;  %v24465_v52 = vpack.c.bf16 %v4372_v44, %v4368_v5 }
  0x91   : > { %21049 = vmatpush1.bf16.msra.mxu1 %v21048_v58  ;;  %3392 = vmatprep.mubr.f32.mxu1 %v29245_v9  ;;  %v3773_v27 = vld [vmem:[%s29204_s4 + $0xc8] sm:$0xff]  ;;  %v3833_v58 = vand.u32 4294901760, %v3765_v37  ;;  %v24493_v63 = vsub.f32 %v3758_v17, %v4374_v53  ;;  %v3923_v17 = vand.u32 4294901760, %v24457_v32  ;;  %p23452_p12 = pnand %p23451_p11, %p23609_p5  ;;  %p23459_p2 = por %p23458_p1, %p23457_p0 }
  0x92   : > { %21051 = vmatprep.subr.bf16.mxu1 %v21050_v46  ;;  %v21012_v46 = vpack.c.bf16 %v24253_v59, %v24251_v21  ;;  %v21076_v21 = vpack.c.bf16 %v29741_v49, %v29740_v19  ;;  %v24449_v59 = vsub.f32 %v3749_v7, %v3825_v4  ;;  %v3837_v61 = vand.u32 4294901760, %v3773_v27 }
  0x93   : > { %21005 = vmatpush1.bf16.msra.mxu0 %v21004_v60  ;;  %v3764_v60 = vld [vmem:[%s29204_s4 + $0x80] sm:$0xff]  ;;  %v4380_v7 = vand.u32 4294901760, %v3775_v11  ;;  %v4472_v19 = vand.u32 4294901760, %v24493_v63  ;;  %p23453_p13 = pneg %p23452_p12 }
  0x94   : > { %21007 = vmatprep.subr.bf16.mxu0 %v21006_v41  ;;  %v3772_v41 = vld [vmem:[%s29204_s4 + $0xc0] sm:$0xff]  ;;  %v3835_v2 = vand.u32 4294901760, %v3764_v60  ;;  %v3911_v38 = vand.u32 4294901760, %v24449_v59  ;;  %v24509_v5 = vsub.f32 %v3773_v27, %v3837_v61 }
  0x95   : > { %21053 = vmatpush1.bf16.msra.mxu1 %v21052_v18  ;;  %v3823_v18 = vsel %vm485_vm0, %v3747_v39, 0  ;;  %v24517_v23 = vsub.f32 %v3775_v11, %v4380_v7  ;;  %p23460_p3 = pnand %p23459_p2, %p23453_p13 }
  0x96   : > { %2851 = vmatmul.mubr.f32.vlgmr.msra.gmra.mrb[4].mxu0 %v23755_v6  ;;  %21055 = vmatprep.subr.bf16.mxu1 %v21054_v45  ;;  %v24475_v45 = vsub.f32 %v3759_v22, %v4372_v44  ;;  %v24498_v22 = vld [vmem:[%s29204_s4 + $0xd0] sm:$0xff]  ;;  %v24500_v4 = vand.u32 4294901760, %v3823_v18  ;;  %v24525_v31 = vsub.f32 %v3764_v60, %v3835_v2 }
  0x97   : > { %21009 = vmatpush1.bf16.msra.mxu0 %v21008_v12  ;;  %2937 = vmatprep.mubr.f32.mxu0 %v29245_v9 }
  0x98   : > { %3394 = vmatmul.mubr.f32.vlgmr.msra.gmra.mrb[4].mxu1 %v23755_v6  ;;  %21011 = vmatprep.subr.bf16.mxu0 %v21010_v1  ;;  %v4466_v44 = vand.u32 4294901760, %v24475_v45  ;;  %v24528_v50 = vsub.f32 %v3823_v18, %v24500_v4  ;;  %v4473_v18 = vsub.f32 %v24493_v63, %v4472_v19 }
  0x99   : > { %21057 = vmatpush1.bf16.msra.mxu1 %v21056_v56  ;;  %3480 = vmatprep.mubr.f32.mxu1 %v29245_v9  ;;  %v4376_v56 = vand.u32 4294901760, %v3767_v54 }
  0x9a   : > { %21059 = vmatprep.subr.bf16.mxu1 %v21058_v29  ;;  %v24484_v29 = vld [vmem:[%s29204_s4 + $0x90] sm:$0xff]  ;;  %v24566_v49 = vand.u32 4294901760, %v24528_v50 }
  0x9b   : > { %21013 = vmatpush1.bf16.msra.mxu0 %v21012_v46  ;;  %v24487_v46 = vsub.f32 %v3756_v16, %v3831_v57  ;;  %v24504_v16 = vsub.f32 %v3765_v37, %v3833_v58  ;;  %v29227_v37 = vand.u32 4294901760, %v24509_v5 }
  0x9c   : > { %21015 = vmatprep.subr.bf16.mxu0 %v24186_v24 }
  0x9d   : > { %21061 = vmatpush1.bf16.msra.mxu1 %v21060_v62  ;;  %v24489_v62 = vpack.c.bf16 %v4374_v53, %v4370_v8 }
  0x9e   : > { %2940 = vmatmul.mubr.f32.vlgmr.msra.gmra.mrb[4].mxu0 %v23763_v14  ;;  %21063 = vmatprep.subr.bf16.mxu1 %v24197_v48 }
  0x9f   : > { %21017 = vmatpush1.bf16.msra.mxu0 %v24211_v36  ;;  %3018 = vmatprep.mubr.f32.mxu0 %v29245_v9 }
  0xa0   : > { %3483 = vmatmul.mubr.f32.vlgmr.msra.gmra.mrb[4].mxu1 %v23763_v14  ;;  %21019 = vmatprep.subr.bf16.mxu0 %v24234_v13  ;;  %v3748_v14 = vld [vmem:[%s29204_s4] sm:$0xff] }
  0xa1   : > { %21065 = vmatpush1.bf16.msra.mxu1 %v24220_v26  ;;  %3561 = vmatprep.mubr.f32.mxu1 %v29245_v9  ;;  %v3827_v0 = vand.u32 4294901760, %v3748_v14 }
  0xa2   : > { %21067 = vmatprep.subr.bf16.mxu1 %v24236_v34 }
  0xa3   : > { %21021 = vmatpush1.bf16.msra.mxu0 %v24245_v51  ;;  %v24477_v12 = vpack.c.bf16 %v3831_v57, %v3827_v0  ;;  %v24479_v1 = vsub.f32 %v3748_v14, %v3827_v0  ;;  %v24502_v14 = vpack.c.bf16 %v3837_v61, %v3833_v58  ;;  %v29231_v57 = vand.u32 4294901760, %v24504_v16 }
  0xa4   : > { %21023 = vmatprep.subr.bf16.mxu0 %v21022_v28  ;;  %v3839_v28 = vand.u32 4294901760, %v3772_v41 }
  0xa5   : > { %21069 = vmatpush1.bf16.msra.mxu1 %v24333_v10  ;;  %v3936_v60 = vsub.f32 %v24504_v16, %v29231_v57 }
  0xa6   : > { %3022 = vmatmul.mubr.f32.vlgmr.msra.gmra.mrb[4].mxu0 %v23774_v30  ;;  %21071 = vmatprep.subr.bf16.mxu1 %v21070_v20  ;;  %v4378_v20 = vand.u32 4294901760, %v24484_v29  ;;  %v24533_v42 = vsub.f32 %v3772_v41, %v3839_v28 }
  0xa7   : > { %21025 = vmatpush1.bf16.msra.mxu0 %v21024_v55  ;;  %3116 = vmatprep.mubr.f32.mxu0 %v29245_v9  ;;  %v4454_v55 = vand.u32 4294901760, %v24459_v43 }
  0xa8   : > { %3565 = vmatmul.mubr.f32.vlgmr.msra.gmra.mrb[4].mxu1 %v23774_v30  ;;  %21027 = vmatprep.subr.bf16.mxu0 %v21026_v15  ;;  %v24491_v30 = vsub.f32 %v3750_v47, %v4370_v8  ;;  %v24511_v47 = vsub.f32 %v3767_v54, %v4376_v56  ;;  %v4382_v15 = vand.u32 4294901760, %v24498_v22  ;;  %v24538_v35 = vsub.f32 %v24484_v29, %v4378_v20 }
  0xa9   : > { %21073 = vmatpush1.bf16.msra.mxu1 %v21072_v33  ;;  %3659 = vmatprep.mubr.f32.mxu1 %v29245_v9  ;;  %v24515_v33 = vpack.c.bf16 %v4380_v7, %v4376_v56  ;;  %v4455_v0 = vsub.f32 %v24459_v43, %v4454_v55  ;;  %v29225_v8 = vand.u32 4294901760, %v24517_v23  ;;  %v29229_v11 = vand.u32 4294901760, %v24533_v42 }
  0xaa   : > { %21075 = vmatprep.subr.bf16.mxu1 %v21074_v40  ;;  %v3917_v40 = vand.u32 4294901760, %v24479_v1  ;;  %v24557_v27 = vsub.f32 %v24498_v22, %v4382_v15  ;;  %v4460_v39 = vand.u32 4294901760, %v24491_v30  ;;  %v29230_v56 = vand.u32 4294901760, %v24538_v35 }
  0xab   : > { %21029 = vmatpush1.bf16.msra.mxu0 %v21028_v25  ;;  %v3929_v25 = vand.u32 4294901760, %v24487_v46  ;;  %v4456_v61 = vand.u32 4294901760, %v4455_v0  ;;  %v4491_v22 = vsub.f32 %v24517_v23, %v29225_v8  ;;  %v24617_v8 = vpack.c.bf16 %v4382_v15, %v4378_v20 }
  0xac   : > { %21031 = vmatprep.subr.bf16.mxu0 %v24186_v24  ;;  %v24523_v24 = vpack.c.bf16 %v3839_v28, %v3835_v2  ;;  %v4461_v41 = vsub.f32 %v24491_v30, %v4460_v39  ;;  %v4496_v7 = vand.u32 4294901760, %v24557_v27  ;;  %v3901_v2 = vsub.f32 %v24528_v50, %v24566_v49 }
  0xad   : > { %21077 = vmatpush1.bf16.msra.mxu1 %v21076_v21  ;;  %v29226_v21 = vand.u32 4294901760, %v24511_v47  ;;  %v3930_v54 = vsub.f32 %v24487_v46, %v3929_v25 }
  0xae   : > { %3118 = vmatmul.mubr.f32.vlgmr.msra.gmra.mrb[4].mxu0 %v23755_v6  ;;  %21079 = vmatprep.subr.bf16.mxu1 %v24197_v48  ;;  %v3912_v48 = vsub.f32 %v24449_v59, %v3911_v38  ;;  %v24628_v29 = vand.u32 4294901760, %v3901_v2 }
  0xaf   : > { %21033 = vmatpush1.bf16.msra.mxu0 %v24211_v36  ;;  %3196 = vmatprep.mubr.f32.mxu0 %v29245_v9  ;;  %v3924_v36 = vsub.f32 %v24457_v32, %v3923_v17  ;;  %v4479_v28 = vsub.f32 %v24511_v47, %v29226_v21 }
  0xb0   : > { %3661 = vmatmul.mubr.f32.vlgmr.msra.gmra.mrb[4].mxu1 %v23755_v6  ;;  %21035 = vmatprep.subr.bf16.mxu0 %v24234_v13  ;;  %v4467_v13 = vsub.f32 %v24475_v45, %v4466_v44  ;;  %v3913_v53 = vand.u32 4294901760, %v3912_v48 }
  0xb1   : > { %21081 = vmatpush1.bf16.msra.mxu1 %v24220_v26  ;;  %3739 = vmatprep.mubr.f32.mxu1 %v29245_v9  ;;  %v3918_v26 = vsub.f32 %v24479_v1, %v3917_v40  ;;  %v3925_v58 = vand.u32 4294901760, %v3924_v36  ;;  %v3931_v36 = vand.u32 4294901760, %v3930_v54  ;;  %v4462_v54 = vand.u32 4294901760, %v4461_v41 }
  0xb2   : > { %21083 = vmatprep.subr.bf16.mxu1 %v24236_v34  ;;  %v29228_v34 = vand.u32 4294901760, %v24525_v31  ;;  %v4480_v15 = vand.u32 4294901760, %v4479_v28  ;;  %v21152_v28 = vpack.c.bf16 %v24493_v63, %v24491_v30  ;;  %v3769_v30 = vld [vmem:[%s29204_s4 + $0xa8] sm:$0xff] }
  0xb3   : > { %21037 = vmatpush1.bf16.msra.mxu0 %v24245_v51  ;;  %v3948_v51 = vsub.f32 %v24509_v5, %v29227_v37  ;;  %v3919_v48 = vand.u32 4294901760, %v3918_v26  ;;  %v21094_v21 = vpack.c.bf16 %v3925_v58, %v3913_v53  ;;  %v3937_v37 = vand.u32 4294901760, %v3936_v60  ;;  %v3777_v63 = vld [vmem:[%s29204_s4 + $0xe8] sm:$0xff] }
  0xb4   : > { %21087 = vmatprep.subr.bf16.mxu0 %v24455_v3  ;;  %v3942_v0 = vsub.f32 %v24525_v31, %v29228_v34  ;;  %v4474_v34 = vand.u32 4294901760, %v4473_v18  ;;  %v4492_v53 = vand.u32 4294901760, %v4491_v22  ;;  %v21156_v22 = vpack.c.bf16 %v24557_v27, %v24538_v35 }
  0xb5   : > { %21085 = vmatpush1.bf16.msra.mxu1 %v24333_v10  ;;  %v4468_v10 = vand.u32 4294901760, %v4467_v13  ;;  %v3954_v13 = vsub.f32 %v24533_v42, %v29229_v11  ;;  %v3949_v26 = vand.u32 4294901760, %v3948_v51  ;;  %v4485_v11 = vsub.f32 %v24538_v35, %v29230_v56 }
  0xb6   : > { %3198 = vmatmul.mubr.f32.vlgmr.msra.gmra.mrb[4].mxu0 %v23755_v6  ;;  %21135 = vmatprep.subr.bf16.mxu1 %v24465_v52  ;;  %v21096_v58 = vpack.c.bf16 %v3931_v36, %v3919_v48  ;;  %v3943_v60 = vand.u32 4294901760, %v3942_v0  ;;  %v21144_v18 = vpack.c.bf16 %v4474_v34, %v4462_v54  ;;  %v21146_v2 = vpack.c.bf16 %v4492_v53, %v4480_v15  ;;  %v3753_v48 = vld [vmem:[%s29204_s4 + $0x28] sm:$0xff]  ;;  %v3752_v54 = vld [vmem:[%s29204_s4 + $0x20] sm:$0xff] }
  0xb7   : > { %21089 = vmatpush1.bf16.msra.mxu0 %v24477_v12  ;;  %3897 = vmatprep.mubr.f32.mxu0 %v29245_v9  ;;  %v21142_v20 = vpack.c.bf16 %v4468_v10, %v4456_v61  ;;  %v3955_v51 = vand.u32 4294901760, %v3954_v13  ;;  %v21098_v41 = vpack.c.bf16 %v3949_v26, %v3937_v37  ;;  %v4486_v56 = vand.u32 4294901760, %v4485_v11  ;;  %v3761_v36 = vld [vmem:[%s29204_s4 + $0x68] sm:$0xff]  ;;  %v3755_v13 = vld [vmem:[%s29204_s4 + $0x38] sm:$0xff] }
  0xb8   : > { %3741 = vmatmul.mubr.f32.vlgmr.msra.gmra.mrb[4].mxu1 %v23755_v6  ;;  %21091 = vmatprep.subr.bf16.mxu0 %v24502_v14  ;;  %v4497_v6 = vsub.f32 %v24557_v27, %v4496_v7  ;;  %v21150_v34 = vpack.c.bf16 %v24475_v45, %v24459_v43  ;;  %v21104_v11 = vpack.c.bf16 %v24487_v46, %v24479_v1  ;;  %v3763_v26 = vld [vmem:[%s29204_s4 + $0x78] sm:$0xff]  ;;  %v425_v15 = vlaneseq }
  0xb9   : > { %21137 = vmatpush1.bf16.msra.mxu1 %v24489_v62  ;;  %4440 = vmatprep.mubr.f32.mxu1 %v29245_v9  ;;  %v21100_v61 = vpack.c.bf16 %v3955_v51, %v3943_v60  ;;  %v21106_v10 = vpack.c.bf16 %v24509_v5, %v24504_v16  ;;  %v21118_v0 = vpack.c.bf16 %v3923_v17, %v3911_v38  ;;  %v4911_v38 = vand.u32 4294901760, %v3753_v48 }
  0xba   : > { %21139 = vmatprep.subr.bf16.mxu1 %v24515_v33  ;;  %v4498_v57 = vand.u32 4294901760, %v4497_v6  ;;  %v4915_v17 = vand.u32 4294901760, %v3761_v36  ;;  %v3754_v6 = vld [vmem:[%s29204_s4 + $0x30] sm:$0xff]  ;;  %v21120_v43 = vpack.c.bf16 %v3929_v25, %v3917_v40  ;;  %v21168_v45 = vpack.c.bf16 %v4472_v19, %v4460_v39 }
  0xbb   : > { %21093 = vmatpush1.bf16.msra.mxu0 %v24523_v24  ;;  %v29742_v53 = vand.u32 4294901760, %v24504_v16  ;;  %v29744_v51 = vand.u32 4294901760, %v24511_v47  ;;  %v29745_v1 = vand.u32 4294901760, %v24517_v23  ;;  %v4913_v46 = vand.u32 4294901760, %v3752_v54 }
  0xbc   : > { %21095 = vmatprep.subr.bf16.mxu0 %v21094_v21  ;;  %v21102_v21 = vpack.c.bf16 %v24457_v32, %v24449_v59  ;;  %v21148_v37 = vpack.c.bf16 %v4498_v57, %v4486_v56  ;;  %v21154_v57 = vpack.c.bf16 %v24517_v23, %v24511_v47  ;;  %v21108_v56 = vpack.c.bf16 %v24533_v42, %v24525_v31  ;;  %v3760_v59 = vld [vmem:[%s29204_s4 + $0x60] sm:$0xff] }
  0xbd   : > { %21141 = vmatpush1.bf16.msra.mxu1 %v24617_v8  ;;  %v21166_v32 = vpack.c.bf16 %v4466_v44, %v4454_v55  ;;  %v5454_v55 = vand.u32 4294901760, %v3755_v13  ;;  %v5458_v44 = vand.u32 4294901760, %v3763_v26  ;;  %v4917_v40 = vand.u32 4294901760, %v3760_v59 }
  0xbe   : > { %3903 = vmatmul.mubr.f32.vlgmr.msra.gmra.mrb[6].mxu0 %v24628_v29  ;;  %21143 = vmatprep.subr.bf16.mxu1 %v21142_v20  ;;  %v3762_v20 = vld [vmem:[%s29204_s4 + $0x70] sm:$0xff]  ;;  %v29746_v16 = vand.u32 4294901760, %v24525_v31  ;;  %v29748_v23 = vand.u32 4294901760, %v24538_v35  ;;  %v5456_v39 = vand.u32 4294901760, %v3754_v6  ;;  %v3771_v31 = vld [vmem:[%s29204_s4 + $0xb8] sm:$0xff]  ;;  %v24743_v35 = vshrl.u32 %v425_v15, 7 }
  0xbf   : > { %21097 = vmatpush1.bf16.msra.mxu0 %v21096_v58  ;;  %4013 = vmatprep.mubr.f32.mxu0 %v29245_v9  ;;  %v29743_v58 = vand.u32 4294901760, %v24509_v5  ;;  %v29747_v5 = vand.u32 4294901760, %v24533_v42  ;;  %v5460_v19 = vand.u32 4294901760, %v3762_v20  ;;  %v3779_v42 = vld [vmem:[%s29204_s4 + $0xf8] sm:$0xff]  ;;  %v24746_v27 = vpack.c.bf16 %v5458_v44, %v5454_v55 }
  0xc0   : > { %4446 = vmatmul.mubr.f32.vlgmr.msra.gmra.mrb[6].mxu1 %v24628_v29  ;;  %21099 = vmatprep.subr.bf16.mxu0 %v21098_v41  ;;  %v21170_v41 = vpack.c.bf16 %v29745_v1, %v29744_v51  ;;  %v21172_v25 = vpack.c.bf16 %v4496_v7, %v29748_v23  ;;  %v24748_v7 = vsub.f32 %v3755_v13, %v5454_v55  ;;  %v24772_v13 = vld [vmem:[%s29203_s3] sm:$0xff] }
  0xc1   : > { %21145 = vmatpush1.bf16.msra.mxu1 %v21144_v18  ;;  %4556 = vmatprep.mubr.f32.mxu1 %v29245_v9  ;;  %v21122_v60 = vpack.c.bf16 %v29743_v58, %v29742_v53  ;;  %v21124_v47 = vpack.c.bf16 %v29747_v5, %v29746_v16  ;;  %v24731_v18 = vpack.c.bf16 %v4915_v17, %v4911_v38 }
  0xc2   : > { %21147 = vmatprep.subr.bf16.mxu1 %v21146_v2  ;;  %v24733_v2 = vsub.f32 %v3753_v48, %v4911_v38  ;;  %v24767_v48 = vpack.c.bf16 %v5460_v19, %v5456_v39  ;;  %v24790_v15 = vsub.f32 %v3754_v6, %v5456_v39 }
  0xc3   : > { %21101 = vmatpush1.bf16.msra.mxu0 %v21100_v61  ;;  %v24735_v61 = vsub.f32 %v3761_v36, %v4915_v17  ;;  %v5462_v36 = vand.u32 4294901760, %v3771_v31  ;;  %v29232_v17 = vsub.s32 7, %v24743_v35 }
  0xc4   : > { %21103 = vmatprep.subr.bf16.mxu0 %v21102_v21  ;;  %v4919_v21 = vand.u32 4294901760, %v3769_v30  ;;  %v4997_v53 = vand.u32 4294901760, %v24733_v2  ;;  %v29235_v39 = vand.u32 4294901760, %v24790_v15 }
  0xc5   : > { %21149 = vmatpush1.bf16.msra.mxu1 %v21148_v37  ;;  %v4923_v37 = vand.u32 4294901760, %v3777_v63  ;;  %v5009_v58 = vand.u32 4294901760, %v24735_v61 }
  0xc6   : > { %4015 = vmatmul.mubr.f32.vlgmr.msra.gmra.mrb[6].mxu0 %v24500_v4  ;;  %21151 = vmatprep.subr.bf16.mxu1 %v21150_v34  ;;  %v3768_v34 = vld [vmem:[%s29204_s4 + $0xa0] sm:$0xff]  ;;  %v24796_v55 = vsub.f32 %v3769_v30, %v4919_v21  ;;  %v4998_v5 = vsub.f32 %v24733_v2, %v4997_v53 }
  0xc7   : > { %21105 = vmatpush1.bf16.msra.mxu0 %v21104_v11  ;;  %4101 = vmatprep.mubr.f32.mxu0 %v29245_v9  ;;  %v3776_v11 = vld [vmem:[%s29204_s4 + $0xe0] sm:$0xff] }
  0xc8   : > { %4558 = vmatmul.mubr.f32.vlgmr.msra.gmra.mrb[6].mxu1 %v24500_v4  ;;  %21107 = vmatprep.subr.bf16.mxu0 %v21106_v10  ;;  %v24757_v10 = vsub.f32 %v3763_v26, %v5458_v44  ;;  %v4921_v26 = vand.u32 4294901760, %v3768_v34  ;;  %v24799_v44 = vsub.f32 %v3777_v63, %v4923_v37 }
  0xc9   : > { %21153 = vmatpush1.bf16.msra.mxu1 %v21152_v28  ;;  %4644 = vmatprep.mubr.f32.mxu1 %v29245_v9  ;;  %v24759_v28 = vpack.c.bf16 %v4917_v40, %v4913_v46 }
  0xca   : > { %21155 = vmatprep.subr.bf16.mxu1 %v21154_v57  ;;  %v24761_v57 = vsub.f32 %v3752_v54, %v4913_v46  ;;  %v4925_v54 = vand.u32 4294901760, %v3776_v11  ;;  %v5540_v46 = vand.u32 4294901760, %v24748_v7  ;;  %v24824_v30 = vsub.f32 %v3768_v34, %v4921_v26 }
  0xcb   : > { %21109 = vmatpush1.bf16.msra.mxu0 %v21108_v56  ;;  %v29233_v56 = vsub.s32 6, %v24743_v35  ;;  %v29236_v23 = vand.u32 4294901760, %v24799_v44 }
  0xcc   : > { %21111 = vmatprep.subr.bf16.mxu0 %v24455_v3  ;;  %v24826_v63 = vsub.f32 %v3776_v11, %v4925_v54  ;;  %v5003_v16 = vand.u32 4294901760, %v24761_v57  ;;  %v29240_v34 = vand.u32 4294901760, %v24824_v30 }
  0xcd   : > { %21157 = vmatpush1.bf16.msra.mxu1 %v21156_v22  ;;  %v24765_v22 = vsub.f32 %v3760_v59, %v4917_v40  ;;  %v24782_v59 = vld [vmem:[%s29204_s4 + $0xf0] sm:$0xff]  ;;  %v24787_v38 = vrot.slane %v24772_v13, %v29233_v56  ;;  %v5552_v40 = vand.u32 4294901760, %v24757_v10 }
  0xce   : > { %4104 = vmatmul.mubr.f32.vlgmr.msra.gmra.mrb[6].mxu0 %v24528_v50  ;;  %21159 = vmatprep.subr.bf16.mxu1 %v24465_v52  ;;  %v29241_v11 = vand.u32 4294901760, %v24826_v63 }
  0xcf   : > { %21113 = vmatpush1.bf16.msra.mxu0 %v24477_v12  ;;  %4182 = vmatprep.mubr.f32.mxu0 %v29245_v9 }
  0xd0   : > { %4647 = vmatmul.mubr.f32.vlgmr.msra.gmra.mrb[6].mxu1 %v24528_v50  ;;  %21115 = vmatprep.subr.bf16.mxu0 %v24502_v14 }
  0xd1   : > { %21161 = vmatpush1.bf16.msra.mxu1 %v24489_v62  ;;  %4725 = vmatprep.mubr.f32.mxu1 %v29245_v9 }
  0xd2   : > { %21163 = vmatprep.subr.bf16.mxu1 %v24515_v33 }
  0xd3   : > { %21117 = vmatpush1.bf16.msra.mxu0 %v24523_v24 }
  0xd4   : > { %21119 = vmatprep.subr.bf16.mxu0 %v21118_v0  ;;  %v5466_v0 = vand.u32 4294901760, %v3779_v42 }
  0xd5   : > { %21165 = vmatpush1.bf16.msra.mxu1 %v24617_v8 }
  0xd6   : > { %4186 = vmatmul.mubr.f32.vlgmr.msra.gmra.mrb[6].mxu0 %v24566_v49  ;;  %21167 = vmatprep.subr.bf16.mxu1 %v21166_v32  ;;  %v24777_v32 = vld [vmem:[%s29204_s4 + $0xb0] sm:$0xff]  ;;  %v24808_v6 = vpack.c.bf16 %v5466_v0, %v5462_v36  ;;  %v24816_v1 = vsub.f32 %v3779_v42, %v5466_v0 }
  0xd7   : > { %21121 = vmatpush1.bf16.msra.mxu0 %v21120_v43  ;;  %4280 = vmatprep.mubr.f32.mxu0 %v29245_v9  ;;  %v24792_v43 = vsub.f32 %v3762_v20, %v5460_v19  ;;  %v24810_v20 = vsub.f32 %v3771_v31, %v5462_v36  ;;  %v5464_v51 = vand.u32 4294901760, %v24777_v32  ;;  %v5541_v31 = vsub.f32 %v24748_v7, %v5540_v46 }
  0xd8   : > { %4729 = vmatmul.mubr.f32.vlgmr.msra.gmra.mrb[6].mxu1 %v24566_v49  ;;  %21123 = vmatprep.subr.bf16.mxu0 %v21122_v60  ;;  %v24806_v60 = vrot.slane %v24772_v13, %v29232_v17  ;;  %v4999_v36 = vand.u32 4294901760, %v4998_v5 }
  0xd9   : > { %21169 = vmatpush1.bf16.msra.mxu1 %v21168_v45  ;;  %4823 = vmatprep.mubr.f32.mxu1 %v29245_v9  ;;  %v24794_v45 = vpack.c.bf16 %v4923_v37, %v4919_v21  ;;  %v29234_v19 = vand.u32 4294901760, %v24792_v43  ;;  %v29238_v42 = vand.u32 4294901760, %v24810_v20  ;;  %v29237_v21 = vand.u32 4294901760, %v24816_v1 }
  0xda   : > { %21171 = vmatprep.subr.bf16.mxu1 %v21170_v41  ;;  %v24818_v41 = vpack.c.bf16 %v4925_v54, %v4921_v26  ;;  %v5004_v37 = vsub.f32 %v24761_v57, %v5003_v16  ;;  %v5034_v26 = vsub.f32 %v24799_v44, %v29236_v23  ;;  %v5547_v54 = vsub.f32 %v24790_v15, %v29235_v39 }
  0xdb   : > { %21125 = vmatpush1.bf16.msra.mxu0 %v21124_v47  ;;  %v29239_v47 = vand.u32 4294901760, %v24796_v55  ;;  %v5577_v56 = vsub.f32 %v24816_v1, %v29237_v21  ;;  %v5028_v23 = vsub.f32 %v24824_v30, %v29240_v34 }
  0xdc   : > { %21127 = vmatprep.subr.bf16.mxu0 %v24455_v3  ;;  %v5468_v3 = vand.u32 4294901760, %v24782_v59 }
  0xdd   : > { %21173 = vmatpush1.bf16.msra.mxu1 %v21172_v25  ;;  %v24843_v25 = vsub.f32 %v24777_v32, %v5464_v51  ;;  %v5559_v32 = vsub.f32 %v24792_v43, %v29234_v19  ;;  %v5005_v19 = vand.u32 4294901760, %v5004_v37  ;;  %v5548_v37 = vand.u32 4294901760, %v5547_v54 }
  0xde   : > { %4282 = vmatmul.mubr.f32.vlgmr.msra.gmra.mrb[6].mxu0 %v24500_v4  ;;  %21175 = vmatprep.subr.bf16.mxu1 %v24465_v52  ;;  %v29243_v52 = vand.u32 4294901760, %v24765_v22 }
  0xdf   : > { %21129 = vmatpush1.bf16.msra.mxu0 %v24477_v12  ;;  %4360 = vmatprep.mubr.f32.mxu0 %v29245_v9  ;;  %v5010_v12 = vsub.f32 %v24735_v61, %v5009_v58 }
  0xe0   : > { %4825 = vmatmul.mubr.f32.vlgmr.msra.gmra.mrb[6].mxu1 %v24500_v4  ;;  %21131 = vmatprep.subr.bf16.mxu0 %v24502_v14  ;;  %v24846_v14 = vsub.f32 %v24782_v59, %v5468_v3  ;;  %v29242_v59 = vand.u32 4294901760, %v24843_v25 }
  0xe1   : > { %21177 = vmatpush1.bf16.msra.mxu1 %v24489_v62  ;;  %4903 = vmatprep.mubr.f32.mxu1 %v29245_v9  ;;  %v5553_v62 = vsub.f32 %v24757_v10, %v5552_v40  ;;  %v5011_v0 = vand.u32 4294901760, %v5010_v12  ;;  %v5542_v12 = vand.u32 4294901760, %v5541_v31  ;;  %v5040_v31 = vsub.f32 %v24826_v63, %v29241_v11 }
  0xe2   : > { %21179 = vmatprep.subr.bf16.mxu1 %v24515_v33  ;;  %v5016_v33 = vsub.f32 %v24765_v22, %v29243_v52  ;;  %v29244_v5 = vand.u32 4294901760, %v24846_v14  ;;  %v5571_v34 = vsub.f32 %v24843_v25, %v29242_v59 }
  0xe3   : > { %21133 = vmatpush1.bf16.msra.mxu0 %v24523_v24  ;;  %v5022_v24 = vsub.f32 %v24796_v55, %v29239_v47  ;;  %v5554_v17 = vand.u32 4294901760, %v5553_v62  ;;  %v24902_v62 = vpack.c.bf16 %v5468_v3, %v5464_v51  ;;  %v21190_v21 = vpack.c.bf16 %v5011_v0, %v4999_v36 }
  0xe4   : > { %21183 = vmatprep.subr.bf16.mxu0 %v24731_v18  ;;  %v5017_v39 = vand.u32 4294901760, %v5016_v33  ;;  %v5035_v47 = vand.u32 4294901760, %v5034_v26  ;;  %v5560_v33 = vand.u32 4294901760, %v5559_v32  ;;  %v5583_v11 = vsub.f32 %v24846_v14, %v29244_v5 }
  0xe5   : > { %21181 = vmatpush1.bf16.msra.mxu1 %v24617_v8  ;;  %v5565_v8 = vsub.f32 %v24810_v20, %v29238_v42  ;;  %v5023_v42 = vand.u32 4294901760, %v5022_v24  ;;  %v21238_v51 = vpack.c.bf16 %v5554_v17, %v5542_v12  ;;  %v5578_v36 = vand.u32 4294901760, %v5577_v56 }
  0xe6   : > { %4362 = vmatmul.mubr.f32.vlgmr.msra.gmra.mrb[6].mxu0 %v24500_v4  ;;  %21231 = vmatprep.subr.bf16.mxu1 %v24746_v27  ;;  %v21192_v0 = vpack.c.bf16 %v5017_v39, %v5005_v19  ;;  %v5029_v24 = vand.u32 4294901760, %v5028_v23  ;;  %v5041_v26 = vand.u32 4294901760, %v5040_v31  ;;  %v21240_v32 = vpack.c.bf16 %v5560_v33, %v5548_v37  ;;  %v6013_v31 = vld [vmem:[%s29206_s6 + $0x80] sm:$0xff] }
  0xe7   : > { %21185 = vmatpush1.bf16.msra.mxu0 %v24759_v28  ;;  %4983 = vmatprep.mubr.f32.mxu0 %v29245_v9  ;;  %v5566_v3 = vand.u32 4294901760, %v5565_v8  ;;  %v21194_v54 = vpack.c.bf16 %v5035_v47, %v5023_v42  ;;  %v5572_v59 = vand.u32 4294901760, %v5571_v34  ;;  %v5584_v52 = vand.u32 4294901760, %v5583_v11  ;;  %v5997_v37 = vld [vmem:[%s29206_s6] sm:$0xff] }
  0xe8   : > { %4905 = vmatmul.mubr.f32.vlgmr.msra.gmra.mrb[6].mxu1 %v24500_v4  ;;  %21187 = vmatprep.subr.bf16.mxu0 %v24794_v45  ;;  %v21196_v17 = vpack.c.bf16 %v5041_v26, %v5029_v24  ;;  %v21198_v56 = vpack.c.bf16 %v24735_v61, %v24733_v2  ;;  %v21246_v23 = vpack.c.bf16 %v24757_v10, %v24748_v7  ;;  %v29750_v61 = vand.u32 4294901760, %v24796_v55  ;;  %v6016_v24 = vld [vmem:[%s29206_s6 + $0x98] sm:$0xff] }
  0xe9   : > { %21233 = vmatpush1.bf16.msra.mxu1 %v24767_v48  ;;  %5526 = vmatprep.mubr.f32.mxu1 %v29245_v9  ;;  %v21242_v5 = vpack.c.bf16 %v5578_v36, %v5566_v3  ;;  %v21244_v47 = vpack.c.bf16 %v5584_v52, %v5572_v59  ;;  %v21200_v39 = vpack.c.bf16 %v24765_v22, %v24761_v57  ;;  %v29752_v7 = vand.u32 4294901760, %v24790_v15 }
  0xea   : > { %21235 = vmatprep.subr.bf16.mxu1 %v24808_v6  ;;  %v21248_v19 = vpack.c.bf16 %v24792_v43, %v24790_v15  ;;  %v21250_v52 = vpack.c.bf16 %v24816_v1, %v24810_v20  ;;  %v21204_v42 = vpack.c.bf16 %v24826_v63, %v24824_v30  ;;  %v21214_v34 = vpack.c.bf16 %v5009_v58, %v4997_v53 }
  0xeb   : > { %21189 = vmatpush1.bf16.msra.mxu0 %v24818_v41  ;;  %v21262_v11 = vpack.c.bf16 %v5552_v40, %v5540_v46  ;;  %v29751_v53 = vand.u32 4294901760, %v24799_v44  ;;  %v29753_v10 = vand.u32 4294901760, %v24792_v43  ;;  %v29754_v57 = vand.u32 4294901760, %v24810_v20 }
  0xec   : > { %21191 = vmatprep.subr.bf16.mxu0 %v21190_v21  ;;  %v21252_v21 = vpack.c.bf16 %v24846_v14, %v24843_v25  ;;  %v29758_v15 = vand.u32 4294901760, %v24843_v25  ;;  %v29759_v43 = vand.u32 4294901760, %v24846_v14  ;;  %v29264_v25 = vsub.s32 4, %v24743_v35 }
  0xed   : > { %21237 = vmatpush1.bf16.msra.mxu1 %v24902_v62  ;;  %v21218_v58 = vpack.c.bf16 %v29751_v53, %v29750_v61  ;;  %v21264_v46 = vpack.c.bf16 %v29753_v10, %v29752_v7  ;;  %v29261_v14 = vsub.s32 5, %v24743_v35  ;;  %v6076_v36 = vand.u32 4294901760, %v5997_v37 }
  0xee   : > { %4989 = vmatmul.mubr.f32.vlgmr.msra.gmra.mrb[8].mxu0 %v24628_v29  ;;  %21239 = vmatprep.subr.bf16.mxu1 %v21238_v51  ;;  %v21268_v20 = vpack.c.bf16 %v29759_v43, %v29758_v15  ;;  %v25030_v12 = vrot.slane %v24772_v13, %v29264_v25  ;;  %v6124_v51 = vand.u32 4294901760, %v6013_v31  ;;  %v6017_v43 = vld [vmem:[%s29206_s6 + $0xa0] sm:$0xff] }
  0xef   : > { %21193 = vmatpush1.bf16.msra.mxu0 %v21192_v0  ;;  %5099 = vmatprep.mubr.f32.mxu0 %v29245_v9  ;;  %v25035_v8 = vrot.slane %v24772_v13, %v29261_v14  ;;  %v6015_v0 = vld [vmem:[%s29206_s6 + $0x90] sm:$0xff] }
  0xf0   : > { %5532 = vmatmul.mubr.f32.vlgmr.msra.gmra.mrb[8].mxu1 %v24628_v29  ;;  %21195 = vmatprep.subr.bf16.mxu0 %v21194_v54  ;;  %v21202_v29 = vpack.c.bf16 %v24799_v44, %v24796_v55  ;;  %v29756_v55 = vand.u32 4294901760, %v24824_v30  ;;  %v29757_v44 = vand.u32 4294901760, %v24826_v63  ;;  %v25019_v63 = vsub.s32 1, %v24743_v35 }
  0xf1   : > { %21241 = vmatpush1.bf16.msra.mxu1 %v21240_v32  ;;  %5642 = vmatprep.mubr.f32.mxu1 %v29245_v9  ;;  %v6130_v32 = vand.u32 4294901760, %v6015_v0 }
  0xf2   : > { %21243 = vmatprep.subr.bf16.mxu1 %v21242_v5  ;;  %29763 = vst [vmem:[#allocation8_spill] sm:$0xff] %v25019_v63  ;;  %v432_v5 = vrot.slane %v24772_v13, %v25019_v63 }
  0xf3   : > { %21197 = vmatpush1.bf16.msra.mxu0 %v21196_v17  ;;  %v6133_v17 = vand.u32 4294901760, %v6016_v24 }
  0xf4   : > { %21199 = vmatprep.subr.bf16.mxu0 %v21198_v56 }
  0xf5   : > { %21245 = vmatpush1.bf16.msra.mxu1 %v21244_v47  ;;  %v25061_v47 = vsub.f32 %v6013_v31, %v6124_v51  ;;  %v25084_v61 = vsub.f32 %v6016_v24, %v6133_v17 }
  0xf6   : > { %5101 = vmatmul.mubr.f32.vlgmr.msra.gmra.mrb[8].mxu0 %v24500_v4  ;;  %21247 = vmatprep.subr.bf16.mxu1 %v21246_v23 }
  0xf7   : > { %21201 = vmatpush1.bf16.msra.mxu0 %v21200_v39  ;;  %5187 = vmatprep.mubr.f32.mxu0 %v29245_v9  ;;  %v25065_v39 = vsub.f32 %v5997_v37, %v6076_v36 }
  0xf8   : > { %5644 = vmatmul.mubr.f32.vlgmr.msra.gmra.mrb[8].mxu1 %v24500_v4  ;;  %21203 = vmatprep.subr.bf16.mxu0 %v21202_v29  ;;  %v5999_v29 = vld [vmem:[%s29206_s6 + $0x10] sm:$0xff] }
  0xf9   : > { %21249 = vmatpush1.bf16.msra.mxu1 %v21248_v19  ;;  %5730 = vmatprep.mubr.f32.mxu1 %v29245_v9  ;;  %v6000_v19 = vld [vmem:[%s29206_s6 + $0x18] sm:$0xff]  ;;  %v6082_v7 = vand.u32 4294901760, %v5999_v29 }
  0xfa   : > { %21251 = vmatprep.subr.bf16.mxu1 %v21250_v52  ;;  %v6085_v10 = vand.u32 4294901760, %v6000_v19 }
  0xfb   : > { %21205 = vmatpush1.bf16.msra.mxu0 %v21204_v42  ;;  %v25109_v15 = vsub.f32 %v5999_v29, %v6082_v7 }
  0xfc   : > { %21207 = vmatprep.subr.bf16.mxu0 %v24731_v18  ;;  %v25124_v31 = vsub.f32 %v6000_v19, %v6085_v10 }
  0xfd   : > { %21253 = vmatpush1.bf16.msra.mxu1 %v21252_v21  ;;  %v25077_v21 = vpack.c.bf16 %v6133_v17, %v6130_v32  ;;  %v6020_v17 = vld [vmem:[%s29206_s6 + $0xb8] sm:$0xff] }
  0xfe   : > { %5190 = vmatmul.mubr.f32.vlgmr.msra.gmra.mrb[8].mxu0 %v24528_v50  ;;  %21255 = vmatprep.subr.bf16.mxu1 %v24746_v27  ;;  %v29250_v24 = vand.u32 4294901760, %v25124_v31 }
  0xff   : > { %21209 = vmatpush1.bf16.msra.mxu0 %v24759_v28  ;;  %5268 = vmatprep.mubr.f32.mxu0 %v29245_v9  ;;  %29766 = vst [vmem:[#allocation11_spill] sm:$0xff] %v25077_v21 }
 0x100   : > { %5733 = vmatmul.mubr.f32.vlgmr.msra.gmra.mrb[8].mxu1 %v24528_v50  ;;  %21211 = vmatprep.subr.bf16.mxu0 %v24794_v45  ;;  %v29749_v50 = vand.u32 4294901760, %v24765_v22  ;;  %v29755_v22 = vand.u32 4294901760, %v24816_v1 }
 0x101   : > { %21257 = vmatpush1.bf16.msra.mxu1 %v24767_v48  ;;  %5811 = vmatprep.mubr.f32.mxu1 %v29245_v9 }
 0x102   : > { %21259 = vmatprep.subr.bf16.mxu1 %v24808_v6  ;;  %v21216_v2 = vpack.c.bf16 %v29749_v50, %v5003_v16  ;;  %v21266_v40 = vpack.c.bf16 %v29755_v22, %v29754_v57  ;;  %v21220_v16 = vpack.c.bf16 %v29757_v44, %v29756_v55 }
 0x103   : > { %21213 = vmatpush1.bf16.msra.mxu0 %v24818_v41 }
 0x104   : > { %21215 = vmatprep.subr.bf16.mxu0 %v21214_v34  ;;  %v25079_v34 = vsub.f32 %v6015_v0, %v6130_v32  ;;  %v6019_v32 = vld [vmem:[%s29206_s6 + $0xb0] sm:$0xff] }
 0x105   : > { %21261 = vmatpush1.bf16.msra.mxu1 %v24902_v62 }
 0x106   : > { %5272 = vmatmul.mubr.f32.vlgmr.msra.gmra.mrb[8].mxu0 %v24566_v49  ;;  %21263 = vmatprep.subr.bf16.mxu1 %v21262_v11  ;;  %v29260_v11 = vand.u32 4294901760, %v25061_v47 }
 0x107   : > { %21217 = vmatpush1.bf16.msra.mxu0 %v21216_v2  ;;  %5366 = vmatprep.mubr.f32.mxu0 %v29245_v9  ;;  %v29257_v2 = vand.u32 4294901760, %v25065_v39 }
 0x108   : > { %5815 = vmatmul.mubr.f32.vlgmr.msra.gmra.mrb[8].mxu1 %v24566_v49  ;;  %21219 = vmatprep.subr.bf16.mxu0 %v21218_v58  ;;  %v25002_v49 = vsub.s32 2, %v24743_v35  ;;  %v29254_v58 = vand.u32 4294901760, %v25079_v34 }
 0x109   : > { %21265 = vmatpush1.bf16.msra.mxu1 %v21264_v46  ;;  %5909 = vmatprep.mubr.f32.mxu1 %v29245_v9  ;;  %v6303_v46 = vsub.f32 %v25061_v47, %v29260_v11  ;;  %v6191_v22 = vsub.f32 %v25065_v39, %v29257_v2 }
 0x10a   : > { %21267 = vmatprep.subr.bf16.mxu1 %v21266_v40  ;;  %29760 = vst [vmem:[#allocation5_spill] sm:$0xff] %v25002_v49  ;;  %v29253_v40 = vand.u32 4294901760, %v25084_v61  ;;  %v6317_v44 = vsub.f32 %v25079_v34, %v29254_v58 }
 0x10b   : > { %21221 = vmatpush1.bf16.msra.mxu0 %v21220_v16  ;;  %v25107_v16 = vpack.c.bf16 %v6085_v10, %v6082_v7 }
 0x10c   : > { %21223 = vmatprep.subr.bf16.mxu0 %v24731_v18  ;;  %v25005_v18 = vsub.s32 3, %v24743_v35 }
 0x10d   : > { %21269 = vmatpush1.bf16.msra.mxu1 %v21268_v20  ;;  %29767 = vst [vmem:[#allocation12_spill] sm:$0xff] %v25107_v16  ;;  %v6018_v20 = vld [vmem:[%s29206_s6 + $0xa8] sm:$0xff] }
 0x10e   : > { %5368 = vmatmul.mubr.f32.vlgmr.msra.gmra.mrb[8].mxu0 %v24500_v4  ;;  %21271 = vmatprep.subr.bf16.mxu1 %v24746_v27  ;;  %29761 = vst [vmem:[#allocation6_spill] sm:$0xff] %v25005_v18  ;;  %v436_v27 = vrot.slane %v24772_v13, %v25002_v49 }
 0x10f   : > { %21225 = vmatpush1.bf16.msra.mxu0 %v24759_v28  ;;  %5446 = vmatprep.mubr.f32.mxu0 %v29245_v9 }
 0x110   : > { %5911 = vmatmul.mubr.f32.vlgmr.msra.gmra.mrb[8].mxu1 %v24500_v4  ;;  %21227 = vmatprep.subr.bf16.mxu0 %v24794_v45 }
 0x111   : > { %21273 = vmatpush1.bf16.msra.mxu1 %v24767_v48  ;;  %5989 = vmatprep.mubr.f32.mxu1 %v29245_v9  ;;  %v440_v48 = vrot.slane %v24772_v13, %v25005_v18  ;;  %v6021_v9 = vld [vmem:[%s29206_s6 + $0xc0] sm:$0xff] }
 0x112   : > { %21275 = vmatprep.subr.bf16.mxu1 %v24808_v6 }
 0x113   : > { %21229 = vmatpush1.bf16.msra.mxu0 %v24818_v41 }
 0x115   : > { %21277 = vmatpush1.bf16.msra.mxu1 %v24902_v62  ;;  %v6014_v62 = vld [vmem:[%s29206_s6 + $0x88] sm:$0xff] }
 0x116   : > { %5448 = vmatmul.mubr.f32.vlgmr.msra.gmra.mrb[8].mxu0 %v24500_v4  ;;  %v6127_v3 = vand.u32 4294901760, %v6014_v62 }
 0x118   : > { %5991 = vmatmul.mubr.f32.vlgmr.msra.gmra.mrb[8].mxu1 %v24500_v4  ;;  %v25016_v4 = vsub.s32 0, %v24743_v35  ;;  %v25059_v56 = vpack.c.bf16 %v6127_v3, %v6124_v51  ;;  %v25063_v23 = vsub.f32 %v6014_v62, %v6127_v3  ;;  %v6136_v51 = vand.u32 4294901760, %v6017_v43 }
 0x119   : > { %v6139_v3 = vand.u32 4294901760, %v6018_v20 }
 0x11a   : > { %29762 = vst [vmem:[#allocation7_spill] sm:$0xff] %v25016_v4  ;;  %v428_v59 = vrot.slane %v24772_v13, %v25016_v4  ;;  %v5998_v13 = vld [vmem:[%s29206_s6 + $0x8] sm:$0xff]  ;;  %29764 = vst [vmem:[#allocation9_spill] sm:$0xff] %v25059_v56  ;;  %v29258_v50 = vand.u32 4294901760, %v25063_v23  ;;  %21279 = vmatprep.subr.bf16.mxu0 %v25059_v56  ;;  %v25149_v7 = vsub.f32 %v6017_v43, %v6136_v51  ;;  %v6142_v43 = vand.u32 4294901760, %v6019_v32 }
 0x11b   : > { %v6079_v54 = vand.u32 4294901760, %v5998_v13  ;;  %v25147_v19 = vpack.c.bf16 %v6139_v3, %v6136_v51  ;;  %v25151_v10 = vsub.f32 %v6018_v20, %v6139_v3 }
 0x11c   : > { %v6310_v57 = vsub.f32 %v25063_v23, %v29258_v50  ;;  %29772 = vst [vmem:[#allocation17_spill] sm:$0xff] %v25149_v7  ;;  %v25179_v3 = vsub.f32 %v6019_v32, %v6142_v43 }
 0x11d   : > { %v25073_v52 = vpack.c.bf16 %v6079_v54, %v6076_v36  ;;  %v25075_v42 = vsub.f32 %v5998_v13, %v6079_v54  ;;  %v6002_v13 = vld [vmem:[%s29206_s6 + $0x28] sm:$0xff]  ;;  %29771 = vst [vmem:[#allocation16_spill] sm:$0xff] %v25147_v19  ;;  %29773 = vst [vmem:[#allocation18_spill] sm:$0xff] %v25151_v10 }
 0x11e   : > { %29778 = vst [vmem:[#allocation23_spill] sm:$0xff] %v25179_v3 }
 0x11f   : > { %29765 = vst [vmem:[#allocation10_spill] sm:$0xff] %v25073_v52  ;;  %v29256_v53 = vand.u32 4294901760, %v25075_v42  ;;  %21281 = vmatpush3.bf16.msra.mxu0 %v25073_v52 }
 0x120   : > { %21283 = vmatprep.subr.bf16.mxu0 %v25077_v21 }
 0x121   : > { %v6198_v55 = vsub.f32 %v25075_v42, %v29256_v53 }
 0x123   : > { %21285 = vmatpush3.bf16.msra.mxu0 %v25107_v16 }
 0x124   : > { %21287 = vmatprep.subr.bf16.mxu0 %v25147_v19 }
 0x129   : > { %v1027_v28 = vpop.f32.mrb[0].mxu0 }
 0x12a   : > { %v1029_v45 = vpop.f32.mrb[1].mxu0  ;;  %v25046_v33 = vadd.f32 %v1027_v28, %v428_v59  ;;  %v6311_v28 = vand.u32 4294901760, %v6310_v57  ;;  %v6318_v59 = vand.u32 4294901760, %v6317_v44  ;;  %v6212_v57 = vsub.f32 %v25124_v31, %v29250_v24 }
 0x12b   : > { %v1570_v6 = vpop.f32.mrb[0].mxu1  ;;  %v25057_v26 = vadd.f32 %v1029_v45, %v432_v5  ;;  %v6324_v45 = vsub.f32 %v25084_v61, %v29253_v40  ;;  %v29252_v5 = vand.u32 4294901760, %v25109_v15  ;;  %v29249_v44 = vand.u32 4294901760, %v25149_v7 }
 0x12c   : > { %v25011_v1 = vadd.f32 %v1570_v6, %v436_v27  ;;  %v1572_v41 = vpop.f32.mrb[1].mxu1  ;;  %v6304_v27 = vand.u32 4294901760, %v6303_v46  ;;  %v6001_v6 = vld [vmem:[%s29206_s6 + $0x20] sm:$0xff]  ;;  %v6213_v20 = vand.u32 4294901760, %v6212_v57 }
 0x12d   : > { %v25013_v30 = vadd.f32 %v1572_v41, %v440_v48  ;;  %v6192_v48 = vand.u32 4294901760, %v6191_v22  ;;  %v6199_v41 = vand.u32 4294901760, %v6198_v55  ;;  %v6325_v37 = vand.u32 4294901760, %v6324_v45 }
 0x12e   : > { %v25127_v62 = vpack.c.bf16 %v6311_v28, %v6304_v27  ;;  %v6205_v0 = vsub.f32 %v25109_v15, %v29252_v5  ;;  %v6088_v54 = vand.u32 4294901760, %v6001_v6  ;;  %v6091_v22 = vand.u32 4294901760, %v6002_v13 }
 0x12f   : > { %v25132_v36 = vpack.c.bf16 %v6199_v41, %v6192_v48  ;;  %v25145_v29 = vpack.c.bf16 %v6325_v37, %v6318_v59  ;;  %v29247_v27 = vand.u32 4294901760, %v25151_v10  ;;  %v6145_v28 = vand.u32 4294901760, %v6020_v17 }
 0x130   : > { %29768 = vst [vmem:[#allocation13_spill] sm:$0xff] %v25127_v62  ;;  %21311 = vmatprep.subr.bf16.mxu1 %v25127_v62  ;;  %v6206_v46 = vand.u32 4294901760, %v6205_v0  ;;  %v25157_v55 = vsub.f32 %v6001_v6, %v6088_v54  ;;  %v25163_v48 = vpack.c.bf16 %v6091_v22, %v6088_v54  ;;  %v25166_v41 = vsub.f32 %v6002_v13, %v6091_v22  ;;  %v6003_v6 = vld [vmem:[%s29206_s6 + $0x30] sm:$0xff]  ;;  %v6004_v13 = vld [vmem:[%s29206_s6 + $0x38] sm:$0xff] }
 0x131   : > { %29769 = vst [vmem:[#allocation14_spill] sm:$0xff] %v25132_v36  ;;  %29770 = vst [vmem:[#allocation15_spill] sm:$0xff] %v25145_v29  ;;  %21313 = vmatpush3.bf16.msra.mxu1 %v25132_v36  ;;  %v6331_v59 = vsub.f32 %v25149_v7, %v29249_v44  ;;  %v6338_v37 = vsub.f32 %v25151_v10, %v29247_v27  ;;  %v25177_v51 = vpack.c.bf16 %v6145_v28, %v6142_v43 }
 0x132   : > { %29774 = vst [vmem:[#allocation19_spill] sm:$0xff] %v25157_v55  ;;  %21315 = vmatprep.subr.bf16.mxu1 %v25145_v29  ;;  %29775 = vst [vmem:[#allocation20_spill] sm:$0xff] %v25163_v48  ;;  %v29248_v45 = vand.u32 4294901760, %v25157_v55  ;;  %v25184_v0 = vpack.c.bf16 %v6213_v20, %v6206_v46  ;;  %v29251_v57 = vand.u32 4294901760, %v25166_v41  ;;  %v25190_v22 = vsub.f32 %v6020_v17, %v6145_v28 }
 0x133   : > { %29776 = vst [vmem:[#allocation21_spill] sm:$0xff] %v25166_v41  ;;  %29777 = vst [vmem:[#allocation22_spill] sm:$0xff] %v25177_v51  ;;  %21289 = vmatpush3.bf16.msra.mxu0 %v25163_v48  ;;  %v6332_v32 = vand.u32 4294901760, %v6331_v59  ;;  %v6339_v43 = vand.u32 4294901760, %v6338_v37  ;;  %v29255_v27 = vand.u32 4294901760, %v25179_v3  ;;  %v6094_v46 = vand.u32 4294901760, %v6003_v6 }
 0x134   : > { %29779 = vst [vmem:[#allocation24_spill] sm:$0xff] %v25184_v0  ;;  %v6219_v54 = vsub.f32 %v25157_v55, %v29248_v45  ;;  %29780 = vst [vmem:[#allocation25_spill] sm:$0xff] %v25190_v22  ;;  %21291 = vmatprep.subr.bf16.mxu0 %v25177_v51  ;;  %v6226_v17 = vsub.f32 %v25166_v41, %v29251_v57  ;;  %v29259_v28 = vand.u32 4294901760, %v25190_v22  ;;  %v6097_v45 = vand.u32 4294901760, %v6004_v13  ;;  %v6022_v59 = vld [vmem:[%s29206_s6 + $0xc8] sm:$0xff]  ;;  %v6005_v57 = vld [vmem:[%s29206_s6 + $0x40] sm:$0xff] }
 0x135   : > { %21317 = vmatpush3.bf16.msra.mxu1 %v25184_v0  ;;  %v25206_v37 = vpack.c.bf16 %v6339_v43, %v6332_v32  ;;  %v6345_v44 = vsub.f32 %v25179_v3, %v29255_v27  ;;  %v25211_v24 = vsub.f32 %v6003_v6, %v6094_v46  ;;  %v6151_v27 = vand.u32 4294901760, %v6022_v59 }
 0x136   : > { %v6220_v20 = vand.u32 4294901760, %v6219_v54  ;;  %v6148_v54 = vand.u32 4294901760, %v6021_v9  ;;  %v6227_v5 = vand.u32 4294901760, %v6226_v17  ;;  %v6352_v40 = vsub.f32 %v25190_v22, %v29259_v28  ;;  %v6006_v17 = vld [vmem:[%s29206_s6 + $0x48] sm:$0xff] }
 0x137   : > { %29781 = vst [vmem:[#allocation26_spill] sm:$0xff] %v25206_v37  ;;  %29782 = vst [vmem:[#allocation27_spill] sm:$0xff] %v25211_v24  ;;  %v25219_v58 = vpack.c.bf16 %v6097_v45, %v6094_v46  ;;  %v25221_v32 = vsub.f32 %v6004_v13, %v6097_v45  ;;  %21319 = vmatprep.subr.bf16.mxu1 %v25206_v37  ;;  %v6346_v43 = vand.u32 4294901760, %v6345_v44  ;;  %v29262_v6 = vand.u32 4294901760, %v25211_v24  ;;  %v6023_v45 = vld [vmem:[%s29206_s6 + $0xd0] sm:$0xff] }
 0x138   : > { %v25225_v53 = vsub.f32 %v6021_v9, %v6148_v54  ;;  %v25230_v2 = vpack.c.bf16 %v6227_v5, %v6220_v20  ;;  %v6353_v50 = vand.u32 4294901760, %v6352_v40  ;;  %v6100_v28 = vand.u32 4294901760, %v6005_v57 }
 0x139   : > { %29783 = vst [vmem:[#allocation28_spill] sm:$0xff] %v25219_v58  ;;  %29784 = vst [vmem:[#allocation29_spill] sm:$0xff] %v25221_v32  ;;  %v29263_v46 = vand.u32 4294901760, %v25221_v32  ;;  %21293 = vmatpush3.bf16.msra.mxu0 %v25219_v58  ;;  %v6233_v9 = vsub.f32 %v25211_v24, %v29262_v6  ;;  %v25240_v44 = vpack.c.bf16 %v6151_v27, %v6148_v54  ;;  %v6103_v11 = vand.u32 4294901760, %v6006_v17  ;;  %v6024_v54 = vld [vmem:[%s29206_s6 + $0xd8] sm:$0xff] }
 0x13a   : > { %29785 = vst [vmem:[#allocation30_spill] sm:$0xff] %v25225_v53  ;;  %29786 = vst [vmem:[#allocation31_spill] sm:$0xff] %v25230_v2  ;;  %v29265_v13 = vand.u32 4294901760, %v25225_v53  ;;  %v25243_v5 = vsub.f32 %v6022_v59, %v6151_v27  ;;  %21321 = vmatpush3.bf16.msra.mxu1 %v25230_v2  ;;  %v25246_v40 = vpack.c.bf16 %v6353_v50, %v6346_v43  ;;  %v6154_v50 = vand.u32 4294901760, %v6023_v45  ;;  %v25263_v43 = vld [vmem:[%s29206_s6 + $0x50] sm:$0xff] }
 0x13b   : > { %29787 = vst [vmem:[#allocation32_spill] sm:$0xff] %v25240_v44  ;;  %v6240_v20 = vsub.f32 %v25221_v32, %v29263_v46  ;;  %v25251_v14 = vsub.f32 %v6005_v57, %v6100_v28  ;;  %v6234_v6 = vand.u32 4294901760, %v6233_v9  ;;  %21295 = vmatprep.subr.bf16.mxu0 %v25240_v44  ;;  %v25267_v46 = vpack.c.bf16 %v6103_v11, %v6100_v28 }
 0x13c   : > { %29788 = vst [vmem:[#allocation33_spill] sm:$0xff] %v25243_v5  ;;  %29789 = vst [vmem:[#allocation34_spill] sm:$0xff] %v25246_v40  ;;  %v6359_v27 = vsub.f32 %v25225_v53, %v29265_v13  ;;  %v29276_v59 = vand.u32 4294901760, %v25243_v5  ;;  %21323 = vmatprep.subr.bf16.mxu1 %v25246_v40  ;;  %v25270_v25 = vsub.f32 %v6006_v17, %v6103_v11  ;;  %v6157_v37 = vand.u32 4294901760, %v6024_v54 }
 0x13d   : > { %29790 = vst [vmem:[#allocation35_spill] sm:$0xff] %v25251_v14  ;;  %v6241_v57 = vand.u32 4294901760, %v6240_v20  ;;  %29791 = vst [vmem:[#allocation36_spill] sm:$0xff] %v25267_v46  ;;  %v29279_v9 = vand.u32 4294901760, %v25251_v14  ;;  %v25275_v0 = vsub.f32 %v6023_v45, %v6154_v50  ;;  %v6106_v11 = vand.u32 4294901760, %v25263_v43  ;;  %21297 = vmatpush3.bf16.msra.mxu0 %v25267_v46 }
 0x13e   : > { %29792 = vst [vmem:[#allocation37_spill] sm:$0xff] %v25270_v25  ;;  %v6360_v13 = vand.u32 4294901760, %v6359_v27  ;;  %v6366_v2 = vsub.f32 %v25243_v5, %v29276_v59  ;;  %v29284_v20 = vand.u32 4294901760, %v25270_v25  ;;  %v25286_v40 = vpack.c.bf16 %v6157_v37, %v6154_v50 }
 0x13f   : > { %29793 = vst [vmem:[#allocation38_spill] sm:$0xff] %v25275_v0  ;;  %v25277_v36 = vpack.c.bf16 %v6241_v57, %v6234_v6  ;;  %v6247_v28 = vsub.f32 %v25251_v14, %v29279_v9  ;;  %v25294_v44 = vsub.f32 %v6024_v54, %v6157_v37 }
 0x140   : > { %v6367_v59 = vand.u32 4294901760, %v6366_v2  ;;  %29795 = vst [vmem:[#allocation40_spill] sm:$0xff] %v25286_v40  ;;  %v6254_v62 = vsub.f32 %v25270_v25, %v29284_v20  ;;  %21299 = vmatprep.subr.bf16.mxu0 %v25286_v40 }
 0x141   : > { %29794 = vst [vmem:[#allocation39_spill] sm:$0xff] %v25277_v36  ;;  %21325 = vmatpush3.bf16.msra.mxu1 %v25277_v36  ;;  %v6248_v9 = vand.u32 4294901760, %v6247_v28  ;;  %29796 = vst [vmem:[#allocation41_spill] sm:$0xff] %v25294_v44 }
 0x142   : > { %v25323_v45 = vpack.c.bf16 %v6367_v59, %v6360_v13  ;;  %v6255_v36 = vand.u32 4294901760, %v6254_v62 }
 0x144   : > { %29802 = vst [vmem:[#allocation47_spill] sm:$0xff] %v25323_v45  ;;  %21327 = vmatprep.subr.bf16.mxu1 %v25323_v45  ;;  %v29812_v45 = vand.u32 4294901760, %v25294_v44 }
 0x159   : > { %v2113_v29 = vpop.f32.mrb[2].mxu0 }
 0x15a   : > { %v23202_v17 = vadd.f32 %v2113_v29, %v25030_v12  ;;  %v2115_v27 = vpop.f32.mrb[3].mxu0 }
 0x15b   : > { %v2656_v6 = vpop.f32.mrb[2].mxu1  ;;  %v23203_v57 = vadd.f32 %v2115_v27, %v25035_v8 }
 0x15c   : > { %v25297_v12 = vmul.f32 %v23202_v17, %v25046_v33  ;;  %v25300_v2 = vmul.f32 %v23202_v17, %v25057_v26  ;;  %v25303_v29 = vmul.f32 %v23202_v17, %v25011_v1  ;;  %v25306_v8 = vmul.f32 %v23202_v17, %v25013_v30  ;;  %v2658_v50 = vpop.f32.mrb[3].mxu1 }
 0x15d   : > { %v23204_v28 = vadd.f32 %v2656_v6, %v24787_v38  ;;  %v25311_v37 = vmul.f32 %v23203_v57, %v25057_v26  ;;  %v25314_v54 = vmul.f32 %v23203_v57, %v25011_v1  ;;  %v25317_v27 = vmul.f32 %v23203_v57, %v25013_v30  ;;  %v6008_v38 = vld [vmem:[%s29206_s6 + $0x58] sm:$0xff] }
 0x15e   : > { %29797 = vst [vmem:[#allocation42_spill] sm:$0xff] %v25303_v29  ;;  %29798 = vst [vmem:[#allocation43_spill] sm:$0xff] %v25306_v8  ;;  %v25320_v20 = vmul.f32 %v23203_v57, %v25046_v33  ;;  %v23205_v17 = vadd.f32 %v2658_v50, %v24806_v60  ;;  %v25353_v50 = vpack.c.bf16 %v6255_v36, %v6248_v9  ;;  %v29810_v8 = vand.u32 4294901760, %v25275_v0 }
 0x15f   : > { %29799 = vst [vmem:[#allocation44_spill] sm:$0xff] %v25314_v54  ;;  %29800 = vst [vmem:[#allocation45_spill] sm:$0xff] %v25317_v27  ;;  %v25329_v6 = vmul.f32 %v23204_v28, %v25011_v1  ;;  %v25332_v40 = vmul.f32 %v23204_v28, %v25013_v30  ;;  %v25335_v46 = vmul.f32 %v23204_v28, %v25046_v33  ;;  %v6109_v58 = vand.u32 4294901760, %v6008_v38 }
 0x160   : > { %29801 = vst [vmem:[#allocation46_spill] sm:$0xff] %v25320_v20  ;;  %v25338_v57 = vmul.f32 %v23204_v28, %v25057_v26  ;;  %v25341_v60 = vmul.f32 %v23205_v17, %v25013_v30  ;;  %v25344_v62 = vmul.f32 %v23205_v17, %v25046_v33  ;;  %v25347_v13 = vmul.f32 %v23205_v17, %v25057_v26  ;;  %v6025_v33 = vld [vmem:[%s29206_s6 + $0xe0] sm:$0xff] }
 0x161   : > { %29803 = vst [vmem:[#allocation48_spill] sm:$0xff] %v25332_v40  ;;  %29804 = vst [vmem:[#allocation49_spill] sm:$0xff] %v25335_v46  ;;  %v25350_v59 = vmul.f32 %v23205_v17, %v25011_v1  ;;  %v6373_v28 = vsub.f32 %v25275_v0, %v29810_v8  ;;  %v6026_v1 = vld [vmem:[%s29206_s6 + $0xe8] sm:$0xff]  ;;  %v25366_v26 = vsub.f32 %v25263_v43, %v6106_v11  ;;  %v6160_v36 = vand.u32 4294901760, %v6025_v33  ;;  %v6009_v8 = vld [vmem:[%s29206_s6 + $0x60] sm:$0xff] }
 0x162   : > { %29805 = vst [vmem:[#allocation50_spill] sm:$0xff] %v25338_v57  ;;  %29806 = vst [vmem:[#allocation51_spill] sm:$0xff] %v25344_v62  ;;  %v6163_v9 = vand.u32 4294901760, %v6026_v1  ;;  %v6010_v17 = vld [vmem:[%s29206_s6 + $0x68] sm:$0xff]  ;;  %21329 = vmatpush3.bf16.msra.mxu1 %v25353_v50  ;;  %v25378_v51 = vpack.c.bf16 %v6109_v58, %v6106_v11  ;;  %v25380_v43 = vsub.f32 %v6008_v38, %v6109_v58  ;;  %v6112_v48 = vand.u32 4294901760, %v6009_v8 }
 0x163   : > { %29807 = vst [vmem:[#allocation52_spill] sm:$0xff] %v25347_v13  ;;  %29808 = vst [vmem:[#allocation53_spill] sm:$0xff] %v25350_v59  ;;  %v6374_v30 = vand.u32 4294901760, %v6373_v28  ;;  %v6380_v59 = vsub.f32 %v25294_v44, %v29812_v45  ;;  %v29305_v20 = vand.u32 4294901760, %v25366_v26  ;;  %v25383_v57 = vsub.f32 %v6025_v33, %v6160_v36  ;;  %v6027_v28 = vld [vmem:[%s29206_s6 + $0xf0] sm:$0xff] }
 0x164   : > { %29809 = vst [vmem:[#allocation54_spill] sm:$0xff] %v25353_v50  ;;  %29811 = vst [vmem:[#allocation55_spill] sm:$0xff] %v25366_v26  ;;  %v25385_v29 = vsub.f32 %v6026_v1, %v6163_v9  ;;  %v29306_v46 = vand.u32 4294901760, %v25380_v43  ;;  %v6115_v50 = vand.u32 4294901760, %v6010_v17  ;;  %21301 = vmatpush3.bf16.msra.mxu0 %v25378_v51  ;;  %v25397_v38 = vsub.f32 %v6009_v8, %v6112_v48 }
 0x165   : > { %29813 = vst [vmem:[#allocation56_spill] sm:$0xff] %v25378_v51  ;;  %29814 = vst [vmem:[#allocation57_spill] sm:$0xff] %v25380_v43  ;;  %v6381_v27 = vand.u32 4294901760, %v6380_v59  ;;  %v6261_v58 = vsub.f32 %v25366_v26, %v29305_v20  ;;  %v29311_v11 = vand.u32 4294901760, %v25383_v57  ;;  %v6028_v59 = vld [vmem:[%s29206_s6 + $0xf8] sm:$0xff]  ;;  %v6166_v19 = vand.u32 4294901760, %v6027_v28 }
 0x166   : > { %29815 = vst [vmem:[#allocation58_spill] sm:$0xff] %v25383_v57  ;;  %29816 = vst [vmem:[#allocation59_spill] sm:$0xff] %v25385_v29  ;;  %v6268_v1 = vsub.f32 %v25380_v43, %v29306_v46  ;;  %v25407_v51 = vsub.f32 %v6010_v17, %v6115_v50  ;;  %v6011_v20 = vld [vmem:[%s29206_s6 + $0x70] sm:$0xff]  ;;  %v29820_v13 = vand.u32 4294901760, %v25385_v29  ;;  %v6169_v54 = vand.u32 4294901760, %v6028_v59 }
 0x167   : > { %29817 = vst [vmem:[#allocation60_spill] sm:$0xff] %v25397_v38  ;;  %v25402_v33 = vpack.c.bf16 %v6381_v27, %v6374_v30  ;;  %v6262_v45 = vand.u32 4294901760, %v6261_v58  ;;  %v6387_v8 = vsub.f32 %v25383_v57, %v29311_v11  ;;  %v29316_v30 = vand.u32 4294901760, %v25397_v38 }
 0x168   : > { %29819 = vst [vmem:[#allocation62_spill] sm:$0xff] %v25407_v51  ;;  %v6394_v27 = vsub.f32 %v25385_v29, %v29820_v13  ;;  %v6269_v17 = vand.u32 4294901760, %v6268_v1  ;;  %v29317_v46 = vand.u32 4294901760, %v25407_v51  ;;  %v25421_v16 = vsub.f32 %v6027_v28, %v6166_v19  ;;  %v6012_v13 = vld [vmem:[%s29206_s6 + $0x78] sm:$0xff] }
 0x169   : > { %29818 = vst [vmem:[#allocation61_spill] sm:$0xff] %v25402_v33  ;;  %21331 = vmatprep.subr.bf16.mxu1 %v25402_v33  ;;  %v6388_v21 = vand.u32 4294901760, %v6387_v8  ;;  %v6275_v11 = vsub.f32 %v25397_v38, %v29316_v30  ;;  %v6118_v52 = vand.u32 4294901760, %v6011_v20  ;;  %v25441_v62 = vsub.f32 %v6028_v59, %v6169_v54 }
 0x16a   : > { %29821 = vst [vmem:[#allocation63_spill] sm:$0xff] %v25421_v16  ;;  %v6395_v58 = vand.u32 4294901760, %v6394_v27  ;;  %v25429_v40 = vpack.c.bf16 %v6269_v17, %v6262_v45  ;;  %v6282_v1 = vsub.f32 %v25407_v51, %v29317_v46  ;;  %v29323_v28 = vand.u32 4294901760, %v25421_v16 }
 0x16b   : > { %v6276_v8 = vand.u32 4294901760, %v6275_v11  ;;  %29824 = vst [vmem:[#allocation66_spill] sm:$0xff] %v25441_v62  ;;  %v6121_v45 = vand.u32 4294901760, %v6012_v13  ;;  %v25444_v17 = vsub.f32 %v6011_v20, %v6118_v52  ;;  %v25451_v11 = vpack.c.bf16 %v6163_v9, %v6160_v36 }
 0x16c   : > { %29822 = vst [vmem:[#allocation64_spill] sm:$0xff] %v25429_v40  ;;  %v25435_v33 = vpack.c.bf16 %v6395_v58, %v6388_v21  ;;  %21333 = vmatpush3.bf16.msra.mxu1 %v25429_v40  ;;  %v6283_v27 = vand.u32 4294901760, %v6282_v1  ;;  %v6401_v30 = vsub.f32 %v25421_v16, %v29323_v28  ;;  %v29322_v21 = vand.u32 4294901760, %v25441_v62 }
 0x16d   : > { %29825 = vst [vmem:[#allocation67_spill] sm:$0xff] %v25444_v17  ;;  %v25449_v58 = vsub.f32 %v6012_v13, %v6121_v45  ;;  %29828 = vst [vmem:[#allocation70_spill] sm:$0xff] %v25451_v11  ;;  %v25453_v1 = vpack.c.bf16 %v6115_v50, %v6112_v48  ;;  %v25455_v40 = vpack.c.bf16 %v6169_v54, %v6166_v19  ;;  %21303 = vmatprep.subr.bf16.mxu0 %v25451_v11 }
 0x16e   : > { %29823 = vst [vmem:[#allocation65_spill] sm:$0xff] %v25435_v33  ;;  %21335 = vmatprep.subr.bf16.mxu1 %v25435_v33  ;;  %v25446_v46 = vpack.c.bf16 %v6283_v27, %v6276_v8  ;;  %v6402_v59 = vand.u32 4294901760, %v6401_v30  ;;  %v6408_v20 = vsub.f32 %v25441_v62, %v29322_v21  ;;  %v29321_v8 = vand.u32 4294901760, %v25444_v17 }
 0x16f   : > { %29827 = vst [vmem:[#allocation69_spill] sm:$0xff] %v25449_v58  ;;  %29829 = vst [vmem:[#allocation71_spill] sm:$0xff] %v25453_v1  ;;  %v29320_v27 = vand.u32 4294901760, %v25449_v58  ;;  %v25464_v36 = vpack.c.bf16 %v6121_v45, %v6118_v52  ;;  %21305 = vmatpush3.bf16.msra.mxu0 %v25453_v1  ;;  %v25484_v30 = vpack.c.bf16 %v25063_v23, %v25061_v47 }
 0x170   : > { %29826 = vst [vmem:[#allocation68_spill] sm:$0xff] %v25446_v46  ;;  %29830 = vst [vmem:[#allocation72_spill] sm:$0xff] %v25455_v40  ;;  %21337 = vmatpush3.bf16.msra.mxu1 %v25446_v46  ;;  %v6409_v13 = vand.u32 4294901760, %v6408_v20  ;;  %v6289_v19 = vsub.f32 %v25444_v17, %v29321_v8  ;;  %21307 = vmatprep.subr.bf16.mxu0 %v25455_v40  ;;  %v25488_v45 = vpack.c.bf16 %v25075_v42, %v25065_v39 }
 0x171   : > { %29831 = vst [vmem:[#allocation73_spill] sm:$0xff] %v25464_v36  ;;  %v6296_v48 = vsub.f32 %v25449_v58, %v29320_v27  ;;  %29834 = vst [vmem:[#allocation76_spill] sm:$0xff] %v25484_v30  ;;  %v25497_v20 = vpack.c.bf16 %v25124_v31, %v25109_v15  ;;  %v25523_v21 = vpack.c.bf16 %v25243_v5, %v25225_v53  ;;  %v29856_v5 = vsub.s32 6, %v24743_v35 }
 0x172   : > { %v25474_v54 = vpack.c.bf16 %v6409_v13, %v6402_v59  ;;  %v6290_v50 = vand.u32 4294901760, %v6289_v19  ;;  %29835 = vst [vmem:[#allocation77_spill] sm:$0xff] %v25488_v45  ;;  %v25493_v59 = vpack.c.bf16 %v25084_v61, %v25079_v34  ;;  %v25501_v13 = vpack.c.bf16 %v25151_v10, %v25149_v7 }
 0x173   : > { %v6297_v9 = vand.u32 4294901760, %v6296_v48  ;;  %21309 = vmatpush3.bf16.msra.mxu0 %v25464_v36  ;;  %29837 = vst [vmem:[#allocation79_spill] sm:$0xff] %v25497_v20  ;;  %v25505_v19 = vpack.c.bf16 %v25166_v41, %v25157_v55  ;;  %v25509_v48 = vpack.c.bf16 %v25190_v22, %v25179_v3  ;;  %29845 = vst [vmem:[#allocation87_spill] sm:$0xff] %v25523_v21 }
 0x174   : > { %29832 = vst [vmem:[#allocation74_spill] sm:$0xff] %v25474_v54  ;;  %21339 = vmatprep.subr.bf16.mxu1 %v25474_v54  ;;  %21343 = vmatprep.subr.bf16.mxu0 %v25484_v30  ;;  %29836 = vst [vmem:[#allocation78_spill] sm:$0xff] %v25493_v59  ;;  %v25529_v30 = vpack.c.bf16 %v25270_v25, %v25251_v14  ;;  %v25553_v54 = vpack.c.bf16 %v25449_v58, %v25444_v17  ;;  %v29855_v17 = vsub.s32 5, %v24743_v35 }
 0x175   : > { %v25477_v52 = vpack.c.bf16 %v6297_v9, %v6290_v50  ;;  %29838 = vst [vmem:[#allocation80_spill] sm:$0xff] %v25501_v13  ;;  %29839 = vst [vmem:[#allocation81_spill] sm:$0xff] %v25505_v19  ;;  %v25513_v50 = vpack.c.bf16 %v25221_v32, %v25211_v24 }
 0x176   : > { %29840 = vst [vmem:[#allocation82_spill] sm:$0xff] %v25509_v48  ;;  %29847 = vst [vmem:[#allocation89_spill] sm:$0xff] %v25529_v30 }
 0x177   : > { %29833 = vst [vmem:[#allocation75_spill] sm:$0xff] %v25477_v52  ;;  %21341 = vmatpush3.bf16.msra.mxu1 %v25477_v52  ;;  %29841 = vst [vmem:[#allocation83_spill] sm:$0xff] %v25513_v50  ;;  %v25533_v52 = vpack.c.bf16 %v25294_v44, %v25275_v0 }
 0x178   : > { %21375 = vmatprep.subr.bf16.mxu1 %v25059_v56  ;;  %29853 = vst [vmem:[#allocation95_spill] sm:$0xff] %v25553_v54 }
 0x179   : > { %29848 = vst [vmem:[#allocation90_spill] sm:$0xff] %v25533_v52 }
 0x189   : > { %v25515_v9 = vpop.f32.mrb[4].mxu0 }
 0x18a   : > { %29842 = vst [vmem:[#allocation84_spill] sm:$0xff] %v25515_v9  ;;  %v25517_v27 = vpop.f32.mrb[5].mxu0  ;;  %v25537_v9 = vpack.c.bf16 %v25380_v43, %v25366_v26 }
 0x18b   : > { %29843 = vst [vmem:[#allocation85_spill] sm:$0xff] %v25517_v27  ;;  %v25519_v8 = vpop.f32.mrb[4].mxu1  ;;  %v25545_v27 = vpack.c.bf16 %v25407_v51, %v25397_v38 }
 0x18c   : > { %29844 = vst [vmem:[#allocation86_spill] sm:$0xff] %v25519_v8  ;;  %v25525_v28 = vpop.f32.mrb[5].mxu1  ;;  %29849 = vst [vmem:[#allocation91_spill] sm:$0xff] %v25537_v9  ;;  %v25541_v8 = vpack.c.bf16 %v25385_v29, %v25383_v57  ;;  %v3780_v29 = vld [vmem:[%s29205_s5] sm:$0xff] }
 0x18d   : > { %29846 = vst [vmem:[#allocation88_spill] sm:$0xff] %v25525_v28  ;;  %29851 = vst [vmem:[#allocation93_spill] sm:$0xff] %v25545_v27  ;;  %v25549_v28 = vpack.c.bf16 %v25441_v62, %v25421_v16  ;;  %v3793_v57 = vrot.slane %v3780_v29, %v25002_v49  ;;  %v3797_v51 = vrot.slane %v3780_v29, %v25005_v18  ;;  %v29854_v16 = vsub.s32 4, %v24743_v35 }
 0x18e   : > { %29850 = vst [vmem:[#allocation92_spill] sm:$0xff] %v25541_v8  ;;  %v3785_v38 = vrot.slane %v3780_v29, %v25016_v4  ;;  %v3789_v62 = vrot.slane %v3780_v29, %v25019_v63  ;;  %v3805_v44 = vrot.slane %v3780_v29, %v29855_v17  ;;  %v3809_v53 = vrot.slane %v3780_v29, %v29856_v5 }
 0x18f   : > { %29852 = vst [vmem:[#allocation94_spill] sm:$0xff] %v25549_v28  ;;  %v3801_v58 = vrot.slane %v3780_v29, %v29854_v16  ;;  %v29857_v4 = vsub.s32 7, %v24743_v35 }
 0x191   : > { %v3813_v22 = vrot.slane %v3780_v29, %v29857_v4 }
 0x1b9   : > { %v4363_v46 = vpop.f32.mrb[6].mxu0 }
 0x1ba   : > { %v4365_v33 = vpop.f32.mrb[7].mxu0  ;;  %v23210_v32 = vadd.f32 %v4363_v46, %v3785_v38 }
 0x1bb   : > { %v4906_v43 = vpop.f32.mrb[6].mxu1  ;;  %v23211_v49 = vadd.f32 %v4365_v33, %v3789_v62 }
 0x1bc   : > { %v4908_v26 = vpop.f32.mrb[7].mxu1  ;;  %v23212_v0 = vadd.f32 %v4906_v43, %v3793_v57 }
 0x1bd   : > { %v23213_v25 = vadd.f32 %v4908_v26, %v3797_v51 }
 0x1e9   : > { %v5449_v14 = vpop.f32.mrb[8].mxu0 }
 0x1ea   : > { %v23214_v24 = vadd.f32 %v5449_v14, %v3801_v58  ;;  %v5451_v18 = vpop.f32.mrb[9].mxu0 }
 0x1eb   : > { %v5992_v63 = vpop.f32.mrb[8].mxu1  ;;  %v23215_v3 = vadd.f32 %v5451_v18, %v3805_v44 }
 0x1ec   : > { %v6067_v41 = vmul.f32 %v23214_v24, %v23210_v32  ;;  %v7804_v16 = vmul.f32 %v23214_v24, %v23211_v49  ;;  %v9541_v55 = vmul.f32 %v23214_v24, %v23212_v0  ;;  %v11278_v10 = vmul.f32 %v23214_v24, %v23213_v25  ;;  %v5994_v17 = vpop.f32.mrb[9].mxu1 }
 0x1ed   : > { %v23216_v57 = vadd.f32 %v5992_v63, %v3809_v53  ;;  %v6068_v51 = vmul.f32 %v23215_v3, %v23211_v49  ;;  %v7805_v26 = vmul.f32 %v23215_v3, %v23212_v0  ;;  %v9542_v43 = vmul.f32 %v23215_v3, %v23213_v25 }
 0x1ee   : > { %v11275_v7 = vmul.f32 %v23215_v3, %v23210_v32  ;;  %v23217_v5 = vadd.f32 %v5994_v17, %v3813_v22  ;;  %v6071_v46 = vadd.f32 %v6067_v41, %v25297_v12  ;;  %v25581_v41 = vadd.f32 %v7804_v16, %v25300_v2  ;;  %v29862_v22 = vld [vmem:[#allocation48_spill] sm:$0xff]  ;;  %v29864_v2 = vld [vmem:[#allocation10_spill] sm:$0xff] }
 0x1ef   : > { %v6069_v14 = vmul.f32 %v23216_v57, %v23212_v0  ;;  %v7806_v62 = vmul.f32 %v23216_v57, %v23213_v25  ;;  %v9539_v38 = vmul.f32 %v23216_v57, %v23210_v32  ;;  %v11276_v35 = vmul.f32 %v23216_v57, %v23211_v49  ;;  %v29866_v17 = vld [vmem:[#allocation12_spill] sm:$0xff] }
 0x1f0   : > { %v6070_v4 = vmul.f32 %v23217_v5, %v23213_v25  ;;  %v7803_v29 = vmul.f32 %v23217_v5, %v23210_v32  ;;  %v9540_v18 = vmul.f32 %v23217_v5, %v23211_v49  ;;  %v11277_v44 = vmul.f32 %v23217_v5, %v23212_v0  ;;  %29859 = vst [vmem:[#allocation97_spill] sm:$0xff] %v25581_v41  ;;  %v29860_v49 = vld [vmem:[#allocation51_spill] sm:$0xff] }
 0x1f1   : > { %v6072_v33 = vadd.f32 %v6068_v51, %v25311_v37  ;;  %v25572_v24 = vand.u32 4294901760, %v6071_v46  ;;  %v25575_v63 = vadd.f32 %v6069_v14, %v25329_v6  ;;  %v25592_v32 = vadd.f32 %v7806_v62, %v29862_v22  ;;  %v29867_v51 = vld [vmem:[#allocation44_spill] sm:$0xff] }
 0x1f2   : > { %v25578_v53 = vadd.f32 %v6070_v4, %v25341_v60  ;;  %v25589_v0 = vadd.f32 %v7803_v29, %v29860_v49  ;;  %v29865_v60 = vld [vmem:[#allocation11_spill] sm:$0xff]  ;;  %v25605_v5 = vadd.f32 %v7805_v26, %v29867_v51  ;;  %v29871_v62 = vld [vmem:[#allocation16_spill] sm:$0xff]  ;;  %v29872_v29 = vld [vmem:[#allocation49_spill] sm:$0xff] }
 0x1f3   : > { %29858 = vst [vmem:[#allocation96_spill] sm:$0xff] %v25575_v63  ;;  %v25583_v3 = vand.u32 4294901760, %v6072_v33  ;;  %v25586_v25 = vsub.f32 %v6071_v46, %v25572_v24  ;;  %29863 = vst [vmem:[#allocation48_spill] sm:$0xff] %v25592_v32  ;;  %v29869_v46 = vld [vmem:[#allocation52_spill] sm:$0xff]  ;;  %v29874_v49 = vld [vmem:[#allocation45_spill] sm:$0xff] }
 0x1f4   : > { %29861 = vst [vmem:[#allocation51_spill] sm:$0xff] %v25589_v0  ;;  %29868 = vst [vmem:[#allocation44_spill] sm:$0xff] %v25605_v5  ;;  %v25608_v14 = vadd.f32 %v9540_v18, %v29869_v46  ;;  %v25615_v22 = vadd.f32 %v9542_v43, %v29874_v49  ;;  %v29877_v26 = vld [vmem:[#allocation42_spill] sm:$0xff]  ;;  %v29884_v43 = vld [vmem:[#allocation28_spill] sm:$0xff] }
 0x1f5   : > { %6412 = vmatprep.mubr.f32.mxu1 %v25583_v3  ;;  %v6172_v12 = vsub.f32 %v6072_v33, %v25583_v3  ;;  %v29362_v37 = vand.u32 4294901760, %v25586_v25  ;;  %v25612_v33 = vadd.f32 %v9539_v38, %v29872_v29  ;;  %v29879_v18 = vld [vmem:[#allocation50_spill] sm:$0xff]  ;;  %v29885_v46 = vld [vmem:[#allocation43_spill] sm:$0xff]  ;;  %v25674_v29 = vld [vmem:[%s29206_s6 + $0x168] sm:$0xff] }
 0x1f6   : > { %6414 = vmatmul.mubr.f32.vlgmr.msra.gmra.mrb[10].mxu1 %v25572_v24  ;;  %29870 = vst [vmem:[#allocation52_spill] sm:$0xff] %v25608_v14  ;;  %29875 = vst [vmem:[#allocation45_spill] sm:$0xff] %v25615_v22  ;;  %v29883_v51 = vld [vmem:[#allocation22_spill] sm:$0xff]  ;;  %v25654_v49 = vld [vmem:[%s29206_s6 + $0x1e0] sm:$0xff] }
 0x1f7   : > { %21377 = vmatpush3.bf16.msra.mxu1 %v29864_v2  ;;  %v6173_v6 = vand.u32 4294901760, %v6172_v12  ;;  %v6180_v58 = vsub.f32 %v25586_v25, %v29362_v37  ;;  %29873 = vst [vmem:[#allocation49_spill] sm:$0xff] %v25612_v33  ;;  %29891 = vst [vmem:[#allocation100_spill] sm:$0xff] %v25654_v49  ;;  %v25669_v37 = vld [vmem:[%s29206_s6 + $0x160] sm:$0xff]  ;;  %v25712_v22 = vld [vmem:[%s29206_s6 + $0x178] sm:$0xff]  ;;  %v29905_v33 = vand.u32 4294901760, %v25654_v49 }
 0x1f8   : > { %21379 = vmatprep.subr.bf16.mxu1 %v29865_v60  ;;  %29896 = vst [vmem:[#allocation102_spill] sm:$0xff] %v25669_v37  ;;  %29897 = vst [vmem:[#allocation103_spill] sm:$0xff] %v25674_v29 }
 0x1f9   : > { %6656 = vmatprep.mubr.f32.mxu1 %v6173_v6  ;;  %v6174_v16 = vsub.f32 %v6172_v12, %v6173_v6  ;;  %v6181_v4 = vand.u32 4294901760, %v6180_v58  ;;  %v29876_v6 = vld [vmem:[#allocation20_spill] sm:$0xff]  ;;  %v25624_v58 = vadd.f32 %v11276_v35, %v29879_v18  ;;  %v25640_v35 = vld [vmem:[%s29206_s6 + $0x150] sm:$0xff]  ;;  %29904 = vst [vmem:[#allocation107_spill] sm:$0xff] %v25712_v22  ;;  %v25717_v14 = vsub.f32 %v25654_v49, %v29905_v33  ;;  %v25747_v33 = vld [vmem:[%s29206_s6 + $0x180] sm:$0xff] }
 0x1fa   : > { %29888 = vst [vmem:[#allocation98_spill] sm:$0xff] %v25640_v35  ;;  %v29893_v18 = vld [vmem:[#allocation53_spill] sm:$0xff]  ;;  %v30006_v49 = vld [vmem:[#allocation59_spill] sm:$0xff] }
 0x1fb   : > { %21381 = vmatpush3.bf16.msra.mxu1 %v29866_v17  ;;  %v6175_v57 = vand.u32 4294901760, %v6174_v16  ;;  %v25620_v16 = vadd.f32 %v9541_v55, %v29877_v26  ;;  %29880 = vst [vmem:[#allocation50_spill] sm:$0xff] %v25624_v58  ;;  %v29887_v55 = vld [vmem:[#allocation32_spill] sm:$0xff] }
 0x1fc   : > { %21383 = vmatprep.subr.bf16.mxu1 %v29871_v62  ;;  %v25659_v26 = vld [vmem:[%s29206_s6 + $0x1e8] sm:$0xff] }
 0x1fd   : > { %6176 = vmatprep.mubr.f32.mxu0 %v6175_v57  ;;  %29878 = vst [vmem:[#allocation42_spill] sm:$0xff] %v25620_v16  ;;  %v29881_v57 = vld [vmem:[#allocation46_spill] sm:$0xff]  ;;  %29892 = vst [vmem:[#allocation101_spill] sm:$0xff] %v25659_v26  ;;  %v29906_v5 = vand.u32 4294901760, %v25659_v26  ;;  %v29908_v16 = vand.u32 4294901760, %v25674_v29 }
 0x1fe   : > { %6182 = vmatmul.mubr.f32.vlgmr.msra.gmra.mrb[10].mxu0 %v6181_v4  ;;  %v25627_v38 = vadd.f32 %v11275_v7, %v29881_v57  ;;  %v25633_v4 = vadd.f32 %v11278_v10, %v29885_v46  ;;  %v25645_v7 = vld [vmem:[%s29206_s6 + $0x158] sm:$0xff]  ;;  %v25662_v57 = vadd.f32 %v11277_v44, %v29893_v18  ;;  %v29895_v46 = vld [vmem:[#allocation40_spill] sm:$0xff]  ;;  %v29899_v18 = vand.u32 4294901760, %v25640_v35  ;;  %v25693_v10 = vld [vmem:[%s29206_s6 + $0x1f0] sm:$0xff] }
 0x1ff   : > { %21345 = vmatpush3.bf16.msra.mxu0 %v25488_v45  ;;  %21385 = vmatpush3.bf16.msra.mxu1 %v29876_v6  ;;  %29889 = vst [vmem:[#allocation99_spill] sm:$0xff] %v25645_v7  ;;  %v29898_v44 = vld [vmem:[#allocation56_spill] sm:$0xff]  ;;  %29901 = vst [vmem:[#allocation104_spill] sm:$0xff] %v25693_v10 }
 0x200   : > { %6549 = vmatprep.mubr.f32.mxu0 %v6172_v12  ;;  %21347 = vmatprep.subr.bf16.mxu0 %v25493_v59  ;;  %29882 = vst [vmem:[#allocation46_spill] sm:$0xff] %v25627_v38  ;;  %29886 = vst [vmem:[#allocation43_spill] sm:$0xff] %v25633_v4  ;;  %v29890_v12 = vld [vmem:[#allocation36_spill] sm:$0xff]  ;;  %v29900_v38 = vand.u32 4294901760, %v25645_v7  ;;  %v25698_v4 = vld [vmem:[%s29206_s6 + $0x1f8] sm:$0xff] }
 0x201   : > { %21387 = vmatprep.subr.bf16.mxu1 %v29883_v51  ;;  %29894 = vst [vmem:[#allocation53_spill] sm:$0xff] %v25662_v57  ;;  %v25683_v57 = vsub.f32 %v25640_v35, %v29899_v18  ;;  %29902 = vst [vmem:[#allocation105_spill] sm:$0xff] %v25698_v4  ;;  %v25722_v18 = vsub.f32 %v25659_v26, %v29906_v5  ;;  %v29907_v5 = vand.u32 4294901760, %v25669_v37  ;;  %v30011_v26 = vld [vmem:[#allocation60_spill] sm:$0xff] }
 0x202   : > { %v25688_v58 = vsub.f32 %v25645_v7, %v29900_v38  ;;  %v25707_v38 = vld [vmem:[%s29206_s6 + $0x170] sm:$0xff] }
 0x203   : > { %21349 = vmatpush3.bf16.msra.mxu0 %v25497_v20  ;;  %21389 = vmatpush3.bf16.msra.mxu1 %v29884_v43  ;;  %29903 = vst [vmem:[#allocation106_spill] sm:$0xff] %v25707_v38  ;;  %v25737_v32 = vsub.f32 %v25669_v37, %v29907_v5  ;;  %v25758_v5 = vld [vmem:[%s29206_s6 + $0x188] sm:$0xff]  ;;  %v29911_v20 = vand.u32 4294901760, %v25698_v4  ;;  %v29912_v45 = vand.u32 4294901760, %v25707_v38 }
 0x204   : > { %21351 = vmatprep.subr.bf16.mxu0 %v25501_v13  ;;  %21391 = vmatprep.subr.bf16.mxu1 %v29887_v55 }
 0x205   : > { %v25780_v59 = vsub.f32 %v25698_v4, %v29911_v20  ;;  %v29917_v20 = vand.u32 4294901760, %v25586_v25 }
 0x207   : > { %21353 = vmatpush3.bf16.msra.mxu0 %v25505_v19  ;;  %21393 = vmatpush3.bf16.msra.mxu1 %v29890_v12  ;;  %v25787_v19 = vsub.f32 %v25707_v38, %v29912_v45  ;;  %v29915_v45 = vand.u32 4294901760, %v25722_v18 }
 0x208   : > { %21355 = vmatprep.subr.bf16.mxu0 %v25509_v48  ;;  %21395 = vmatprep.subr.bf16.mxu1 %v29895_v46 }
 0x20b   : > { %21357 = vmatpush3.bf16.msra.mxu0 %v25513_v50  ;;  %21397 = vmatpush3.bf16.msra.mxu1 %v29898_v44  ;;  %v29385_v50 = vand.u32 4294901760, %v25688_v58 }
 0x20c   : > { %21359 = vmatprep.subr.bf16.mxu0 %v25523_v21  ;;  %21399 = vmatprep.subr.bf16.mxu1 %v25451_v11  ;;  %v29386_v21 = vand.u32 4294901760, %v25683_v57 }
 0x20e   : > { %v25753_v48 = vpack.c.bf16 %v29385_v50, %v29386_v21  ;;  %v29910_v21 = vand.u32 4294901760, %v25693_v10  ;;  %v29913_v50 = vand.u32 4294901760, %v25712_v22 }
 0x20f   : > { %21361 = vmatpush3.bf16.msra.mxu0 %v25529_v30  ;;  %21401 = vmatpush3.bf16.msra.mxu1 %v25453_v1  ;;  %v25742_v30 = vsub.f32 %v25674_v29, %v29908_v16  ;;  %v25763_v16 = vld [vmem:[%s29206_s6 + $0x100] sm:$0xff] }
 0x210   : > { %21363 = vmatprep.subr.bf16.mxu0 %v25533_v52  ;;  %21403 = vmatprep.subr.bf16.mxu1 %v25455_v40  ;;  %29909 = vst [vmem:[#allocation108_spill] sm:$0xff] %v25753_v48  ;;  %v25768_v52 = vld [vmem:[%s29206_s6 + $0x108] sm:$0xff]  ;;  %v25775_v13 = vsub.f32 %v25693_v10, %v29910_v21  ;;  %v25792_v0 = vsub.f32 %v25712_v22, %v29913_v50  ;;  %v29914_v48 = vand.u32 4294901760, %v25717_v14  ;;  %v25811_v21 = vld [vmem:[%s29206_s6 + $0x190] sm:$0xff]  ;;  %v29918_v50 = vand.u32 4294901760, %v25737_v32 }
 0x211   : > { %v29978_v10 = vld [vmem:[#allocation33_spill] sm:$0xff] }
 0x212   : > { %v25803_v41 = vpack.c.bf16 %v29915_v45, %v29914_v48  ;;  %v29929_v45 = vand.u32 4294901760, %v25758_v5 }
 0x213   : > { %21365 = vmatpush3.bf16.msra.mxu0 %v25537_v9  ;;  %21405 = vmatpush3.bf16.msra.mxu1 %v25464_v36  ;;  %v25816_v9 = vld [vmem:[%s29206_s6 + $0x198] sm:$0xff] }
 0x214   : > { %21367 = vmatprep.subr.bf16.mxu0 %v25541_v8  ;;  %21439 = vmatprep.subr.bf16.mxu1 %v25059_v56  ;;  %29916 = vst [vmem:[#allocation109_spill] sm:$0xff] %v25803_v41  ;;  %v29919_v8 = vand.u32 4294901760, %v25742_v30  ;;  %v29921_v56 = vand.u32 4294901760, %v25061_v47  ;;  %v29922_v41 = vand.u32 4294901760, %v25063_v23  ;;  %v29927_v23 = vand.u32 4294901760, %v25780_v59 }
 0x215   : > { %v29933_v47 = vand.u32 4294901760, %v25768_v52 }
 0x216   : > { %6660 = vmatmul.mubr.f32.vlgmr.msra.gmra.mrb[12].mxu1 %v29917_v20  ;;  %v25826_v38 = vpack.c.bf16 %v29919_v8, %v29918_v50  ;;  %v25834_v22 = vpack.c.bf16 %v29922_v41, %v29921_v56  ;;  %v29924_v8 = vand.u32 4294901760, %v25747_v33  ;;  %v29926_v56 = vand.u32 4294901760, %v25775_v13 }
 0x217   : > { %21369 = vmatpush3.bf16.msra.mxu0 %v25545_v27  ;;  %21441 = vmatpush3.bf16.msra.mxu1 %v29864_v2  ;;  %v25857_v20 = vsub.f32 %v25758_v5, %v29929_v45  ;;  %v25867_v48 = vsub.f32 %v25768_v52, %v29933_v47  ;;  %v29936_v45 = vand.u32 4294901760, %v25792_v0  ;;  %v29939_v47 = vand.u32 4294901760, %v25075_v42 }
 0x218   : > { %29920 = vst [vmem:[#allocation110_spill] sm:$0xff] %v25826_v38  ;;  %29923 = vst [vmem:[#allocation111_spill] sm:$0xff] %v25834_v22  ;;  %6930 = vmatprep.mubr.f32.mxu1 %v25583_v3  ;;  %21371 = vmatprep.subr.bf16.mxu0 %v25549_v28  ;;  %v25843_v50 = vsub.f32 %v25747_v33, %v29924_v8  ;;  %v25851_v41 = vpack.c.bf16 %v29927_v23, %v29926_v56  ;;  %v29931_v8 = vand.u32 4294901760, %v25763_v16  ;;  %v25872_v56 = vld [vmem:[%s29206_s6 + $0x110] sm:$0xff]  ;;  %v29966_v38 = vld [vmem:[#allocation23_spill] sm:$0xff] }
 0x219   : > { %21443 = vmatprep.subr.bf16.mxu1 %v29865_v60  ;;  %29930 = vst [vmem:[#allocation114_spill] sm:$0xff] %v25857_v20  ;;  %29934 = vst [vmem:[#allocation116_spill] sm:$0xff] %v25867_v48  ;;  %v29935_v23 = vand.u32 4294901760, %v25787_v19  ;;  %v29941_v2 = vand.u32 4294901760, %v25079_v34  ;;  %v25923_v34 = vld [vmem:[%s29206_s6 + $0x118] sm:$0xff] }
 0x21a   : > { %29925 = vst [vmem:[#allocation112_spill] sm:$0xff] %v25843_v50  ;;  %29928 = vst [vmem:[#allocation113_spill] sm:$0xff] %v25851_v41  ;;  %v25862_v28 = vsub.f32 %v25763_v16, %v29931_v8  ;;  %v29938_v8 = vand.u32 4294901760, %v25065_v39  ;;  %v29942_v41 = vand.u32 4294901760, %v25084_v61  ;;  %v29946_v39 = vand.u32 4294901760, %v25816_v9 }
 0x21b   : > { %v25878_v27 = vpack.c.bf16 %v29936_v45, %v29935_v23  ;;  %21373 = vmatpush3.bf16.msra.mxu0 %v25553_v54  ;;  %21445 = vmatpush3.bf16.msra.mxu1 %v29866_v17  ;;  %v29944_v45 = vand.u32 4294901760, %v25811_v21  ;;  %v29963_v17 = vld [vmem:[#allocation21_spill] sm:$0xff] }
 0x21c   : > { %29932 = vst [vmem:[#allocation115_spill] sm:$0xff] %v25862_v28  ;;  %v25886_v60 = vpack.c.bf16 %v29939_v47, %v29938_v8  ;;  %21407 = vmatprep.subr.bf16.mxu0 %v25834_v22  ;;  %21447 = vmatprep.subr.bf16.mxu1 %v29871_v62  ;;  %v25894_v23 = vpack.c.bf16 %v29942_v41, %v29941_v2  ;;  %v29422_v8 = vand.u32 4294901760, %v25872_v56  ;;  %v29948_v41 = vand.u32 4294901760, %v25109_v15  ;;  %v25928_v2 = vld [vmem:[%s29206_s6 + $0x1a0] sm:$0xff]  ;;  %v29951_v15 = vld [vmem:[#allocation17_spill] sm:$0xff] }
 0x21d   : > { %29937 = vst [vmem:[#allocation117_spill] sm:$0xff] %v25878_v27  ;;  %v25899_v54 = vsub.f32 %v25811_v21, %v29944_v45  ;;  %v25904_v42 = vsub.f32 %v25816_v9, %v29946_v39  ;;  %v29949_v45 = vand.u32 4294901760, %v25124_v31  ;;  %v29952_v31 = vand.u32 4294901760, %v29951_v15 }
 0x21e   : > { %29940 = vst [vmem:[#allocation118_spill] sm:$0xff] %v25886_v60  ;;  %29943 = vst [vmem:[#allocation119_spill] sm:$0xff] %v25894_v23  ;;  %6552 = vmatmul.mubr.f32.vlgmr.msra.gmra.mrb[12].mxu0 %v25586_v25  ;;  %v29953_v25 = vld [vmem:[#allocation18_spill] sm:$0xff]  ;;  %v29957_v22 = vand.u32 4294901760, %v25843_v50  ;;  %v29958_v15 = vand.u32 4294901760, %v25857_v20  ;;  %v29960_v47 = vand.u32 4294901760, %v25867_v48 }
 0x21f   : > { %29945 = vst [vmem:[#allocation120_spill] sm:$0xff] %v25899_v54  ;;  %29947 = vst [vmem:[#allocation121_spill] sm:$0xff] %v25904_v42  ;;  %21409 = vmatpush3.bf16.msra.mxu0 %v25886_v60  ;;  %6826 = vmatprep.mubr.f32.mxu0 %v25583_v3  ;;  %v25918_v39 = vpack.c.bf16 %v29949_v45, %v29948_v41  ;;  %v25933_v3 = vld [vmem:[%s29206_s6 + $0x1a8] sm:$0xff]  ;;  %v29954_v41 = vand.u32 4294901760, %v29953_v25  ;;  %v25948_v60 = vsub.f32 %v25872_v56, %v29422_v8 }
 0x220   : > { %21449 = vmatpush3.bf16.msra.mxu1 %v29876_v6  ;;  %21411 = vmatprep.subr.bf16.mxu0 %v25894_v23  ;;  %v7165_v23 = vsub.f32 %v25843_v50, %v29957_v22  ;;  %v29959_v25 = vand.u32 4294901760, %v25862_v28  ;;  %v7060_v61 = vsub.f32 %v25867_v48, %v29960_v47  ;;  %v29961_v22 = vld [vmem:[#allocation19_spill] sm:$0xff]  ;;  %v29973_v48 = vld [vmem:[#allocation29_spill] sm:$0xff]  ;;  %v29976_v6 = vld [vmem:[#allocation30_spill] sm:$0xff] }
 0x221   : > { %29950 = vst [vmem:[#allocation122_spill] sm:$0xff] %v25918_v39  ;;  %v25941_v45 = vpack.c.bf16 %v29954_v41, %v29952_v31  ;;  %29956 = vst [vmem:[#allocation18_spill] sm:$0xff] %v25948_v60  ;;  %21451 = vmatprep.subr.bf16.mxu1 %v29883_v51  ;;  %v7172_v31 = vsub.f32 %v25857_v20, %v29958_v15  ;;  %v29962_v62 = vand.u32 4294901760, %v29961_v22  ;;  %v29964_v15 = vand.u32 4294901760, %v29963_v17  ;;  %v29971_v47 = vld [vmem:[#allocation27_spill] sm:$0xff] }
 0x222   : > { %v7053_v41 = vsub.f32 %v25862_v28, %v29959_v25  ;;  %v29967_v25 = vand.u32 4294901760, %v29966_v38  ;;  %v29968_v28 = vld [vmem:[#allocation25_spill] sm:$0xff]  ;;  %v29972_v8 = vand.u32 4294901760, %v29971_v47  ;;  %v29974_v51 = vand.u32 4294901760, %v29973_v48  ;;  %v25994_v17 = vld [vmem:[%s29206_s6 + $0x120] sm:$0xff] }
 0x223   : > { %29955 = vst [vmem:[#allocation17_spill] sm:$0xff] %v25941_v45  ;;  %21413 = vmatpush3.bf16.msra.mxu0 %v25918_v39  ;;  %v25971_v27 = vpack.c.bf16 %v29964_v15, %v29962_v62  ;;  %v29969_v20 = vand.u32 4294901760, %v29968_v28  ;;  %v29977_v39 = vand.u32 4294901760, %v29976_v6  ;;  %v29979_v22 = vand.u32 4294901760, %v29978_v10  ;;  %v29981_v28 = vld [vmem:[#allocation35_spill] sm:$0xff]  ;;  %v29983_v38 = vld [vmem:[#allocation37_spill] sm:$0xff] }
 0x224   : > { %v25983_v4 = vpack.c.bf16 %v29974_v51, %v29972_v8  ;;  %21453 = vmatpush3.bf16.msra.mxu1 %v29884_v43  ;;  %21415 = vmatprep.subr.bf16.mxu0 %v25941_v45  ;;  %v29982_v62 = vand.u32 4294901760, %v29981_v28  ;;  %v29984_v51 = vand.u32 4294901760, %v29983_v38  ;;  %v29986_v6 = vand.u32 4294901760, %v25899_v54  ;;  %v26014_v15 = vld [vmem:[%s29206_s6 + $0x128] sm:$0xff]  ;;  %v29999_v43 = vld [vmem:[#allocation55_spill] sm:$0xff] }
 0x225   : > { %29965 = vst [vmem:[#allocation19_spill] sm:$0xff] %v25971_v27  ;;  %v25977_v50 = vpack.c.bf16 %v29969_v20, %v29967_v25  ;;  %v25989_v29 = vpack.c.bf16 %v29979_v22, %v29977_v39  ;;  %v29987_v20 = vand.u32 4294901760, %v25904_v42  ;;  %v26019_v25 = vld [vmem:[%s29206_s6 + $0x1b0] sm:$0xff]  ;;  %21455 = vmatprep.subr.bf16.mxu1 %v29887_v55  ;;  %v7166_v47 = vand.u32 4294901760, %v7165_v23 }
 0x226   : > { %29975 = vst [vmem:[#allocation23_spill] sm:$0xff] %v25983_v4  ;;  %v26002_v48 = vpack.c.bf16 %v29984_v51, %v29982_v62  ;;  %v7179_v10 = vsub.f32 %v25899_v54, %v29986_v6  ;;  %v7173_v22 = vand.u32 4294901760, %v7172_v31  ;;  %v7054_v28 = vand.u32 4294901760, %v7053_v41  ;;  %v29994_v31 = vld [vmem:[#allocation38_spill] sm:$0xff]  ;;  %v30001_v54 = vld [vmem:[#allocation57_spill] sm:$0xff] }
 0x227   : > { %29970 = vst [vmem:[#allocation21_spill] sm:$0xff] %v25977_v50  ;;  %29980 = vst [vmem:[#allocation25_spill] sm:$0xff] %v25989_v29  ;;  %v7186_v8 = vsub.f32 %v25904_v42, %v29987_v20  ;;  %v7061_v62 = vand.u32 4294901760, %v7060_v61  ;;  %v29988_v38 = vand.u32 4294901760, %v25923_v34  ;;  %v29990_v6 = vand.u32 4294901760, %v25928_v2  ;;  %v26041_v61 = vld [vmem:[%s29206_s6 + $0x1b8] sm:$0xff]  ;;  %21417 = vmatpush3.bf16.msra.mxu0 %v25971_v27 }
 0x228   : > { %29985 = vst [vmem:[#allocation27_spill] sm:$0xff] %v26002_v48  ;;  %v29992_v39 = vand.u32 4294901760, %v25933_v3  ;;  %v29995_v41 = vand.u32 4294901760, %v29994_v31  ;;  %v30000_v42 = vand.u32 4294901760, %v29999_v43  ;;  %21457 = vmatpush3.bf16.msra.mxu1 %v29890_v12  ;;  %21419 = vmatprep.subr.bf16.mxu0 %v25977_v50  ;;  %v30004_v27 = vld [vmem:[#allocation58_spill] sm:$0xff]  ;;  %v30012_v23 = vand.u32 4294901760, %v30011_v26 }
 0x229   : > { %v26025_v51 = vsub.f32 %v25923_v34, %v29988_v38  ;;  %v26030_v20 = vsub.f32 %v25928_v2, %v29990_v6  ;;  %v29996_v38 = vld [vmem:[#allocation41_spill] sm:$0xff]  ;;  %v30005_v31 = vand.u32 4294901760, %v30004_v27  ;;  %v7187_v43 = vand.u32 4294901760, %v7186_v8  ;;  %21459 = vmatprep.subr.bf16.mxu1 %v29895_v46  ;;  %v30013_v50 = vld [vmem:[#allocation62_spill] sm:$0xff] }
 0x22a   : > { %v26035_v45 = vsub.f32 %v25933_v3, %v29992_v39  ;;  %v29997_v55 = vand.u32 4294901760, %v29996_v38  ;;  %v30002_v39 = vand.u32 4294901760, %v30001_v54  ;;  %v30007_v38 = vand.u32 4294901760, %v30006_v49  ;;  %v26086_v8 = vld [vmem:[%s29206_s6 + $0x130] sm:$0xff] }
 0x22b   : > { %29989 = vst [vmem:[#allocation29_spill] sm:$0xff] %v26025_v51  ;;  %29991 = vst [vmem:[#allocation30_spill] sm:$0xff] %v26030_v20  ;;  %v30009_v54 = vand.u32 4294901760, %v25948_v60  ;;  %v30014_v12 = vand.u32 4294901760, %v30013_v50  ;;  %v26080_v49 = vpack.c.bf16 %v7061_v62, %v7054_v28  ;;  %v26104_v62 = vld [vmem:[%s29206_s6 + $0x1c0] sm:$0xff]  ;;  %21421 = vmatpush3.bf16.msra.mxu0 %v25983_v4  ;;  %v30021_v50 = vld [vmem:[#allocation66_spill] sm:$0xff] }
 0x22c   : > { %29993 = vst [vmem:[#allocation33_spill] sm:$0xff] %v26035_v45  ;;  %v26048_v6 = vpack.c.bf16 %v29997_v55, %v29995_v41  ;;  %v26054_v37 = vpack.c.bf16 %v30002_v39, %v30000_v42  ;;  %v26064_v55 = vpack.c.bf16 %v30007_v38, %v30005_v31  ;;  %v7180_v41 = vand.u32 4294901760, %v7179_v10  ;;  %21461 = vmatpush3.bf16.msra.mxu1 %v29898_v44 }
 0x22d   : > { %v26069_v42 = vsub.f32 %v25948_v60, %v30009_v54  ;;  %v26072_v39 = vpack.c.bf16 %v7173_v22, %v7166_v47  ;;  %v26078_v27 = vpack.c.bf16 %v30014_v12, %v30012_v23  ;;  %v26091_v47 = vld [vmem:[%s29206_s6 + $0x138] sm:$0xff]  ;;  %v30015_v22 = vand.u32 4294901760, %v25994_v17  ;;  %v26109_v23 = vld [vmem:[%s29206_s6 + $0x1c8] sm:$0xff]  ;;  %21423 = vmatprep.subr.bf16.mxu0 %v25989_v29  ;;  %21463 = vmatprep.subr.bf16.mxu1 %v25451_v11 }
 0x22e   : > { %29998 = vst [vmem:[#allocation35_spill] sm:$0xff] %v26048_v6  ;;  %30003 = vst [vmem:[#allocation37_spill] sm:$0xff] %v26054_v37  ;;  %v30017_v31 = vand.u32 4294901760, %v25747_v33  ;;  %v30018_v38 = vand.u32 4294901760, %v25758_v5  ;;  %v30022_v26 = vand.u32 4294901760, %v30021_v50  ;;  %v30023_v46 = vand.u32 4294901760, %v26014_v15 }
 0x22f   : > { %30008 = vst [vmem:[#allocation38_spill] sm:$0xff] %v26064_v55  ;;  %30010 = vst [vmem:[#allocation41_spill] sm:$0xff] %v26072_v39  ;;  %v26099_v28 = vsub.f32 %v25994_v17, %v30015_v22  ;;  %v30019_v22 = vld [vmem:[#allocation63_spill] sm:$0xff]  ;;  %v30025_v7 = vand.u32 4294901760, %v26019_v25  ;;  %v26136_v33 = vpack.c.bf16 %v7187_v43, %v7180_v41  ;;  %v7068_v5 = vand.u32 4294901760, %v26069_v42  ;;  %21425 = vmatpush3.bf16.msra.mxu0 %v26002_v48 }
 0x230   : > { %v26116_v54 = vpack.c.bf16 %v30018_v38, %v30017_v31  ;;  %v30020_v12 = vand.u32 4294901760, %v30019_v22  ;;  %v26127_v60 = vsub.f32 %v26014_v15, %v30023_v46  ;;  %v26144_v46 = vld [vmem:[%s29206_s6 + $0x140] sm:$0xff]  ;;  %v26153_v41 = vand.u32 4294901760, %v25578_v53  ;;  %v26165_v38 = vld [vmem:[%s29206_s6 + $0x1d0] sm:$0xff]  ;;  %v26170_v22 = vld [vmem:[%s29206_s6 + $0x1d8] sm:$0xff]  ;;  %21465 = vmatpush3.bf16.msra.mxu1 %v25453_v1  ;;  %21427 = vmatprep.subr.bf16.mxu0 %v26048_v6 }
 0x231   : > { %30016 = vst [vmem:[#allocation55_spill] sm:$0xff] %v26099_v28  ;;  %v26132_v4 = vsub.f32 %v26019_v25, %v30025_v7  ;;  %30027 = vst [vmem:[#allocation59_spill] sm:$0xff] %v26136_v33  ;;  %v26149_v7 = vld [vmem:[%s29206_s6 + $0x148] sm:$0xff]  ;;  %v30029_v43 = vand.u32 4294901760, %v26041_v61  ;;  %v30032_v50 = vand.u32 4294901760, %v26025_v51  ;;  %v30034_v31 = vand.u32 4294901760, %v26035_v45  ;;  %21467 = vmatprep.subr.bf16.mxu1 %v25455_v40 }
 0x232   : > { %v26122_v10 = vpack.c.bf16 %v30022_v26, %v30020_v12  ;;  %30024 = vst [vmem:[#allocation57_spill] sm:$0xff] %v26127_v60  ;;  %30028 = vst [vmem:[#allocation60_spill] sm:$0xff] %v26149_v7  ;;  %v30036_v11 = vand.u32 4294901760, %v26091_v47  ;;  %v30039_v40 = vand.u32 4294901760, %v26099_v28  ;;  %v30040_v44 = vand.u32 4294901760, %v26127_v60 }
 0x233   : > { %30026 = vst [vmem:[#allocation58_spill] sm:$0xff] %v26132_v4  ;;  %v26158_v42 = vsub.f32 %v26041_v61, %v30029_v43  ;;  %30030 = vst [vmem:[#allocation62_spill] sm:$0xff] %v26165_v38  ;;  %v7074_v26 = vsub.f32 %v26025_v51, %v30032_v50  ;;  %v30033_v43 = vand.u32 4294901760, %v26030_v20  ;;  %v7200_v29 = vsub.f32 %v26035_v45, %v30034_v31 }
 0x234   : > { %30031 = vst [vmem:[#allocation63_spill] sm:$0xff] %v26170_v22  ;;  %v26197_v48 = vsub.f32 %v26091_v47, %v30036_v11  ;;  %v26204_v50 = vsub.f32 %v25578_v53, %v26153_v41  ;;  %v30038_v11 = vand.u32 4294901760, %v26109_v23  ;;  %v7081_v53 = vsub.f32 %v26099_v28, %v30039_v40  ;;  %21429 = vmatpush3.bf16.msra.mxu0 %v26054_v37  ;;  %v30049_v28 = vld [vmem:[#allocation69_spill] sm:$0xff] }
 0x235   : > { %v7193_v12 = vsub.f32 %v26030_v20, %v30033_v43  ;;  %v30035_v43 = vand.u32 4294901760, %v26086_v8  ;;  %v7075_v35 = vand.u32 4294901760, %v7074_v26  ;;  %v7201_v45 = vand.u32 4294901760, %v7200_v29  ;;  %21469 = vmatpush3.bf16.msra.mxu1 %v25464_v36  ;;  %21431 = vmatprep.subr.bf16.mxu0 %v26064_v55 }
 0x236   : > { %v26215_v1 = vsub.f32 %v26109_v23, %v30038_v11  ;;  %v7088_v20 = vsub.f32 %v26127_v60, %v30040_v44  ;;  %v30042_v11 = vand.u32 4294901760, %v26144_v46  ;;  %v30043_v29 = vand.u32 4294901760, %v26149_v7  ;;  %21503 = vmatprep.subr.bf16.mxu1 %v26072_v39  ;;  %v30047_v60 = vld [vmem:[#allocation67_spill] sm:$0xff] }
 0x237   : > { %v26192_v31 = vsub.f32 %v26086_v8, %v30035_v43  ;;  %v30037_v43 = vand.u32 4294901760, %v26104_v62  ;;  %v7194_v63 = vand.u32 4294901760, %v7193_v12  ;;  %v30046_v55 = vand.u32 4294901760, %v26158_v42 }
 0x238   : > { %v26230_v26 = vsub.f32 %v26144_v46, %v30042_v11  ;;  %v26235_v12 = vsub.f32 %v26149_v7, %v30043_v29  ;;  %v30045_v11 = vand.u32 4294901760, %v26170_v22  ;;  %v7082_v39 = vand.u32 4294901760, %v7081_v53  ;;  %6932 = vmatmul.mubr.f32.vlgmr.msra.gmra.mrb[14].mxu1 %v25572_v24  ;;  %21433 = vmatpush3.bf16.msra.mxu0 %v26078_v27 }
 0x239   : > { %v26210_v6 = vsub.f32 %v26104_v62, %v30037_v43  ;;  %v30041_v43 = vand.u32 4294901760, %v26132_v4  ;;  %v7214_v40 = vsub.f32 %v26158_v42, %v30046_v55  ;;  %v7089_v55 = vand.u32 4294901760, %v7088_v20  ;;  %21505 = vmatpush3.bf16.msra.mxu1 %v26080_v49  ;;  %7274 = vmatprep.mubr.f32.mxu1 %v26153_v41 }
 0x23a   : > { %21435 = vmatprep.subr.bf16.mxu0 %v26122_v10  ;;  %21507 = vmatprep.subr.bf16.mxu1 %v26136_v33  ;;  %v30056_v20 = vand.u32 4294901760, %v26204_v50  ;;  %v30061_v44 = vand.u32 4294901760, %v25811_v21  ;;  %v30062_v33 = vand.u32 4294901760, %v25816_v9 }
 0x23b   : > { %v7207_v51 = vsub.f32 %v26132_v4, %v30041_v43  ;;  %v30044_v43 = vand.u32 4294901760, %v26165_v38  ;;  %v26249_v4 = vsub.f32 %v26170_v22, %v30045_v11  ;;  %v26264_v11 = vpack.c.bf16 %v7075_v35, %v7068_v5 }
 0x23c   : > { %v26266_v22 = vpack.c.bf16 %v7201_v45, %v7194_v63  ;;  %v30055_v35 = vand.u32 4294901760, %v26197_v48  ;;  %v7036_v5 = vsub.f32 %v26204_v50, %v30056_v20  ;;  %v30057_v53 = vand.u32 4294901760, %v26210_v6 }
 0x23d   : > { %v26244_v37 = vsub.f32 %v26165_v38, %v30044_v43  ;;  %v30048_v43 = vand.u32 4294901760, %v30047_v60  ;;  %v30050_v38 = vand.u32 4294901760, %v30049_v28  ;;  %30052 = vst [vmem:[#allocation67_spill] sm:$0xff] %v26264_v11  ;;  %v7208_v29 = vand.u32 4294901760, %v7207_v51  ;;  %21509 = vmatpush3.bf16.msra.mxu1 %v26264_v11 }
 0x23e   : > { %30053 = vst [vmem:[#allocation69_spill] sm:$0xff] %v26266_v22  ;;  %v30054_v60 = vand.u32 4294901760, %v26192_v31  ;;  %v7102_v45 = vsub.f32 %v26197_v48, %v30055_v35  ;;  %v30059_v28 = vand.u32 4294901760, %v25763_v16  ;;  %v30060_v51 = vand.u32 4294901760, %v25768_v52  ;;  %21511 = vmatprep.subr.bf16.mxu1 %v26266_v22 }
 0x23f   : > { %v26262_v7 = vpack.c.bf16 %v30050_v38, %v30048_v43  ;;  %v7215_v38 = vand.u32 4294901760, %v7214_v40  ;;  %v7221_v43 = vsub.f32 %v26210_v6, %v30057_v53  ;;  %v26303_v20 = vpack.c.bf16 %v30062_v33, %v30061_v44 }
 0x240   : > { %v7095_v63 = vsub.f32 %v26192_v31, %v30054_v60  ;;  %v30058_v60 = vand.u32 4294901760, %v26215_v1  ;;  %v26297_v36 = vpack.c.bf16 %v30060_v51, %v30059_v28  ;;  %v26306_v40 = vpack.c.bf16 %v7089_v55, %v7082_v39 }
 0x241   : > { %30051 = vst [vmem:[#allocation66_spill] sm:$0xff] %v26262_v7  ;;  %21437 = vmatpush3.bf16.msra.mxu0 %v26262_v7  ;;  %v30064_v53 = vand.u32 4294901760, %v26230_v26  ;;  %v30065_v16 = vand.u32 4294901760, %v26235_v12  ;;  %v7103_v9 = vand.u32 4294901760, %v7102_v45  ;;  %v30066_v33 = vand.u32 4294901760, %v26244_v37 }
 0x242   : > { %v7228_v35 = vsub.f32 %v26215_v1, %v30058_v60  ;;  %30063 = vst [vmem:[#allocation123_spill] sm:$0xff] %v26306_v40  ;;  %21471 = vmatprep.subr.bf16.mxu0 %v26116_v54  ;;  %v7096_v21 = vand.u32 4294901760, %v7095_v63  ;;  %v30067_v39 = vand.u32 4294901760, %v26249_v4  ;;  %v7037_v28 = vand.u32 4294901760, %v7036_v5  ;;  %21513 = vmatpush3.bf16.msra.mxu1 %v26306_v40 }
 0x243   : > { %v7109_v60 = vsub.f32 %v26230_v26, %v30064_v53  ;;  %v7116_v52 = vsub.f32 %v26235_v12, %v30065_v16  ;;  %v7235_v44 = vsub.f32 %v26244_v37, %v30066_v33  ;;  %v26323_v51 = vpack.c.bf16 %v7215_v38, %v7208_v29 }
 0x244   : > { %v7242_v55 = vsub.f32 %v26249_v4, %v30067_v39  ;;  %v7222_v53 = vand.u32 4294901760, %v7221_v43  ;;  %v7229_v16 = vand.u32 4294901760, %v7228_v35  ;;  %v30069_v11 = vand.u32 4294901760, %v25872_v56  ;;  %6828 = vmatmul.mubr.f32.vlgmr.msra.gmra.mrb[14].mxu0 %v25572_v24 }
 0x245   : > { %30068 = vst [vmem:[#allocation124_spill] sm:$0xff] %v26323_v51  ;;  %v30070_v63 = vand.u32 4294901760, %v25923_v34  ;;  %21473 = vmatpush3.bf16.msra.mxu0 %v26297_v36  ;;  %7038 = vmatprep.mubr.f32.mxu0 %v7037_v28  ;;  %v7110_v33 = vand.u32 4294901760, %v7109_v60  ;;  %v7117_v39 = vand.u32 4294901760, %v7116_v52  ;;  %v30071_v22 = vand.u32 4294901760, %v25683_v57 }
 0x246   : > { %v30072_v5 = vand.u32 4294901760, %v25688_v58  ;;  %v30073_v56 = vand.u32 4294901760, %v25928_v2  ;;  %v30074_v34 = vand.u32 4294901760, %v25933_v3  ;;  %21475 = vmatprep.subr.bf16.mxu0 %v26303_v20  ;;  %v26347_v24 = vpack.c.bf16 %v7103_v9, %v7096_v21  ;;  %21515 = vmatprep.subr.bf16.mxu1 %v26323_v51 }
 0x247   : > { %v26329_v45 = vpack.c.bf16 %v30070_v63, %v30069_v11  ;;  %v7123_v29 = vsub.f32 %v25683_v57, %v30071_v22  ;;  %v7236_v43 = vand.u32 4294901760, %v7235_v44  ;;  %v7243_v35 = vand.u32 4294901760, %v7242_v55 }
 0x248   : > { %v7130_v38 = vsub.f32 %v25688_v58, %v30072_v5  ;;  %v26343_v11 = vpack.c.bf16 %v30074_v34, %v30073_v56  ;;  %30075 = vst [vmem:[#allocation125_spill] sm:$0xff] %v26347_v24  ;;  %v26350_v22 = vpack.c.bf16 %v7229_v16, %v7222_v53  ;;  %v30077_v60 = vand.u32 4294901760, %v25717_v14  ;;  %21517 = vmatpush3.bf16.msra.mxu1 %v26347_v24 }
 0x249   : > { %v30078_v3 = vand.u32 4294901760, %v25722_v18  ;;  %v30079_v28 = vand.u32 4294901760, %v25994_v17  ;;  %v30080_v63 = vand.u32 4294901760, %v26014_v15  ;;  %v30081_v9 = vand.u32 4294901760, %v26019_v25  ;;  %21477 = vmatpush3.bf16.msra.mxu0 %v26329_v45 }
 0x24a   : > { %30076 = vst [vmem:[#allocation126_spill] sm:$0xff] %v26350_v22  ;;  %v7249_v2 = vsub.f32 %v25717_v14, %v30077_v60  ;;  %v30082_v44 = vand.u32 4294901760, %v26041_v61  ;;  %v26371_v53 = vpack.c.bf16 %v7117_v39, %v7110_v33  ;;  %v7124_v16 = vand.u32 4294901760, %v7123_v29  ;;  %21479 = vmatprep.subr.bf16.mxu0 %v26343_v11  ;;  %21519 = vmatprep.subr.bf16.mxu1 %v26350_v22 }
 0x24b   : > { %v7256_v52 = vsub.f32 %v25722_v18, %v30078_v3  ;;  %v26362_v21 = vpack.c.bf16 %v30080_v63, %v30079_v28  ;;  %v7131_v5 = vand.u32 4294901760, %v7130_v38  ;;  %v26375_v17 = vpack.c.bf16 %v7243_v35, %v7236_v43 }
 0x24c   : > { %v26368_v55 = vpack.c.bf16 %v30082_v44, %v30081_v9  ;;  %30083 = vst [vmem:[#allocation127_spill] sm:$0xff] %v26371_v53  ;;  %v30085_v15 = vand.u32 4294901760, %v25737_v32  ;;  %v30086_v61 = vand.u32 4294901760, %v25742_v30  ;;  %v7250_v33 = vand.u32 4294901760, %v7249_v2  ;;  %21521 = vmatpush3.bf16.msra.mxu1 %v26371_v53 }
 0x24d   : > { %30084 = vst [vmem:[#allocation128_spill] sm:$0xff] %v26375_v17  ;;  %v7257_v39 = vand.u32 4294901760, %v7256_v52  ;;  %v30087_v29 = vand.u32 4294901760, %v25775_v13  ;;  %v30088_v34 = vand.u32 4294901760, %v25780_v59  ;;  %v30089_v35 = vand.u32 4294901760, %v26086_v8  ;;  %21481 = vmatpush3.bf16.msra.mxu0 %v26362_v21  ;;  %21523 = vmatprep.subr.bf16.mxu1 %v26375_v17 }
 0x24e   : > { %v7137_v25 = vsub.f32 %v25737_v32, %v30085_v15  ;;  %v7144_v56 = vsub.f32 %v25742_v30, %v30086_v61  ;;  %v30090_v60 = vand.u32 4294901760, %v26091_v47  ;;  %v30091_v28 = vand.u32 4294901760, %v26104_v62  ;;  %21483 = vmatprep.subr.bf16.mxu0 %v26368_v55 }
 0x24f   : > { %v7263_v38 = vsub.f32 %v25775_v13, %v30087_v29  ;;  %v7270_v43 = vsub.f32 %v25780_v59, %v30088_v34  ;;  %v30092_v63 = vand.u32 4294901760, %v26109_v23  ;;  %v26403_v52 = vpack.c.bf16 %v7131_v5, %v7124_v16  ;;  %v30098_v29 = vld [vmem:[#allocation60_spill] sm:$0xff] }
 0x250   : > { %v26394_v3 = vpack.c.bf16 %v30090_v60, %v30089_v35  ;;  %v7138_v9 = vand.u32 4294901760, %v7137_v25  ;;  %v7145_v8 = vand.u32 4294901760, %v7144_v56  ;;  %v30094_v47 = vand.u32 4294901760, %v25787_v19  ;;  %v30100_v56 = vld [vmem:[#allocation62_spill] sm:$0xff]  ;;  %v30102_v60 = vld [vmem:[#allocation63_spill] sm:$0xff] }
 0x251   : > { %v26400_v2 = vpack.c.bf16 %v30092_v63, %v30091_v28  ;;  %30093 = vst [vmem:[#allocation129_spill] sm:$0xff] %v26403_v52  ;;  %v30095_v62 = vand.u32 4294901760, %v25792_v0  ;;  %v26414_v15 = vpack.c.bf16 %v7257_v39, %v7250_v33  ;;  %v7264_v16 = vand.u32 4294901760, %v7263_v38  ;;  %21525 = vmatpush3.bf16.msra.mxu1 %v26403_v52  ;;  %v30105_v38 = vld [vmem:[#allocation96_spill] sm:$0xff] }
 0x252   : > { %v7151_v44 = vsub.f32 %v25787_v19, %v30094_v47  ;;  %v7271_v5 = vand.u32 4294901760, %v7270_v43  ;;  %v30097_v61 = vand.u32 4294901760, %v26144_v46  ;;  %v30099_v34 = vand.u32 4294901760, %v30098_v29  ;;  %21485 = vmatpush3.bf16.msra.mxu0 %v26394_v3  ;;  %v30109_v29 = vld [vmem:[#allocation99_spill] sm:$0xff] }
 0x253   : > { %v7158_v23 = vsub.f32 %v25792_v0, %v30095_v62  ;;  %30096 = vst [vmem:[#allocation130_spill] sm:$0xff] %v26414_v15  ;;  %v30101_v35 = vand.u32 4294901760, %v30100_v56  ;;  %v30103_v28 = vand.u32 4294901760, %v30102_v60  ;;  %21487 = vmatprep.subr.bf16.mxu0 %v26400_v2  ;;  %v26431_v33 = vpack.c.bf16 %v7145_v8, %v7138_v9  ;;  %21527 = vmatprep.subr.bf16.mxu1 %v26414_v15  ;;  %v30107_v62 = vld [vmem:[#allocation98_spill] sm:$0xff]  ;;  %v30113_v8 = vld [vmem:[#allocation101_spill] sm:$0xff] }
 0x254   : > { %v26420_v25 = vpack.c.bf16 %v30099_v34, %v30097_v61  ;;  %v7152_v39 = vand.u32 4294901760, %v7151_v44  ;;  %v26434_v43 = vand.u32 4294901760, %v30105_v38  ;;  %v26437_v47 = vpack.c.bf16 %v7271_v5, %v7264_v16  ;;  %v30116_v60 = vld [vmem:[#allocation102_spill] sm:$0xff]  ;;  %v30139_v15 = vld [vmem:[#allocation29_spill] sm:$0xff] }
 0x255   : > { %v26426_v63 = vpack.c.bf16 %v30103_v28, %v30101_v35  ;;  %30104 = vst [vmem:[#allocation60_spill] sm:$0xff] %v26431_v33  ;;  %v7159_v46 = vand.u32 4294901760, %v7158_v23  ;;  %v30108_v61 = vand.u32 4294901760, %v30107_v62  ;;  %v30110_v34 = vand.u32 4294901760, %v30109_v29  ;;  %v30111_v35 = vld [vmem:[#allocation100_spill] sm:$0xff]  ;;  %21529 = vmatpush3.bf16.msra.mxu1 %v26431_v33  ;;  %v30118_v62 = vld [vmem:[#allocation103_spill] sm:$0xff] }
 0x256   : > { %30106 = vst [vmem:[#allocation62_spill] sm:$0xff] %v26437_v47  ;;  %21489 = vmatpush3.bf16.msra.mxu0 %v26420_v25  ;;  %v30112_v9 = vand.u32 4294901760, %v30111_v35  ;;  %v30114_v44 = vand.u32 4294901760, %v30113_v8  ;;  %v26458_v5 = vsub.f32 %v30105_v38, %v26434_v43  ;;  %21531 = vmatprep.subr.bf16.mxu1 %v26437_v47  ;;  %v30117_v28 = vand.u32 4294901760, %v30116_v60  ;;  %v30122_v38 = vld [vmem:[#allocation105_spill] sm:$0xff]  ;;  %v30124_v8 = vld [vmem:[#allocation106_spill] sm:$0xff] }
 0x257   : > { %v26443_v56 = vpack.c.bf16 %v30110_v34, %v30108_v61  ;;  %21491 = vmatprep.subr.bf16.mxu0 %v26426_v63  ;;  %v26454_v16 = vpack.c.bf16 %v7159_v46, %v7152_v39  ;;  %v30119_v61 = vand.u32 4294901760, %v30118_v62  ;;  %v30120_v46 = vld [vmem:[#allocation104_spill] sm:$0xff]  ;;  %v30123_v35 = vand.u32 4294901760, %v30122_v38  ;;  %v30126_v60 = vld [vmem:[#allocation107_spill] sm:$0xff]  ;;  %v30130_v38 = vld [vmem:[#allocation114_spill] sm:$0xff] }
 0x258   : > { %v26450_v23 = vpack.c.bf16 %v30114_v44, %v30112_v9  ;;  %v7041_v39 = vand.u32 4294901760, %v26458_v5  ;;  %v30121_v34 = vand.u32 4294901760, %v30120_v46  ;;  %v30125_v44 = vand.u32 4294901760, %v30124_v8  ;;  %v30132_v8 = vld [vmem:[#allocation115_spill] sm:$0xff]  ;;  %v30138_v33 = vld [vmem:[#allocation18_spill] sm:$0xff] }
 0x259   : > { %30115 = vst [vmem:[#allocation63_spill] sm:$0xff] %v26454_v16  ;;  %v26465_v29 = vpack.c.bf16 %v30119_v61, %v30117_v28  ;;  %21533 = vmatpush3.bf16.msra.mxu1 %v26454_v16  ;;  %v30127_v28 = vand.u32 4294901760, %v30126_v60  ;;  %v30128_v61 = vand.u32 4294901760, %v26204_v50  ;;  %v30136_v16 = vld [vmem:[#allocation121_spill] sm:$0xff]  ;;  %v26512_v52 = vpack.c.bf16 %v30139_v15, %v30138_v33 }
 0x25a   : > { %21493 = vmatpush3.bf16.msra.mxu0 %v26443_v56  ;;  %v26475_v9 = vpack.c.bf16 %v30123_v35, %v30121_v34  ;;  %21567 = vmatprep.subr.bf16.mxu1 %v26116_v54  ;;  %v7042_v46 = vsub.f32 %v26458_v5, %v7041_v39  ;;  %v30129_v34 = vld [vmem:[#allocation112_spill] sm:$0xff] }
 0x25b   : > { %21495 = vmatprep.subr.bf16.mxu0 %v26450_v23  ;;  %v26482_v62 = vpack.c.bf16 %v30127_v28, %v30125_v44  ;;  %v26492_v35 = vpack.c.bf16 %v30130_v38, %v30129_v34  ;;  %v30133_v44 = vld [vmem:[#allocation116_spill] sm:$0xff]  ;;  %30140 = vst [vmem:[#allocation100_spill] sm:$0xff] %v26512_v52 }
 0x25c   : > { %7276 = vmatmul.mubr.f32.vlgmr.msra.gmra.mrb[16].mxu1 %v26434_v43  ;;  %v26499_v60 = vpack.c.bf16 %v30133_v44, %v30132_v8  ;;  %v7043_v28 = vand.u32 4294901760, %v7042_v46  ;;  %v30141_v46 = vld [vmem:[#allocation30_spill] sm:$0xff] }
 0x25d   : > { %21569 = vmatpush3.bf16.msra.mxu1 %v26297_v36  ;;  %7518 = vmatprep.mubr.f32.mxu1 %v30128_v61  ;;  %30131 = vst [vmem:[#allocation96_spill] sm:$0xff] %v26492_v35  ;;  %v30135_v61 = vld [vmem:[#allocation120_spill] sm:$0xff] }
 0x25e   : > { %21497 = vmatpush3.bf16.msra.mxu0 %v26465_v29  ;;  %21571 = vmatprep.subr.bf16.mxu1 %v26303_v20  ;;  %30134 = vst [vmem:[#allocation98_spill] sm:$0xff] %v26499_v60  ;;  %v26505_v47 = vpack.c.bf16 %v30136_v16, %v30135_v61 }
 0x25f   : > { %21499 = vmatprep.subr.bf16.mxu0 %v26475_v9 }
 0x260   : > { %30137 = vst [vmem:[#allocation99_spill] sm:$0xff] %v26505_v47 }
 0x261   : > { %21573 = vmatpush3.bf16.msra.mxu1 %v26329_v45 }
 0x262   : > { %21501 = vmatpush3.bf16.msra.mxu0 %v26482_v62  ;;  %21575 = vmatprep.subr.bf16.mxu1 %v26343_v11 }
 0x263   : > { %21535 = vmatprep.subr.bf16.mxu0 %v26492_v35  ;;  %v30142_v35 = vld [vmem:[#allocation33_spill] sm:$0xff] }
 0x264   : > { %v26518_v17 = vpack.c.bf16 %v30142_v35, %v30141_v46 }
 0x265   : > { %7044 = vmatmul.mubr.f32.vlgmr.msra.gmra.mrb[16].mxu0 %v7043_v28  ;;  %21577 = vmatpush3.bf16.msra.mxu1 %v26362_v21  ;;  %v30144_v28 = vld [vmem:[#allocation55_spill] sm:$0xff] }
 0x266   : > { %21537 = vmatpush3.bf16.msra.mxu0 %v26499_v60  ;;  %7411 = vmatprep.mubr.f32.mxu0 %v26204_v50  ;;  %30143 = vst [vmem:[#allocation101_spill] sm:$0xff] %v26518_v17  ;;  %v30145_v60 = vld [vmem:[#allocation57_spill] sm:$0xff]  ;;  %v30147_v50 = vld [vmem:[#allocation58_spill] sm:$0xff] }
 0x267   : > { %21539 = vmatprep.subr.bf16.mxu0 %v26505_v47  ;;  %21579 = vmatprep.subr.bf16.mxu1 %v26368_v55  ;;  %v26524_v53 = vpack.c.bf16 %v30145_v60, %v30144_v28  ;;  %v26530_v22 = vpack.c.bf16 %v26158_v42, %v30147_v50  ;;  %v26536_v47 = vpack.c.bf16 %v26197_v48, %v26192_v31 }
 0x269   : > { %30146 = vst [vmem:[#allocation102_spill] sm:$0xff] %v26524_v53  ;;  %21581 = vmatpush3.bf16.msra.mxu1 %v26394_v3  ;;  %30148 = vst [vmem:[#allocation103_spill] sm:$0xff] %v26530_v22 }
 0x26a   : > { %21541 = vmatpush3.bf16.msra.mxu0 %v26512_v52  ;;  %21583 = vmatprep.subr.bf16.mxu1 %v26400_v2  ;;  %30149 = vst [vmem:[#allocation104_spill] sm:$0xff] %v26536_v47  ;;  %v26542_v52 = vpack.c.bf16 %v26215_v1, %v26210_v6 }
 0x26b   : > { %21543 = vmatprep.subr.bf16.mxu0 %v26518_v17  ;;  %v26548_v17 = vpack.c.bf16 %v26235_v12, %v26230_v26 }
 0x26c   : > { %30150 = vst [vmem:[#allocation105_spill] sm:$0xff] %v26542_v52 }
 0x26d   : > { %21585 = vmatpush3.bf16.msra.mxu1 %v26420_v25 }
 0x26e   : > { %21545 = vmatpush3.bf16.msra.mxu0 %v26524_v53  ;;  %21587 = vmatprep.subr.bf16.mxu1 %v26426_v63  ;;  %v26554_v53 = vpack.c.bf16 %v26249_v4, %v26244_v37 }
 0x26f   : > { %21547 = vmatprep.subr.bf16.mxu0 %v26530_v22  ;;  %v26560_v22 = vpack.c.bf16 %v25688_v58, %v25683_v57  ;;  %v26579_v58 = vpack.c.bf16 %v25780_v59, %v25775_v13  ;;  %v30160_v59 = vand.u32 4294901760, %v30132_v8  ;;  %v30161_v13 = vand.u32 4294901760, %v30133_v44 }
 0x270   : > { %30151 = vst [vmem:[#allocation106_spill] sm:$0xff] %v26554_v53  ;;  %v30170_v44 = vand.u32 4294901760, %v30142_v35  ;;  %v30176_v35 = vand.u32 4294901760, %v26158_v42  ;;  %v30182_v42 = vand.u32 4294901760, %v26215_v1  ;;  %v30188_v1 = vand.u32 4294901760, %v26249_v4  ;;  %v30192_v4 = vld [vmem:[#allocation109_spill] sm:$0xff] }
 0x271   : > { %21589 = vmatpush3.bf16.msra.mxu1 %v26443_v56  ;;  %30152 = vst [vmem:[#allocation107_spill] sm:$0xff] %v26560_v22  ;;  %30155 = vst [vmem:[#allocation115_spill] sm:$0xff] %v26579_v58 }
 0x272   : > { %21549 = vmatpush3.bf16.msra.mxu0 %v26536_v47  ;;  %21591 = vmatprep.subr.bf16.mxu1 %v26450_v23  ;;  %v26566_v47 = vpack.c.bf16 %v25722_v18, %v25717_v14  ;;  %v26584_v14 = vpack.c.bf16 %v25792_v0, %v25787_v19  ;;  %v26601_v19 = vpack.c.bf16 %v30161_v13, %v30160_v59  ;;  %v30163_v0 = vand.u32 4294901760, %v30135_v61 }
 0x273   : > { %21551 = vmatprep.subr.bf16.mxu0 %v26542_v52  ;;  %v26572_v52 = vpack.c.bf16 %v25742_v30, %v25737_v32  ;;  %v30157_v30 = vand.u32 4294901760, %v30129_v34  ;;  %v30158_v32 = vand.u32 4294901760, %v30130_v38  ;;  %v30164_v18 = vand.u32 4294901760, %v30136_v16 }
 0x274   : > { %30153 = vst [vmem:[#allocation112_spill] sm:$0xff] %v26566_v47  ;;  %30156 = vst [vmem:[#allocation116_spill] sm:$0xff] %v26584_v14  ;;  %v30166_v34 = vand.u32 4294901760, %v30138_v33  ;;  %v30167_v38 = vand.u32 4294901760, %v30139_v15  ;;  %v30169_v16 = vand.u32 4294901760, %v30141_v46  ;;  %v30173_v15 = vand.u32 4294901760, %v30145_v60 }
 0x275   : > { %21593 = vmatpush3.bf16.msra.mxu1 %v26465_v29  ;;  %30154 = vst [vmem:[#allocation114_spill] sm:$0xff] %v26572_v52  ;;  %v26592_v57 = vpack.c.bf16 %v30158_v32, %v30157_v30  ;;  %30162 = vst [vmem:[#allocation121_spill] sm:$0xff] %v26601_v19  ;;  %v30179_v60 = vand.u32 4294901760, %v26197_v48  ;;  %v30185_v48 = vand.u32 4294901760, %v26235_v12  ;;  %v30193_v12 = vld [vmem:[#allocation13_spill] sm:$0xff] }
 0x276   : > { %21553 = vmatpush3.bf16.msra.mxu0 %v26548_v17  ;;  %21595 = vmatprep.subr.bf16.mxu1 %v26475_v9  ;;  %v26619_v8 = vpack.c.bf16 %v30167_v38, %v30166_v34  ;;  %v26627_v61 = vpack.c.bf16 %v30170_v44, %v30169_v16  ;;  %v30194_v38 = vld [vmem:[#allocation110_spill] sm:$0xff]  ;;  %v30196_v44 = vld [vmem:[#allocation113_spill] sm:$0xff] }
 0x277   : > { %21555 = vmatprep.subr.bf16.mxu0 %v26554_v53  ;;  %30159 = vst [vmem:[#allocation120_spill] sm:$0xff] %v26592_v57  ;;  %v30195_v16 = vld [vmem:[#allocation14_spill] sm:$0xff] }
 0x278   : > { %30168 = vst [vmem:[#allocation29_spill] sm:$0xff] %v26619_v8  ;;  %30171 = vst [vmem:[#allocation30_spill] sm:$0xff] %v26627_v61 }
 0x279   : > { %21597 = vmatpush3.bf16.msra.mxu1 %v26482_v62 }
 0x27a   : > { %21557 = vmatpush3.bf16.msra.mxu0 %v26560_v22  ;;  %21631 = vmatprep.subr.bf16.mxu1 %v26116_v54 }
 0x27b   : > { %21559 = vmatprep.subr.bf16.mxu0 %v26566_v47 }
 0x27c   : > { %7522 = vmatmul.mubr.f32.vlgmr.msra.gmra.mrb[18].mxu1 %v7041_v39  ;;  %v26609_v39 = vpack.c.bf16 %v30164_v18, %v30163_v0  ;;  %v30190_v0 = vld [vmem:[#allocation97_spill] sm:$0xff] }
 0x27d   : > { %21633 = vmatpush3.bf16.msra.mxu1 %v26297_v36  ;;  %7792 = vmatprep.mubr.f32.mxu1 %v26153_v41  ;;  %v26679_v18 = vand.u32 4294901760, %v30190_v0 }
 0x27e   : > { %21561 = vmatpush3.bf16.msra.mxu0 %v26572_v52  ;;  %21635 = vmatprep.subr.bf16.mxu1 %v26303_v20  ;;  %30165 = vst [vmem:[#allocation18_spill] sm:$0xff] %v26609_v39 }
 0x27f   : > { %21563 = vmatprep.subr.bf16.mxu0 %v26579_v58 }
 0x281   : > { %21637 = vmatpush3.bf16.msra.mxu1 %v26329_v45 }
 0x282   : > { %21565 = vmatpush3.bf16.msra.mxu0 %v26584_v14  ;;  %21639 = vmatprep.subr.bf16.mxu1 %v26343_v11 }
 0x283   : > { %21599 = vmatprep.subr.bf16.mxu0 %v26592_v57 }
 0x285   : > { %7414 = vmatmul.mubr.f32.vlgmr.msra.gmra.mrb[18].mxu0 %v26458_v5  ;;  %21641 = vmatpush3.bf16.msra.mxu1 %v26362_v21  ;;  %v30175_v5 = vand.u32 4294901760, %v30147_v50  ;;  %v30181_v50 = vand.u32 4294901760, %v26210_v6  ;;  %v30187_v6 = vand.u32 4294901760, %v26244_v37  ;;  %v7908_v37 = vsub.f32 %v30190_v0, %v26679_v18  ;;  %v30207_v0 = vld [vmem:[#allocation39_spill] sm:$0xff] }
 0x286   : > { %21601 = vmatpush3.bf16.msra.mxu0 %v26601_v19  ;;  %7688 = vmatprep.mubr.f32.mxu0 %v26153_v41  ;;  %v30172_v41 = vand.u32 4294901760, %v30144_v28  ;;  %v30178_v28 = vand.u32 4294901760, %v26192_v31  ;;  %v30184_v31 = vand.u32 4294901760, %v26230_v26  ;;  %v30191_v26 = vld [vmem:[#allocation108_spill] sm:$0xff] }
 0x287   : > { %21603 = vmatprep.subr.bf16.mxu0 %v26609_v39  ;;  %21643 = vmatprep.subr.bf16.mxu1 %v26368_v55  ;;  %v26643_v46 = vpack.c.bf16 %v30176_v35, %v30175_v5  ;;  %v26659_v32 = vpack.c.bf16 %v30182_v42, %v30181_v50  ;;  %v26675_v13 = vpack.c.bf16 %v30188_v1, %v30187_v6  ;;  %v7909_v34 = vand.u32 4294901760, %v7908_v37  ;;  %v30198_v5 = vld [vmem:[#allocation117_spill] sm:$0xff]  ;;  %v30199_v35 = vld [vmem:[#allocation24_spill] sm:$0xff]  ;;  %v30202_v42 = vld [vmem:[#allocation10_spill] sm:$0xff] }
 0x288   : > { %v26635_v33 = vpack.c.bf16 %v30173_v15, %v30172_v41  ;;  %v26651_v30 = vpack.c.bf16 %v30179_v60, %v30178_v28  ;;  %v26667_v59 = vpack.c.bf16 %v30185_v48, %v30184_v31  ;;  %v30197_v41 = vld [vmem:[#allocation15_spill] sm:$0xff]  ;;  %v30200_v28 = vld [vmem:[#allocation9_spill] sm:$0xff]  ;;  %v30201_v60 = vld [vmem:[#allocation26_spill] sm:$0xff] }
 0x289   : > { %21645 = vmatpush3.bf16.msra.mxu1 %v26394_v3  ;;  %30177 = vst [vmem:[#allocation55_spill] sm:$0xff] %v26643_v46  ;;  %30183 = vst [vmem:[#allocation58_spill] sm:$0xff] %v26659_v32  ;;  %v7910_v15 = vsub.f32 %v7908_v37, %v7909_v34  ;;  %v30203_v31 = vld [vmem:[#allocation31_spill] sm:$0xff]  ;;  %v30205_v6 = vld [vmem:[#allocation34_spill] sm:$0xff] }
 0x28a   : > { %21605 = vmatpush3.bf16.msra.mxu0 %v26619_v8  ;;  %30174 = vst [vmem:[#allocation33_spill] sm:$0xff] %v26635_v33  ;;  %21647 = vmatprep.subr.bf16.mxu1 %v26400_v2  ;;  %30180 = vst [vmem:[#allocation57_spill] sm:$0xff] %v26651_v30  ;;  %v30204_v48 = vld [vmem:[#allocation11_spill] sm:$0xff]  ;;  %v30206_v1 = vld [vmem:[#allocation12_spill] sm:$0xff] }
 0x28b   : > { %21607 = vmatprep.subr.bf16.mxu0 %v26627_v61  ;;  %30186 = vst [vmem:[#allocation131_spill] sm:$0xff] %v26667_v59  ;;  %30189 = vst [vmem:[#allocation132_spill] sm:$0xff] %v26675_v13  ;;  %v7911_v50 = vand.u32 4294901760, %v7910_v15  ;;  %v30210_v15 = vld [vmem:[#allocation20_spill] sm:$0xff] }
 0x28d   : > { %21649 = vmatpush3.bf16.msra.mxu1 %v26420_v25 }
 0x28e   : > { %21609 = vmatpush3.bf16.msra.mxu0 %v26635_v33  ;;  %21651 = vmatprep.subr.bf16.mxu1 %v26426_v63 }
 0x28f   : > { %21611 = vmatprep.subr.bf16.mxu0 %v26643_v46  ;;  %v30233_v46 = vld [vmem:[#allocation80_spill] sm:$0xff] }
 0x291   : > { %21653 = vmatpush3.bf16.msra.mxu1 %v26443_v56 }
 0x292   : > { %21613 = vmatpush3.bf16.msra.mxu0 %v26651_v30  ;;  %21655 = vmatprep.subr.bf16.mxu1 %v26450_v23  ;;  %v30232_v30 = vld [vmem:[#allocation79_spill] sm:$0xff] }
 0x293   : > { %21615 = vmatprep.subr.bf16.mxu0 %v26659_v32  ;;  %v30230_v32 = vld [vmem:[#allocation77_spill] sm:$0xff] }
 0x295   : > { %21657 = vmatpush3.bf16.msra.mxu1 %v26465_v29 }
 0x296   : > { %21617 = vmatpush3.bf16.msra.mxu0 %v26667_v59  ;;  %21659 = vmatprep.subr.bf16.mxu1 %v26475_v9  ;;  %v30229_v59 = vld [vmem:[#allocation76_spill] sm:$0xff] }
 0x297   : > { %21619 = vmatprep.subr.bf16.mxu0 %v26675_v13 }
 0x299   : > { %21661 = vmatpush3.bf16.msra.mxu1 %v26482_v62 }
 0x29a   : > { %21621 = vmatpush3.bf16.msra.mxu0 %v30191_v26  ;;  %21695 = vmatprep.subr.bf16.mxu1 %v30193_v12  ;;  %v30222_v12 = vld [vmem:[#allocation74_spill] sm:$0xff] }
 0x29b   : > { %21623 = vmatprep.subr.bf16.mxu0 %v30192_v4  ;;  %v30223_v4 = vld [vmem:[#allocation56_spill] sm:$0xff]  ;;  %v30225_v26 = vld [vmem:[#allocation70_spill] sm:$0xff] }
 0x29c   : > { %7794 = vmatmul.mubr.f32.vlgmr.msra.gmra.mrb[20].mxu1 %v26434_v43 }
 0x29d   : > { %21697 = vmatpush3.bf16.msra.mxu1 %v30195_v16  ;;  %8148 = vmatprep.mubr.f32.mxu1 %v26679_v18  ;;  %v30218_v16 = vld [vmem:[#allocation65_spill] sm:$0xff] }
 0x29e   : > { %21625 = vmatpush3.bf16.msra.mxu0 %v30194_v38  ;;  %21699 = vmatprep.subr.bf16.mxu1 %v30197_v41  ;;  %v30215_v41 = vld [vmem:[#allocation64_spill] sm:$0xff] }
 0x29f   : > { %21627 = vmatprep.subr.bf16.mxu0 %v30196_v44  ;;  %v30217_v44 = vld [vmem:[#allocation51_spill] sm:$0xff]  ;;  %v30220_v38 = vld [vmem:[#allocation68_spill] sm:$0xff] }
 0x2a1   : > { %21701 = vmatpush3.bf16.msra.mxu1 %v30199_v35  ;;  %v30208_v35 = vld [vmem:[#allocation16_spill] sm:$0xff] }
 0x2a2   : > { %21629 = vmatpush3.bf16.msra.mxu0 %v30198_v5  ;;  %21703 = vmatprep.subr.bf16.mxu1 %v30201_v60  ;;  %v30209_v5 = vld [vmem:[#allocation47_spill] sm:$0xff]  ;;  %v30212_v60 = vld [vmem:[#allocation22_spill] sm:$0xff] }
 0x2a3   : > { %21663 = vmatprep.subr.bf16.mxu0 %v30200_v28 }
 0x2a5   : > { %7690 = vmatmul.mubr.f32.vlgmr.msra.gmra.mrb[20].mxu0 %v26434_v43  ;;  %21705 = vmatpush3.bf16.msra.mxu1 %v30203_v31  ;;  %v30211_v43 = vld [vmem:[#allocation54_spill] sm:$0xff]  ;;  %v30214_v31 = vld [vmem:[#allocation28_spill] sm:$0xff] }
 0x2a6   : > { %21665 = vmatpush3.bf16.msra.mxu0 %v30202_v42  ;;  %7912 = vmatprep.mubr.f32.mxu0 %v7911_v50  ;;  %v30213_v50 = vld [vmem:[#allocation61_spill] sm:$0xff] }
 0x2a7   : > { %21667 = vmatprep.subr.bf16.mxu0 %v30204_v48  ;;  %21707 = vmatprep.subr.bf16.mxu1 %v30205_v6  ;;  %v30216_v6 = vld [vmem:[#allocation32_spill] sm:$0xff] }
 0x2a9   : > { %21709 = vmatpush3.bf16.msra.mxu1 %v30207_v0  ;;  %v26718_v0 = vand.u32 4294901760, %v30217_v44 }
 0x2aa   : > { %21669 = vmatpush3.bf16.msra.mxu0 %v30206_v1  ;;  %21711 = vmatprep.subr.bf16.mxu1 %v30209_v5  ;;  %v30219_v5 = vld [vmem:[#allocation36_spill] sm:$0xff] }
 0x2ab   : > { %21671 = vmatprep.subr.bf16.mxu0 %v30208_v35 }
 0x2ad   : > { %21713 = vmatpush3.bf16.msra.mxu1 %v30211_v43  ;;  %v30221_v43 = vld [vmem:[#allocation40_spill] sm:$0xff] }
 0x2ae   : > { %21673 = vmatpush3.bf16.msra.mxu0 %v30210_v15  ;;  %21715 = vmatprep.subr.bf16.mxu1 %v30213_v50  ;;  %v7914_v50 = vsub.f32 %v30217_v44, %v26718_v0  ;;  %v30227_v44 = vld [vmem:[#allocation72_spill] sm:$0xff] }
 0x2af   : > { %21675 = vmatprep.subr.bf16.mxu0 %v30212_v60 }
 0x2b0   : > { %v7915_v13 = vand.u32 4294901760, %v7914_v50 }
 0x2b1   : > { %21717 = vmatpush3.bf16.msra.mxu1 %v30215_v41  ;;  %v30224_v41 = vld [vmem:[#allocation75_spill] sm:$0xff] }
 0x2b2   : > { %21677 = vmatpush3.bf16.msra.mxu0 %v30214_v31  ;;  %21719 = vmatprep.subr.bf16.mxu1 %v30218_v16  ;;  %v30226_v16 = vld [vmem:[#allocation71_spill] sm:$0xff] }
 0x2b3   : > { %21679 = vmatprep.subr.bf16.mxu0 %v30216_v6 }
 0x2b5   : > { %21721 = vmatpush3.bf16.msra.mxu1 %v30220_v38  ;;  %v7916_v38 = vsub.f32 %v7914_v50, %v7915_v13 }
 0x2b6   : > { %21681 = vmatpush3.bf16.msra.mxu0 %v30219_v5  ;;  %21723 = vmatprep.subr.bf16.mxu1 %v30222_v12  ;;  %v30228_v12 = vld [vmem:[#allocation73_spill] sm:$0xff] }
 0x2b7   : > { %21683 = vmatprep.subr.bf16.mxu0 %v30221_v43 }
 0x2b9   : > { %21725 = vmatpush3.bf16.msra.mxu1 %v30224_v41  ;;  %v7917_v41 = vand.u32 4294901760, %v7916_v38  ;;  %v30234_v38 = vld [vmem:[#allocation81_spill] sm:$0xff] }
 0x2ba   : > { %21685 = vmatpush3.bf16.msra.mxu0 %v30223_v4  ;;  %21759 = vmatprep.subr.bf16.mxu1 %v30200_v28 }
 0x2bb   : > { %21687 = vmatprep.subr.bf16.mxu0 %v30225_v26 }
 0x2bc   : > { %8150 = vmatmul.mubr.f32.vlgmr.msra.gmra.mrb[22].mxu1 %v26718_v0 }
 0x2bd   : > { %21761 = vmatpush3.bf16.msra.mxu1 %v30202_v42  ;;  %8392 = vmatprep.mubr.f32.mxu1 %v7909_v34  ;;  %v30231_v34 = vld [vmem:[#allocation78_spill] sm:$0xff] }
 0x2be   : > { %21689 = vmatpush3.bf16.msra.mxu0 %v30226_v16  ;;  %21763 = vmatprep.subr.bf16.mxu1 %v30204_v48 }
 0x2bf   : > { %21691 = vmatprep.subr.bf16.mxu0 %v30227_v44 }
 0x2c1   : > { %21765 = vmatpush3.bf16.msra.mxu1 %v30206_v1 }
 0x2c2   : > { %21693 = vmatpush3.bf16.msra.mxu0 %v30228_v12  ;;  %21767 = vmatprep.subr.bf16.mxu1 %v30208_v35 }
 0x2c3   : > { %21727 = vmatprep.subr.bf16.mxu0 %v30229_v59  ;;  %v30236_v59 = vld [vmem:[#allocation83_spill] sm:$0xff] }
 0x2c5   : > { %7918 = vmatmul.mubr.f32.vlgmr.msra.gmra.mrb[22].mxu0 %v7917_v41  ;;  %21769 = vmatpush3.bf16.msra.mxu1 %v30210_v15  ;;  %v30235_v41 = vld [vmem:[#allocation82_spill] sm:$0xff] }
 0x2c6   : > { %21729 = vmatpush3.bf16.msra.mxu0 %v30230_v32  ;;  %8285 = vmatprep.mubr.f32.mxu0 %v7908_v37 }
 0x2c7   : > { %21731 = vmatprep.subr.bf16.mxu0 %v30231_v34  ;;  %21771 = vmatprep.subr.bf16.mxu1 %v30212_v60 }
 0x2c9   : > { %21773 = vmatpush3.bf16.msra.mxu1 %v30214_v31  ;;  %v18765_v37 = vpop.f32.mrb[10].mxu1 }
 0x2ca   : > { %21733 = vmatpush3.bf16.msra.mxu0 %v30232_v30  ;;  %21775 = vmatprep.subr.bf16.mxu1 %v30216_v6  ;;  %v18766_v34 = vpop.f32.mrb[11].mxu1  ;;  %v30237_v30 = vld [vmem:[#allocation87_spill] sm:$0xff] }
 0x2cb   : > { %21735 = vmatprep.subr.bf16.mxu0 %v30233_v46  ;;  %v18767_v32 = vadd.f32 %v18766_v34, %v18765_v37  ;;  %v30238_v46 = vld [vmem:[#allocation89_spill] sm:$0xff]  ;;  %v30240_v34 = vld [vmem:[#allocation91_spill] sm:$0xff]  ;;  %v30241_v37 = vld [vmem:[#allocation92_spill] sm:$0xff] }
 0x2cd   : > { %21777 = vmatpush3.bf16.msra.mxu1 %v30219_v5 }
 0x2ce   : > { %21737 = vmatpush3.bf16.msra.mxu0 %v30234_v38  ;;  %21779 = vmatprep.subr.bf16.mxu1 %v30221_v43  ;;  %v30239_v38 = vld [vmem:[#allocation90_spill] sm:$0xff] }
 0x2cf   : > { %21739 = vmatprep.subr.bf16.mxu0 %v30235_v41 }
 0x2d1   : > { %21781 = vmatpush3.bf16.msra.mxu1 %v30223_v4  ;;  %v18730_v41 = vpop.f32.mrb[10].mxu0 }
 0x2d2   : > { %21741 = vmatpush3.bf16.msra.mxu0 %v30236_v59  ;;  %21783 = vmatprep.subr.bf16.mxu1 %v30225_v26  ;;  %v18731_v33 = vpop.f32.mrb[11].mxu0  ;;  %v30259_v59 = vld [vmem:[#allocation41_spill] sm:$0xff] }
 0x2d3   : > { %21743 = vmatprep.subr.bf16.mxu0 %v30237_v30  ;;  %v18732_v61 = vadd.f32 %v18731_v33, %v18730_v41  ;;  %v30244_v33 = vld [vmem:[#allocation95_spill] sm:$0xff] }
 0x2d4   : > { %v30245_v41 = vld [vmem:[#allocation111_spill] sm:$0xff] }
 0x2d5   : > { %21785 = vmatpush3.bf16.msra.mxu1 %v30226_v16  ;;  %v6416_v30 = vadd.f32 %v18767_v32, %v18732_v61  ;;  %v30246_v61 = vld [vmem:[#allocation118_spill] sm:$0xff]  ;;  %v30247_v32 = vld [vmem:[#allocation119_spill] sm:$0xff] }
 0x2d6   : > { %21745 = vmatpush3.bf16.msra.mxu0 %v30238_v46  ;;  %21787 = vmatprep.subr.bf16.mxu1 %v30227_v44  ;;  %v30242_v46 = vld [vmem:[#allocation93_spill] sm:$0xff] }
 0x2d7   : > { %21747 = vmatprep.subr.bf16.mxu0 %v30239_v38  ;;  %v30243_v38 = vld [vmem:[#allocation94_spill] sm:$0xff] }
 0x2d9   : > { %21789 = vmatpush3.bf16.msra.mxu1 %v30228_v12 }
 0x2da   : > { %21749 = vmatpush3.bf16.msra.mxu0 %v30240_v34  ;;  %21823 = vmatprep.subr.bf16.mxu1 %v30200_v28  ;;  %v30258_v34 = vld [vmem:[#allocation38_spill] sm:$0xff] }
 0x2db   : > { %21751 = vmatprep.subr.bf16.mxu0 %v30241_v37 }
 0x2dc   : > { %8396 = vmatmul.mubr.f32.vlgmr.msra.gmra.mrb[24].mxu1 %v7915_v13  ;;  %v30248_v13 = vld [vmem:[#allocation122_spill] sm:$0xff] }
 0x2dd   : > { %21825 = vmatpush3.bf16.msra.mxu1 %v30202_v42  ;;  %8666 = vmatprep.mubr.f32.mxu1 %v26679_v18 }
 0x2de   : > { %21753 = vmatpush3.bf16.msra.mxu0 %v30242_v46  ;;  %21827 = vmatprep.subr.bf16.mxu1 %v30204_v48 }
 0x2df   : > { %21755 = vmatprep.subr.bf16.mxu0 %v30243_v38  ;;  %v30252_v38 = vld [vmem:[#allocation23_spill] sm:$0xff] }
 0x2e1   : > { %21829 = vmatpush3.bf16.msra.mxu1 %v30206_v1 }
 0x2e2   : > { %21757 = vmatpush3.bf16.msra.mxu0 %v30244_v33  ;;  %21831 = vmatprep.subr.bf16.mxu1 %v30208_v35  ;;  %v30249_v33 = vld [vmem:[#allocation17_spill] sm:$0xff] }
 0x2e3   : > { %21791 = vmatprep.subr.bf16.mxu0 %v30245_v41  ;;  %v30250_v41 = vld [vmem:[#allocation19_spill] sm:$0xff] }
 0x2e5   : > { %8288 = vmatmul.mubr.f32.vlgmr.msra.gmra.mrb[24].mxu0 %v7914_v50  ;;  %21833 = vmatpush3.bf16.msra.mxu1 %v30210_v15  ;;  %v30251_v50 = vld [vmem:[#allocation21_spill] sm:$0xff] }
 0x2e6   : > { %21793 = vmatpush3.bf16.msra.mxu0 %v30246_v61  ;;  %8562 = vmatprep.mubr.f32.mxu0 %v26679_v18 }
 0x2e7   : > { %21795 = vmatprep.subr.bf16.mxu0 %v30247_v32  ;;  %21835 = vmatprep.subr.bf16.mxu1 %v30212_v60 }
 0x2e9   : > { %21837 = vmatpush3.bf16.msra.mxu1 %v30214_v31  ;;  %v18835_v18 = vpop.f32.mrb[12].mxu1 }
 0x2ea   : > { %21797 = vmatpush3.bf16.msra.mxu0 %v30248_v13  ;;  %21839 = vmatprep.subr.bf16.mxu1 %v30216_v6  ;;  %v18836_v32 = vpop.f32.mrb[13].mxu1  ;;  %v30253_v13 = vld [vmem:[#allocation25_spill] sm:$0xff] }
 0x2eb   : > { %21799 = vmatprep.subr.bf16.mxu0 %v30249_v33  ;;  %v18837_v61 = vadd.f32 %v18836_v32, %v18835_v18  ;;  %v30254_v33 = vld [vmem:[#allocation48_spill] sm:$0xff] }
 0x2ec   : > { %v26791_v46 = vand.u32 4294901760, %v30254_v33 }
 0x2ed   : > { %21841 = vmatpush3.bf16.msra.mxu1 %v30219_v5 }
 0x2ee   : > { %21801 = vmatpush3.bf16.msra.mxu0 %v30250_v41  ;;  %21843 = vmatprep.subr.bf16.mxu1 %v30221_v43  ;;  %v30255_v41 = vld [vmem:[#allocation27_spill] sm:$0xff]  ;;  %v26799_v32 = vsub.f32 %v30254_v33, %v26791_v46 }
 0x2ef   : > { %21803 = vmatprep.subr.bf16.mxu0 %v30251_v50  ;;  %v30256_v50 = vld [vmem:[#allocation35_spill] sm:$0xff] }
 0x2f1   : > { %21845 = vmatpush3.bf16.msra.mxu1 %v30223_v4  ;;  %v18800_v37 = vpop.f32.mrb[12].mxu0 }
 0x2f2   : > { %21805 = vmatpush3.bf16.msra.mxu0 %v30252_v38  ;;  %21847 = vmatprep.subr.bf16.mxu1 %v30225_v26  ;;  %v18801_v18 = vpop.f32.mrb[13].mxu0  ;;  %v30257_v38 = vld [vmem:[#allocation37_spill] sm:$0xff] }
 0x2f3   : > { %21807 = vmatprep.subr.bf16.mxu0 %v30253_v13  ;;  %v18802_v13 = vadd.f32 %v18801_v18, %v18800_v37  ;;  %v30260_v37 = vld [vmem:[#allocation59_spill] sm:$0xff] }
 0x2f5   : > { %21849 = vmatpush3.bf16.msra.mxu1 %v30226_v16 }
 0x2f6   : > { %21809 = vmatpush3.bf16.msra.mxu0 %v30255_v41  ;;  %21851 = vmatprep.subr.bf16.mxu1 %v30227_v44  ;;  %v6554_v41 = vadd.f32 %v18802_v13, %v6416_v30  ;;  %v30261_v30 = vld [vmem:[#allocation67_spill] sm:$0xff]  ;;  %v30262_v13 = vld [vmem:[#allocation69_spill] sm:$0xff] }
 0x2f7   : > { %21811 = vmatprep.subr.bf16.mxu0 %v30256_v50  ;;  %v8771_v50 = vand.u32 4294901760, %v26799_v32 }
 0x2f8   : > { %v6662_v44 = vadd.f32 %v18837_v61, %v6554_v41  ;;  %v30263_v41 = vld [vmem:[#allocation126_spill] sm:$0xff]  ;;  %v30265_v61 = vld [vmem:[#allocation128_spill] sm:$0xff] }
 0x2f9   : > { %21853 = vmatpush3.bf16.msra.mxu1 %v30228_v12  ;;  %v8772_v33 = vsub.f32 %v26799_v32, %v8771_v50 }
 0x2fa   : > { %21813 = vmatpush3.bf16.msra.mxu0 %v30257_v38  ;;  %21887 = vmatprep.subr.bf16.mxu1 %v30259_v59 }
 0x2fb   : > { %21815 = vmatprep.subr.bf16.mxu0 %v30258_v34  ;;  %v8773_v18 = vand.u32 4294901760, %v8772_v33 }
 0x2fc   : > { %8668 = vmatmul.mubr.f32.vlgmr.msra.gmra.mrb[26].mxu1 %v26718_v0 }
 0x2fd   : > { %21889 = vmatpush3.bf16.msra.mxu1 %v26080_v49  ;;  %9010 = vmatprep.mubr.f32.mxu1 %v26791_v46 }
 0x2fe   : > { %21817 = vmatpush3.bf16.msra.mxu0 %v26078_v27  ;;  %21891 = vmatprep.subr.bf16.mxu1 %v30260_v37 }
 0x2ff   : > { %21819 = vmatprep.subr.bf16.mxu0 %v26122_v10 }
 0x301   : > { %21893 = vmatpush3.bf16.msra.mxu1 %v30261_v30 }
 0x302   : > { %21821 = vmatpush3.bf16.msra.mxu0 %v26262_v7  ;;  %21895 = vmatprep.subr.bf16.mxu1 %v30262_v13  ;;  %v30271_v7 = vld [vmem:[#allocation63_spill] sm:$0xff] }
 0x303   : > { %21855 = vmatprep.subr.bf16.mxu0 %v26116_v54 }
 0x305   : > { %8564 = vmatmul.mubr.f32.vlgmr.msra.gmra.mrb[26].mxu0 %v26718_v0  ;;  %21897 = vmatpush3.bf16.msra.mxu1 %v26306_v40  ;;  %v30264_v0 = vld [vmem:[#allocation127_spill] sm:$0xff]  ;;  %v30266_v40 = vld [vmem:[#allocation129_spill] sm:$0xff] }
 0x306   : > { %21857 = vmatpush3.bf16.msra.mxu0 %v26297_v36  ;;  %8774 = vmatprep.mubr.f32.mxu0 %v8773_v18 }
 0x307   : > { %21859 = vmatprep.subr.bf16.mxu0 %v26303_v20  ;;  %21899 = vmatprep.subr.bf16.mxu1 %v26323_v51 }
 0x309   : > { %21901 = vmatpush3.bf16.msra.mxu1 %v26347_v24  ;;  %v30267_v24 = vld [vmem:[#allocation44_spill] sm:$0xff] }
 0x30a   : > { %21861 = vmatpush3.bf16.msra.mxu0 %v26329_v45  ;;  %21903 = vmatprep.subr.bf16.mxu1 %v30263_v41  ;;  %v26834_v13 = vand.u32 4294901760, %v30267_v24  ;;  %v30268_v41 = vld [vmem:[#allocation130_spill] sm:$0xff] }
 0x30b   : > { %21863 = vmatprep.subr.bf16.mxu0 %v26343_v11  ;;  %v18905_v33 = vpop.f32.mrb[14].mxu1 }
 0x30c   : > { %v18906_v18 = vpop.f32.mrb[15].mxu1 }
 0x30d   : > { %21905 = vmatpush3.bf16.msra.mxu1 %v30264_v0  ;;  %v18907_v51 = vadd.f32 %v18906_v18, %v18905_v33  ;;  %v30269_v0 = vld [vmem:[#allocation60_spill] sm:$0xff]  ;;  %v30270_v18 = vld [vmem:[#allocation62_spill] sm:$0xff] }
 0x30e   : > { %21865 = vmatpush3.bf16.msra.mxu0 %v26362_v21  ;;  %21907 = vmatprep.subr.bf16.mxu1 %v30265_v61  ;;  %v26842_v61 = vsub.f32 %v30267_v24, %v26834_v13 }
 0x30f   : > { %21867 = vmatprep.subr.bf16.mxu0 %v26368_v55 }
 0x311   : > { %21909 = vmatpush3.bf16.msra.mxu1 %v30266_v40 }
 0x312   : > { %21869 = vmatpush3.bf16.msra.mxu0 %v26394_v3  ;;  %21911 = vmatprep.subr.bf16.mxu1 %v30268_v41  ;;  %v8777_v41 = vand.u32 4294901760, %v26842_v61 }
 0x313   : > { %21871 = vmatprep.subr.bf16.mxu0 %v26400_v2 }
 0x315   : > { %21913 = vmatpush3.bf16.msra.mxu1 %v30269_v0 }
 0x316   : > { %21873 = vmatpush3.bf16.msra.mxu0 %v26420_v25  ;;  %21915 = vmatprep.subr.bf16.mxu1 %v30270_v18 }
 0x317   : > { %21875 = vmatprep.subr.bf16.mxu0 %v26426_v63  ;;  %v18870_v33 = vpop.f32.mrb[14].mxu0 }
 0x318   : > { %v18871_v40 = vpop.f32.mrb[15].mxu0 }
 0x319   : > { %v18872_v30 = vadd.f32 %v18871_v40, %v18870_v33  ;;  %21917 = vmatpush3.bf16.msra.mxu1 %v30271_v7  ;;  %v8778_v40 = vsub.f32 %v26842_v61, %v8777_v41  ;;  %v30276_v33 = vld [vmem:[#allocation101_spill] sm:$0xff] }
 0x31a   : > { %21877 = vmatpush3.bf16.msra.mxu0 %v26443_v56  ;;  %21951 = vmatprep.subr.bf16.mxu1 %v26116_v54 }
 0x31b   : > { %21879 = vmatprep.subr.bf16.mxu0 %v26450_v23  ;;  %v6830_v0 = vadd.f32 %v18872_v30, %v6662_v44  ;;  %v8779_v44 = vand.u32 4294901760, %v8778_v40  ;;  %v30272_v30 = vld [vmem:[#allocation96_spill] sm:$0xff]  ;;  %v30277_v40 = vld [vmem:[#allocation102_spill] sm:$0xff] }
 0x31c   : > { %9012 = vmatmul.mubr.f32.vlgmr.msra.gmra.mrb[28].mxu1 %v26834_v13 }
 0x31d   : > { %v6934_v24 = vadd.f32 %v18907_v51, %v6830_v0  ;;  %21953 = vmatpush3.bf16.msra.mxu1 %v26297_v36  ;;  %9254 = vmatprep.mubr.f32.mxu1 %v8771_v50  ;;  %v30273_v51 = vld [vmem:[#allocation98_spill] sm:$0xff]  ;;  %v30274_v50 = vld [vmem:[#allocation99_spill] sm:$0xff]  ;;  %v30275_v0 = vld [vmem:[#allocation100_spill] sm:$0xff] }
 0x31e   : > { %21881 = vmatpush3.bf16.msra.mxu0 %v26465_v29  ;;  %21955 = vmatprep.subr.bf16.mxu1 %v26303_v20 }
 0x31f   : > { %21883 = vmatprep.subr.bf16.mxu0 %v26475_v9 }
 0x321   : > { %21957 = vmatpush3.bf16.msra.mxu1 %v26329_v45 }
 0x322   : > { %21885 = vmatpush3.bf16.msra.mxu0 %v26482_v62  ;;  %21959 = vmatprep.subr.bf16.mxu1 %v26343_v11 }
 0x323   : > { %21919 = vmatprep.subr.bf16.mxu0 %v30272_v30 }
 0x325   : > { %8780 = vmatmul.mubr.f32.vlgmr.msra.gmra.mrb[28].mxu0 %v8779_v44  ;;  %21961 = vmatpush3.bf16.msra.mxu1 %v26362_v21  ;;  %v30278_v44 = vld [vmem:[#allocation103_spill] sm:$0xff] }
 0x326   : > { %21921 = vmatpush3.bf16.msra.mxu0 %v30273_v51  ;;  %9147 = vmatprep.mubr.f32.mxu0 %v26799_v32  ;;  %v30279_v51 = vld [vmem:[#allocation104_spill] sm:$0xff] }
 0x327   : > { %21923 = vmatprep.subr.bf16.mxu0 %v30274_v50  ;;  %21963 = vmatprep.subr.bf16.mxu1 %v26368_v55 }
 0x329   : > { %21965 = vmatpush3.bf16.msra.mxu1 %v26394_v3 }
 0x32a   : > { %21925 = vmatpush3.bf16.msra.mxu0 %v30275_v0  ;;  %21967 = vmatprep.subr.bf16.mxu1 %v26400_v2  ;;  %v30280_v0 = vld [vmem:[#allocation105_spill] sm:$0xff] }
 0x32b   : > { %21927 = vmatprep.subr.bf16.mxu0 %v30276_v33 }
 0x32d   : > { %21969 = vmatpush3.bf16.msra.mxu1 %v26420_v25 }
 0x32e   : > { %21929 = vmatpush3.bf16.msra.mxu0 %v30277_v40  ;;  %21971 = vmatprep.subr.bf16.mxu1 %v26426_v63 }
 0x32f   : > { %21931 = vmatprep.subr.bf16.mxu0 %v30278_v44  ;;  %v18975_v32 = vpop.f32.mrb[16].mxu1 }
 0x330   : > { %v18976_v50 = vpop.f32.mrb[17].mxu1 }
 0x331   : > { %v18977_v30 = vadd.f32 %v18976_v50, %v18975_v32  ;;  %21973 = vmatpush3.bf16.msra.mxu1 %v26443_v56 }
 0x332   : > { %21933 = vmatpush3.bf16.msra.mxu0 %v30279_v51  ;;  %21975 = vmatprep.subr.bf16.mxu1 %v26450_v23 }
 0x333   : > { %21935 = vmatprep.subr.bf16.mxu0 %v30280_v0 }
 0x335   : > { %21977 = vmatpush3.bf16.msra.mxu1 %v26465_v29 }
 0x336   : > { %21937 = vmatpush3.bf16.msra.mxu0 %v26548_v17  ;;  %21979 = vmatprep.subr.bf16.mxu1 %v26475_v9 }
 0x337   : > { %21939 = vmatprep.subr.bf16.mxu0 %v26554_v53 }
 0x338   : > { %v18940_v44 = vpop.f32.mrb[16].mxu0 }
 0x339   : > { %v18941_v40 = vpop.f32.mrb[17].mxu0  ;;  %21981 = vmatpush3.bf16.msra.mxu1 %v26482_v62 }
 0x33a   : > { %v18942_v33 = vadd.f32 %v18941_v40, %v18940_v44  ;;  %21941 = vmatpush3.bf16.msra.mxu0 %v26560_v22  ;;  %22015 = vmatprep.subr.bf16.mxu1 %v26116_v54  ;;  %v30285_v44 = vld [vmem:[#allocation58_spill] sm:$0xff] }
 0x33b   : > { %21943 = vmatprep.subr.bf16.mxu0 %v26566_v47 }
 0x33c   : > { %v7046_v50 = vadd.f32 %v18942_v33, %v6934_v24  ;;  %9258 = vmatmul.mubr.f32.vlgmr.msra.gmra.mrb[30].mxu1 %v8777_v41  ;;  %v30281_v41 = vld [vmem:[#allocation30_spill] sm:$0xff]  ;;  %v30282_v24 = vld [vmem:[#allocation33_spill] sm:$0xff] }
 0x33d   : > { %22017 = vmatpush3.bf16.msra.mxu1 %v26297_v36  ;;  %9528 = vmatprep.mubr.f32.mxu1 %v26791_v46  ;;  %v30284_v33 = vld [vmem:[#allocation57_spill] sm:$0xff] }
 0x33e   : > { %21945 = vmatpush3.bf16.msra.mxu0 %v26572_v52  ;;  %v7278_v32 = vadd.f32 %v18977_v30, %v7046_v50  ;;  %22019 = vmatprep.subr.bf16.mxu1 %v26303_v20  ;;  %v30286_v50 = vld [vmem:[#allocation52_spill] sm:$0xff] }
 0x33f   : > { %21947 = vmatprep.subr.bf16.mxu0 %v26579_v58 }
 0x341   : > { %22021 = vmatpush3.bf16.msra.mxu1 %v26329_v45 }
 0x342   : > { %21949 = vmatpush3.bf16.msra.mxu0 %v26584_v14  ;;  %22023 = vmatprep.subr.bf16.mxu1 %v26343_v11 }
 0x343   : > { %21983 = vmatprep.subr.bf16.mxu0 %v26592_v57  ;;  %v30292_v57 = vld [vmem:[#allocation110_spill] sm:$0xff] }
 0x345   : > { %9150 = vmatmul.mubr.f32.vlgmr.msra.gmra.mrb[30].mxu0 %v26842_v61  ;;  %22025 = vmatpush3.bf16.msra.mxu1 %v26362_v21  ;;  %v30283_v61 = vld [vmem:[#allocation55_spill] sm:$0xff] }
 0x346   : > { %21985 = vmatpush3.bf16.msra.mxu0 %v26601_v19  ;;  %9424 = vmatprep.mubr.f32.mxu0 %v26791_v46  ;;  %v30291_v19 = vld [vmem:[#allocation13_spill] sm:$0xff] }
 0x347   : > { %21987 = vmatprep.subr.bf16.mxu0 %v26609_v39  ;;  %22027 = vmatprep.subr.bf16.mxu1 %v26368_v55  ;;  %v30290_v39 = vld [vmem:[#allocation109_spill] sm:$0xff] }
 0x349   : > { %22029 = vmatpush3.bf16.msra.mxu1 %v26394_v3 }
 0x34a   : > { %21989 = vmatpush3.bf16.msra.mxu0 %v26619_v8  ;;  %22031 = vmatprep.subr.bf16.mxu1 %v26400_v2 }
 0x34b   : > { %21991 = vmatprep.subr.bf16.mxu0 %v30281_v41  ;;  %v26913_v41 = vand.u32 4294901760, %v30286_v50 }
 0x34d   : > { %22033 = vmatpush3.bf16.msra.mxu1 %v26420_v25 }
 0x34e   : > { %21993 = vmatpush3.bf16.msra.mxu0 %v30282_v24  ;;  %22035 = vmatprep.subr.bf16.mxu1 %v26426_v63  ;;  %v30287_v24 = vld [vmem:[#allocation131_spill] sm:$0xff] }
 0x34f   : > { %21995 = vmatprep.subr.bf16.mxu0 %v30283_v61  ;;  %v19045_v46 = vpop.f32.mrb[18].mxu1  ;;  %v30288_v61 = vld [vmem:[#allocation132_spill] sm:$0xff] }
 0x350   : > { %v19046_v30 = vpop.f32.mrb[19].mxu1 }
 0x351   : > { %v19047_v40 = vadd.f32 %v19046_v30, %v19045_v46  ;;  %22037 = vmatpush3.bf16.msra.mxu1 %v26443_v56  ;;  %v26921_v46 = vsub.f32 %v30286_v50, %v26913_v41  ;;  %v30293_v50 = vld [vmem:[#allocation14_spill] sm:$0xff] }
 0x352   : > { %21997 = vmatpush3.bf16.msra.mxu0 %v30284_v33  ;;  %22039 = vmatprep.subr.bf16.mxu1 %v26450_v23  ;;  %v30289_v33 = vld [vmem:[#allocation108_spill] sm:$0xff] }
 0x353   : > { %21999 = vmatprep.subr.bf16.mxu0 %v30285_v44 }
 0x355   : > { %22041 = vmatpush3.bf16.msra.mxu1 %v26465_v29 }
 0x356   : > { %22001 = vmatpush3.bf16.msra.mxu0 %v30287_v24  ;;  %22043 = vmatprep.subr.bf16.mxu1 %v26475_v9 }
 0x357   : > { %22003 = vmatprep.subr.bf16.mxu0 %v30288_v61  ;;  %v9645_v61 = vand.u32 4294901760, %v26921_v46 }
 0x358   : > { %v19010_v8 = vpop.f32.mrb[18].mxu0 }
 0x359   : > { %v19011_v30 = vpop.f32.mrb[19].mxu0  ;;  %22045 = vmatpush3.bf16.msra.mxu1 %v26482_v62 }
 0x35a   : > { %v19012_v44 = vadd.f32 %v19011_v30, %v19010_v8  ;;  %22005 = vmatpush3.bf16.msra.mxu0 %v30289_v33  ;;  %22079 = vmatprep.subr.bf16.mxu1 %v30291_v19  ;;  %v30294_v8 = vld [vmem:[#allocation113_spill] sm:$0xff]  ;;  %v30295_v30 = vld [vmem:[#allocation15_spill] sm:$0xff]  ;;  %v30298_v19 = vld [vmem:[#allocation26_spill] sm:$0xff] }
 0x35b   : > { %22007 = vmatprep.subr.bf16.mxu0 %v30290_v39  ;;  %v9646_v39 = vsub.f32 %v26921_v46, %v9645_v61 }
 0x35c   : > { %v7416_v24 = vadd.f32 %v19012_v44, %v7278_v32  ;;  %9530 = vmatmul.mubr.f32.vlgmr.msra.gmra.mrb[32].mxu1 %v26834_v13  ;;  %v30296_v32 = vld [vmem:[#allocation117_spill] sm:$0xff]  ;;  %v30297_v44 = vld [vmem:[#allocation24_spill] sm:$0xff] }
 0x35d   : > { %22081 = vmatpush3.bf16.msra.mxu1 %v30293_v50  ;;  %9884 = vmatprep.mubr.f32.mxu1 %v26913_v41  ;;  %v30310_v50 = vld [vmem:[#allocation75_spill] sm:$0xff] }
 0x35e   : > { %22009 = vmatpush3.bf16.msra.mxu0 %v30292_v57  ;;  %v7524_v14 = vadd.f32 %v19047_v40, %v7416_v24  ;;  %22083 = vmatprep.subr.bf16.mxu1 %v30295_v30  ;;  %v9647_v57 = vand.u32 4294901760, %v9646_v39  ;;  %v30299_v24 = vld [vmem:[#allocation31_spill] sm:$0xff]  ;;  %v30300_v40 = vld [vmem:[#allocation34_spill] sm:$0xff] }
 0x35f   : > { %22011 = vmatprep.subr.bf16.mxu0 %v30294_v8  ;;  %v30303_v39 = vld [vmem:[#allocation54_spill] sm:$0xff] }
 0x361   : > { %22085 = vmatpush3.bf16.msra.mxu1 %v30297_v44  ;;  %v30302_v44 = vld [vmem:[#allocation47_spill] sm:$0xff] }
 0x362   : > { %22013 = vmatpush3.bf16.msra.mxu0 %v30296_v32  ;;  %22087 = vmatprep.subr.bf16.mxu1 %v30298_v19  ;;  %v30301_v32 = vld [vmem:[#allocation39_spill] sm:$0xff]  ;;  %v30305_v19 = vld [vmem:[#allocation64_spill] sm:$0xff] }
 0x363   : > { %22047 = vmatprep.subr.bf16.mxu0 %v30200_v28 }
 0x365   : > { %9426 = vmatmul.mubr.f32.vlgmr.msra.gmra.mrb[32].mxu0 %v26834_v13  ;;  %22089 = vmatpush3.bf16.msra.mxu1 %v30299_v24 }
 0x366   : > { %22049 = vmatpush3.bf16.msra.mxu0 %v30202_v42  ;;  %9648 = vmatprep.mubr.f32.mxu0 %v9647_v57  ;;  %v30304_v57 = vld [vmem:[#allocation61_spill] sm:$0xff] }
 0x367   : > { %22051 = vmatprep.subr.bf16.mxu0 %v30204_v48  ;;  %22091 = vmatprep.subr.bf16.mxu1 %v30300_v40 }
 0x369   : > { %22093 = vmatpush3.bf16.msra.mxu1 %v30301_v32  ;;  %v30306_v32 = vld [vmem:[#allocation49_spill] sm:$0xff] }
 0x36a   : > { %22053 = vmatpush3.bf16.msra.mxu0 %v30206_v1  ;;  %22095 = vmatprep.subr.bf16.mxu1 %v30302_v44  ;;  %v26956_v30 = vand.u32 4294901760, %v30306_v32  ;;  %v30307_v44 = vld [vmem:[#allocation65_spill] sm:$0xff] }
 0x36b   : > { %22055 = vmatprep.subr.bf16.mxu0 %v30208_v35 }
 0x36d   : > { %22097 = vmatpush3.bf16.msra.mxu1 %v30303_v39  ;;  %v30308_v39 = vld [vmem:[#allocation68_spill] sm:$0xff] }
 0x36e   : > { %22057 = vmatpush3.bf16.msra.mxu0 %v30210_v15  ;;  %22099 = vmatprep.subr.bf16.mxu1 %v30304_v57  ;;  %v26964_v57 = vsub.f32 %v30306_v32, %v26956_v30  ;;  %v30312_v32 = vld [vmem:[#allocation72_spill] sm:$0xff] }
 0x36f   : > { %22059 = vmatprep.subr.bf16.mxu0 %v30212_v60  ;;  %v19115_v13 = vpop.f32.mrb[20].mxu1 }
 0x370   : > { %v19116_v24 = vpop.f32.mrb[21].mxu1 }
 0x371   : > { %v19117_v40 = vadd.f32 %v19116_v24, %v19115_v13  ;;  %22101 = vmatpush3.bf16.msra.mxu1 %v30305_v19  ;;  %v30309_v13 = vld [vmem:[#allocation74_spill] sm:$0xff] }
 0x372   : > { %22061 = vmatpush3.bf16.msra.mxu0 %v30214_v31  ;;  %22103 = vmatprep.subr.bf16.mxu1 %v30307_v44  ;;  %v9651_v44 = vand.u32 4294901760, %v26964_v57 }
 0x373   : > { %22063 = vmatprep.subr.bf16.mxu0 %v30216_v6 }
 0x375   : > { %22105 = vmatpush3.bf16.msra.mxu1 %v30308_v39 }
 0x376   : > { %22065 = vmatpush3.bf16.msra.mxu0 %v30219_v5  ;;  %22107 = vmatprep.subr.bf16.mxu1 %v30309_v13  ;;  %v30324_v13 = vld [vmem:[#allocation91_spill] sm:$0xff] }
 0x377   : > { %22067 = vmatprep.subr.bf16.mxu0 %v30221_v43 }
 0x378   : > { %v19080_v24 = vpop.f32.mrb[20].mxu0 }
 0x379   : > { %v19081_v19 = vpop.f32.mrb[21].mxu0  ;;  %22109 = vmatpush3.bf16.msra.mxu1 %v30310_v50 }
 0x37a   : > { %v19082_v8 = vadd.f32 %v19081_v19, %v19080_v24  ;;  %22069 = vmatpush3.bf16.msra.mxu0 %v30223_v4  ;;  %22143 = vmatprep.subr.bf16.mxu1 %v30200_v28  ;;  %v9652_v19 = vsub.f32 %v26964_v57, %v9651_v44  ;;  %v30317_v24 = vld [vmem:[#allocation80_spill] sm:$0xff] }
 0x37b   : > { %22071 = vmatprep.subr.bf16.mxu0 %v30225_v26 }
 0x37c   : > { %v7692_v39 = vadd.f32 %v19082_v8, %v7524_v14  ;;  %9886 = vmatmul.mubr.f32.vlgmr.msra.gmra.mrb[34].mxu1 %v26956_v30  ;;  %v9653_v14 = vand.u32 4294901760, %v9652_v19  ;;  %v30313_v8 = vld [vmem:[#allocation76_spill] sm:$0xff]  ;;  %v30318_v19 = vld [vmem:[#allocation81_spill] sm:$0xff] }
 0x37d   : > { %22145 = vmatpush3.bf16.msra.mxu1 %v30202_v42  ;;  %10128 = vmatprep.mubr.f32.mxu1 %v9645_v61  ;;  %v30315_v61 = vld [vmem:[#allocation78_spill] sm:$0xff] }
 0x37e   : > { %v26972_v33 = vadd.f32 %v19117_v40, %v7692_v39  ;;  %22073 = vmatpush3.bf16.msra.mxu0 %v30226_v16  ;;  %22147 = vmatprep.subr.bf16.mxu1 %v30204_v48  ;;  %v30314_v40 = vld [vmem:[#allocation77_spill] sm:$0xff]  ;;  %v30316_v39 = vld [vmem:[#allocation79_spill] sm:$0xff] }
 0x37f   : > { %22075 = vmatprep.subr.bf16.mxu0 %v30312_v32 }
 0x380   : > { %30311 = vst [vmem:[#allocation97_spill] sm:$0xff] %v26972_v33 }
 0x381   : > { %22149 = vmatpush3.bf16.msra.mxu1 %v30206_v1 }
 0x382   : > { %22077 = vmatpush3.bf16.msra.mxu0 %v30228_v12  ;;  %22151 = vmatprep.subr.bf16.mxu1 %v30208_v35 }
 0x383   : > { %22111 = vmatprep.subr.bf16.mxu0 %v30313_v8 }
 0x385   : > { %9654 = vmatmul.mubr.f32.vlgmr.msra.gmra.mrb[34].mxu0 %v9653_v14  ;;  %22153 = vmatpush3.bf16.msra.mxu1 %v30210_v15  ;;  %v30319_v14 = vld [vmem:[#allocation82_spill] sm:$0xff] }
 0x386   : > { %22113 = vmatpush3.bf16.msra.mxu0 %v30314_v40  ;;  %10021 = vmatprep.mubr.f32.mxu0 %v26921_v46  ;;  %v30320_v40 = vld [vmem:[#allocation83_spill] sm:$0xff] }
 0x387   : > { %22115 = vmatprep.subr.bf16.mxu0 %v30315_v61  ;;  %22155 = vmatprep.subr.bf16.mxu1 %v30212_v60 }
 0x389   : > { %22157 = vmatpush3.bf16.msra.mxu1 %v30214_v31 }
 0x38a   : > { %22117 = vmatpush3.bf16.msra.mxu0 %v30316_v39  ;;  %22159 = vmatprep.subr.bf16.mxu1 %v30216_v6  ;;  %v30321_v39 = vld [vmem:[#allocation87_spill] sm:$0xff] }
 0x38b   : > { %22119 = vmatprep.subr.bf16.mxu0 %v30317_v24  ;;  %v30322_v24 = vld [vmem:[#allocation89_spill] sm:$0xff] }
 0x38d   : > { %22161 = vmatpush3.bf16.msra.mxu1 %v30219_v5 }
 0x38e   : > { %22121 = vmatpush3.bf16.msra.mxu0 %v30318_v19  ;;  %22163 = vmatprep.subr.bf16.mxu1 %v30221_v43  ;;  %v30323_v19 = vld [vmem:[#allocation90_spill] sm:$0xff] }
 0x38f   : > { %22123 = vmatprep.subr.bf16.mxu0 %v30319_v14  ;;  %v19185_v46 = vpop.f32.mrb[22].mxu1 }
 0x390   : > { %v19186_v61 = vpop.f32.mrb[23].mxu1 }
 0x391   : > { %v19187_v8 = vadd.f32 %v19186_v61, %v19185_v46  ;;  %22165 = vmatpush3.bf16.msra.mxu1 %v30223_v4  ;;  %v30325_v61 = vld [vmem:[#allocation92_spill] sm:$0xff] }
 0x392   : > { %22125 = vmatpush3.bf16.msra.mxu0 %v30320_v40  ;;  %22167 = vmatprep.subr.bf16.mxu1 %v30225_v26 }
 0x393   : > { %22127 = vmatprep.subr.bf16.mxu0 %v30321_v39 }
 0x395   : > { %22169 = vmatpush3.bf16.msra.mxu1 %v30226_v16 }
 0x396   : > { %22129 = vmatpush3.bf16.msra.mxu0 %v30322_v24  ;;  %22171 = vmatprep.subr.bf16.mxu1 %v30312_v32  ;;  %v30326_v24 = vld [vmem:[#allocation93_spill] sm:$0xff] }
 0x397   : > { %22131 = vmatprep.subr.bf16.mxu0 %v30323_v19  ;;  %v30327_v19 = vld [vmem:[#allocation94_spill] sm:$0xff] }
 0x398   : > { %v19150_v14 = vpop.f32.mrb[22].mxu0 }
 0x399   : > { %v19151_v33 = vpop.f32.mrb[23].mxu0  ;;  %22173 = vmatpush3.bf16.msra.mxu1 %v30228_v12 }
 0x39a   : > { %v19152_v50 = vadd.f32 %v19151_v33, %v19150_v14  ;;  %22133 = vmatpush3.bf16.msra.mxu0 %v30324_v13  ;;  %22207 = vmatprep.subr.bf16.mxu1 %v30200_v28  ;;  %v30328_v33 = vld [vmem:[#allocation95_spill] sm:$0xff] }
 0x39b   : > { %22135 = vmatprep.subr.bf16.mxu0 %v30325_v61  ;;  %v30329_v14 = vld [vmem:[#allocation111_spill] sm:$0xff] }
 0x39c   : > { %v8152_v46 = vadd.f32 %v19187_v8, %v19152_v50  ;;  %10132 = vmatmul.mubr.f32.vlgmr.msra.gmra.mrb[36].mxu1 %v9651_v44  ;;  %v30330_v50 = vld [vmem:[#allocation118_spill] sm:$0xff]  ;;  %v30331_v44 = vld [vmem:[#allocation119_spill] sm:$0xff] }
 0x39d   : > { %22209 = vmatpush3.bf16.msra.mxu1 %v30202_v42  ;;  %10402 = vmatprep.mubr.f32.mxu1 %v26913_v41  ;;  %v30332_v8 = vld [vmem:[#allocation122_spill] sm:$0xff] }
 0x39e   : > { %22137 = vmatpush3.bf16.msra.mxu0 %v30326_v24  ;;  %22211 = vmatprep.subr.bf16.mxu1 %v30204_v48 }
 0x39f   : > { %22139 = vmatprep.subr.bf16.mxu0 %v30327_v19 }
 0x3a1   : > { %22213 = vmatpush3.bf16.msra.mxu1 %v30206_v1 }
 0x3a2   : > { %22141 = vmatpush3.bf16.msra.mxu0 %v30328_v33  ;;  %22215 = vmatprep.subr.bf16.mxu1 %v30208_v35  ;;  %v30333_v33 = vld [vmem:[#allocation17_spill] sm:$0xff] }
 0x3a3   : > { %22175 = vmatprep.subr.bf16.mxu0 %v30329_v14  ;;  %v30334_v14 = vld [vmem:[#allocation19_spill] sm:$0xff] }
 0x3a5   : > { %10024 = vmatmul.mubr.f32.vlgmr.msra.gmra.mrb[36].mxu0 %v26964_v57  ;;  %22217 = vmatpush3.bf16.msra.mxu1 %v30210_v15  ;;  %v30335_v57 = vld [vmem:[#allocation21_spill] sm:$0xff] }
 0x3a6   : > { %22177 = vmatpush3.bf16.msra.mxu0 %v30330_v50  ;;  %10298 = vmatprep.mubr.f32.mxu0 %v26913_v41  ;;  %v30336_v50 = vld [vmem:[#allocation23_spill] sm:$0xff] }
 0x3a7   : > { %22179 = vmatprep.subr.bf16.mxu0 %v30331_v44  ;;  %22219 = vmatprep.subr.bf16.mxu1 %v30212_v60 }
 0x3a9   : > { %22221 = vmatpush3.bf16.msra.mxu1 %v30214_v31 }
 0x3aa   : > { %22181 = vmatpush3.bf16.msra.mxu0 %v30332_v8  ;;  %22223 = vmatprep.subr.bf16.mxu1 %v30216_v6  ;;  %v30337_v8 = vld [vmem:[#allocation25_spill] sm:$0xff] }
 0x3ab   : > { %22183 = vmatprep.subr.bf16.mxu0 %v30333_v33  ;;  %v30338_v33 = vld [vmem:[#allocation45_spill] sm:$0xff] }
 0x3ac   : > { %v27037_v24 = vand.u32 4294901760, %v30338_v33 }
 0x3ad   : > { %22225 = vmatpush3.bf16.msra.mxu1 %v30219_v5 }
 0x3ae   : > { %22185 = vmatpush3.bf16.msra.mxu0 %v30334_v14  ;;  %22227 = vmatprep.subr.bf16.mxu1 %v30221_v43  ;;  %v30339_v14 = vld [vmem:[#allocation27_spill] sm:$0xff] }
 0x3af   : > { %22187 = vmatprep.subr.bf16.mxu0 %v30335_v57  ;;  %v19255_v41 = vpop.f32.mrb[24].mxu1  ;;  %v30340_v57 = vld [vmem:[#allocation35_spill] sm:$0xff] }
 0x3b0   : > { %v19256_v44 = vpop.f32.mrb[25].mxu1 }
 0x3b1   : > { %v19257_v19 = vadd.f32 %v19256_v44, %v19255_v41  ;;  %22229 = vmatpush3.bf16.msra.mxu1 %v30223_v4  ;;  %v27045_v44 = vsub.f32 %v30338_v33, %v27037_v24  ;;  %v30342_v33 = vld [vmem:[#allocation67_spill] sm:$0xff] }
 0x3b2   : > { %22189 = vmatpush3.bf16.msra.mxu0 %v30336_v50  ;;  %22231 = vmatprep.subr.bf16.mxu1 %v30225_v26 }
 0x3b3   : > { %22191 = vmatprep.subr.bf16.mxu0 %v30337_v8 }
 0x3b5   : > { %22233 = vmatpush3.bf16.msra.mxu1 %v30226_v16 }
 0x3b6   : > { %22193 = vmatpush3.bf16.msra.mxu0 %v30339_v14  ;;  %22235 = vmatprep.subr.bf16.mxu1 %v30312_v32 }
 0x3b7   : > { %22195 = vmatprep.subr.bf16.mxu0 %v30340_v57  ;;  %v10507_v57 = vand.u32 4294901760, %v27045_v44 }
 0x3b8   : > { %v19220_v61 = vpop.f32.mrb[24].mxu0 }
 0x3b9   : > { %v19221_v41 = vpop.f32.mrb[25].mxu0  ;;  %22237 = vmatpush3.bf16.msra.mxu1 %v30228_v12 }
 0x3ba   : > { %v19222_v8 = vadd.f32 %v19221_v41, %v19220_v61  ;;  %22197 = vmatpush3.bf16.msra.mxu0 %v30257_v38  ;;  %22271 = vmatprep.subr.bf16.mxu1 %v30259_v59  ;;  %v10508_v61 = vsub.f32 %v27045_v44, %v10507_v57 }
 0x3bb   : > { %22199 = vmatprep.subr.bf16.mxu0 %v30258_v34 }
 0x3bc   : > { %v8290_v14 = vadd.f32 %v19222_v8, %v8152_v46  ;;  %10404 = vmatmul.mubr.f32.vlgmr.msra.gmra.mrb[38].mxu1 %v26956_v30  ;;  %v30341_v46 = vld [vmem:[#allocation66_spill] sm:$0xff]  ;;  %v30343_v8 = vld [vmem:[#allocation69_spill] sm:$0xff]  ;;  %v10509_v41 = vand.u32 4294901760, %v10508_v61  ;;  %v30349_v61 = vld [vmem:[#allocation128_spill] sm:$0xff] }
 0x3bd   : > { %22273 = vmatpush3.bf16.msra.mxu1 %v26080_v49  ;;  %10746 = vmatprep.mubr.f32.mxu1 %v27037_v24 }
 0x3be   : > { %22201 = vmatpush3.bf16.msra.mxu0 %v26078_v27  ;;  %v8398_v50 = vadd.f32 %v19257_v19, %v8290_v14  ;;  %22275 = vmatprep.subr.bf16.mxu1 %v30260_v37  ;;  %v30344_v19 = vld [vmem:[#allocation123_spill] sm:$0xff]  ;;  %v30345_v14 = vld [vmem:[#allocation124_spill] sm:$0xff] }
 0x3bf   : > { %22203 = vmatprep.subr.bf16.mxu0 %v26122_v10 }
 0x3c1   : > { %22277 = vmatpush3.bf16.msra.mxu1 %v30342_v33  ;;  %v30347_v33 = vld [vmem:[#allocation126_spill] sm:$0xff] }
 0x3c2   : > { %22205 = vmatpush3.bf16.msra.mxu0 %v30341_v46  ;;  %22279 = vmatprep.subr.bf16.mxu1 %v30343_v8  ;;  %v30346_v46 = vld [vmem:[#allocation125_spill] sm:$0xff] }
 0x3c3   : > { %22239 = vmatprep.subr.bf16.mxu0 %v26116_v54  ;;  %v30350_v8 = vld [vmem:[#allocation129_spill] sm:$0xff] }
 0x3c5   : > { %10300 = vmatmul.mubr.f32.vlgmr.msra.gmra.mrb[38].mxu0 %v26956_v30  ;;  %22281 = vmatpush3.bf16.msra.mxu1 %v30344_v19  ;;  %v30348_v30 = vld [vmem:[#allocation127_spill] sm:$0xff] }
 0x3c6   : > { %22241 = vmatpush3.bf16.msra.mxu0 %v26297_v36  ;;  %10510 = vmatprep.mubr.f32.mxu0 %v10509_v41 }
 0x3c7   : > { %22243 = vmatprep.subr.bf16.mxu0 %v26303_v20  ;;  %22283 = vmatprep.subr.bf16.mxu1 %v30345_v14 }
 0x3c9   : > { %22285 = vmatpush3.bf16.msra.mxu1 %v30346_v46  ;;  %v30351_v46 = vld [vmem:[#allocation42_spill] sm:$0xff] }
 0x3ca   : > { %22245 = vmatpush3.bf16.msra.mxu0 %v26329_v45  ;;  %22287 = vmatprep.subr.bf16.mxu1 %v30347_v33  ;;  %v27080_v37 = vand.u32 4294901760, %v30351_v46  ;;  %v30352_v33 = vld [vmem:[#allocation130_spill] sm:$0xff] }
 0x3cb   : > { %22247 = vmatprep.subr.bf16.mxu0 %v26343_v11 }
 0x3cd   : > { %22289 = vmatpush3.bf16.msra.mxu1 %v30348_v30  ;;  %v30353_v30 = vld [vmem:[#allocation60_spill] sm:$0xff] }
 0x3ce   : > { %22249 = vmatpush3.bf16.msra.mxu0 %v26362_v21  ;;  %22291 = vmatprep.subr.bf16.mxu1 %v30349_v61  ;;  %v27088_v61 = vsub.f32 %v30351_v46, %v27080_v37 }
 0x3cf   : > { %22251 = vmatprep.subr.bf16.mxu0 %v26368_v55  ;;  %v19325_v41 = vpop.f32.mrb[26].mxu1 }
 0x3d0   : > { %v19326_v19 = vpop.f32.mrb[27].mxu1 }
 0x3d1   : > { %v19327_v14 = vadd.f32 %v19326_v19, %v19325_v41  ;;  %22293 = vmatpush3.bf16.msra.mxu1 %v30350_v8 }
 0x3d2   : > { %22253 = vmatpush3.bf16.msra.mxu0 %v26394_v3  ;;  %22295 = vmatprep.subr.bf16.mxu1 %v30352_v33  ;;  %v10513_v33 = vand.u32 4294901760, %v27088_v61 }
 0x3d3   : > { %22255 = vmatprep.subr.bf16.mxu0 %v26400_v2 }
 0x3d5   : > { %22297 = vmatpush3.bf16.msra.mxu1 %v30353_v30 }
 0x3d6   : > { %22257 = vmatpush3.bf16.msra.mxu0 %v26420_v25  ;;  %22299 = vmatprep.subr.bf16.mxu1 %v30270_v18 }
 0x3d7   : > { %22259 = vmatprep.subr.bf16.mxu0 %v26426_v63 }
 0x3d8   : > { %v19290_v19 = vpop.f32.mrb[26].mxu0 }
 0x3d9   : > { %v19291_v41 = vpop.f32.mrb[27].mxu0  ;;  %22301 = vmatpush3.bf16.msra.mxu1 %v30271_v7 }
 0x3da   : > { %v19292_v8 = vadd.f32 %v19291_v41, %v19290_v19  ;;  %22261 = vmatpush3.bf16.msra.mxu0 %v26443_v56  ;;  %22335 = vmatprep.subr.bf16.mxu1 %v26116_v54  ;;  %v10514_v19 = vsub.f32 %v27088_v61, %v10513_v33  ;;  %v30358_v41 = vld [vmem:[#allocation101_spill] sm:$0xff] }
 0x3db   : > { %22263 = vmatprep.subr.bf16.mxu0 %v26450_v23 }
 0x3dc   : > { %v8566_v30 = vadd.f32 %v19292_v8, %v8398_v50  ;;  %10748 = vmatmul.mubr.f32.vlgmr.msra.gmra.mrb[40].mxu1 %v27080_v37  ;;  %v10515_v50 = vand.u32 4294901760, %v10514_v19  ;;  %v30354_v8 = vld [vmem:[#allocation96_spill] sm:$0xff]  ;;  %v30359_v19 = vld [vmem:[#allocation102_spill] sm:$0xff] }
 0x3dd   : > { %22337 = vmatpush3.bf16.msra.mxu1 %v26297_v36  ;;  %10990 = vmatprep.mubr.f32.mxu1 %v10507_v57  ;;  %v30356_v57 = vld [vmem:[#allocation99_spill] sm:$0xff] }
 0x3de   : > { %22265 = vmatpush3.bf16.msra.mxu0 %v26465_v29  ;;  %v8670_v46 = vadd.f32 %v19327_v14, %v8566_v30  ;;  %22339 = vmatprep.subr.bf16.mxu1 %v26303_v20  ;;  %v30355_v14 = vld [vmem:[#allocation98_spill] sm:$0xff]  ;;  %v30357_v30 = vld [vmem:[#allocation100_spill] sm:$0xff] }
 0x3df   : > { %22267 = vmatprep.subr.bf16.mxu0 %v26475_v9 }
 0x3e1   : > { %22341 = vmatpush3.bf16.msra.mxu1 %v26329_v45 }
 0x3e2   : > { %22269 = vmatpush3.bf16.msra.mxu0 %v26482_v62  ;;  %22343 = vmatprep.subr.bf16.mxu1 %v26343_v11 }
 0x3e3   : > { %22303 = vmatprep.subr.bf16.mxu0 %v30354_v8 }
 0x3e5   : > { %10516 = vmatmul.mubr.f32.vlgmr.msra.gmra.mrb[40].mxu0 %v10515_v50  ;;  %22345 = vmatpush3.bf16.msra.mxu1 %v26362_v21  ;;  %v30360_v50 = vld [vmem:[#allocation103_spill] sm:$0xff] }
 0x3e6   : > { %22305 = vmatpush3.bf16.msra.mxu0 %v30355_v14  ;;  %10883 = vmatprep.mubr.f32.mxu0 %v27045_v44 }
 0x3e7   : > { %22307 = vmatprep.subr.bf16.mxu0 %v30356_v57  ;;  %22347 = vmatprep.subr.bf16.mxu1 %v26368_v55 }
 0x3e9   : > { %22349 = vmatpush3.bf16.msra.mxu1 %v26394_v3 }
 0x3ea   : > { %22309 = vmatpush3.bf16.msra.mxu0 %v30357_v30  ;;  %22351 = vmatprep.subr.bf16.mxu1 %v26400_v2 }
 0x3eb   : > { %22311 = vmatprep.subr.bf16.mxu0 %v30358_v41 }
 0x3ed   : > { %22353 = vmatpush3.bf16.msra.mxu1 %v26420_v25 }
 0x3ee   : > { %22313 = vmatpush3.bf16.msra.mxu0 %v30359_v19  ;;  %22355 = vmatprep.subr.bf16.mxu1 %v26426_v63 }
 0x3ef   : > { %22315 = vmatprep.subr.bf16.mxu0 %v30360_v50  ;;  %v19395_v44 = vpop.f32.mrb[28].mxu1 }
 0x3f0   : > { %v19396_v57 = vpop.f32.mrb[29].mxu1 }
 0x3f1   : > { %v19397_v14 = vadd.f32 %v19396_v57, %v19395_v44  ;;  %22357 = vmatpush3.bf16.msra.mxu1 %v26443_v56 }
 0x3f2   : > { %22317 = vmatpush3.bf16.msra.mxu0 %v30279_v51  ;;  %22359 = vmatprep.subr.bf16.mxu1 %v26450_v23 }
 0x3f3   : > { %22319 = vmatprep.subr.bf16.mxu0 %v30280_v0 }
 0x3f5   : > { %22361 = vmatpush3.bf16.msra.mxu1 %v26465_v29 }
 0x3f6   : > { %22321 = vmatpush3.bf16.msra.mxu0 %v26548_v17  ;;  %22363 = vmatprep.subr.bf16.mxu1 %v26475_v9 }
 0x3f7   : > { %22323 = vmatprep.subr.bf16.mxu0 %v26554_v53 }
 0x3f8   : > { %v19360_v50 = vpop.f32.mrb[28].mxu0 }
 0x3f9   : > { %v19361_v19 = vpop.f32.mrb[29].mxu0  ;;  %22365 = vmatpush3.bf16.msra.mxu1 %v26482_v62 }
 0x3fa   : > { %v19362_v41 = vadd.f32 %v19361_v19, %v19360_v50  ;;  %22325 = vmatpush3.bf16.msra.mxu0 %v26560_v22  ;;  %22399 = vmatprep.subr.bf16.mxu1 %v26116_v54  ;;  %v30361_v19 = vld [vmem:[#allocation116_spill] sm:$0xff]  ;;  %v30377_v22 = vld [vmem:[#allocation110_spill] sm:$0xff] }
 0x3fb   : > { %22327 = vmatprep.subr.bf16.mxu0 %v26566_v47  ;;  %v30362_v50 = vld [vmem:[#allocation120_spill] sm:$0xff]  ;;  %v30376_v47 = vld [vmem:[#allocation13_spill] sm:$0xff] }
 0x3fc   : > { %v8782_v57 = vadd.f32 %v19362_v41, %v8670_v46  ;;  %10994 = vmatmul.mubr.f32.vlgmr.msra.gmra.mrb[42].mxu1 %v10513_v33  ;;  %v30363_v33 = vld [vmem:[#allocation121_spill] sm:$0xff]  ;;  %v30364_v46 = vld [vmem:[#allocation18_spill] sm:$0xff] }
 0x3fd   : > { %22401 = vmatpush3.bf16.msra.mxu1 %v26297_v36  ;;  %11264 = vmatprep.mubr.f32.mxu1 %v27037_v24  ;;  %v30366_v41 = vld [vmem:[#allocation30_spill] sm:$0xff] }
 0x3fe   : > { %22329 = vmatpush3.bf16.msra.mxu0 %v26572_v52  ;;  %v9014_v44 = vadd.f32 %v19397_v14, %v8782_v57  ;;  %22403 = vmatprep.subr.bf16.mxu1 %v26303_v20  ;;  %v30365_v14 = vld [vmem:[#allocation29_spill] sm:$0xff] }
 0x3ff   : > { %22331 = vmatprep.subr.bf16.mxu0 %v26579_v58  ;;  %v30367_v57 = vld [vmem:[#allocation33_spill] sm:$0xff] }
 0x400   : > { %v30375_v52 = vld [vmem:[#allocation109_spill] sm:$0xff] }
 0x401   : > { %22405 = vmatpush3.bf16.msra.mxu1 %v26329_v45 }
 0x402   : > { %22333 = vmatpush3.bf16.msra.mxu0 %v30361_v19  ;;  %22407 = vmatprep.subr.bf16.mxu1 %v26343_v11 }
 0x403   : > { %22367 = vmatprep.subr.bf16.mxu0 %v30362_v50 }
 0x405   : > { %10886 = vmatmul.mubr.f32.vlgmr.msra.gmra.mrb[42].mxu0 %v27088_v61  ;;  %22409 = vmatpush3.bf16.msra.mxu1 %v26362_v21  ;;  %v30368_v61 = vld [vmem:[#allocation55_spill] sm:$0xff] }
 0x406   : > { %22369 = vmatpush3.bf16.msra.mxu0 %v30363_v33  ;;  %11160 = vmatprep.mubr.f32.mxu0 %v27037_v24  ;;  %v30369_v33 = vld [vmem:[#allocation57_spill] sm:$0xff] }
 0x407   : > { %22371 = vmatprep.subr.bf16.mxu0 %v30364_v46  ;;  %22411 = vmatprep.subr.bf16.mxu1 %v26368_v55 }
 0x409   : > { %22413 = vmatpush3.bf16.msra.mxu1 %v26394_v3 }
 0x40a   : > { %22373 = vmatpush3.bf16.msra.mxu0 %v30365_v14  ;;  %22415 = vmatprep.subr.bf16.mxu1 %v26400_v2  ;;  %v30370_v14 = vld [vmem:[#allocation58_spill] sm:$0xff] }
 0x40b   : > { %22375 = vmatprep.subr.bf16.mxu0 %v30366_v41  ;;  %v30371_v41 = vld [vmem:[#allocation50_spill] sm:$0xff] }
 0x40c   : > { %v27159_v19 = vand.u32 4294901760, %v30371_v41 }
 0x40d   : > { %22417 = vmatpush3.bf16.msra.mxu1 %v26420_v25 }
 0x40e   : > { %22377 = vmatpush3.bf16.msra.mxu0 %v30367_v57  ;;  %22419 = vmatprep.subr.bf16.mxu1 %v26426_v63  ;;  %v30372_v57 = vld [vmem:[#allocation131_spill] sm:$0xff] }
 0x40f   : > { %22379 = vmatprep.subr.bf16.mxu0 %v30368_v61  ;;  %v19465_v24 = vpop.f32.mrb[30].mxu1  ;;  %v30373_v61 = vld [vmem:[#allocation132_spill] sm:$0xff] }
 0x410   : > { %v19466_v46 = vpop.f32.mrb[31].mxu1 }
 0x411   : > { %v19467_v50 = vadd.f32 %v19466_v46, %v19465_v24  ;;  %22421 = vmatpush3.bf16.msra.mxu1 %v26443_v56  ;;  %v27167_v46 = vsub.f32 %v30371_v41, %v27159_v19  ;;  %v30378_v41 = vld [vmem:[#allocation14_spill] sm:$0xff] }
 0x412   : > { %22381 = vmatpush3.bf16.msra.mxu0 %v30369_v33  ;;  %22423 = vmatprep.subr.bf16.mxu1 %v26450_v23  ;;  %v30374_v33 = vld [vmem:[#allocation108_spill] sm:$0xff] }
 0x413   : > { %22383 = vmatprep.subr.bf16.mxu0 %v30370_v14 }
 0x415   : > { %22425 = vmatpush3.bf16.msra.mxu1 %v26465_v29 }
 0x416   : > { %22385 = vmatpush3.bf16.msra.mxu0 %v30372_v57  ;;  %22427 = vmatprep.subr.bf16.mxu1 %v26475_v9 }
 0x417   : > { %22387 = vmatprep.subr.bf16.mxu0 %v30373_v61  ;;  %v11381_v61 = vand.u32 4294901760, %v27167_v46 }
 0x418   : > { %v19430_v58 = vpop.f32.mrb[30].mxu0 }
 0x419   : > { %v19431_v24 = vpop.f32.mrb[31].mxu0  ;;  %22429 = vmatpush3.bf16.msra.mxu1 %v26482_v62 }
 0x41a   : > { %v19432_v14 = vadd.f32 %v19431_v24, %v19430_v58  ;;  %22389 = vmatpush3.bf16.msra.mxu0 %v30374_v33  ;;  %22463 = vmatprep.subr.bf16.mxu1 %v30376_v47  ;;  %v30379_v58 = vld [vmem:[#allocation113_spill] sm:$0xff]  ;;  %v30380_v24 = vld [vmem:[#allocation15_spill] sm:$0xff]  ;;  %v30382_v47 = vld [vmem:[#allocation24_spill] sm:$0xff] }
 0x41b   : > { %22391 = vmatprep.subr.bf16.mxu0 %v30375_v52  ;;  %v11382_v52 = vsub.f32 %v27167_v46, %v11381_v61 }
 0x41c   : > { %v9152_v57 = vadd.f32 %v19432_v14, %v9014_v44  ;;  %11266 = vmatmul.mubr.f32.vlgmr.msra.gmra.mrb[44].mxu1 %v27080_v37  ;;  %v30381_v44 = vld [vmem:[#allocation117_spill] sm:$0xff]  ;;  %v30383_v14 = vld [vmem:[#allocation26_spill] sm:$0xff] }
 0x41d   : > { %22465 = vmatpush3.bf16.msra.mxu1 %v30378_v41  ;;  %11620 = vmatprep.mubr.f32.mxu1 %v27159_v19  ;;  %v30386_v41 = vld [vmem:[#allocation39_spill] sm:$0xff] }
 0x41e   : > { %22393 = vmatpush3.bf16.msra.mxu0 %v30377_v22  ;;  %v9260_v53 = vadd.f32 %v19467_v50, %v9152_v57  ;;  %22467 = vmatprep.subr.bf16.mxu1 %v30380_v24  ;;  %v11383_v22 = vand.u32 4294901760, %v11382_v52  ;;  %v30384_v50 = vld [vmem:[#allocation31_spill] sm:$0xff]  ;;  %v30385_v57 = vld [vmem:[#allocation34_spill] sm:$0xff] }
 0x41f   : > { %22395 = vmatprep.subr.bf16.mxu0 %v30379_v58  ;;  %v30387_v24 = vld [vmem:[#allocation47_spill] sm:$0xff]  ;;  %v30388_v52 = vld [vmem:[#allocation54_spill] sm:$0xff] }
 0x420   : > { %v30395_v58 = vld [vmem:[#allocation75_spill] sm:$0xff] }
 0x421   : > { %22469 = vmatpush3.bf16.msra.mxu1 %v30382_v47 }
 0x422   : > { %22397 = vmatpush3.bf16.msra.mxu0 %v30381_v44  ;;  %22471 = vmatprep.subr.bf16.mxu1 %v30383_v14 }
 0x423   : > { %22431 = vmatprep.subr.bf16.mxu0 %v30200_v28 }
 0x425   : > { %11162 = vmatmul.mubr.f32.vlgmr.msra.gmra.mrb[44].mxu0 %v27080_v37  ;;  %22473 = vmatpush3.bf16.msra.mxu1 %v30384_v50  ;;  %v30390_v50 = vld [vmem:[#allocation64_spill] sm:$0xff] }
 0x426   : > { %22433 = vmatpush3.bf16.msra.mxu0 %v30202_v42  ;;  %11384 = vmatprep.mubr.f32.mxu0 %v11383_v22  ;;  %v30389_v22 = vld [vmem:[#allocation61_spill] sm:$0xff] }
 0x427   : > { %22435 = vmatprep.subr.bf16.mxu0 %v30204_v48  ;;  %22475 = vmatprep.subr.bf16.mxu1 %v30385_v57  ;;  %v30391_v57 = vld [vmem:[#allocation46_spill] sm:$0xff] }
 0x429   : > { %22477 = vmatpush3.bf16.msra.mxu1 %v30386_v41  ;;  %v27202_v41 = vand.u32 4294901760, %v30391_v57 }
 0x42a   : > { %22437 = vmatpush3.bf16.msra.mxu0 %v30206_v1  ;;  %22479 = vmatprep.subr.bf16.mxu1 %v30387_v24  ;;  %v30392_v24 = vld [vmem:[#allocation65_spill] sm:$0xff] }
 0x42b   : > { %22439 = vmatprep.subr.bf16.mxu0 %v30208_v35 }
 0x42d   : > { %22481 = vmatpush3.bf16.msra.mxu1 %v30388_v52  ;;  %v30393_v52 = vld [vmem:[#allocation68_spill] sm:$0xff] }
 0x42e   : > { %22441 = vmatpush3.bf16.msra.mxu0 %v30210_v15  ;;  %22483 = vmatprep.subr.bf16.mxu1 %v30389_v22  ;;  %v27210_v22 = vsub.f32 %v30391_v57, %v27202_v41 }
 0x42f   : > { %22443 = vmatprep.subr.bf16.mxu0 %v30212_v60  ;;  %v19535_v37 = vpop.f32.mrb[32].mxu1 }
 0x430   : > { %v19536_v47 = vpop.f32.mrb[33].mxu1 }
 0x431   : > { %v19537_v14 = vadd.f32 %v19536_v47, %v19535_v37  ;;  %22485 = vmatpush3.bf16.msra.mxu1 %v30390_v50  ;;  %v30394_v47 = vld [vmem:[#allocation74_spill] sm:$0xff] }
 0x432   : > { %22445 = vmatpush3.bf16.msra.mxu0 %v30214_v31  ;;  %22487 = vmatprep.subr.bf16.mxu1 %v30392_v24  ;;  %v11387_v24 = vand.u32 4294901760, %v27210_v22 }
 0x433   : > { %22447 = vmatprep.subr.bf16.mxu0 %v30216_v6 }
 0x434   : > { %v11388_v57 = vsub.f32 %v27210_v22, %v11387_v24 }
 0x435   : > { %22489 = vmatpush3.bf16.msra.mxu1 %v30393_v52 }
 0x436   : > { %22449 = vmatpush3.bf16.msra.mxu0 %v30219_v5  ;;  %22491 = vmatprep.subr.bf16.mxu1 %v30394_v47  ;;  %v30400_v47 = vld [vmem:[#allocation79_spill] sm:$0xff] }
 0x437   : > { %22451 = vmatprep.subr.bf16.mxu0 %v30221_v43 }
 0x438   : > { %v19500_v37 = vpop.f32.mrb[32].mxu0 }
 0x439   : > { %v19501_v50 = vpop.f32.mrb[33].mxu0  ;;  %22493 = vmatpush3.bf16.msra.mxu1 %v30395_v58  ;;  %v30396_v58 = vld [vmem:[#allocation97_spill] sm:$0xff] }
 0x43a   : > { %v19502_v44 = vadd.f32 %v19501_v50, %v19500_v37  ;;  %22453 = vmatpush3.bf16.msra.mxu0 %v30223_v4  ;;  %22527 = vmatprep.subr.bf16.mxu1 %v30200_v28  ;;  %v30401_v50 = vld [vmem:[#allocation80_spill] sm:$0xff] }
 0x43b   : > { %22455 = vmatprep.subr.bf16.mxu0 %v30225_v26 }
 0x43c   : > { %v9428_v52 = vadd.f32 %v19502_v44, %v9260_v53  ;;  %11622 = vmatmul.mubr.f32.vlgmr.msra.gmra.mrb[46].mxu1 %v27202_v41  ;;  %v11389_v53 = vand.u32 4294901760, %v11388_v57  ;;  %v30397_v44 = vld [vmem:[#allocation76_spill] sm:$0xff]  ;;  %v30403_v57 = vld [vmem:[#allocation82_spill] sm:$0xff] }
 0x43d   : > { %22529 = vmatpush3.bf16.msra.mxu1 %v30202_v42  ;;  %11864 = vmatprep.mubr.f32.mxu1 %v11381_v61  ;;  %v30398_v61 = vld [vmem:[#allocation77_spill] sm:$0xff] }
 0x43e   : > { %v27218_v33 = vadd.f32 %v19537_v14, %v9428_v52  ;;  %22457 = vmatpush3.bf16.msra.mxu0 %v30226_v16  ;;  %22531 = vmatprep.subr.bf16.mxu1 %v30204_v48  ;;  %v30399_v14 = vld [vmem:[#allocation78_spill] sm:$0xff]  ;;  %v30402_v52 = vld [vmem:[#allocation81_spill] sm:$0xff] }
 0x43f   : > { %22459 = vmatprep.subr.bf16.mxu0 %v30312_v32 }
 0x440   : > { %v13007_v37 = vmax.f32 %v30396_v58, %v27218_v33 }
 0x441   : > { %22533 = vmatpush3.bf16.msra.mxu1 %v30206_v1 }
 0x442   : > { %22461 = vmatpush3.bf16.msra.mxu0 %v30228_v12  ;;  %22535 = vmatprep.subr.bf16.mxu1 %v30208_v35 }
 0x443   : > { %22495 = vmatprep.subr.bf16.mxu0 %v30397_v44 }
 0x445   : > { %11390 = vmatmul.mubr.f32.vlgmr.msra.gmra.mrb[46].mxu0 %v11389_v53  ;;  %22537 = vmatpush3.bf16.msra.mxu1 %v30210_v15 }
 0x446   : > { %22497 = vmatpush3.bf16.msra.mxu0 %v30398_v61  ;;  %11757 = vmatprep.mubr.f32.mxu0 %v27167_v46  ;;  %v30404_v61 = vld [vmem:[#allocation89_spill] sm:$0xff] }
 0x447   : > { %22499 = vmatprep.subr.bf16.mxu0 %v30399_v14  ;;  %22539 = vmatprep.subr.bf16.mxu1 %v30212_v60  ;;  %v30405_v14 = vld [vmem:[#allocation90_spill] sm:$0xff] }
 0x449   : > { %22541 = vmatpush3.bf16.msra.mxu1 %v30214_v31 }
 0x44a   : > { %22501 = vmatpush3.bf16.msra.mxu0 %v30400_v47  ;;  %22543 = vmatprep.subr.bf16.mxu1 %v30216_v6 }
 0x44b   : > { %22503 = vmatprep.subr.bf16.mxu0 %v30401_v50 }
 0x44d   : > { %22545 = vmatpush3.bf16.msra.mxu1 %v30219_v5 }
 0x44e   : > { %22505 = vmatpush3.bf16.msra.mxu0 %v30402_v52  ;;  %22547 = vmatprep.subr.bf16.mxu1 %v30221_v43 }
 0x44f   : > { %22507 = vmatprep.subr.bf16.mxu0 %v30403_v57  ;;  %v19605_v46 = vpop.f32.mrb[34].mxu1  ;;  %v30407_v57 = vld [vmem:[#allocation93_spill] sm:$0xff] }
 0x450   : > { %v19606_v53 = vpop.f32.mrb[35].mxu1 }
 0x451   : > { %v19607_v44 = vadd.f32 %v19606_v53, %v19605_v46  ;;  %22549 = vmatpush3.bf16.msra.mxu1 %v30223_v4  ;;  %v30408_v46 = vld [vmem:[#allocation94_spill] sm:$0xff]  ;;  %v30409_v53 = vld [vmem:[#allocation95_spill] sm:$0xff] }
 0x452   : > { %22509 = vmatpush3.bf16.msra.mxu0 %v30320_v40  ;;  %22551 = vmatprep.subr.bf16.mxu1 %v30225_v26  ;;  %v30406_v40 = vld [vmem:[#allocation92_spill] sm:$0xff] }
 0x453   : > { %22511 = vmatprep.subr.bf16.mxu0 %v30321_v39 }
 0x455   : > { %22553 = vmatpush3.bf16.msra.mxu1 %v30226_v16 }
 0x456   : > { %22513 = vmatpush3.bf16.msra.mxu0 %v30404_v61  ;;  %22555 = vmatprep.subr.bf16.mxu1 %v30312_v32  ;;  %v30420_v61 = vld [vmem:[#allocation27_spill] sm:$0xff] }
 0x457   : > { %22515 = vmatprep.subr.bf16.mxu0 %v30405_v14 }
 0x458   : > { %v19570_v47 = vpop.f32.mrb[34].mxu0 }
 0x459   : > { %v19571_v50 = vpop.f32.mrb[35].mxu0  ;;  %22557 = vmatpush3.bf16.msra.mxu1 %v30228_v12 }
 0x45a   : > { %v19572_v52 = vadd.f32 %v19571_v50, %v19570_v47  ;;  %22517 = vmatpush3.bf16.msra.mxu0 %v30324_v13  ;;  %22591 = vmatprep.subr.bf16.mxu1 %v30200_v28  ;;  %v30410_v13 = vld [vmem:[#allocation111_spill] sm:$0xff]  ;;  %v30411_v28 = vld [vmem:[#allocation118_spill] sm:$0xff]  ;;  %v30425_v50 = vld [vmem:[#allocation69_spill] sm:$0xff] }
 0x45b   : > { %22519 = vmatprep.subr.bf16.mxu0 %v30406_v40  ;;  %v30429_v40 = vld [vmem:[#allocation126_spill] sm:$0xff] }
 0x45c   : > { %v9888_v39 = vadd.f32 %v19607_v44, %v19572_v52  ;;  %11868 = vmatmul.mubr.f32.vlgmr.msra.gmra.mrb[48].mxu1 %v11387_v24  ;;  %v30417_v24 = vld [vmem:[#allocation23_spill] sm:$0xff]  ;;  %v30428_v52 = vld [vmem:[#allocation125_spill] sm:$0xff] }
 0x45d   : > { %22593 = vmatpush3.bf16.msra.mxu1 %v30202_v42  ;;  %12138 = vmatprep.mubr.f32.mxu1 %v27159_v19  ;;  %v30412_v42 = vld [vmem:[#allocation119_spill] sm:$0xff] }
 0x45e   : > { %22521 = vmatpush3.bf16.msra.mxu0 %v30407_v57  ;;  %22595 = vmatprep.subr.bf16.mxu1 %v30204_v48  ;;  %v30413_v48 = vld [vmem:[#allocation122_spill] sm:$0xff] }
 0x45f   : > { %22523 = vmatprep.subr.bf16.mxu0 %v30408_v46 }
 0x461   : > { %22597 = vmatpush3.bf16.msra.mxu1 %v30206_v1  ;;  %v30414_v1 = vld [vmem:[#allocation17_spill] sm:$0xff] }
 0x462   : > { %22525 = vmatpush3.bf16.msra.mxu0 %v30409_v53  ;;  %22599 = vmatprep.subr.bf16.mxu1 %v30208_v35  ;;  %v30415_v35 = vld [vmem:[#allocation19_spill] sm:$0xff] }
 0x463   : > { %22559 = vmatprep.subr.bf16.mxu0 %v30410_v13  ;;  %v30432_v13 = vld [vmem:[#allocation129_spill] sm:$0xff] }
 0x465   : > { %11760 = vmatmul.mubr.f32.vlgmr.msra.gmra.mrb[48].mxu0 %v27210_v22  ;;  %22601 = vmatpush3.bf16.msra.mxu1 %v30210_v15  ;;  %v30416_v22 = vld [vmem:[#allocation21_spill] sm:$0xff] }
 0x466   : > { %22561 = vmatpush3.bf16.msra.mxu0 %v30411_v28  ;;  %12034 = vmatprep.mubr.f32.mxu0 %v27159_v19  ;;  %v30433_v28 = vld [vmem:[#allocation53_spill] sm:$0xff] }
 0x467   : > { %22563 = vmatprep.subr.bf16.mxu0 %v30412_v42  ;;  %22603 = vmatprep.subr.bf16.mxu1 %v30212_v60  ;;  %v27328_v42 = vand.u32 4294901760, %v30433_v28 }
 0x469   : > { %22605 = vmatpush3.bf16.msra.mxu1 %v30214_v31  ;;  %v30418_v31 = vld [vmem:[#allocation25_spill] sm:$0xff] }
 0x46a   : > { %22565 = vmatpush3.bf16.msra.mxu0 %v30413_v48  ;;  %22607 = vmatprep.subr.bf16.mxu1 %v30216_v6  ;;  %v30419_v6 = vld [vmem:[#allocation43_spill] sm:$0xff]  ;;  %v30434_v48 = vld [vmem:[#allocation130_spill] sm:$0xff] }
 0x46b   : > { %22567 = vmatprep.subr.bf16.mxu0 %v30414_v1  ;;  %v27285_v44 = vand.u32 4294901760, %v30419_v6  ;;  %v30435_v1 = vld [vmem:[#allocation60_spill] sm:$0xff] }
 0x46d   : > { %22609 = vmatpush3.bf16.msra.mxu1 %v30219_v5  ;;  %v30421_v5 = vld [vmem:[#allocation35_spill] sm:$0xff]  ;;  %v27293_v14 = vsub.f32 %v30419_v6, %v27285_v44  ;;  %v30436_v6 = vld [vmem:[#allocation98_spill] sm:$0xff] }
 0x46e   : > { %22569 = vmatpush3.bf16.msra.mxu0 %v30415_v35  ;;  %22611 = vmatprep.subr.bf16.mxu1 %v30221_v43  ;;  %v27336_v35 = vsub.f32 %v30433_v28, %v27328_v42 }
 0x46f   : > { %22571 = vmatprep.subr.bf16.mxu0 %v30416_v22  ;;  %v19675_v15 = vpop.f32.mrb[36].mxu1 }
 0x470   : > { %v19676_v19 = vpop.f32.mrb[37].mxu1 }
 0x471   : > { %v19677_v60 = vadd.f32 %v19676_v19, %v19675_v15  ;;  %22613 = vmatpush3.bf16.msra.mxu1 %v30223_v4 }
 0x472   : > { %22573 = vmatpush3.bf16.msra.mxu0 %v30417_v24  ;;  %22615 = vmatprep.subr.bf16.mxu1 %v30225_v26  ;;  %v12249_v24 = vand.u32 4294901760, %v27336_v35 }
 0x473   : > { %22575 = vmatprep.subr.bf16.mxu0 %v30418_v31 }
 0x475   : > { %22617 = vmatpush3.bf16.msra.mxu1 %v30226_v16  ;;  %v12243_v16 = vand.u32 4294901760, %v27293_v14 }
 0x476   : > { %22577 = vmatpush3.bf16.msra.mxu0 %v30420_v61  ;;  %22619 = vmatprep.subr.bf16.mxu1 %v30312_v32  ;;  %v30437_v61 = vld [vmem:[#allocation99_spill] sm:$0xff] }
 0x477   : > { %22579 = vmatprep.subr.bf16.mxu0 %v30421_v5  ;;  %v30438_v5 = vld [vmem:[#allocation101_spill] sm:$0xff] }
 0x478   : > { %v19640_v43 = vpop.f32.mrb[36].mxu0 }
 0x479   : > { %v19641_v4 = vpop.f32.mrb[37].mxu0  ;;  %22621 = vmatpush3.bf16.msra.mxu1 %v30228_v12  ;;  %v12244_v12 = vsub.f32 %v27293_v14, %v12243_v16 }
 0x47a   : > { %v19642_v47 = vadd.f32 %v19641_v4, %v19640_v43  ;;  %22581 = vmatpush3.bf16.msra.mxu0 %v30257_v38  ;;  %22655 = vmatprep.subr.bf16.mxu1 %v30259_v59  ;;  %v30422_v38 = vld [vmem:[#allocation59_spill] sm:$0xff] }
 0x47b   : > { %22583 = vmatprep.subr.bf16.mxu0 %v30258_v34  ;;  %v30423_v34 = vld [vmem:[#allocation66_spill] sm:$0xff]  ;;  %v30424_v59 = vld [vmem:[#allocation67_spill] sm:$0xff] }
 0x47c   : > { %v10026_v26 = vadd.f32 %v19642_v47, %v9888_v39  ;;  %12140 = vmatmul.mubr.f32.vlgmr.msra.gmra.mrb[50].mxu1 %v27202_v41  ;;  %v30431_v39 = vld [vmem:[#allocation128_spill] sm:$0xff]  ;;  %v30440_v43 = vld [vmem:[#allocation103_spill] sm:$0xff] }
 0x47d   : > { %22657 = vmatpush3.bf16.msra.mxu1 %v26080_v49  ;;  %12482 = vmatprep.mubr.f32.mxu1 %v27285_v44  ;;  %v30426_v49 = vld [vmem:[#allocation123_spill] sm:$0xff] }
 0x47e   : > { %22585 = vmatpush3.bf16.msra.mxu0 %v26078_v27  ;;  %v10134_v32 = vadd.f32 %v19677_v60, %v10026_v26  ;;  %22659 = vmatprep.subr.bf16.mxu1 %v30422_v38  ;;  %v12245_v27 = vand.u32 4294901760, %v12244_v12  ;;  %v30442_v38 = vld [vmem:[#allocation107_spill] sm:$0xff] }
 0x47f   : > { %22587 = vmatprep.subr.bf16.mxu0 %v26122_v10  ;;  %v30427_v10 = vld [vmem:[#allocation124_spill] sm:$0xff] }
 0x481   : > { %22661 = vmatpush3.bf16.msra.mxu1 %v30424_v59  ;;  %v30446_v59 = vld [vmem:[#allocation116_spill] sm:$0xff] }
 0x482   : > { %22589 = vmatpush3.bf16.msra.mxu0 %v30423_v34  ;;  %22663 = vmatprep.subr.bf16.mxu1 %v30425_v50  ;;  %v30445_v34 = vld [vmem:[#allocation115_spill] sm:$0xff]  ;;  %v30447_v50 = vld [vmem:[#allocation120_spill] sm:$0xff] }
 0x483   : > { %22623 = vmatprep.subr.bf16.mxu0 %v26116_v54 }
 0x485   : > { %12036 = vmatmul.mubr.f32.vlgmr.msra.gmra.mrb[50].mxu0 %v27202_v41  ;;  %22665 = vmatpush3.bf16.msra.mxu1 %v30426_v49  ;;  %v30430_v41 = vld [vmem:[#allocation127_spill] sm:$0xff]  ;;  %v30454_v49 = vld [vmem:[#allocation57_spill] sm:$0xff] }
 0x486   : > { %22625 = vmatpush3.bf16.msra.mxu0 %v26297_v36  ;;  %12246 = vmatprep.mubr.f32.mxu0 %v12245_v27  ;;  %v30453_v27 = vld [vmem:[#allocation55_spill] sm:$0xff] }
 0x487   : > { %22627 = vmatprep.subr.bf16.mxu0 %v26303_v20  ;;  %22667 = vmatprep.subr.bf16.mxu1 %v30427_v10 }
 0x489   : > { %22669 = vmatpush3.bf16.msra.mxu1 %v30428_v52 }
 0x48a   : > { %22629 = vmatpush3.bf16.msra.mxu0 %v26329_v45  ;;  %22671 = vmatprep.subr.bf16.mxu1 %v30429_v40  ;;  %v30458_v40 = vld [vmem:[#allocation108_spill] sm:$0xff] }
 0x48b   : > { %22631 = vmatprep.subr.bf16.mxu0 %v26343_v11 }
 0x48d   : > { %22673 = vmatpush3.bf16.msra.mxu1 %v30430_v41 }
 0x48e   : > { %22633 = vmatpush3.bf16.msra.mxu0 %v26362_v21  ;;  %22675 = vmatprep.subr.bf16.mxu1 %v30431_v39 }
 0x48f   : > { %22635 = vmatprep.subr.bf16.mxu0 %v26368_v55  ;;  %v19745_v57 = vpop.f32.mrb[38].mxu1 }
 0x490   : > { %v19746_v46 = vpop.f32.mrb[39].mxu1 }
 0x491   : > { %v19747_v53 = vadd.f32 %v19746_v46, %v19745_v57  ;;  %22677 = vmatpush3.bf16.msra.mxu1 %v30432_v13  ;;  %v30462_v57 = vmov 0.0   ;;  %v30463_v46 = vld [vmem:[#allocation117_spill] sm:$0xff] }
 0x492   : > { %22637 = vmatpush3.bf16.msra.mxu0 %v26394_v3  ;;  %22679 = vmatprep.subr.bf16.mxu1 %v30434_v48 }
 0x493   : > { %22639 = vmatprep.subr.bf16.mxu0 %v26400_v2 }
 0x495   : > { %22681 = vmatpush3.bf16.msra.mxu1 %v30435_v1 }
 0x496   : > { %22641 = vmatpush3.bf16.msra.mxu0 %v26420_v25  ;;  %22683 = vmatprep.subr.bf16.mxu1 %v30270_v18  ;;  %v12250_v18 = vsub.f32 %v27336_v35, %v12249_v24 }
 0x497   : > { %22643 = vmatprep.subr.bf16.mxu0 %v26426_v63 }
 0x498   : > { %v19710_v22 = vpop.f32.mrb[38].mxu0 }
 0x499   : > { %v19711_v15 = vpop.f32.mrb[39].mxu0  ;;  %22685 = vmatpush3.bf16.msra.mxu1 %v30271_v7  ;;  %v12251_v7 = vand.u32 4294901760, %v12250_v18 }
 0x49a   : > { %v19712_v19 = vadd.f32 %v19711_v15, %v19710_v22  ;;  %22645 = vmatpush3.bf16.msra.mxu0 %v26443_v56  ;;  %22719 = vmatprep.subr.bf16.mxu1 %v26116_v54 }
 0x49b   : > { %22647 = vmatprep.subr.bf16.mxu0 %v26450_v23 }
 0x49c   : > { %v10302_v60 = vadd.f32 %v19712_v19, %v10134_v32  ;;  %12484 = vmatmul.mubr.f32.vlgmr.msra.gmra.mrb[52].mxu1 %v27328_v42 }
 0x49d   : > { %22721 = vmatpush3.bf16.msra.mxu1 %v26297_v36  ;;  %12726 = vmatprep.mubr.f32.mxu1 %v12243_v16 }
 0x49e   : > { %22649 = vmatpush3.bf16.msra.mxu0 %v26465_v29  ;;  %v10406_v31 = vadd.f32 %v19747_v53, %v10302_v60  ;;  %22723 = vmatprep.subr.bf16.mxu1 %v26303_v20 }
 0x49f   : > { %22651 = vmatprep.subr.bf16.mxu0 %v26475_v9 }
 0x4a1   : > { %22725 = vmatpush3.bf16.msra.mxu1 %v26329_v45 }
 0x4a2   : > { %22653 = vmatpush3.bf16.msra.mxu0 %v26482_v62  ;;  %22727 = vmatprep.subr.bf16.mxu1 %v26343_v11 }
 0x4a3   : > { %22687 = vmatprep.subr.bf16.mxu0 %v30354_v8  ;;  %v30439_v8 = vld [vmem:[#allocation102_spill] sm:$0xff] }
 0x4a5   : > { %12252 = vmatmul.mubr.f32.vlgmr.msra.gmra.mrb[52].mxu0 %v12251_v7  ;;  %22729 = vmatpush3.bf16.msra.mxu1 %v26362_v21 }
 0x4a6   : > { %22689 = vmatpush3.bf16.msra.mxu0 %v30436_v6  ;;  %12619 = vmatprep.mubr.f32.mxu0 %v27293_v14 }
 0x4a7   : > { %22691 = vmatprep.subr.bf16.mxu0 %v30437_v61  ;;  %22731 = vmatprep.subr.bf16.mxu1 %v26368_v55 }
 0x4a9   : > { %22733 = vmatpush3.bf16.msra.mxu1 %v26394_v3 }
 0x4aa   : > { %22693 = vmatpush3.bf16.msra.mxu0 %v30357_v30  ;;  %22735 = vmatprep.subr.bf16.mxu1 %v26400_v2  ;;  %v30441_v30 = vld [vmem:[#allocation106_spill] sm:$0xff] }
 0x4ab   : > { %22695 = vmatprep.subr.bf16.mxu0 %v30438_v5 }
 0x4ad   : > { %22737 = vmatpush3.bf16.msra.mxu1 %v26420_v25 }
 0x4ae   : > { %22697 = vmatpush3.bf16.msra.mxu0 %v30439_v8  ;;  %22739 = vmatprep.subr.bf16.mxu1 %v26426_v63 }
 0x4af   : > { %22699 = vmatprep.subr.bf16.mxu0 %v30440_v43  ;;  %v19815_v14 = vpop.f32.mrb[40].mxu1 }
 0x4b0   : > { %v19816_v4 = vpop.f32.mrb[41].mxu1 }
 0x4b1   : > { %v19817_v47 = vadd.f32 %v19816_v4, %v19815_v14  ;;  %22741 = vmatpush3.bf16.msra.mxu1 %v26443_v56 }
 0x4b2   : > { %22701 = vmatpush3.bf16.msra.mxu0 %v30279_v51  ;;  %22743 = vmatprep.subr.bf16.mxu1 %v26450_v23  ;;  %v30443_v51 = vld [vmem:[#allocation112_spill] sm:$0xff] }
 0x4b3   : > { %22703 = vmatprep.subr.bf16.mxu0 %v30280_v0 }
 0x4b5   : > { %22745 = vmatpush3.bf16.msra.mxu1 %v26465_v29 }
 0x4b6   : > { %22705 = vmatpush3.bf16.msra.mxu0 %v26548_v17  ;;  %22747 = vmatprep.subr.bf16.mxu1 %v26475_v9  ;;  %v30444_v17 = vld [vmem:[#allocation114_spill] sm:$0xff] }
 0x4b7   : > { %22707 = vmatprep.subr.bf16.mxu0 %v30441_v30 }
 0x4b8   : > { %v19780_v26 = vpop.f32.mrb[40].mxu0 }
 0x4b9   : > { %v19781_v16 = vpop.f32.mrb[41].mxu0  ;;  %22749 = vmatpush3.bf16.msra.mxu1 %v26482_v62 }
 0x4ba   : > { %v19782_v32 = vadd.f32 %v19781_v16, %v19780_v26  ;;  %22709 = vmatpush3.bf16.msra.mxu0 %v30442_v38  ;;  %22783 = vmatprep.subr.bf16.mxu1 %v26116_v54  ;;  %v30448_v54 = vld [vmem:[#allocation121_spill] sm:$0xff] }
 0x4bb   : > { %22711 = vmatprep.subr.bf16.mxu0 %v30443_v51 }
 0x4bc   : > { %v10518_v0 = vadd.f32 %v19782_v32, %v10406_v31  ;;  %12730 = vmatmul.mubr.f32.vlgmr.msra.gmra.mrb[54].mxu1 %v12249_v24 }
 0x4bd   : > { %22785 = vmatpush3.bf16.msra.mxu1 %v26297_v36  ;;  %13000 = vmatprep.mubr.f32.mxu1 %v27285_v44  ;;  %v30449_v36 = vld [vmem:[#allocation18_spill] sm:$0xff] }
 0x4be   : > { %22713 = vmatpush3.bf16.msra.mxu0 %v30444_v17  ;;  %v10750_v12 = vadd.f32 %v19817_v47, %v10518_v0  ;;  %22787 = vmatprep.subr.bf16.mxu1 %v26303_v20  ;;  %v30450_v20 = vld [vmem:[#allocation29_spill] sm:$0xff]  ;;  %v6061_v0 = vld [vmem:[%s29207_s7] sm:$0xff]  ;;  %v6062_v17 = vld [vmem:[%s29207_s7 + $0x8] sm:$0xff] }
 0x4bf   : > { %22715 = vmatprep.subr.bf16.mxu0 %v30445_v34  ;;  %v27434_v34 = vsel %vm13036_vm1, %v6061_v0, 0 }
 0x4c1   : > { %22789 = vmatpush3.bf16.msra.mxu1 %v26329_v45  ;;  %v30451_v45 = vld [vmem:[#allocation30_spill] sm:$0xff] }
 0x4c2   : > { %22717 = vmatpush3.bf16.msra.mxu0 %v30446_v59  ;;  %22791 = vmatprep.subr.bf16.mxu1 %v26343_v11  ;;  %v30452_v11 = vld [vmem:[#allocation33_spill] sm:$0xff]  ;;  %v13031_v59 = vcombine.high %v6062_v17, %v6062_v17 }
 0x4c3   : > { %22751 = vmatprep.subr.bf16.mxu0 %v30447_v50  ;;  %v27436_v50 = vsel %vm13036_vm1, %v6062_v17, 0 }
 0x4c5   : > { %12622 = vmatmul.mubr.f32.vlgmr.msra.gmra.mrb[54].mxu0 %v27336_v35  ;;  %22793 = vmatpush3.bf16.msra.mxu1 %v26362_v21 }
 0x4c6   : > { %22753 = vmatpush3.bf16.msra.mxu0 %v30448_v54  ;;  %12896 = vmatprep.mubr.f32.mxu0 %v27285_v44 }
 0x4c7   : > { %22755 = vmatprep.subr.bf16.mxu0 %v30449_v36  ;;  %22795 = vmatprep.subr.bf16.mxu1 %v26368_v55  ;;  %v27439_v36 = vand.u32 4294901760, %v27434_v34 }
 0x4c9   : > { %22797 = vmatpush3.bf16.msra.mxu1 %v26394_v3  ;;  %v30455_v3 = vld [vmem:[#allocation58_spill] sm:$0xff] }
 0x4ca   : > { %22757 = vmatpush3.bf16.msra.mxu0 %v30450_v20  ;;  %22799 = vmatprep.subr.bf16.mxu1 %v26400_v2  ;;  %v30456_v2 = vld [vmem:[#allocation131_spill] sm:$0xff]  ;;  %v13043_v20 = vsel %vm13036_vm1, %v13031_v59, 0 }
 0x4cb   : > { %22759 = vmatprep.subr.bf16.mxu0 %v30451_v45  ;;  %v27442_v45 = vand.u32 4294901760, %v27436_v50 }
 0x4cd   : > { %22801 = vmatpush3.bf16.msra.mxu1 %v26420_v25  ;;  %v30457_v25 = vld [vmem:[#allocation132_spill] sm:$0xff] }
 0x4ce   : > { %22761 = vmatpush3.bf16.msra.mxu0 %v30452_v11  ;;  %22803 = vmatprep.subr.bf16.mxu1 %v26426_v63 }
 0x4cf   : > { %22763 = vmatprep.subr.bf16.mxu0 %v30453_v27  ;;  %v19885_v21 = vpop.f32.mrb[42].mxu1  ;;  %v27446_v27 = vand.u32 4294901760, %v13043_v20 }
 0x4d0   : > { %v19886_v44 = vpop.f32.mrb[43].mxu1 }
 0x4d1   : > { %v19887_v55 = vadd.f32 %v19886_v44, %v19885_v21  ;;  %22805 = vmatpush3.bf16.msra.mxu1 %v26443_v56  ;;  %v30459_v56 = vld [vmem:[#allocation109_spill] sm:$0xff] }
 0x4d2   : > { %22765 = vmatpush3.bf16.msra.mxu0 %v30454_v49  ;;  %22807 = vmatprep.subr.bf16.mxu1 %v26450_v23  ;;  %v30460_v23 = vld [vmem:[#allocation110_spill] sm:$0xff]  ;;  %v27456_v49 = vsub.f32 %v13043_v20, %v27446_v27 }
 0x4d3   : > { %22767 = vmatprep.subr.bf16.mxu0 %v30455_v3 }
 0x4d5   : > { %22809 = vmatpush3.bf16.msra.mxu1 %v26465_v29  ;;  %v30461_v29 = vld [vmem:[#allocation113_spill] sm:$0xff] }
 0x4d6   : > { %22769 = vmatpush3.bf16.msra.mxu0 %v30456_v2  ;;  %22811 = vmatprep.subr.bf16.mxu1 %v26475_v9 }
 0x4d7   : > { %22771 = vmatprep.subr.bf16.mxu0 %v30457_v25  ;;  %v27462_v25 = vand.u32 4294901760, %v27456_v49 }
 0x4d8   : > { %v19850_v10 = vpop.f32.mrb[42].mxu0 }
 0x4d9   : > { %v19851_v63 = vpop.f32.mrb[43].mxu0  ;;  %22813 = vmatpush3.bf16.msra.mxu1 %v26482_v62 }
 0x4da   : > { %v19852_v52 = vadd.f32 %v19851_v63, %v19850_v10  ;;  %22773 = vmatpush3.bf16.msra.mxu0 %v30458_v40  ;;  %13511 = vmatprep.subr.mxu1 %v27446_v27  ;;  %v13591_v63 = vsub.f32 %v27456_v49, %v27462_v25 }
 0x4db   : > { %22775 = vmatprep.subr.bf16.mxu0 %v30459_v56 }
 0x4dc   : > { %v10888_v41 = vadd.f32 %v19852_v52, %v10750_v12  ;;  %13002 = vmatmul.mubr.f32.vlgmr.msra.gmra.mrb[56].mxu1 %v27328_v42  ;;  %v13030_v12 = vcombine.high %v6061_v0, %v6061_v0  ;;  %v27470_v40 = vand.u32 4294901760, %v13591_v63 }
 0x4dd   : > { %13576 = vmatprep.mubr.f32.mxu1 %v30462_v57  ;;  %13513 = vmatpush1.msra.mxu1 %v27442_v45 }
 0x4de   : > { %22777 = vmatpush3.bf16.msra.mxu0 %v30460_v23  ;;  %v10996_v39 = vadd.f32 %v19887_v55, %v10888_v41  ;;  %v13039_v54 = vsel %vm13036_vm1, %v13030_v12, 0  ;;  %13593 = vmatprep.subr.mxu1 %v27470_v40 }
 0x4df   : > { %22779 = vmatprep.subr.bf16.mxu0 %v30461_v29  ;;  %v27444_v11 = vand.u32 4294901760, %v13039_v54 }
 0x4e1   : > { %v27453_v21 = vsub.f32 %v13039_v54, %v27444_v11 }
 0x4e2   : > { %22781 = vmatpush3.bf16.msra.mxu0 %v30463_v46 }
 0x4e3   : > { %13046 = vmatprep.subr.mxu0 %v27444_v11  ;;  %v27459_v3 = vand.u32 4294901760, %v27453_v21 }
 0x4e5   : > { %12898 = vmatmul.mubr.f32.vlgmr.msra.gmra.mrb[56].mxu0 %v27328_v42  ;;  %v13126_v10 = vsub.f32 %v27453_v21, %v27459_v3 }
 0x4e6   : > { %13111 = vmatprep.mubr.f32.mxu0 %v30462_v57  ;;  %13048 = vmatpush1.msra.mxu0 %v27439_v36 }
 0x4e7   : > { %v27468_v52 = vand.u32 4294901760, %v13126_v10 }
 0x4e9   : > { %13128 = vmatprep.subr.mxu0 %v27468_v52 }
 0x4ef   : > { %v19955_v9 = vpop.f32.mrb[44].mxu1 }
 0x4f0   : > { %v19956_v62 = vpop.f32.mrb[45].mxu1 }
 0x4f1   : > { %v19957_v53 = vadd.f32 %v19956_v62, %v19955_v9 }
 0x4f8   : > { %v19920_v13 = vpop.f32.mrb[44].mxu0 }
 0x4f9   : > { %v19921_v28 = vpop.f32.mrb[45].mxu0 }
 0x4fa   : > { %v19922_v48 = vadd.f32 %v19921_v28, %v19920_v13 }
 0x4fc   : > { %v11164_v1 = vadd.f32 %v19922_v48, %v10996_v39 }
 0x4fe   : > { %v27420_v35 = vadd.f32 %v19957_v53, %v11164_v1 }
 0x500   : > { %v27426_v22 = vmax.f32 %v13007_v37, %v27420_v35 }
 0x50f   : > { %v20025_v15 = vpop.f32.mrb[46].mxu1 }
 0x510   : > { %v20026_v19 = vpop.f32.mrb[47].mxu1 }
 0x511   : > { %v20027_v42 = vadd.f32 %v20026_v19, %v20025_v15 }
 0x518   : > { %v19990_v24 = vpop.f32.mrb[46].mxu0 }
 0x519   : > { %v19991_v60 = vpop.f32.mrb[47].mxu0 }
 0x51a   : > { %v19992_v31 = vadd.f32 %v19991_v60, %v19990_v24 }
 0x51c   : > { %v11624_v18 = vadd.f32 %v20027_v42, %v19992_v31 }
 0x52f   : > { %v20095_v7 = vpop.f32.mrb[48].mxu1 }
 0x530   : > { %v20096_v6 = vpop.f32.mrb[49].mxu1 }
 0x531   : > { %v20097_v61 = vadd.f32 %v20096_v6, %v20095_v7 }
 0x538   : > { %v20060_v5 = vpop.f32.mrb[48].mxu0 }
 0x539   : > { %v20061_v8 = vpop.f32.mrb[49].mxu0 }
 0x53a   : > { %v20062_v43 = vadd.f32 %v20061_v8, %v20060_v5 }
 0x53c   : > { %v11762_v14 = vadd.f32 %v20062_v43, %v11624_v18 }
 0x53e   : > { %v11870_v4 = vadd.f32 %v20097_v61, %v11762_v14 }
 0x54f   : > { %v20165_v47 = vpop.f32.mrb[50].mxu1 }
 0x550   : > { %v20166_v30 = vpop.f32.mrb[51].mxu1 }
 0x551   : > { %v20167_v26 = vadd.f32 %v20166_v30, %v20165_v47 }
 0x558   : > { %v20130_v37 = vpop.f32.mrb[50].mxu0 }
 0x559   : > { %v20131_v16 = vpop.f32.mrb[51].mxu0 }
 0x55a   : > { %v20132_v32 = vadd.f32 %v20131_v16, %v20130_v37 }
 0x55c   : > { %v12038_v38 = vadd.f32 %v20132_v32, %v11870_v4 }
 0x55e   : > { %v12142_v51 = vadd.f32 %v20167_v26, %v12038_v38 }
 0x56f   : > { %v20235_v44 = vpop.f32.mrb[52].mxu1 }
 0x570   : > { %v20236_v55 = vpop.f32.mrb[53].mxu1 }
 0x571   : > { %v20237_v2 = vadd.f32 %v20236_v55, %v20235_v44 }
 0x578   : > { %v20200_v56 = vpop.f32.mrb[52].mxu0 }
 0x579   : > { %v20201_v41 = vpop.f32.mrb[53].mxu0 }
 0x57a   : > { %v20202_v23 = vadd.f32 %v20201_v41, %v20200_v56 }
 0x57c   : > { %v12254_v39 = vadd.f32 %v20202_v23, %v12142_v51  ;;  %v27484_v51 = vsub.f32 %v27436_v50, %v27442_v45 }
 0x57e   : > { %v12486_v29 = vadd.f32 %v20237_v2, %v12254_v39  ;;  %v27497_v2 = vand.u32 4294901760, %v27484_v51 }
 0x580   : > { %v13597_v56 = vsub.f32 %v27484_v51, %v27497_v2 }
 0x58f   : > { %v20305_v46 = vpop.f32.mrb[54].mxu1 }
 0x590   : > { %v20306_v9 = vpop.f32.mrb[55].mxu1 }
 0x591   : > { %v20307_v62 = vadd.f32 %v20306_v9, %v20305_v46 }
 0x598   : > { %v20270_v53 = vpop.f32.mrb[54].mxu0 }
 0x599   : > { %v20271_v13 = vpop.f32.mrb[55].mxu0 }
 0x59a   : > { %v20272_v28 = vadd.f32 %v20271_v13, %v20270_v53 }
 0x59c   : > { %v12624_v48 = vadd.f32 %v20272_v28, %v12486_v29  ;;  %v27505_v29 = vand.u32 4294901760, %v13597_v56  ;;  %v27761_v56 = vld [vmem:[%s29208_s8 + $0xa8] sm:$0xff] }
 0x59e   : > { %v12732_v1 = vadd.f32 %v20307_v62, %v12624_v48 }
 0x5af   : > { %v20375_v15 = vpop.f32.mrb[56].mxu1 }
 0x5b0   : > { %v20376_v19 = vpop.f32.mrb[57].mxu1 }
 0x5b1   : > { %v20377_v42 = vadd.f32 %v20376_v19, %v20375_v15 }
 0x5b8   : > { %v20340_v24 = vpop.f32.mrb[56].mxu0 }
 0x5b9   : > { %v20341_v60 = vpop.f32.mrb[57].mxu0 }
 0x5ba   : > { %v20342_v31 = vadd.f32 %v20341_v60, %v20340_v24 }
 0x5bc   : > { %v12900_v18 = vadd.f32 %v20342_v31, %v12732_v1 }
 0x5be   : > { %v13004_v7 = vadd.f32 %v20377_v42, %v12900_v18 }
 0x5c0   : > { %v13009_v6 = vmax.f32 %v27426_v22, %v13004_v7 }
 0x5c2   : > { %v13010_v61 = vsub.f32 %v30396_v58, %v13009_v6  ;;  %v13013_v5 = vsub.f32 %v27218_v33, %v13009_v6  ;;  %v13016_v8 = vsub.f32 %v27420_v35, %v13009_v6  ;;  %v13019_v43 = vsub.f32 %v13004_v7, %v13009_v6 }
 0x5c3   : > { %v27480_v33 = vsub.f32 %v27434_v34, %v27439_v36 }
 0x5c4   : > { %v13011_v14 = vmul.f32 1.442695, %v13010_v61  ;;  %v13014_v4 = vmul.f32 1.442695, %v13013_v5  ;;  %v13017_v47 = vmul.f32 1.442695, %v13016_v8 }
 0x5c5   : > { %v13020_v30 = vmul.f32 1.442695, %v13019_v43  ;;  %v27488_v20 = vand.u32 4294901760, %v27480_v33  ;;  %v27693_v61 = vld [vmem:[%s29208_s8 + $0x10] sm:$0xff]  ;;  %v27698_v5 = vld [vmem:[%s29208_s8 + $0x18] sm:$0xff] }
 0x5c6   : > { %23440 = vpow2.f32 %v13011_v14 }
 0x5c7   : > { %23442 = vpow2.f32 %v13014_v4  ;;  %v13132_v10 = vsub.f32 %v27480_v33, %v27488_v20  ;;  %v16883_v4 = vand.u32 4294901760, %v27693_v61 }
 0x5c8   : > { %23444 = vpow2.f32 %v13017_v47 }
 0x5c9   : > { %23446 = vpow2.f32 %v13020_v30  ;;  %v27503_v23 = vand.u32 4294901760, %v13132_v10 }
 0x5d0   : > { %v23441_v26 = vpop.eup %23440 }
 0x5d1   : > { %v23443_v37 = vpop.eup %23442 }
 0x5d2   : > { %v13022_v16 = vadd.f32 %v23443_v37, %v23441_v26  ;;  %v23445_v32 = vpop.eup %23444 }
 0x5d3   : > { %v23447_v38 = vpop.eup %23446 }
 0x5d4   : > { %v13023_v22 = vadd.f32 %v23445_v32, %v13022_v16 }
 0x5d6   : > { %v13024_v58 = vadd.f32 %v23447_v38, %v13023_v22 }
 0x5d8   : > { %23448 = vrcp.f32 %v13024_v58 }
 0x5e2   : > { %v23449_v35 = vpop.eup %23448 }
 0x5e3   : > { %v15863_v0 = vmul.f32 %v23449_v35, %v23447_v38  ;;  %v13027_v17 = vmul.f32 %v23449_v35, %v23441_v26  ;;  %v13979_v12 = vmul.f32 %v23449_v35, %v23443_v37  ;;  %v14921_v59 = vmul.f32 %v23449_v35, %v23445_v32 }
 0x5e4   : > { %v16886_v37 = vand.u32 4294901760, %v27698_v5  ;;  %v27722_v38 = vsub.f32 %v27693_v61, %v16883_v4 }
 0x5e5   : > { %v13034_v54 = vsel %vm13032_vm2, %v13027_v17, 0  ;;  %v27491_v44 = vsel %vm13032_vm2, %v14921_v59, 0  ;;  %v27494_v34 = vsel %vm13032_vm2, %v15863_v0, 0  ;;  %v13981_v46 = vsel %vm13032_vm2, %v13979_v12, 0 }
 0x5e6   : > { %v13112_v55 = vand.u32 4294901760, %v13034_v54  ;;  %v27530_v9 = vand.u32 4294901760, %v13981_v46  ;;  %v27572_v48 = vand.u32 4294901760, %v27491_v44  ;;  %v15934_v24 = vand.u32 4294901760, %v27494_v34 }
 0x5e7   : > { %v29594_v59 = vand.u32 4294901760, %v27722_v38 }
 0x5e8   : > { %v13113_v50 = vsub.f32 %v13034_v54, %v13112_v55  ;;  %v14051_v62 = vsub.f32 %v13981_v46, %v27530_v9  ;;  %v14993_v1 = vsub.f32 %v27491_v44, %v27572_v48  ;;  %v15935_v60 = vsub.f32 %v27494_v34, %v15934_v24  ;;  %v27769_v46 = vld [vmem:[%s29208_s8 + $0x20] sm:$0xff] }
 0x5ea   : > { %v13114_v63 = vand.u32 4294901760, %v13113_v50  ;;  %v14052_v53 = vand.u32 4294901760, %v14051_v62  ;;  %v14994_v15 = vand.u32 4294901760, %v14993_v1  ;;  %v15936_v31 = vand.u32 4294901760, %v15935_v60 }
 0x5ec   : > { %v13115_v41 = vsub.f32 %v13113_v50, %v13114_v63  ;;  %v14053_v13 = vsub.f32 %v14051_v62, %v14052_v53  ;;  %v14995_v19 = vsub.f32 %v14993_v1, %v14994_v15  ;;  %v15937_v18 = vsub.f32 %v15935_v60, %v15936_v31 }
 0x5ee   : > { %v13116_v39 = vand.u32 4294901760, %v13115_v41  ;;  %v14054_v28 = vand.u32 4294901760, %v14053_v13  ;;  %v14996_v42 = vand.u32 4294901760, %v14995_v19  ;;  %v15938_v7 = vand.u32 4294901760, %v15937_v18 }
 0x5ef   : > { %v16889_v18 = vand.u32 4294901760, %v27769_v46 }
 0x5f0   : > { %13117 = vmatmul.mubr.f32.vlgmr.msra.gmra.mrb[58].mxu0 %v13116_v39  ;;  %13582 = vmatmul.mubr.f32.vlgmr.msra.gmra.mrb[58].mxu1 %v13116_v39 }
 0x5f1   : > { %13134 = vmatpush1.msra.mxu0 %v27503_v23  ;;  %13197 = vmatprep.mubr.f32.mxu0 %v30462_v57 }
 0x5f2   : > { %13599 = vmatpush1.msra.mxu1 %v27505_v29  ;;  %13662 = vmatprep.mubr.f32.mxu1 %v30462_v57 }
 0x5f3   : > { %13207 = vmatprep.subr.mxu0 %v27453_v21  ;;  %13672 = vmatprep.subr.mxu1 %v27456_v49 }
 0x5f8   : > { %13199 = vmatmul.mubr.f32.vlgmr.msra.gmra.mrb[58].mxu0 %v13112_v55  ;;  %13664 = vmatmul.mubr.f32.vlgmr.msra.gmra.mrb[58].mxu1 %v13112_v55 }
 0x5f9   : > { %13210 = vmatpush1.msra.mxu0 %v27480_v33  ;;  %13273 = vmatprep.mubr.f32.mxu0 %v30462_v57 }
 0x5fa   : > { %13675 = vmatpush1.msra.mxu1 %v27484_v51  ;;  %13738 = vmatprep.mubr.f32.mxu1 %v30462_v57 }
 0x5fb   : > { %13283 = vmatprep.subr.mxu0 %v27444_v11  ;;  %13748 = vmatprep.subr.mxu1 %v27446_v27 }
 0x600   : > { %13276 = vmatmul.mubr.f32.vlgmr.msra.gmra.mrb[58].mxu0 %v13113_v50  ;;  %13741 = vmatmul.mubr.f32.vlgmr.msra.gmra.mrb[58].mxu1 %v13113_v50 }
 0x601   : > { %13285 = vmatpush1.msra.mxu0 %v27439_v36  ;;  %13348 = vmatprep.mubr.f32.mxu0 %v30462_v57 }
 0x602   : > { %13750 = vmatpush1.msra.mxu1 %v27442_v45  ;;  %13813 = vmatprep.mubr.f32.mxu1 %v30462_v57 }
 0x603   : > { %13361 = vmatprep.subr.mxu0 %v27459_v3  ;;  %13826 = vmatprep.subr.mxu1 %v27462_v25 }
 0x608   : > { %13352 = vmatmul.mubr.f32.vlgmr.msra.gmra.mrb[58].mxu0 %v13114_v63  ;;  %13817 = vmatmul.mubr.f32.vlgmr.msra.gmra.mrb[58].mxu1 %v13114_v63  ;;  %v17006_v63 = vsub.f32 %v27722_v38, %v29594_v59 }
 0x609   : > { %13365 = vmatpush1.msra.mxu0 %v27488_v20  ;;  %13428 = vmatprep.mubr.f32.mxu0 %v30462_v57 }
 0x60a   : > { %13830 = vmatpush1.msra.mxu1 %v27497_v2  ;;  %13893 = vmatprep.mubr.f32.mxu1 %v30462_v57 }
 0x60b   : > { %13437 = vmatprep.subr.mxu0 %v27444_v11  ;;  %13902 = vmatprep.subr.mxu1 %v27446_v27 }
 0x610   : > { %13430 = vmatmul.mubr.f32.vlgmr.msra.gmra.mrb[58].mxu0 %v13112_v55  ;;  %13895 = vmatmul.mubr.f32.vlgmr.msra.gmra.mrb[58].mxu1 %v13112_v55 }
 0x611   : > { %13439 = vmatpush1.msra.mxu0 %v27439_v36  ;;  %13502 = vmatprep.mubr.f32.mxu0 %v30462_v57 }
 0x612   : > { %13904 = vmatpush1.msra.mxu1 %v27442_v45  ;;  %13967 = vmatprep.mubr.f32.mxu1 %v30462_v57 }
 0x613   : > { %13984 = vmatprep.subr.mxu0 %v27444_v11  ;;  %14449 = vmatprep.subr.mxu1 %v27446_v27 }
 0x618   : > { %13504 = vmatmul.mubr.f32.vlgmr.msra.gmra.mrb[58].mxu0 %v13112_v55  ;;  %13969 = vmatmul.mubr.f32.vlgmr.msra.gmra.mrb[58].mxu1 %v13112_v55  ;;  %v27753_v55 = vld [vmem:[%s29208_s8 + $0xa0] sm:$0xff] }
 0x619   : > { %13986 = vmatpush1.msra.mxu0 %v27439_v36  ;;  %14049 = vmatprep.mubr.f32.mxu0 %v30462_v57 }
 0x61a   : > { %14451 = vmatpush1.msra.mxu1 %v27442_v45  ;;  %14514 = vmatprep.mubr.f32.mxu1 %v30462_v57 }
 0x61b   : > { %14066 = vmatprep.subr.mxu0 %v27468_v52  ;;  %14531 = vmatprep.subr.mxu1 %v27470_v40 }
 0x61c   : > { %14055 = vmatmul.mubr.f32.vlgmr.msra.gmra.mrb[60].mxu0 %v14054_v28  ;;  %14520 = vmatmul.mubr.f32.vlgmr.msra.gmra.mrb[60].mxu1 %v14054_v28  ;;  %v16937_v28 = vand.u32 4294901760, %v27753_v55 }
 0x61d   : > { %14072 = vmatpush1.msra.mxu0 %v27503_v23  ;;  %14135 = vmatprep.mubr.f32.mxu0 %v30462_v57 }
 0x61e   : > { %14537 = vmatpush1.msra.mxu1 %v27505_v29  ;;  %14600 = vmatprep.mubr.f32.mxu1 %v30462_v57 }
 0x61f   : > { %14145 = vmatprep.subr.mxu0 %v27453_v21  ;;  %14610 = vmatprep.subr.mxu1 %v27456_v49 }
 0x624   : > { %14137 = vmatmul.mubr.f32.vlgmr.msra.gmra.mrb[60].mxu0 %v27530_v9  ;;  %14602 = vmatmul.mubr.f32.vlgmr.msra.gmra.mrb[60].mxu1 %v27530_v9 }
 0x625   : > { %14148 = vmatpush1.msra.mxu0 %v27480_v33  ;;  %14211 = vmatprep.mubr.f32.mxu0 %v30462_v57 }
 0x626   : > { %14613 = vmatpush1.msra.mxu1 %v27484_v51  ;;  %14676 = vmatprep.mubr.f32.mxu1 %v30462_v57 }
 0x627   : > { %14221 = vmatprep.subr.mxu0 %v27444_v11  ;;  %14686 = vmatprep.subr.mxu1 %v27446_v27 }
 0x62c   : > { %14214 = vmatmul.mubr.f32.vlgmr.msra.gmra.mrb[60].mxu0 %v14051_v62  ;;  %14679 = vmatmul.mubr.f32.vlgmr.msra.gmra.mrb[60].mxu1 %v14051_v62 }
 0x62d   : > { %14223 = vmatpush1.msra.mxu0 %v27439_v36  ;;  %14286 = vmatprep.mubr.f32.mxu0 %v30462_v57 }
 0x62e   : > { %14688 = vmatpush1.msra.mxu1 %v27442_v45  ;;  %14751 = vmatprep.mubr.f32.mxu1 %v30462_v57 }
 0x62f   : > { %14299 = vmatprep.subr.mxu0 %v27459_v3  ;;  %14764 = vmatprep.subr.mxu1 %v27462_v25 }
 0x634   : > { %14290 = vmatmul.mubr.f32.vlgmr.msra.gmra.mrb[60].mxu0 %v14052_v53  ;;  %14755 = vmatmul.mubr.f32.vlgmr.msra.gmra.mrb[60].mxu1 %v14052_v53  ;;  %v17007_v53 = vand.u32 4294901760, %v17006_v63 }
 0x635   : > { %14303 = vmatpush1.msra.mxu0 %v27488_v20  ;;  %14366 = vmatprep.mubr.f32.mxu0 %v30462_v57 }
 0x636   : > { %14768 = vmatpush1.msra.mxu1 %v27497_v2  ;;  %14831 = vmatprep.mubr.f32.mxu1 %v30462_v57 }
 0x637   : > { %14375 = vmatprep.subr.mxu0 %v27444_v11  ;;  %14840 = vmatprep.subr.mxu1 %v27446_v27 }
 0x63c   : > { %14368 = vmatmul.mubr.f32.vlgmr.msra.gmra.mrb[60].mxu0 %v27530_v9  ;;  %14833 = vmatmul.mubr.f32.vlgmr.msra.gmra.mrb[60].mxu1 %v27530_v9 }
 0x63d   : > { %14377 = vmatpush1.msra.mxu0 %v27439_v36  ;;  %14440 = vmatprep.mubr.f32.mxu0 %v30462_v57 }
 0x63e   : > { %14842 = vmatpush1.msra.mxu1 %v27442_v45  ;;  %14905 = vmatprep.mubr.f32.mxu1 %v30462_v57 }
 0x63f   : > { %14926 = vmatprep.subr.mxu0 %v27444_v11  ;;  %15391 = vmatprep.subr.mxu1 %v27446_v27 }
 0x644   : > { %14442 = vmatmul.mubr.f32.vlgmr.msra.gmra.mrb[60].mxu0 %v27530_v9  ;;  %14907 = vmatmul.mubr.f32.vlgmr.msra.gmra.mrb[60].mxu1 %v27530_v9  ;;  %v27774_v9 = vld [vmem:[%s29208_s8 + $0x28] sm:$0xff] }
 0x645   : > { %14928 = vmatpush1.msra.mxu0 %v27439_v36  ;;  %14991 = vmatprep.mubr.f32.mxu0 %v30462_v57 }
 0x646   : > { %15393 = vmatpush1.msra.mxu1 %v27442_v45  ;;  %15456 = vmatprep.mubr.f32.mxu1 %v30462_v57 }
 0x647   : > { %15008 = vmatprep.subr.mxu0 %v27468_v52  ;;  %15473 = vmatprep.subr.mxu1 %v27470_v40 }
 0x648   : > { %14997 = vmatmul.mubr.f32.vlgmr.msra.gmra.mrb[62].mxu0 %v14996_v42  ;;  %15462 = vmatmul.mubr.f32.vlgmr.msra.gmra.mrb[62].mxu1 %v14996_v42  ;;  %v16940_v42 = vand.u32 4294901760, %v27761_v56 }
 0x649   : > { %15014 = vmatpush1.msra.mxu0 %v27503_v23  ;;  %15077 = vmatprep.mubr.f32.mxu0 %v30462_v57 }
 0x64a   : > { %15479 = vmatpush1.msra.mxu1 %v27505_v29  ;;  %15542 = vmatprep.mubr.f32.mxu1 %v30462_v57 }
 0x64b   : > { %15087 = vmatprep.subr.mxu0 %v27453_v21  ;;  %15552 = vmatprep.subr.mxu1 %v27456_v49 }
 0x650   : > { %15079 = vmatmul.mubr.f32.vlgmr.msra.gmra.mrb[62].mxu0 %v27572_v48  ;;  %15544 = vmatmul.mubr.f32.vlgmr.msra.gmra.mrb[62].mxu1 %v27572_v48 }
 0x651   : > { %15090 = vmatpush1.msra.mxu0 %v27480_v33  ;;  %15153 = vmatprep.mubr.f32.mxu0 %v30462_v57 }
 0x652   : > { %15555 = vmatpush1.msra.mxu1 %v27484_v51  ;;  %15618 = vmatprep.mubr.f32.mxu1 %v30462_v57 }
 0x653   : > { %15163 = vmatprep.subr.mxu0 %v27444_v11  ;;  %15628 = vmatprep.subr.mxu1 %v27446_v27 }
 0x658   : > { %15156 = vmatmul.mubr.f32.vlgmr.msra.gmra.mrb[62].mxu0 %v14993_v1  ;;  %15621 = vmatmul.mubr.f32.vlgmr.msra.gmra.mrb[62].mxu1 %v14993_v1 }
 0x659   : > { %15165 = vmatpush1.msra.mxu0 %v27439_v36  ;;  %15228 = vmatprep.mubr.f32.mxu0 %v30462_v57 }
 0x65a   : > { %15630 = vmatpush1.msra.mxu1 %v27442_v45  ;;  %15693 = vmatprep.mubr.f32.mxu1 %v30462_v57 }
 0x65b   : > { %15241 = vmatprep.subr.mxu0 %v27459_v3  ;;  %15706 = vmatprep.subr.mxu1 %v27462_v25 }
 0x660   : > { %15232 = vmatmul.mubr.f32.vlgmr.msra.gmra.mrb[62].mxu0 %v14994_v15  ;;  %15697 = vmatmul.mubr.f32.vlgmr.msra.gmra.mrb[62].mxu1 %v14994_v15 }
 0x661   : > { %15245 = vmatpush1.msra.mxu0 %v27488_v20  ;;  %15308 = vmatprep.mubr.f32.mxu0 %v30462_v57 }
 0x662   : > { %15710 = vmatpush1.msra.mxu1 %v27497_v2  ;;  %15773 = vmatprep.mubr.f32.mxu1 %v30462_v57 }
 0x663   : > { %15317 = vmatprep.subr.mxu0 %v27444_v11  ;;  %15782 = vmatprep.subr.mxu1 %v27446_v27 }
 0x668   : > { %15310 = vmatmul.mubr.f32.vlgmr.msra.gmra.mrb[62].mxu0 %v27572_v48  ;;  %15775 = vmatmul.mubr.f32.vlgmr.msra.gmra.mrb[62].mxu1 %v27572_v48 }
 0x669   : > { %15319 = vmatpush1.msra.mxu0 %v27439_v36  ;;  %15382 = vmatprep.mubr.f32.mxu0 %v30462_v57 }
 0x66a   : > { %15784 = vmatpush1.msra.mxu1 %v27442_v45  ;;  %15847 = vmatprep.mubr.f32.mxu1 %v30462_v57 }
 0x66b   : > { %15868 = vmatprep.subr.mxu0 %v27444_v11  ;;  %16333 = vmatprep.subr.mxu1 %v27446_v27 }
 0x670   : > { %15384 = vmatmul.mubr.f32.vlgmr.msra.gmra.mrb[62].mxu0 %v27572_v48  ;;  %15849 = vmatmul.mubr.f32.vlgmr.msra.gmra.mrb[62].mxu1 %v27572_v48  ;;  %v27782_v48 = vld [vmem:[%s29208_s8 + $0xb0] sm:$0xff] }
 0x671   : > { %15870 = vmatpush1.msra.mxu0 %v27439_v36  ;;  %15933 = vmatprep.mubr.f32.mxu0 %v30462_v57 }
 0x672   : > { %16335 = vmatpush1.msra.mxu1 %v27442_v45  ;;  %16398 = vmatprep.mubr.f32.mxu1 %v30462_v57 }
 0x673   : > { %15950 = vmatprep.subr.mxu0 %v27468_v52  ;;  %16415 = vmatprep.subr.mxu1 %v27470_v40 }
 0x674   : > { %15939 = vmatmul.mubr.f32.vlgmr.msra.gmra.mrb[64].mxu0 %v15938_v7  ;;  %16404 = vmatmul.mubr.f32.vlgmr.msra.gmra.mrb[64].mxu1 %v15938_v7  ;;  %v16892_v7 = vand.u32 4294901760, %v27774_v9 }
 0x675   : > { %15956 = vmatpush1.msra.mxu0 %v27503_v23  ;;  %16019 = vmatprep.mubr.f32.mxu0 %v30462_v57 }
 0x676   : > { %16421 = vmatpush1.msra.mxu1 %v27505_v29  ;;  %16484 = vmatprep.mubr.f32.mxu1 %v30462_v57 }
 0x677   : > { %16029 = vmatprep.subr.mxu0 %v27453_v21  ;;  %16494 = vmatprep.subr.mxu1 %v27456_v49  ;;  %v16821_v21 = vld [vmem:[%s29208_s8 + $0x80] sm:$0xff] }
 0x67c   : > { %16021 = vmatmul.mubr.f32.vlgmr.msra.gmra.mrb[64].mxu0 %v15934_v24  ;;  %16486 = vmatmul.mubr.f32.vlgmr.msra.gmra.mrb[64].mxu1 %v15934_v24 }
 0x67d   : > { %16032 = vmatpush1.msra.mxu0 %v27480_v33  ;;  %16095 = vmatprep.mubr.f32.mxu0 %v30462_v57 }
 0x67e   : > { %16497 = vmatpush1.msra.mxu1 %v27484_v51  ;;  %16560 = vmatprep.mubr.f32.mxu1 %v30462_v57  ;;  %v27728_v51 = vsub.f32 %v27698_v5, %v16886_v37  ;;  %v27832_v5 = vpack.c.bf16 %v16886_v37, %v16883_v4 }
 0x67f   : > { %16105 = vmatprep.subr.mxu0 %v27444_v11  ;;  %16570 = vmatprep.subr.mxu1 %v27446_v27 }
 0x680   : > { %v29592_v34 = vand.u32 4294901760, %v27728_v51  ;;  %30467 = vst [vmem:[#allocation12_spill] sm:$0xff] %v27832_v5 }
 0x682   : > { %v17013_v29 = vsub.f32 %v27728_v51, %v29592_v34 }
 0x684   : > { %16098 = vmatmul.mubr.f32.vlgmr.msra.gmra.mrb[64].mxu0 %v15935_v60  ;;  %16563 = vmatmul.mubr.f32.vlgmr.msra.gmra.mrb[64].mxu1 %v15935_v60  ;;  %v17014_v19 = vand.u32 4294901760, %v17013_v29  ;;  %v27792_v60 = vsub.f32 %v27753_v55, %v16937_v28  ;;  %v27876_v29 = vld [vmem:[%s29208_s8 + $0xc8] sm:$0xff] }
 0x685   : > { %16107 = vmatpush1.msra.mxu0 %v27439_v36  ;;  %16170 = vmatprep.mubr.f32.mxu0 %v30462_v57 }
 0x686   : > { %16572 = vmatpush1.msra.mxu1 %v27442_v45  ;;  %16635 = vmatprep.mubr.f32.mxu1 %v30462_v57 }
 0x687   : > { %16183 = vmatprep.subr.mxu0 %v27459_v3  ;;  %16648 = vmatprep.subr.mxu1 %v27462_v25  ;;  %v27681_v3 = vld [vmem:[%s29208_s8 + $0x90] sm:$0xff]  ;;  %v27686_v25 = vld [vmem:[%s29208_s8 + $0x98] sm:$0xff] }
 0x688   : > { %v16931_v40 = vand.u32 4294901760, %v27681_v3  ;;  %v16934_v6 = vand.u32 4294901760, %v27686_v25 }
 0x68a   : > { %v27710_v30 = vsub.f32 %v27681_v3, %v16931_v40  ;;  %v27713_v26 = vsub.f32 %v27686_v25, %v16934_v6  ;;  %v27815_v3 = vsub.f32 %v27774_v9, %v16892_v7 }
 0x68c   : > { %16174 = vmatmul.mubr.f32.vlgmr.msra.gmra.mrb[64].mxu0 %v15936_v31  ;;  %16639 = vmatmul.mubr.f32.vlgmr.msra.gmra.mrb[64].mxu1 %v15936_v31  ;;  %v29596_v33 = vand.u32 4294901760, %v27710_v30  ;;  %v29595_v35 = vand.u32 4294901760, %v27713_v26 }
 0x68d   : > { %16187 = vmatpush1.msra.mxu0 %v27488_v20  ;;  %16250 = vmatprep.mubr.f32.mxu0 %v30462_v57 }
 0x68e   : > { %16652 = vmatpush1.msra.mxu1 %v27497_v2  ;;  %16715 = vmatprep.mubr.f32.mxu1 %v30462_v57  ;;  %v17118_v20 = vsub.f32 %v27710_v30, %v29596_v33  ;;  %v17125_v44 = vsub.f32 %v27713_v26, %v29595_v35 }
 0x68f   : > { %16259 = vmatprep.subr.mxu0 %v27444_v11  ;;  %16724 = vmatprep.subr.mxu1 %v27446_v27  ;;  %v16822_v11 = vld [vmem:[%s29208_s8 + $0x88] sm:$0xff]  ;;  %v16925_v27 = vand.u32 4294901760, %v16821_v21 }
 0x690   : > { %v16928_v49 = vand.u32 4294901760, %v16822_v11  ;;  %v17119_v23 = vand.u32 4294901760, %v17118_v20  ;;  %v17126_v39 = vand.u32 4294901760, %v17125_v44 }
 0x691   : > { %v27700_v8 = vsub.f32 %v16821_v21, %v16925_v27  ;;  %v27801_v21 = vld [vmem:[%s29208_s8 + $0x30] sm:$0xff] }
 0x692   : > { %v27702_v43 = vsub.f32 %v16822_v11, %v16928_v49  ;;  %v27776_v13 = vpack.c.bf16 %v16928_v49, %v16925_v27  ;;  %v22850_v15 = vpack.c.bf16 %v17126_v39, %v17119_v23  ;;  %v22852_v11 = vpack.c.bf16 %v17014_v19, %v17007_v53  ;;  %v27871_v39 = vld [vmem:[%s29208_s8 + $0xc0] sm:$0xff] }
 0x693   : > { %30464 = vst [vmem:[#allocation9_spill] sm:$0xff] %v27700_v8  ;;  %v29605_v16 = vand.u32 4294901760, %v27700_v8  ;;  %v27806_v27 = vpack.c.bf16 %v16934_v6, %v16931_v40  ;;  %v16943_v49 = vand.u32 4294901760, %v27782_v48  ;;  %v27881_v53 = vpack.c.bf16 %v16940_v42, %v16937_v28 }
 0x694   : > { %16252 = vmatmul.mubr.f32.vlgmr.msra.gmra.mrb[64].mxu0 %v15934_v24  ;;  %16717 = vmatmul.mubr.f32.vlgmr.msra.gmra.mrb[64].mxu1 %v15934_v24  ;;  %30465 = vst [vmem:[#allocation10_spill] sm:$0xff] %v27702_v43  ;;  %v29601_v32 = vand.u32 4294901760, %v27702_v43 }
 0x695   : > { %16261 = vmatpush1.msra.mxu0 %v27439_v36  ;;  %16324 = vmatprep.mubr.f32.mxu0 %v30462_v57  ;;  %v16805_v36 = vld [vmem:[%s29208_s8] sm:$0xff]  ;;  %v17104_v0 = vsub.f32 %v27700_v8, %v29605_v16  ;;  %30466 = vst [vmem:[#allocation11_spill] sm:$0xff] %v27806_v27  ;;  %v27828_v6 = vsub.f32 %v27782_v48, %v16943_v49  ;;  %30468 = vst [vmem:[#allocation16_spill] sm:$0xff] %v27881_v53  ;;  %v27949_v48 = vld [vmem:[%s29208_s8 + $0x50] sm:$0xff] }
 0x696   : > { %16726 = vmatpush1.msra.mxu1 %v27442_v45  ;;  %16789 = vmatprep.mubr.f32.mxu1 %v30462_v57  ;;  %v16806_v57 = vld [vmem:[%s29208_s8 + $0x8] sm:$0xff]  ;;  %v16877_v45 = vand.u32 4294901760, %v16805_v36  ;;  %v17111_v17 = vsub.f32 %v27702_v43, %v29601_v32 }
 0x697   : > { %v16880_v52 = vand.u32 4294901760, %v16806_v57  ;;  %v17105_v2 = vand.u32 4294901760, %v17104_v0  ;;  %22815 = vmatprep.subr.bf16.mxu0 %v27776_v13  ;;  %v16895_v0 = vand.u32 4294901760, %v27801_v21  ;;  %v29585_v4 = vand.u32 4294901760, %v27828_v6 }
 0x698   : > { %v27704_v14 = vsub.f32 %v16805_v36, %v16877_v45  ;;  %v17112_v50 = vand.u32 4294901760, %v17111_v17  ;;  %v27804_v36 = vsub.f32 %v27761_v56, %v16940_v42 }
 0x699   : > { %v27707_v47 = vsub.f32 %v16806_v57, %v16880_v52  ;;  %v27794_v31 = vpack.c.bf16 %v16880_v52, %v16877_v45  ;;  %v29591_v57 = vand.u32 4294901760, %v27792_v60  ;;  %v27812_v45 = vsub.f32 %v27769_v46, %v16889_v18  ;;  %v27821_v52 = vld [vmem:[%s29208_s8 + $0x38] sm:$0xff] }
 0x69a   : > { %v29599_v22 = vand.u32 4294901760, %v27704_v14  ;;  %v22846_v62 = vpack.c.bf16 %v17112_v50, %v17105_v2  ;;  %v29590_v40 = vand.u32 4294901760, %v27804_v36  ;;  %v16898_v37 = vand.u32 4294901760, %v27821_v52 }
 0x69b   : > { %v29598_v58 = vand.u32 4294901760, %v27707_v47  ;;  %v17132_v17 = vsub.f32 %v27792_v60, %v29591_v57  ;;  %v27851_v44 = vsub.f32 %v27801_v21, %v16895_v0  ;;  %v17146_v56 = vsub.f32 %v27828_v6, %v29585_v4 }
 0x69c   : > { %16326 = vmatmul.mubr.f32.vlgmr.msra.gmra.mrb[64].mxu0 %v15934_v24  ;;  %16791 = vmatmul.mubr.f32.vlgmr.msra.gmra.mrb[64].mxu1 %v15934_v24  ;;  %v16992_v12 = vsub.f32 %v27704_v14, %v29599_v22  ;;  %v27788_v24 = vld [vmem:[%s29208_s8 + $0xb8] sm:$0xff]  ;;  %v17139_v61 = vsub.f32 %v27804_v36, %v29590_v40  ;;  %v27866_v23 = vsub.f32 %v27821_v52, %v16898_v37  ;;  %v27895_v52 = vld [vmem:[%s29208_s8 + $0x48] sm:$0xff] }
 0x69d   : > { %v16999_v54 = vsub.f32 %v27707_v47, %v29598_v58  ;;  %22847 = vmatprep.subr.bf16.mxu1 %v22846_v62  ;;  %22817 = vmatpush3.bf16.msra.mxu0 %v27794_v31  ;;  %v16946_v25 = vand.u32 4294901760, %v27788_v24  ;;  %v17133_v55 = vand.u32 4294901760, %v17132_v17  ;;  %v17147_v19 = vand.u32 4294901760, %v17146_v56 }
 0x69e   : > { %v16993_v10 = vand.u32 4294901760, %v16992_v12  ;;  %22819 = vmatprep.subr.bf16.mxu0 %v27806_v27  ;;  %v29587_v12 = vand.u32 4294901760, %v27812_v45  ;;  %v17140_v63 = vand.u32 4294901760, %v17139_v61  ;;  %v16949_v17 = vand.u32 4294901760, %v27871_v39 }
 0x69f   : > { %v17000_v41 = vand.u32 4294901760, %v16999_v54  ;;  %v29586_v54 = vand.u32 4294901760, %v27815_v3  ;;  %v27841_v20 = vsub.f32 %v27788_v24, %v16946_v25  ;;  %v16952_v61 = vand.u32 4294901760, %v27876_v29 }
 0x6a0   : > { %v17020_v2 = vsub.f32 %v27812_v45, %v29587_v12  ;;  %v27965_v4 = vpack.c.bf16 %v16898_v37, %v16895_v0  ;;  %v16907_v37 = vand.u32 4294901760, %v27949_v48 }
 0x6a1   : > { %v22848_v1 = vpack.c.bf16 %v17000_v41, %v16993_v10  ;;  %v17027_v50 = vsub.f32 %v27815_v3, %v29586_v54  ;;  %v29584_v10 = vand.u32 4294901760, %v27841_v20  ;;  %22821 = vmatpush3.bf16.msra.mxu0 %v27832_v5  ;;  %v29583_v41 = vand.u32 4294901760, %v27851_v44 }
 0x6a2   : > { %v17021_v46 = vand.u32 4294901760, %v17020_v2  ;;  %22823 = vmatprep.subr.bf16.mxu0 %v27881_v53  ;;  %30472 = vst [vmem:[#allocation32_spill] sm:$0xff] %v27965_v4  ;;  %v27994_v59 = vsub.f32 %v27949_v48, %v16907_v37 }
 0x6a3   : > { %22849 = vmatpush3.bf16.msra.mxu1 %v22848_v1  ;;  %v17028_v9 = vand.u32 4294901760, %v17027_v50  ;;  %v17153_v62 = vsub.f32 %v27841_v20, %v29584_v10  ;;  %v27886_v1 = vld [vmem:[%s29208_s8 + $0x40] sm:$0xff]  ;;  %v17034_v24 = vsub.f32 %v27851_v44, %v29583_v41 }
 0x6a4   : > { %22851 = vmatprep.subr.bf16.mxu1 %v22850_v15  ;;  %v22854_v15 = vpack.c.bf16 %v17140_v63, %v17133_v55  ;;  %v27903_v55 = vld [vmem:[%s29208_s8 + $0xd0] sm:$0xff]  ;;  %v27908_v63 = vpack.c.bf16 %v16892_v7, %v16889_v18  ;;  %v16901_v56 = vand.u32 4294901760, %v27886_v1  ;;  %v16904_v18 = vand.u32 4294901760, %v27895_v52 }
 0x6a5   : > { %v22856_v28 = vpack.c.bf16 %v17028_v9, %v17021_v46  ;;  %v17154_v42 = vand.u32 4294901760, %v17153_v62  ;;  %v17035_v2 = vand.u32 4294901760, %v17034_v24  ;;  %v27914_v46 = vld [vmem:[%s29208_s8 + $0xd8] sm:$0xff]  ;;  %v27919_v62 = vsub.f32 %v27871_v39, %v16949_v17 }
 0x6a6   : > { %30469 = vst [vmem:[#allocation20_spill] sm:$0xff] %v27908_v63  ;;  %22825 = vmatpush3.bf16.msra.mxu0 %v27908_v63  ;;  %v27931_v24 = vsub.f32 %v27886_v1, %v16901_v56  ;;  %v16958_v41 = vand.u32 4294901760, %v27914_v46  ;;  %v29602_v58 = vand.u32 4294901760, %v27994_v59  ;;  %v16836_v39 = vld [vmem:[%s29208_s8 + $0xf8] sm:$0xff] }
 0x6a7   : > { %22853 = vmatpush3.bf16.msra.mxu1 %v22852_v11  ;;  %v29582_v11 = vand.u32 4294901760, %v27866_v23  ;;  %v22858_v9 = vpack.c.bf16 %v17154_v42, %v17147_v19  ;;  %v27935_v19 = vpack.c.bf16 %v16946_v25, %v16943_v49  ;;  %v29589_v42 = vand.u32 4294901760, %v27919_v62  ;;  %v27954_v49 = vld [vmem:[%s29208_s8 + $0x58] sm:$0xff] }
 0x6a8   : > { %22855 = vmatprep.subr.bf16.mxu1 %v22854_v15  ;;  %v27924_v15 = vsub.f32 %v27876_v29, %v16952_v61  ;;  %v27977_v12 = vsub.f32 %v27914_v46, %v16958_v41  ;;  %v16819_v29 = vld [vmem:[%s29208_s8 + $0x70] sm:$0xff] }
 0x6a9   : > { %v17041_v50 = vsub.f32 %v27866_v23, %v29582_v11  ;;  %30471 = vst [vmem:[#allocation28_spill] sm:$0xff] %v27935_v19  ;;  %22827 = vmatprep.subr.bf16.mxu0 %v27935_v19  ;;  %v17160_v54 = vsub.f32 %v27919_v62, %v29589_v42 }
 0x6aa   : > { %30470 = vst [vmem:[#allocation22_spill] sm:$0xff] %v27924_v15  ;;  %v29588_v11 = vand.u32 4294901760, %v27924_v15  ;;  %22829 = vmatpush3.bf16.msra.mxu0 %v27965_v4 }
 0x6ab   : > { %22857 = vmatpush3.bf16.msra.mxu1 %v22856_v28  ;;  %v17042_v7 = vand.u32 4294901760, %v17041_v50  ;;  %v16955_v28 = vand.u32 4294901760, %v27903_v55  ;;  %v27943_v50 = vsub.f32 %v27895_v52, %v16904_v18  ;;  %v17161_v42 = vand.u32 4294901760, %v17160_v54 }
 0x6ac   : > { %22859 = vmatprep.subr.bf16.mxu1 %v22858_v9  ;;  %v29593_v9 = vand.u32 4294901760, %v27931_v24 }
 0x6ad   : > { %v22860_v25 = vpack.c.bf16 %v17042_v7, %v17035_v2  ;;  %v27961_v10 = vsub.f32 %v27903_v55, %v16955_v28  ;;  %v17167_v2 = vsub.f32 %v27924_v15, %v29588_v11  ;;  %v29597_v7 = vand.u32 4294901760, %v27943_v50 }
 0x6ae   : > { %v17048_v21 = vsub.f32 %v27931_v24, %v29593_v9  ;;  %v16910_v11 = vand.u32 4294901760, %v27954_v49  ;;  %v28059_v52 = vpack.c.bf16 %v16958_v41, %v16955_v28  ;;  %v16919_v28 = vand.u32 4294901760, %v16819_v29 }
 0x6af   : > { %22861 = vmatpush3.bf16.msra.mxu1 %v22860_v25  ;;  %v29600_v0 = vand.u32 4294901760, %v27961_v10  ;;  %v17168_v40 = vand.u32 4294901760, %v17167_v2  ;;  %v17055_v57 = vsub.f32 %v27943_v50, %v29597_v7  ;;  %v29604_v25 = vand.u32 4294901760, %v27977_v12 }
 0x6b0   : > { %v17049_v34 = vand.u32 4294901760, %v17048_v21  ;;  %v27997_v35 = vsub.f32 %v27954_v49, %v16910_v11  ;;  %30475 = vst [vmem:[#allocation40_spill] sm:$0xff] %v28059_v52 }
 0x6b1   : > { %v17174_v9 = vsub.f32 %v27961_v10, %v29600_v0  ;;  %v22862_v33 = vpack.c.bf16 %v17168_v40, %v17161_v42  ;;  %v17056_v54 = vand.u32 4294901760, %v17055_v57  ;;  %v17181_v2 = vsub.f32 %v27977_v12, %v29604_v25 }
 0x6b2   : > { %v29603_v21 = vand.u32 4294901760, %v27997_v35  ;;  %v17062_v57 = vsub.f32 %v27994_v59, %v29602_v58  ;;  %v16834_v58 = vld [vmem:[%s29208_s8 + $0xe8] sm:$0xff] }
 0x6b3   : > { %v17175_v7 = vand.u32 4294901760, %v17174_v9  ;;  %22863 = vmatprep.subr.bf16.mxu1 %v22862_v33  ;;  %v22864_v22 = vpack.c.bf16 %v17056_v54, %v17049_v34  ;;  %v17182_v0 = vand.u32 4294901760, %v17181_v2  ;;  %v16833_v2 = vld [vmem:[%s29208_s8 + $0xe0] sm:$0xff]  ;;  %v16964_v25 = vand.u32 4294901760, %v16834_v58 }
 0x6b4   : > { %v17069_v40 = vsub.f32 %v27997_v35, %v29603_v21  ;;  %v17063_v34 = vand.u32 4294901760, %v17062_v57  ;;  %v16961_v21 = vand.u32 4294901760, %v16833_v2  ;;  %v28040_v57 = vpack.c.bf16 %v16904_v18, %v16901_v56  ;;  %v16820_v56 = vld [vmem:[%s29208_s8 + $0x78] sm:$0xff] }
 0x6b5   : > { %22865 = vmatpush3.bf16.msra.mxu1 %v22864_v22  ;;  %v22866_v33 = vpack.c.bf16 %v17182_v0, %v17175_v7  ;;  %v16817_v22 = vld [vmem:[%s29208_s8 + $0x60] sm:$0xff]  ;;  %v16818_v7 = vld [vmem:[%s29208_s8 + $0x68] sm:$0xff]  ;;  %v28034_v0 = vpack.c.bf16 %v16952_v61, %v16949_v17  ;;  %v28053_v1 = vsub.f32 %v16834_v58, %v16964_v25  ;;  %v28069_v58 = vpack.c.bf16 %v16910_v11, %v16907_v37 }
 0x6b6   : > { %v17070_v9 = vand.u32 4294901760, %v17069_v40  ;;  %30474 = vst [vmem:[#allocation36_spill] sm:$0xff] %v28040_v57  ;;  %v16913_v40 = vand.u32 4294901760, %v16817_v22  ;;  %v28051_v17 = vsub.f32 %v16833_v2, %v16961_v21 }
 0x6b7   : > { %22867 = vmatprep.subr.bf16.mxu1 %v22866_v33  ;;  %30473 = vst [vmem:[#allocation51_spill] sm:$0xff] %v28034_v0  ;;  %v16916_v33 = vand.u32 4294901760, %v16818_v7  ;;  %22831 = vmatprep.subr.bf16.mxu0 %v28034_v0  ;;  %30476 = vst [vmem:[#allocation56_spill] sm:$0xff] %v28069_v58  ;;  %v29617_v46 = vand.u32 4294901760, %v28053_v1 }
 0x6b8   : > { %v22868_v54 = vpack.c.bf16 %v17070_v9, %v17063_v34  ;;  %v16835_v34 = vld [vmem:[%s29208_s8 + $0xf0] sm:$0xff]  ;;  %v28065_v18 = vsub.f32 %v16817_v22, %v16913_v40  ;;  %v29614_v55 = vand.u32 4294901760, %v28051_v17  ;;  %22833 = vmatpush3.bf16.msra.mxu0 %v28040_v57  ;;  %v28088_v57 = vsub.f32 %v16819_v29, %v16919_v28 }
 0x6b9   : > { %v16967_v61 = vand.u32 4294901760, %v16835_v34  ;;  %v28067_v9 = vsub.f32 %v16818_v7, %v16916_v33  ;;  %22835 = vmatprep.subr.bf16.mxu0 %v28059_v52  ;;  %v16922_v7 = vand.u32 4294901760, %v16820_v56  ;;  %v17195_v37 = vsub.f32 %v28053_v1, %v29617_v46 }
 0x6ba   : > { %22869 = vmatpush3.bf16.msra.mxu1 %v22868_v54  ;;  %v16970_v54 = vand.u32 4294901760, %v16836_v39  ;;  %v29620_v2 = vand.u32 4294901760, %v28065_v18  ;;  %v17188_v11 = vsub.f32 %v28051_v17, %v29614_v55  ;;  %30477 = vst [vmem:[#allocation70_spill] sm:$0xff] %v28088_v57  ;;  %v29630_v29 = vand.u32 4294901760, %v28088_v57 }
 0x6bb   : > { %v28074_v41 = vsub.f32 %v16835_v34, %v16967_v61  ;;  %v28097_v4 = vsub.f32 %v16820_v56, %v16922_v7  ;;  %v17196_v19 = vand.u32 4294901760, %v17195_v37  ;;  %v28111_v37 = vpack.c.bf16 %v16964_v25, %v16961_v21  ;;  %v30488_v21 = vld [vmem:[#allocation88_spill] sm:$0xff] }
 0x6bc   : > { %v28079_v22 = vsub.f32 %v16836_v39, %v16970_v54  ;;  %v17076_v16 = vsub.f32 %v28065_v18, %v29620_v2  ;;  %v30478_v39 = vand.u32 4294901760, %v28067_v9  ;;  %v17189_v55 = vand.u32 4294901760, %v17188_v11  ;;  %22837 = vmatpush3.bf16.msra.mxu0 %v28069_v58 }
 0x6bd   : > { %v29625_v34 = vand.u32 4294901760, %v28074_v41  ;;  %30479 = vst [vmem:[#allocation71_spill] sm:$0xff] %v28097_v4  ;;  %v29629_v53 = vand.u32 4294901760, %v28097_v4  ;;  %v17090_v11 = vsub.f32 %v28088_v57, %v29630_v29  ;;  %30480 = vst [vmem:[#allocation73_spill] sm:$0xff] %v28111_v37  ;;  %22839 = vmatprep.subr.bf16.mxu0 %v28111_v37 }
 0x6be   : > { %v17083_v52 = vsub.f32 %v28067_v9, %v30478_v39  ;;  %v29628_v0 = vand.u32 4294901760, %v28079_v22  ;;  %v17077_v63 = vand.u32 4294901760, %v17076_v16  ;;  %v22870_v56 = vpack.c.bf16 %v17196_v19, %v17189_v55 }
 0x6bf   : > { %v17202_v46 = vsub.f32 %v28074_v41, %v29625_v34  ;;  %v17097_v16 = vsub.f32 %v28097_v4, %v29629_v53  ;;  %v28119_v19 = vpack.c.bf16 %v16970_v54, %v16967_v61  ;;  %v28121_v55 = vpack.c.bf16 %v16922_v7, %v16919_v28  ;;  %v30485_v28 = vld [vmem:[#allocation84_spill] sm:$0xff]  ;;  %v30486_v7 = vld [vmem:[#allocation85_spill] sm:$0xff] }
 0x6c0   : > { %v17084_v2 = vand.u32 4294901760, %v17083_v52  ;;  %v17209_v39 = vsub.f32 %v28079_v22, %v29628_v0  ;;  %v28116_v52 = vpack.c.bf16 %v16916_v33, %v16913_v40  ;;  %22871 = vmatprep.subr.bf16.mxu1 %v22870_v56  ;;  %v17091_v0 = vand.u32 4294901760, %v17090_v11  ;;  %v30482_v11 = vld [vmem:[#allocation8_spill] sm:$0xff] }
 0x6c1   : > { %v17203_v5 = vand.u32 4294901760, %v17202_v46  ;;  %v17098_v25 = vand.u32 4294901760, %v17097_v16  ;;  %v22878_v40 = vpack.c.bf16 %v27702_v43, %v27700_v8 }
 0x6c2   : > { %v22872_v34 = vpack.c.bf16 %v17084_v2, %v17077_v63  ;;  %v17210_v58 = vand.u32 4294901760, %v17209_v39  ;;  %22841 = vmatpush3.bf16.msra.mxu0 %v28116_v52 }
 0x6c3   : > { %22843 = vmatprep.subr.bf16.mxu0 %v28119_v19  ;;  %v22876_v61 = vpack.c.bf16 %v17098_v25, %v17091_v0  ;;  %v422_v0 = vld [vmem:[%s29203_s3 + $0x8] sm:$0xf] }
 0x6c4   : > { %22873 = vmatpush3.bf16.msra.mxu1 %v22872_v34  ;;  %v22874_v46 = vpack.c.bf16 %v17210_v58, %v17203_v5  ;;  %v30481_v34 = vld [vmem:[#allocation7_spill] sm:$0xff]  ;;  %v464_v16 = vrot.slane %v422_v0, %v30482_v11 }
 0x6c5   : > { %v460_v39 = vrot.slane %v422_v0, %v30481_v34  ;;  %v30487_v34 = vld [vmem:[#allocation86_spill] sm:$0xff] }
 0x6c6   : > { %22875 = vmatprep.subr.bf16.mxu1 %v22874_v46  ;;  %22845 = vmatpush3.bf16.msra.mxu0 %v28121_v55  ;;  %v30483_v46 = vld [vmem:[#allocation5_spill] sm:$0xff]  ;;  %v23207_v5 = vadd.f32 %v30486_v7, %v464_v16 }
 0x6c7   : > { %22879 = vmatprep.subr.bf16.mxu0 %v22878_v40  ;;  %v468_v25 = vrot.slane %v422_v0, %v30483_v46  ;;  %v30484_v40 = vld [vmem:[#allocation6_spill] sm:$0xff]  ;;  %v23206_v58 = vadd.f32 %v30485_v28, %v460_v39  ;;  %v30490_v28 = vand.u32 4294901760, %v28053_v1 }
 0x6c8   : > { %22877 = vmatpush3.bf16.msra.mxu1 %v22876_v61  ;;  %v472_v61 = vrot.slane %v422_v0, %v30484_v40 }
 0x6c9   : > { %22911 = vmatprep.subr.bf16.mxu1 %v27776_v13  ;;  %v23208_v33 = vadd.f32 %v30487_v34, %v468_v25 }
 0x6ca   : > { %v23209_v56 = vadd.f32 %v30488_v21, %v472_v61 }
 0x6eb   : > { %v28004_v32 = vpop.f32.mrb[58].mxu0  ;;  %v28006_v48 = vpop.f32.mrb[58].mxu1 }
 0x6ec   : > { %v28014_v42 = vpop.f32.mrb[59].mxu0  ;;  %v28016_v49 = vpop.f32.mrb[59].mxu1  ;;  %v13975_v11 = vmul.f32 %v23206_v58, %v28004_v32  ;;  %v13977_v0 = vmul.f32 %v23208_v33, %v28006_v48 }
 0x6ed   : > { %v13976_v39 = vmul.f32 %v23207_v5, %v28014_v42  ;;  %v13978_v7 = vmul.f32 %v23209_v56, %v28016_v49  ;;  %v30492_v42 = vand.u32 4294901760, %v28065_v18  ;;  %v30493_v49 = vand.u32 4294901760, %v28067_v9 }
 0x717   : > { %v14443_v63 = vpop.f32.mrb[60].mxu0  ;;  %v14908_v46 = vpop.f32.mrb[60].mxu1 }
 0x718   : > { %v14913_v40 = vmul.f32 %v23209_v56, %v14443_v63  ;;  %v14915_v53 = vmul.f32 %v23207_v5, %v14908_v46  ;;  %v14445_v2 = vpop.f32.mrb[61].mxu0  ;;  %v14910_v29 = vpop.f32.mrb[61].mxu1  ;;  %v30489_v46 = vand.u32 4294901760, %v28051_v17 }
 0x719   : > { %v14914_v16 = vmul.f32 %v23206_v58, %v14445_v2  ;;  %v14916_v25 = vmul.f32 %v23208_v33, %v14910_v29  ;;  %v28184_v29 = vpack.c.bf16 %v30493_v49, %v30492_v42  ;;  %v30496_v2 = vand.u32 4294901760, %v28079_v22 }
 0x71a   : > { %v14917_v21 = vadd.f32 %v14913_v40, %v13975_v11  ;;  %v14919_v61 = vadd.f32 %v14915_v53, %v13977_v0  ;;  %v28178_v54 = vpack.c.bf16 %v30490_v28, %v30489_v46  ;;  %v30495_v53 = vand.u32 4294901760, %v28074_v41 }
 0x71b   : > { %v14918_v34 = vadd.f32 %v14914_v16, %v13976_v39  ;;  %v14920_v48 = vadd.f32 %v14916_v25, %v13978_v7  ;;  %30494 = vst [vmem:[#allocation37_spill] sm:$0xff] %v28184_v29  ;;  %v30498_v0 = vand.u32 4294901760, %v28088_v57  ;;  %v30499_v40 = vand.u32 4294901760, %v28097_v4 }
 0x71c   : > { %30491 = vst [vmem:[#allocation48_spill] sm:$0xff] %v28178_v54  ;;  %v28190_v11 = vpack.c.bf16 %v30496_v2, %v30495_v53 }
 0x71d   : > { %v28196_v39 = vpack.c.bf16 %v30499_v40, %v30498_v0  ;;  %v28201_v0 = vld [vmem:[%s29208_s8 + $0x180] sm:$0xff] }
 0x71e   : > { %30497 = vst [vmem:[#allocation38_spill] sm:$0xff] %v28190_v11  ;;  %30501 = vst [vmem:[#allocation44_spill] sm:$0xff] %v28201_v0 }
 0x71f   : > { %30500 = vst [vmem:[#allocation41_spill] sm:$0xff] %v28196_v39 }
 0x743   : > { %v15385_v28 = vpop.f32.mrb[62].mxu0  ;;  %v15850_v7 = vpop.f32.mrb[62].mxu1 }
 0x744   : > { %v15855_v16 = vmul.f32 %v23208_v33, %v15385_v28  ;;  %v15857_v25 = vmul.f32 %v23206_v58, %v15850_v7  ;;  %v15387_v46 = vpop.f32.mrb[63].mxu0  ;;  %v15852_v63 = vpop.f32.mrb[63].mxu1 }
 0x745   : > { %v15856_v42 = vmul.f32 %v23209_v56, %v15387_v46  ;;  %v15858_v49 = vmul.f32 %v23207_v5, %v15852_v63  ;;  %v29635_v63 = vand.u32 4294901760, %v28201_v0 }
 0x746   : > { %v15859_v32 = vadd.f32 %v15855_v16, %v14917_v21  ;;  %v15861_v29 = vadd.f32 %v15857_v25, %v14919_v61  ;;  %v28206_v21 = vld [vmem:[%s29208_s8 + $0x188] sm:$0xff]  ;;  %v28211_v61 = vld [vmem:[%s29208_s8 + $0x100] sm:$0xff]  ;;  %v28252_v16 = vld [vmem:[%s29208_s8 + $0x118] sm:$0xff] }
 0x747   : > { %v15860_v54 = vadd.f32 %v15856_v42, %v14918_v34  ;;  %v15862_v43 = vadd.f32 %v15858_v49, %v14920_v48  ;;  %30502 = vst [vmem:[#allocation62_spill] sm:$0xff] %v28206_v21  ;;  %30503 = vst [vmem:[#allocation63_spill] sm:$0xff] %v28211_v61  ;;  %v28259_v46 = vsub.f32 %v28201_v0, %v29635_v63  ;;  %v28265_v49 = vld [vmem:[%s29208_s8 + $0x1a0] sm:$0xff]  ;;  %v30527_v42 = vld [vmem:[#allocation12_spill] sm:$0xff] }
 0x748   : > { %30511 = vst [vmem:[#allocation91_spill] sm:$0xff] %v28252_v16  ;;  %30513 = vst [vmem:[#allocation42_spill] sm:$0xff] %v28265_v49  ;;  %v28305_v63 = vld [vmem:[%s29208_s8 + $0x120] sm:$0xff]  ;;  %v28352_v0 = vld [vmem:[%s29208_s8 + $0x138] sm:$0xff] }
 0x749   : > { %30512 = vst [vmem:[#allocation45_spill] sm:$0xff] %v28259_v46  ;;  %30519 = vst [vmem:[#allocation15_spill] sm:$0xff] %v28305_v63 }
 0x74a   : > { %30531 = vst [vmem:[#allocation61_spill] sm:$0xff] %v28352_v0 }
 0x76f   : > { %v16327_v53 = vpop.f32.mrb[64].mxu0  ;;  %v16792_v2 = vpop.f32.mrb[64].mxu1 }
 0x770   : > { %v16797_v11 = vmul.f32 %v23207_v5, %v16327_v53  ;;  %v16799_v57 = vmul.f32 %v23209_v56, %v16792_v2  ;;  %v16329_v8 = vpop.f32.mrb[65].mxu0  ;;  %v16794_v4 = vpop.f32.mrb[65].mxu1 }
 0x771   : > { %v16798_v40 = vmul.f32 %v23208_v33, %v16329_v8  ;;  %v16800_v28 = vmul.f32 %v23206_v58, %v16794_v4  ;;  %v28221_v8 = vld [vmem:[%s29208_s8 + $0x108] sm:$0xff]  ;;  %v28226_v4 = vld [vmem:[%s29208_s8 + $0x190] sm:$0xff] }
 0x772   : > { %v16801_v5 = vadd.f32 %v16797_v11, %v15859_v32  ;;  %v28213_v56 = vadd.f32 %v16799_v57, %v15861_v29  ;;  %30506 = vst [vmem:[#allocation52_spill] sm:$0xff] %v28221_v8  ;;  %30507 = vst [vmem:[#allocation49_spill] sm:$0xff] %v28226_v4  ;;  %v29636_v57 = vand.u32 4294901760, %v28206_v21  ;;  %v28242_v32 = vld [vmem:[%s29208_s8 + $0x110] sm:$0xff]  ;;  %v29639_v11 = vand.u32 4294901760, %v28221_v8 }
 0x773   : > { %v16802_v34 = vadd.f32 %v16798_v40, %v15860_v54  ;;  %v28215_v48 = vadd.f32 %v16800_v28, %v15862_v43  ;;  %v29637_v54 = vand.u32 4294901760, %v28211_v61  ;;  %v28235_v43 = vld [vmem:[%s29208_s8 + $0x198] sm:$0xff]  ;;  %30510 = vst [vmem:[#allocation87_spill] sm:$0xff] %v28242_v32  ;;  %v29641_v7 = vand.u32 4294901760, %v28226_v4 }
 0x774   : > { %30504 = vst [vmem:[#allocation104_spill] sm:$0xff] %v28213_v56  ;;  %v28228_v33 = vand.u32 4294901760, %v16801_v5  ;;  %30509 = vst [vmem:[#allocation83_spill] sm:$0xff] %v28235_v43  ;;  %v28272_v2 = vsub.f32 %v28206_v21, %v29636_v57  ;;  %v30521_v56 = vand.u32 4294901760, %v28235_v43 }
 0x775   : > { %30505 = vst [vmem:[#allocation105_spill] sm:$0xff] %v28215_v48  ;;  %v28237_v58 = vand.u32 4294901760, %v16802_v34  ;;  %v28277_v40 = vsub.f32 %v28211_v61, %v29637_v54  ;;  %v28294_v54 = vsub.f32 %v28221_v8, %v29639_v11  ;;  %v28299_v28 = vsub.f32 %v28226_v4, %v29641_v7 }
 0x776   : > { %30508 = vst [vmem:[#allocation72_spill] sm:$0xff] %v28228_v33  ;;  %v28245_v29 = vsub.f32 %v16801_v5, %v28228_v33  ;;  %30514 = vst [vmem:[#allocation96_spill] sm:$0xff] %v28272_v2  ;;  %v28283_v5 = vld [vmem:[%s29208_s8 + $0x1a8] sm:$0xff]  ;;  %v28315_v39 = vsub.f32 %v28235_v43, %v30521_v56  ;;  %v30523_v61 = vand.u32 4294901760, %v28242_v32  ;;  %v28334_v56 = vld [vmem:[%s29208_s8 + $0x1b8] sm:$0xff]  ;;  %v30528_v8 = vand.u32 4294901760, %v28252_v16 }
 0x777   : > { %v16973_v25 = vsub.f32 %v16802_v34, %v28237_v58  ;;  %17213 = vmatprep.mubr.f32.mxu1 %v28237_v58  ;;  %30515 = vst [vmem:[#allocation100_spill] sm:$0xff] %v28277_v40  ;;  %30516 = vst [vmem:[#allocation50_spill] sm:$0xff] %v28283_v5  ;;  %v28347_v43 = vld [vmem:[%s29208_s8 + $0x130] sm:$0xff]  ;;  %v30540_v48 = vand.u32 4294901760, %v28277_v40 }
 0x778   : > { %v29638_v53 = vand.u32 4294901760, %v28245_v29  ;;  %17215 = vmatmul.mubr.f32.vlgmr.msra.gmra.mrb[66].mxu1 %v28228_v33  ;;  %30517 = vst [vmem:[#allocation13_spill] sm:$0xff] %v28294_v54  ;;  %30518 = vst [vmem:[#allocation14_spill] sm:$0xff] %v28299_v28  ;;  %v28324_v21 = vsub.f32 %v28242_v32, %v30523_v61  ;;  %v28340_v7 = vsub.f32 %v28252_v16, %v30528_v8  ;;  %v30533_v61 = vand.u32 4294901760, %v28265_v49  ;;  %v28422_v8 = vld [vmem:[%s29208_s8 + $0x148] sm:$0xff] }
 0x779   : > { %22913 = vmatpush3.bf16.msra.mxu1 %v27794_v31  ;;  %v16974_v34 = vand.u32 4294901760, %v16973_v25  ;;  %30522 = vst [vmem:[#allocation26_spill] sm:$0xff] %v28315_v39  ;;  %30526 = vst [vmem:[#allocation39_spill] sm:$0xff] %v28334_v56 }
 0x77a   : > { %22915 = vmatprep.subr.bf16.mxu1 %v27806_v27  ;;  %v16981_v57 = vsub.f32 %v28245_v29, %v29638_v53  ;;  %v28310_v53 = vld [vmem:[%s29208_s8 + $0x128] sm:$0xff]  ;;  %30524 = vst [vmem:[#allocation31_spill] sm:$0xff] %v28324_v21  ;;  %30529 = vst [vmem:[#allocation47_spill] sm:$0xff] %v28340_v7  ;;  %v28360_v32 = vsub.f32 %v28265_v49, %v30533_v61  ;;  %v30537_v61 = vand.u32 4294901760, %v28259_v46 }
 0x77b   : > { %30520 = vst [vmem:[#allocation24_spill] sm:$0xff] %v28310_v53  ;;  %17457 = vmatprep.mubr.f32.mxu1 %v16974_v34  ;;  %v16975_v11 = vsub.f32 %v16973_v25, %v16974_v34  ;;  %v28329_v34 = vld [vmem:[%s29208_s8 + $0x1b0] sm:$0xff]  ;;  %30530 = vst [vmem:[#allocation54_spill] sm:$0xff] %v28347_v43 }
 0x77c   : > { %30525 = vst [vmem:[#allocation34_spill] sm:$0xff] %v28329_v34  ;;  %v16982_v33 = vand.u32 4294901760, %v16981_v57  ;;  %30534 = vst [vmem:[#allocation64_spill] sm:$0xff] %v28360_v32  ;;  %v30543_v57 = vpack.c.bf16 %v27707_v47, %v27704_v14  ;;  %v30558_v16 = vand.u32 4294901760, %v28329_v34 }
 0x77d   : > { %22917 = vmatpush3.bf16.msra.mxu1 %v30527_v42  ;;  %v16976_v4 = vand.u32 4294901760, %v16975_v11  ;;  %v30532_v11 = vld [vmem:[#allocation16_spill] sm:$0xff]  ;;  %v30535_v42 = vand.u32 4294901760, %v28283_v5  ;;  %30553 = vst [vmem:[#allocation78_spill] sm:$0xff] %v28422_v8 }
 0x77e   : > { %22919 = vmatprep.subr.bf16.mxu1 %v30532_v11  ;;  %v30545_v11 = vand.u32 4294901760, %v28305_v63 }
 0x77f   : > { %16977 = vmatprep.mubr.f32.mxu0 %v16976_v4  ;;  %v28366_v27 = vsub.f32 %v28283_v5, %v30535_v42  ;;  %v30538_v4 = vand.u32 4294901760, %v28272_v2  ;;  %v30541_v42 = vand.u32 4294901760, %v28294_v54  ;;  %v30560_v54 = vand.u32 4294901760, %v28334_v56 }
 0x780   : > { %16983 = vmatmul.mubr.f32.vlgmr.msra.gmra.mrb[66].mxu0 %v16982_v33  ;;  %v30544_v33 = vld [vmem:[#allocation20_spill] sm:$0xff] }
 0x781   : > { %30536 = vst [vmem:[#allocation46_spill] sm:$0xff] %v28366_v27  ;;  %v28376_v49 = vpack.c.bf16 %v30538_v4, %v30537_v61  ;;  %v28382_v5 = vpack.c.bf16 %v30541_v42, %v30540_v48  ;;  %22881 = vmatpush3.bf16.msra.mxu0 %v30543_v57  ;;  %22921 = vmatpush3.bf16.msra.mxu1 %v30544_v33  ;;  %v30547_v4 = vand.u32 4294901760, %v28310_v53  ;;  %v28403_v57 = vld [vmem:[%s29208_s8 + $0x1c0] sm:$0xff]  ;;  %v28408_v42 = vld [vmem:[%s29208_s8 + $0x1c8] sm:$0xff] }
 0x782   : > { %v28393_v61 = vsub.f32 %v28305_v63, %v30545_v11  ;;  %30549 = vst [vmem:[#allocation97_spill] sm:$0xff] %v28403_v57  ;;  %30550 = vst [vmem:[#allocation76_spill] sm:$0xff] %v28408_v42  ;;  %17350 = vmatprep.mubr.f32.mxu0 %v16973_v25  ;;  %v30551_v11 = vpack.c.bf16 %v27713_v26, %v27710_v30  ;;  %v30555_v25 = vand.u32 4294901760, %v28315_v39  ;;  %v28445_v39 = vld [vmem:[%s29208_s8 + $0x1d0] sm:$0xff] }
 0x783   : > { %30539 = vst [vmem:[#allocation65_spill] sm:$0xff] %v28376_v49  ;;  %30542 = vst [vmem:[#allocation68_spill] sm:$0xff] %v28382_v5  ;;  %v28398_v48 = vsub.f32 %v28310_v53, %v30547_v4  ;;  %v28417_v4 = vld [vmem:[%s29208_s8 + $0x140] sm:$0xff]  ;;  %v30554_v5 = vand.u32 4294901760, %v28299_v28  ;;  %v30557_v53 = vld [vmem:[#allocation28_spill] sm:$0xff]  ;;  %v28435_v63 = vsub.f32 %v28329_v34, %v30558_v16  ;;  %v28440_v40 = vsub.f32 %v28334_v56, %v30560_v54 }
 0x784   : > { %30546 = vst [vmem:[#allocation74_spill] sm:$0xff] %v28393_v61  ;;  %22883 = vmatprep.subr.bf16.mxu0 %v30551_v11  ;;  %30552 = vst [vmem:[#allocation77_spill] sm:$0xff] %v28417_v4  ;;  %22923 = vmatprep.subr.bf16.mxu1 %v30557_v53  ;;  %v30565_v16 = vand.u32 4294901760, %v28340_v7  ;;  %v30569_v56 = vand.u32 4294901760, %v28352_v0  ;;  %v30574_v28 = vld [vmem:[#allocation51_spill] sm:$0xff]  ;;  %v30592_v2 = vand.u32 4294901760, %v28445_v39 }
 0x785   : > { %30548 = vst [vmem:[#allocation75_spill] sm:$0xff] %v28398_v48  ;;  %v28428_v49 = vpack.c.bf16 %v30555_v25, %v30554_v5  ;;  %30559 = vst [vmem:[#allocation80_spill] sm:$0xff] %v28435_v63  ;;  %v28450_v5 = vld [vmem:[%s29208_s8 + $0x1d8] sm:$0xff]  ;;  %v30564_v25 = vand.u32 4294901760, %v28324_v21  ;;  %v30571_v21 = vpack.c.bf16 %v27728_v51, %v27722_v38  ;;  %v30581_v7 = vand.u32 4294901760, %v28398_v48 }
 0x786   : > { %30561 = vst [vmem:[#allocation81_spill] sm:$0xff] %v28440_v40  ;;  %30562 = vst [vmem:[#allocation82_spill] sm:$0xff] %v28445_v39  ;;  %v28466_v34 = vsub.f32 %v28352_v0, %v30569_v56  ;;  %v30573_v56 = vpack.c.bf16 %v27804_v36, %v27792_v60  ;;  %v30580_v0 = vand.u32 4294901760, %v28393_v61 }
 0x787   : > { %30556 = vst [vmem:[#allocation79_spill] sm:$0xff] %v28428_v49  ;;  %30563 = vst [vmem:[#allocation89_spill] sm:$0xff] %v28450_v5  ;;  %v28456_v11 = vpack.c.bf16 %v30565_v16, %v30564_v25  ;;  %v30567_v49 = vand.u32 4294901760, %v28347_v43  ;;  %22885 = vmatpush3.bf16.msra.mxu0 %v30571_v21  ;;  %v30572_v25 = vld [vmem:[#allocation32_spill] sm:$0xff]  ;;  %v28487_v16 = vld [vmem:[%s29208_s8 + $0x150] sm:$0xff]  ;;  %v30585_v21 = vpack.c.bf16 %v27815_v3, %v27812_v45 }
 0x788   : > { %30570 = vst [vmem:[#allocation93_spill] sm:$0xff] %v28466_v34  ;;  %22925 = vmatpush3.bf16.msra.mxu1 %v30572_v25  ;;  %22887 = vmatprep.subr.bf16.mxu0 %v30573_v56  ;;  %30575 = vst [vmem:[#allocation94_spill] sm:$0xff] %v28487_v16  ;;  %v30578_v56 = vand.u32 4294901760, %v28366_v27  ;;  %v28506_v46 = vpack.c.bf16 %v30581_v7, %v30580_v0  ;;  %v30586_v0 = vld [vmem:[#allocation36_spill] sm:$0xff]  ;;  %v30587_v7 = vand.u32 4294901760, %v28417_v4 }
 0x789   : > { %30566 = vst [vmem:[#allocation90_spill] sm:$0xff] %v28456_v11  ;;  %v28461_v54 = vsub.f32 %v28347_v43, %v30567_v49  ;;  %22927 = vmatprep.subr.bf16.mxu1 %v30574_v28  ;;  %v28492_v11 = vld [vmem:[%s29208_s8 + $0x158] sm:$0xff]  ;;  %v30577_v43 = vand.u32 4294901760, %v28360_v32  ;;  %v30583_v32 = vand.u32 4294901760, %v28403_v57  ;;  %v30588_v28 = vand.u32 4294901760, %v28422_v8 }
 0x78a   : > { %30576 = vst [vmem:[#allocation95_spill] sm:$0xff] %v28492_v11  ;;  %30582 = vst [vmem:[#allocation118_spill] sm:$0xff] %v28506_v46  ;;  %v28527_v25 = vsub.f32 %v28417_v4, %v30587_v7  ;;  %v28544_v46 = vld [vmem:[%s29208_s8 + $0x1e8] sm:$0xff]  ;;  %v30590_v7 = vpack.c.bf16 %v27841_v20, %v27828_v6  ;;  %v30594_v4 = vand.u32 4294901760, %v28435_v63  ;;  %v28589_v63 = vld [vmem:[%s29208_s8 + $0x1f0] sm:$0xff] }
 0x78b   : > { %30568 = vst [vmem:[#allocation92_spill] sm:$0xff] %v28461_v54  ;;  %v28498_v49 = vpack.c.bf16 %v30578_v56, %v30577_v43  ;;  %v28513_v27 = vsub.f32 %v28403_v57, %v30583_v32  ;;  %v30584_v43 = vand.u32 4294901760, %v28408_v42  ;;  %22889 = vmatpush3.bf16.msra.mxu0 %v30585_v21  ;;  %v28532_v32 = vsub.f32 %v28422_v8, %v30588_v28  ;;  %v28539_v21 = vld [vmem:[%s29208_s8 + $0x1e0] sm:$0xff]  ;;  %v30591_v28 = vld [vmem:[#allocation40_spill] sm:$0xff] }
 0x78c   : > { %22929 = vmatpush3.bf16.msra.mxu1 %v30586_v0  ;;  %30589 = vst [vmem:[#allocation119_spill] sm:$0xff] %v28544_v46  ;;  %22891 = vmatprep.subr.bf16.mxu0 %v30590_v7  ;;  %v28569_v7 = vld [vmem:[%s29208_s8 + $0x160] sm:$0xff]  ;;  %30602 = vst [vmem:[#allocation23_spill] sm:$0xff] %v28589_v63 }
 0x78d   : > { %30579 = vst [vmem:[#allocation111_spill] sm:$0xff] %v28498_v49  ;;  %v28518_v56 = vsub.f32 %v28408_v42, %v30584_v43  ;;  %22931 = vmatprep.subr.bf16.mxu1 %v30591_v28  ;;  %v28553_v43 = vsub.f32 %v28445_v39, %v30592_v2  ;;  %v30593_v49 = vand.u32 4294901760, %v28450_v5  ;;  %v30595_v42 = vand.u32 4294901760, %v28440_v40  ;;  %30597 = vst [vmem:[#allocation17_spill] sm:$0xff] %v28569_v7  ;;  %v28574_v2 = vld [vmem:[%s29208_s8 + $0x168] sm:$0xff] }
 0x78e   : > { %30598 = vst [vmem:[#allocation19_spill] sm:$0xff] %v28574_v2  ;;  %v30599_v39 = vand.u32 4294901760, %v28461_v54  ;;  %v28594_v54 = vld [vmem:[%s29208_s8 + $0x1f8] sm:$0xff] }
 0x78f   : > { %v28558_v8 = vsub.f32 %v28450_v5, %v30593_v49  ;;  %v28564_v57 = vpack.c.bf16 %v30595_v42, %v30594_v4  ;;  %v30600_v49 = vand.u32 4294901760, %v28466_v34  ;;  %30603 = vst [vmem:[#allocation25_spill] sm:$0xff] %v28594_v54  ;;  %v30606_v42 = vand.u32 4294901760, %v28487_v16  ;;  %v28620_v4 = vld [vmem:[%s29208_s8 + $0x178] sm:$0xff] }
 0x790   : > { %30609 = vst [vmem:[#allocation27_spill] sm:$0xff] %v28620_v4  ;;  %v30612_v48 = vand.u32 4294901760, %v28518_v56  ;;  %v30622_v28 = vand.u32 4294901760, %v28553_v43 }
 0x791   : > { %30596 = vst [vmem:[#allocation122_spill] sm:$0xff] %v28564_v57  ;;  %v28580_v5 = vpack.c.bf16 %v30600_v49, %v30599_v39  ;;  %v30604_v39 = vpack.c.bf16 %v27866_v23, %v27851_v44  ;;  %v30605_v49 = vld [vmem:[#allocation56_spill] sm:$0xff]  ;;  %v28605_v40 = vsub.f32 %v28487_v16, %v30606_v42  ;;  %v30610_v57 = vpack.c.bf16 %v27924_v15, %v27919_v62 }
 0x792   : > { %22933 = vmatpush3.bf16.msra.mxu1 %v30605_v49  ;;  %v30611_v16 = vand.u32 4294901760, %v28513_v27  ;;  %v30615_v42 = vand.u32 4294901760, %v28532_v32  ;;  %v30619_v49 = vpack.c.bf16 %v27943_v50, %v27931_v24 }
 0x793   : > { %30601 = vst [vmem:[#allocation21_spill] sm:$0xff] %v28580_v5  ;;  %22893 = vmatpush3.bf16.msra.mxu0 %v30604_v39  ;;  %v30607_v5 = vand.u32 4294901760, %v28492_v11  ;;  %v28615_v39 = vld [vmem:[%s29208_s8 + $0x170] sm:$0xff]  ;;  %22935 = vmatprep.subr.bf16.mxu1 %v28111_v37  ;;  %v30614_v37 = vand.u32 4294901760, %v28527_v25 }
 0x794   : > { %22895 = vmatprep.subr.bf16.mxu0 %v30610_v57  ;;  %v28633_v61 = vpack.c.bf16 %v30612_v48, %v30611_v16  ;;  %v30618_v48 = vand.u32 4294901760, %v28544_v46 }
 0x795   : > { %v28610_v34 = vsub.f32 %v28492_v11, %v30607_v5  ;;  %v28642_v15 = vpack.c.bf16 %v30615_v42, %v30614_v37  ;;  %v30617_v5 = vand.u32 4294901760, %v28539_v21  ;;  %v30625_v37 = vand.u32 4294901760, %v28574_v2 }
 0x796   : > { %30613 = vst [vmem:[#allocation35_spill] sm:$0xff] %v28633_v61  ;;  %v28652_v16 = vsub.f32 %v28544_v46, %v30618_v48  ;;  %22937 = vmatpush3.bf16.msra.mxu1 %v28116_v52  ;;  %v30621_v48 = vand.u32 4294901760, %v28569_v7  ;;  %v30629_v46 = vand.u32 4294901760, %v28594_v54 }
 0x797   : > { %30608 = vst [vmem:[#allocation43_spill] sm:$0xff] %v28610_v34  ;;  %30616 = vst [vmem:[#allocation59_spill] sm:$0xff] %v28642_v15  ;;  %v28647_v11 = vsub.f32 %v28539_v21, %v30617_v5  ;;  %22897 = vmatpush3.bf16.msra.mxu0 %v30619_v49  ;;  %v30620_v5 = vpack.c.bf16 %v27977_v12, %v27961_v10  ;;  %22939 = vmatprep.subr.bf16.mxu1 %v28119_v19  ;;  %v30623_v49 = vand.u32 4294901760, %v28558_v8 }
 0x798   : > { %v28669_v57 = vsub.f32 %v28569_v7, %v30621_v48  ;;  %v28680_v42 = vsub.f32 %v28574_v2, %v30625_v37  ;;  %v28690_v48 = vsub.f32 %v28594_v54, %v30629_v46  ;;  %v30631_v7 = vand.u32 4294901760, %v28605_v40 }
 0x799   : > { %22899 = vmatprep.subr.bf16.mxu0 %v30620_v5  ;;  %v28675_v15 = vpack.c.bf16 %v30623_v49, %v30622_v28  ;;  %v30627_v5 = vand.u32 4294901760, %v28589_v63  ;;  %v30632_v28 = vand.u32 4294901760, %v28610_v34  ;;  %v29710_v37 = vand.u32 4294901760, %v28652_v16 }
 0x79a   : > { %30626 = vst [vmem:[#allocation67_spill] sm:$0xff] %v28680_v42  ;;  %30630 = vst [vmem:[#allocation123_spill] sm:$0xff] %v28690_v48  ;;  %v30634_v2 = vand.u32 4294901760, %v28615_v39  ;;  %v30637_v54 = vpack.c.bf16 %v27997_v35, %v27994_v59  ;;  %22941 = vmatpush3.bf16.msra.mxu1 %v28121_v55 }
 0x79b   : > { %30624 = vst [vmem:[#allocation66_spill] sm:$0xff] %v28675_v15  ;;  %v28685_v61 = vsub.f32 %v28589_v63, %v30627_v5  ;;  %v28696_v49 = vpack.c.bf16 %v30632_v28, %v30631_v7  ;;  %v29711_v15 = vand.u32 4294901760, %v28647_v11  ;;  %v30636_v63 = vand.u32 4294901760, %v28620_v4  ;;  %22975 = vmatprep.subr.bf16.mxu1 %v27776_v13 }
 0x79c   : > { %v28703_v5 = vsub.f32 %v28615_v39, %v30634_v2  ;;  %22901 = vmatpush3.bf16.msra.mxu0 %v30637_v54  ;;  %v30638_v7 = vpack.c.bf16 %v28053_v1, %v28051_v17  ;;  %v29712_v28 = vand.u32 4294901760, %v28680_v42  ;;  %v30641_v1 = vpack.c.bf16 %v28067_v9, %v28065_v18  ;;  %v30645_v9 = vld [vmem:[#allocation9_spill] sm:$0xff] }
 0x79d   : > { %30628 = vst [vmem:[#allocation69_spill] sm:$0xff] %v28685_v61  ;;  %30633 = vst [vmem:[#allocation124_spill] sm:$0xff] %v28696_v49  ;;  %v28708_v46 = vsub.f32 %v28620_v4, %v30636_v63  ;;  %v28722_v2 = vpack.c.bf16 %v29710_v37, %v29711_v15  ;;  %v29713_v63 = vand.u32 4294901760, %v28669_v57  ;;  %v29715_v54 = vand.u32 4294901760, %v28685_v61 }
 0x79e   : > { %30635 = vst [vmem:[#allocation125_spill] sm:$0xff] %v28703_v5  ;;  %22903 = vmatprep.subr.bf16.mxu0 %v30638_v7  ;;  %v29714_v49 = vand.u32 4294901760, %v28690_v48  ;;  %v30640_v4 = vand.u32 4294901760, %v28245_v29  ;;  %v29718_v17 = vand.u32 4294901760, %v28703_v5  ;;  %v30644_v18 = vpack.c.bf16 %v28079_v22, %v28074_v41 }
 0x79f   : > { %30639 = vst [vmem:[#allocation126_spill] sm:$0xff] %v28722_v2  ;;  %v29716_v13 = vand.u32 4294901760, %v28708_v46  ;;  %v28740_v7 = vpack.c.bf16 %v29712_v28, %v29713_v63  ;;  %v30650_v63 = vld [vmem:[#allocation11_spill] sm:$0xff]  ;;  %v30655_v41 = vand.u32 4294901760, %v27704_v14  ;;  %v30656_v22 = vand.u32 4294901760, %v27707_v47 }
 0x7a0   : > { %17461 = vmatmul.mubr.f32.vlgmr.msra.gmra.mrb[68].mxu1 %v30640_v4  ;;  %22905 = vmatpush3.bf16.msra.mxu0 %v30641_v1  ;;  %v28746_v4 = vpack.c.bf16 %v29714_v49, %v29715_v54  ;;  %v30647_v1 = vld [vmem:[#allocation10_spill] sm:$0xff]  ;;  %v30651_v49 = vld [vmem:[#allocation71_spill] sm:$0xff]  ;;  %v30661_v14 = vand.u32 4294901760, %v27728_v51  ;;  %v30662_v47 = vand.u32 4294901760, %v27792_v60  ;;  %v30667_v51 = vand.u32 4294901760, %v27828_v6  ;;  %v30675_v6 = vld [vmem:[#allocation45_spill] sm:$0xff] }
 0x7a1   : > { %22977 = vmatpush3.bf16.msra.mxu1 %v27794_v31  ;;  %30642 = vst [vmem:[#allocation127_spill] sm:$0xff] %v28740_v7  ;;  %17731 = vmatprep.mubr.f32.mxu1 %v28237_v58  ;;  %v30646_v31 = vand.u32 4294901760, %v30645_v9  ;;  %v30648_v37 = vand.u32 4294901760, %v30647_v1  ;;  %v28760_v28 = vpack.c.bf16 %v29716_v13, %v29718_v17  ;;  %v30652_v54 = vld [vmem:[#allocation70_spill] sm:$0xff]  ;;  %v30654_v7 = vld [vmem:[#allocation12_spill] sm:$0xff]  ;;  %v30658_v9 = vand.u32 4294901760, %v27710_v30 }
 0x7a2   : > { %30643 = vst [vmem:[#allocation128_spill] sm:$0xff] %v28746_v4  ;;  %22907 = vmatprep.subr.bf16.mxu0 %v30644_v18  ;;  %22979 = vmatprep.subr.bf16.mxu1 %v30650_v63  ;;  %v30653_v4 = vpack.c.bf16 %v30651_v49, %v30652_v54  ;;  %v22944_v18 = vpack.c.bf16 %v30656_v22, %v30655_v41  ;;  %v30660_v49 = vand.u32 4294901760, %v27722_v38  ;;  %v30663_v30 = vand.u32 4294901760, %v27804_v36  ;;  %v30666_v38 = vld [vmem:[#allocation32_spill] sm:$0xff]  ;;  %v30669_v60 = vld [vmem:[#allocation51_spill] sm:$0xff]  ;;  %v30723_v13 = vld [vmem:[#allocation93_spill] sm:$0xff] }
 0x7a3   : > { %v22942_v15 = vpack.c.bf16 %v30648_v37, %v30646_v31  ;;  %30649 = vst [vmem:[#allocation129_spill] sm:$0xff] %v28760_v28  ;;  %v30657_v37 = vld [vmem:[#allocation16_spill] sm:$0xff]  ;;  %v30659_v31 = vand.u32 4294901760, %v27713_v26  ;;  %v30664_v26 = vand.u32 4294901760, %v27812_v45  ;;  %v30670_v36 = vand.u32 4294901760, %v27851_v44 }
 0x7a4   : > { %22909 = vmatpush3.bf16.msra.mxu0 %v30653_v4  ;;  %v22948_v63 = vpack.c.bf16 %v30661_v14, %v30660_v49  ;;  %v30672_v45 = vand.u32 4294901760, %v27919_v62  ;;  %v30676_v22 = vand.u32 4294901760, %v30675_v6  ;;  %v30682_v62 = vld [vmem:[#allocation56_spill] sm:$0xff]  ;;  %v30684_v49 = vand.u32 4294901760, %v27977_v12 }
 0x7a5   : > { %22981 = vmatpush3.bf16.msra.mxu1 %v30654_v7  ;;  %22943 = vmatprep.subr.bf16.mxu0 %v22942_v15  ;;  %v22946_v1 = vpack.c.bf16 %v30659_v31, %v30658_v9  ;;  %v22950_v15 = vpack.c.bf16 %v30663_v30, %v30662_v47  ;;  %v30685_v47 = vld [vmem:[#allocation100_spill] sm:$0xff] }
 0x7a6   : > { %22983 = vmatprep.subr.bf16.mxu1 %v30657_v37  ;;  %v30678_v37 = vld [vmem:[#allocation96_spill] sm:$0xff]  ;;  %v30686_v30 = vand.u32 4294901760, %v30685_v47 }
 0x7a7   : > { %17353 = vmatmul.mubr.f32.vlgmr.msra.gmra.mrb[68].mxu0 %v28245_v29  ;;  %v30679_v9 = vand.u32 4294901760, %v30678_v37 }
 0x7a8   : > { %22945 = vmatpush3.bf16.msra.mxu0 %v22944_v18  ;;  %17627 = vmatprep.mubr.f32.mxu0 %v28237_v58  ;;  %v30665_v58 = vand.u32 4294901760, %v27815_v3  ;;  %v30673_v3 = vld [vmem:[#allocation22_spill] sm:$0xff]  ;;  %v30677_v18 = vld [vmem:[#allocation40_spill] sm:$0xff] }
 0x7a9   : > { %22985 = vmatpush3.bf16.msra.mxu1 %v30544_v33  ;;  %22947 = vmatprep.subr.bf16.mxu0 %v22946_v1  ;;  %v30668_v33 = vand.u32 4294901760, %v27841_v20  ;;  %v30674_v4 = vand.u32 4294901760, %v30673_v3  ;;  %v17966_v20 = vsub.f32 %v30675_v6, %v30676_v22  ;;  %v17973_v44 = vsub.f32 %v30678_v37, %v30679_v9  ;;  %v30698_v3 = vld [vmem:[#allocation31_spill] sm:$0xff] }
 0x7aa   : > { %22987 = vmatprep.subr.bf16.mxu1 %v30557_v53  ;;  %v22952_v29 = vpack.c.bf16 %v30665_v58, %v30664_v26  ;;  %v30671_v53 = vand.u32 4294901760, %v27866_v23  ;;  %v30680_v23 = vand.u32 4294901760, %v27931_v24  ;;  %v30683_v1 = vand.u32 4294901760, %v27961_v10  ;;  %v30687_v26 = vld [vmem:[#allocation13_spill] sm:$0xff]  ;;  %v30700_v22 = vld [vmem:[#allocation47_spill] sm:$0xff] }
 0x7ab   : > { %v22954_v54 = vpack.c.bf16 %v30668_v33, %v30667_v51  ;;  %v22958_v41 = vpack.c.bf16 %v30674_v4, %v30672_v45  ;;  %v30688_v58 = vand.u32 4294901760, %v30687_v26  ;;  %v17974_v51 = vand.u32 4294901760, %v17973_v44  ;;  %v30692_v33 = vld [vmem:[#allocation14_spill] sm:$0xff] }
 0x7ac   : > { %22949 = vmatpush3.bf16.msra.mxu0 %v22948_v63  ;;  %v22956_v7 = vpack.c.bf16 %v30671_v53, %v30670_v36  ;;  %v22962_v14 = vpack.c.bf16 %v30684_v49, %v30683_v1  ;;  %v17967_v63 = vand.u32 4294901760, %v17966_v20  ;;  %v30693_v10 = vand.u32 4294901760, %v30692_v33 }
 0x7ad   : > { %22989 = vmatpush3.bf16.msra.mxu1 %v30666_v38  ;;  %22951 = vmatprep.subr.bf16.mxu0 %v22950_v15  ;;  %v17854_v15 = vsub.f32 %v30685_v47, %v30686_v30  ;;  %v17861_v24 = vsub.f32 %v30687_v26, %v30688_v58  ;;  %v30691_v38 = vld [vmem:[#allocation73_spill] sm:$0xff]  ;;  %v30696_v53 = vand.u32 4294901760, %v27994_v59  ;;  %v30699_v4 = vand.u32 4294901760, %v30698_v3  ;;  %v30706_v58 = vld [vmem:[#allocation74_spill] sm:$0xff] }
 0x7ae   : > { %22991 = vmatprep.subr.bf16.mxu1 %v30669_v60  ;;  %v17980_v12 = vsub.f32 %v30692_v33, %v30693_v10  ;;  %v30701_v20 = vand.u32 4294901760, %v30700_v22  ;;  %v23038_v49 = vpack.c.bf16 %v17974_v51, %v17967_v63  ;;  %v30708_v10 = vld [vmem:[#allocation75_spill] sm:$0xff]  ;;  %v30711_v51 = vld [vmem:[#allocation80_spill] sm:$0xff] }
 0x7af   : > { %v17855_v9 = vand.u32 4294901760, %v17854_v15  ;;  %v17862_v44 = vand.u32 4294901760, %v17861_v24  ;;  %v30707_v24 = vand.u32 4294901760, %v30706_v58 }
 0x7b0   : > { %22953 = vmatpush3.bf16.msra.mxu0 %v22952_v29  ;;  %v30689_v29 = vld [vmem:[#allocation105_spill] sm:$0xff]  ;;  %v17981_v30 = vand.u32 4294901760, %v17980_v12  ;;  %v30712_v12 = vand.u32 4294901760, %v30711_v51 }
 0x7b1   : > { %22993 = vmatpush3.bf16.msra.mxu1 %v30586_v0  ;;  %22955 = vmatprep.subr.bf16.mxu0 %v22954_v54  ;;  %v30681_v0 = vand.u32 4294901760, %v27943_v50  ;;  %v28830_v50 = vand.u32 4294901760, %v30689_v29  ;;  %v30694_v54 = vld [vmem:[#allocation26_spill] sm:$0xff] }
 0x7b2   : > { %22995 = vmatprep.subr.bf16.mxu1 %v30677_v18  ;;  %v30695_v60 = vand.u32 4294901760, %v30694_v54  ;;  %v17875_v18 = vsub.f32 %v30700_v22, %v30701_v20 }
 0x7b3   : > { %v22960_v31 = vpack.c.bf16 %v30681_v0, %v30680_v23  ;;  %30690 = vst [vmem:[#allocation53_spill] sm:$0xff] %v28830_v50  ;;  %v30702_v23 = vld [vmem:[#allocation64_spill] sm:$0xff]  ;;  %v28858_v1 = vsub.f32 %v30689_v29, %v28830_v50 }
 0x7b4   : > { %22957 = vmatpush3.bf16.msra.mxu0 %v22956_v7  ;;  %v17987_v36 = vsub.f32 %v30694_v54, %v30695_v60  ;;  %v30697_v7 = vand.u32 4294901760, %v27997_v35  ;;  %v30703_v0 = vand.u32 4294901760, %v30702_v23  ;;  %v17876_v15 = vand.u32 4294901760, %v17875_v18  ;;  %v30710_v29 = vld [vmem:[#allocation48_spill] sm:$0xff] }
 0x7b5   : > { %22997 = vmatpush3.bf16.msra.mxu1 %v30682_v62  ;;  %22959 = vmatprep.subr.bf16.mxu0 %v22958_v41  ;;  %v17868_v41 = vsub.f32 %v30698_v3, %v30699_v4  ;;  %v30709_v60 = vand.u32 4294901760, %v30708_v10  ;;  %v29717_v4 = vand.u32 4294901760, %v28858_v1 }
 0x7b6   : > { %22999 = vmatprep.subr.bf16.mxu1 %v30691_v38  ;;  %v22964_v45 = vpack.c.bf16 %v30697_v7, %v30696_v53  ;;  %v17994_v59 = vsub.f32 %v30702_v23, %v30703_v0  ;;  %v17882_v38 = vsub.f32 %v30706_v58, %v30707_v24  ;;  %v23040_v7 = vpack.c.bf16 %v17862_v44, %v17855_v9  ;;  %v30715_v0 = vld [vmem:[#allocation72_spill] sm:$0xff] }
 0x7b7   : > { %v17889_v53 = vsub.f32 %v30708_v10, %v30709_v60  ;;  %v30717_v9 = vld [vmem:[#allocation44_spill] sm:$0xff] }
 0x7b8   : > { %22961 = vmatpush3.bf16.msra.mxu0 %v22960_v31  ;;  %v30704_v31 = vld [vmem:[#allocation46_spill] sm:$0xff]  ;;  %v30718_v44 = vand.u32 4294901760, %v30717_v9  ;;  %v17883_v60 = vand.u32 4294901760, %v17882_v38  ;;  %v17837_v38 = vsub.f32 %v28858_v1, %v29717_v4  ;;  %v30728_v9 = vld [vmem:[#allocation63_spill] sm:$0xff] }
 0x7b9   : > { %23001 = vmatpush3.bf16.msra.mxu1 %v28116_v52  ;;  %22963 = vmatprep.subr.bf16.mxu0 %v22962_v14  ;;  %v30705_v35 = vand.u32 4294901760, %v30704_v31  ;;  %v17988_v52 = vand.u32 4294901760, %v17987_v36  ;;  %v17869_v14 = vand.u32 4294901760, %v17868_v41  ;;  %v18008_v36 = vsub.f32 %v30711_v51, %v30712_v12  ;;  %v30713_v41 = vld [vmem:[#allocation81_spill] sm:$0xff] }
 0x7ba   : > { %23003 = vmatprep.subr.bf16.mxu1 %v28119_v19  ;;  %v17995_v19 = vand.u32 4294901760, %v17994_v59  ;;  %v30714_v20 = vand.u32 4294901760, %v30713_v41  ;;  %v30719_v59 = vld [vmem:[#allocation62_spill] sm:$0xff] }
 0x7bb   : > { %v18001_v62 = vsub.f32 %v30704_v31, %v30705_v35  ;;  %v23044_v35 = vpack.c.bf16 %v17876_v15, %v17869_v14  ;;  %v30725_v15 = vld [vmem:[#allocation38_spill] sm:$0xff] }
 0x7bc   : > { %22965 = vmatpush3.bf16.msra.mxu0 %v22964_v45  ;;  %v23042_v45 = vpack.c.bf16 %v17988_v52, %v17981_v30  ;;  %v18015_v18 = vsub.f32 %v30713_v41, %v30714_v20  ;;  %v18009_v52 = vand.u32 4294901760, %v18008_v36 }
 0x7bd   : > { %23005 = vmatpush3.bf16.msra.mxu1 %v28121_v55  ;;  %22967 = vmatprep.subr.bf16.mxu0 %v30710_v29  ;;  %v18002_v63 = vand.u32 4294901760, %v18001_v62  ;;  %v30716_v55 = vld [vmem:[#allocation37_spill] sm:$0xff]  ;;  %v30720_v62 = vand.u32 4294901760, %v30719_v59  ;;  %v30721_v29 = vld [vmem:[#allocation92_spill] sm:$0xff] }
 0x7be   : > { %23039 = vmatprep.subr.bf16.mxu1 %v23038_v49  ;;  %v17890_v49 = vand.u32 4294901760, %v17889_v53  ;;  %v30722_v12 = vand.u32 4294901760, %v30721_v29  ;;  %v18016_v53 = vand.u32 4294901760, %v18015_v18  ;;  %v30730_v59 = vld [vmem:[#allocation52_spill] sm:$0xff]  ;;  %v30735_v18 = vld [vmem:[#allocation83_spill] sm:$0xff] }
 0x7bf   : > { %v28882_v24 = vpack.c.bf16 %v30720_v62, %v30718_v44  ;;  %v23046_v30 = vpack.c.bf16 %v18002_v63, %v17995_v19  ;;  %v30727_v63 = vand.u32 4294901760, %v28518_v56  ;;  %v30729_v44 = vand.u32 4294901760, %v30728_v9 }
 0x7c0   : > { %17733 = vmatmul.mubr.f32.vlgmr.msra.gmra.mrb[70].mxu1 %v30715_v0  ;;  %22969 = vmatpush3.bf16.msra.mxu0 %v30716_v55  ;;  %v17896_v20 = vsub.f32 %v30721_v29, %v30722_v12  ;;  %v30724_v55 = vand.u32 4294901760, %v30723_v13  ;;  %v30731_v62 = vand.u32 4294901760, %v30730_v59  ;;  %v30736_v17 = vand.u32 4294901760, %v30735_v18 }
 0x7c1   : > { %23041 = vmatpush3.bf16.msra.mxu1 %v23040_v7  ;;  %18075 = vmatprep.mubr.f32.mxu1 %v28830_v50  ;;  %v30726_v7 = vand.u32 4294901760, %v28513_v27  ;;  %v18029_v36 = vsub.f32 %v28518_v56, %v30727_v63  ;;  %v30738_v63 = vand.u32 4294901760, %v28532_v32 }
 0x7c2   : > { %v17903_v14 = vsub.f32 %v30723_v13, %v30724_v55  ;;  %22971 = vmatprep.subr.bf16.mxu0 %v30725_v15  ;;  %23043 = vmatprep.subr.bf16.mxu1 %v23042_v45  ;;  %v28905_v12 = vpack.c.bf16 %v30731_v62, %v30729_v44  ;;  %v30732_v45 = vld [vmem:[#allocation41_spill] sm:$0xff]  ;;  %v23048_v55 = vpack.c.bf16 %v17890_v49, %v17883_v60  ;;  %v17897_v44 = vand.u32 4294901760, %v17896_v20 }
 0x7c3   : > { %v18022_v19 = vsub.f32 %v28513_v27, %v30726_v7  ;;  %v30733_v15 = vld [vmem:[#allocation49_spill] sm:$0xff]  ;;  %v30737_v7 = vand.u32 4294901760, %v28527_v25  ;;  %v17917_v9 = vsub.f32 %v28532_v32, %v30738_v63  ;;  %v30739_v60 = vand.u32 4294901760, %v28553_v43  ;;  %v30743_v63 = vld [vmem:[#allocation91_spill] sm:$0xff] }
 0x7c4   : > { %22973 = vmatpush3.bf16.msra.mxu0 %v30732_v45  ;;  %v30734_v4 = vand.u32 4294901760, %v30733_v15  ;;  %v17904_v59 = vand.u32 4294901760, %v17903_v14  ;;  %v17838_v62 = vand.u32 4294901760, %v17837_v38  ;;  %v23050_v45 = vpack.c.bf16 %v18016_v53, %v18009_v52  ;;  %v30747_v53 = vld [vmem:[#allocation42_spill] sm:$0xff] }
 0x7c5   : > { %v17910_v2 = vsub.f32 %v28527_v25, %v30737_v7  ;;  %23045 = vmatpush3.bf16.msra.mxu1 %v23044_v35  ;;  %23007 = vmatprep.subr.bf16.mxu0 %v28882_v24  ;;  %v18036_v49 = vsub.f32 %v28553_v43, %v30739_v60  ;;  %v18023_v15 = vand.u32 4294901760, %v18022_v19  ;;  %v18030_v18 = vand.u32 4294901760, %v18029_v36  ;;  %v30741_v35 = vld [vmem:[#allocation87_spill] sm:$0xff]  ;;  %v30749_v36 = vld [vmem:[#allocation50_spill] sm:$0xff] }
 0x7c6   : > { %v28912_v28 = vpack.c.bf16 %v30736_v17, %v30734_v4  ;;  %v30740_v17 = vand.u32 4294901760, %v28558_v8  ;;  %23047 = vmatprep.subr.bf16.mxu1 %v23046_v30  ;;  %v30742_v7 = vand.u32 4294901760, %v30741_v35  ;;  %v30744_v20 = vand.u32 4294901760, %v30743_v63 }
 0x7c7   : > { %17629 = vmatmul.mubr.f32.vlgmr.msra.gmra.mrb[70].mxu0 %v30715_v0  ;;  %v17911_v60 = vand.u32 4294901760, %v17910_v2  ;;  %v17918_v50 = vand.u32 4294901760, %v17917_v9  ;;  %v30746_v52 = vand.u32 4294901760, %v28610_v34  ;;  %v23052_v0 = vpack.c.bf16 %v17904_v59, %v17897_v44  ;;  %v30755_v59 = vld [vmem:[#allocation24_spill] sm:$0xff] }
 0x7c8   : > { %v18043_v4 = vsub.f32 %v28558_v8, %v30740_v17  ;;  %v28932_v14 = vpack.c.bf16 %v30744_v20, %v30742_v7  ;;  %23009 = vmatpush3.bf16.msra.mxu0 %v28905_v12  ;;  %17839 = vmatprep.mubr.f32.mxu0 %v17838_v62  ;;  %v30745_v17 = vand.u32 4294901760, %v28605_v40  ;;  %v30748_v19 = vand.u32 4294901760, %v30747_v53 }
 0x7c9   : > { %v17931_v38 = vsub.f32 %v28610_v34, %v30746_v52  ;;  %23049 = vmatpush3.bf16.msra.mxu1 %v23048_v55  ;;  %23011 = vmatprep.subr.bf16.mxu0 %v28912_v28  ;;  %v30750_v35 = vand.u32 4294901760, %v30749_v36  ;;  %v18037_v2 = vand.u32 4294901760, %v18036_v49  ;;  %v23054_v62 = vpack.c.bf16 %v18030_v18, %v18023_v15  ;;  %v30753_v52 = vld [vmem:[#allocation15_spill] sm:$0xff] }
 0x7ca   : > { %v17924_v30 = vsub.f32 %v28605_v40, %v30745_v17  ;;  %v18044_v9 = vand.u32 4294901760, %v18043_v4  ;;  %23051 = vmatprep.subr.bf16.mxu1 %v23050_v45  ;;  %v30751_v63 = vand.u32 4294901760, %v28647_v11  ;;  %v30752_v17 = vand.u32 4294901760, %v28652_v16  ;;  %v30757_v4 = vld [vmem:[#allocation34_spill] sm:$0xff]  ;;  %v30759_v15 = vld [vmem:[#allocation39_spill] sm:$0xff] }
 0x7cb   : > { %v28946_v7 = vpack.c.bf16 %v30750_v35, %v30748_v19  ;;  %v30754_v44 = vand.u32 4294901760, %v30753_v52  ;;  %v30756_v53 = vand.u32 4294901760, %v30755_v59  ;;  %v23056_v49 = vpack.c.bf16 %v17918_v50, %v17911_v60 }
 0x7cc   : > { %v18050_v20 = vsub.f32 %v28647_v11, %v30751_v63  ;;  %v18057_v55 = vsub.f32 %v28652_v16, %v30752_v17  ;;  %23013 = vmatpush3.bf16.msra.mxu0 %v28932_v14  ;;  %v30758_v45 = vand.u32 4294901760, %v30757_v4  ;;  %v30760_v18 = vand.u32 4294901760, %v30759_v15  ;;  %v30767_v4 = vld [vmem:[#allocation61_spill] sm:$0xff] }
 0x7cd   : > { %v28958_v34 = vpack.c.bf16 %v30756_v53, %v30754_v44  ;;  %v17925_v36 = vand.u32 4294901760, %v17924_v30  ;;  %v17932_v35 = vand.u32 4294901760, %v17931_v38  ;;  %23053 = vmatpush3.bf16.msra.mxu1 %v23052_v0  ;;  %23015 = vmatprep.subr.bf16.mxu0 %v28946_v7  ;;  %v23058_v63 = vpack.c.bf16 %v18044_v9, %v18037_v2  ;;  %v30765_v2 = vld [vmem:[#allocation54_spill] sm:$0xff] }
 0x7ce   : > { %v28965_v19 = vpack.c.bf16 %v30760_v18, %v30758_v45  ;;  %v30761_v17 = vand.u32 4294901760, %v28669_v57  ;;  %v30762_v44 = vand.u32 4294901760, %v28680_v42  ;;  %23055 = vmatprep.subr.bf16.mxu1 %v23054_v62  ;;  %v18051_v60 = vand.u32 4294901760, %v18050_v20  ;;  %v30769_v62 = vld [vmem:[#allocation97_spill] sm:$0xff] }
 0x7cf   : > { %v18058_v59 = vand.u32 4294901760, %v18057_v55  ;;  %v30763_v53 = vand.u32 4294901760, %v28685_v61  ;;  %v30764_v38 = vand.u32 4294901760, %v28690_v48  ;;  %v30766_v9 = vand.u32 4294901760, %v30765_v2  ;;  %v30771_v55 = vld [vmem:[#allocation76_spill] sm:$0xff] }
 0x7d0   : > { %v17938_v52 = vsub.f32 %v28669_v57, %v30761_v17  ;;  %v17945_v50 = vsub.f32 %v28680_v42, %v30762_v44  ;;  %23017 = vmatpush3.bf16.msra.mxu0 %v28958_v34  ;;  %v30768_v45 = vand.u32 4294901760, %v30767_v4  ;;  %v23060_v18 = vpack.c.bf16 %v17932_v35, %v17925_v36  ;;  %v30783_v42 = vld [vmem:[#allocation104_spill] sm:$0xff] }
 0x7d1   : > { %v18064_v30 = vsub.f32 %v28685_v61, %v30763_v53  ;;  %v18071_v0 = vsub.f32 %v28690_v48, %v30764_v38  ;;  %v30770_v20 = vand.u32 4294901760, %v30769_v62  ;;  %v30772_v17 = vand.u32 4294901760, %v30771_v55  ;;  %23057 = vmatpush3.bf16.msra.mxu1 %v23056_v49  ;;  %23019 = vmatprep.subr.bf16.mxu0 %v28965_v19  ;;  %v30775_v62 = vld [vmem:[#allocation77_spill] sm:$0xff] }
 0x7d2   : > { %v28985_v15 = vpack.c.bf16 %v30768_v45, %v30766_v9  ;;  %v17939_v53 = vand.u32 4294901760, %v17938_v52  ;;  %v17946_v38 = vand.u32 4294901760, %v17945_v50  ;;  %v30773_v48 = vand.u32 4294901760, %v28703_v5  ;;  %23059 = vmatprep.subr.bf16.mxu1 %v23058_v63  ;;  %v30779_v50 = vld [vmem:[#allocation82_spill] sm:$0xff]  ;;  %v30781_v61 = vld [vmem:[#allocation89_spill] sm:$0xff] }
 0x7d3   : > { %v28991_v44 = vpack.c.bf16 %v30772_v17, %v30770_v20  ;;  %v30774_v4 = vand.u32 4294901760, %v28708_v46  ;;  %v23062_v36 = vpack.c.bf16 %v18058_v59, %v18051_v60  ;;  %v18065_v35 = vand.u32 4294901760, %v18064_v30  ;;  %v30777_v20 = vld [vmem:[#allocation78_spill] sm:$0xff] }
 0x7d4   : > { %v17952_v2 = vsub.f32 %v28703_v5, %v30773_v48  ;;  %v18072_v45 = vand.u32 4294901760, %v18071_v0  ;;  %23021 = vmatpush3.bf16.msra.mxu0 %v28985_v15  ;;  %v30776_v49 = vand.u32 4294901760, %v30775_v62  ;;  %v30778_v55 = vand.u32 4294901760, %v30777_v20  ;;  %v30784_v0 = vld [vmem:[#allocation94_spill] sm:$0xff] }
 0x7d5   : > { %v17959_v9 = vsub.f32 %v28708_v46, %v30774_v4  ;;  %v30780_v17 = vand.u32 4294901760, %v30779_v50  ;;  %v30782_v48 = vand.u32 4294901760, %v30781_v61  ;;  %v29014_v4 = vand.u32 4294901760, %v30783_v42  ;;  %23061 = vmatpush3.bf16.msra.mxu1 %v23060_v18  ;;  %23023 = vmatprep.subr.bf16.mxu0 %v28991_v44 }
 0x7d6   : > { %v29005_v52 = vpack.c.bf16 %v30778_v55, %v30776_v49  ;;  %v23064_v63 = vpack.c.bf16 %v17946_v38, %v17939_v53  ;;  %v17953_v60 = vand.u32 4294901760, %v17952_v2  ;;  %23063 = vmatprep.subr.bf16.mxu1 %v23062_v36  ;;  %v23066_v30 = vpack.c.bf16 %v18072_v45, %v18065_v35  ;;  %v30786_v49 = vld [vmem:[#allocation95_spill] sm:$0xff]  ;;  %v30791_v36 = vld [vmem:[#allocation17_spill] sm:$0xff] }
 0x7d7   : > { %v29011_v5 = vpack.c.bf16 %v30782_v48, %v30780_v17  ;;  %v17960_v59 = vand.u32 4294901760, %v17959_v9  ;;  %v30785_v62 = vand.u32 4294901760, %v30784_v0  ;;  %v30787_v20 = vand.u32 4294901760, %v30786_v49  ;;  %v30789_v38 = vld [vmem:[#allocation119_spill] sm:$0xff] }
 0x7d8   : > { %23025 = vmatpush3.bf16.msra.mxu0 %v29005_v52  ;;  %v29026_v55 = vsub.f32 %v30783_v42, %v29014_v4  ;;  %v30788_v53 = vand.u32 4294901760, %v28539_v21  ;;  %v30790_v2 = vand.u32 4294901760, %v30789_v38  ;;  %v30792_v35 = vand.u32 4294901760, %v30791_v36  ;;  %v30793_v45 = vld [vmem:[#allocation19_spill] sm:$0xff] }
 0x7d9   : > { %v29022_v61 = vpack.c.bf16 %v30787_v20, %v30785_v62  ;;  %23065 = vmatpush3.bf16.msra.mxu1 %v23064_v63  ;;  %23027 = vmatprep.subr.bf16.mxu0 %v29011_v5  ;;  %v23068_v18 = vpack.c.bf16 %v17960_v59, %v17953_v60  ;;  %v30794_v50 = vand.u32 4294901760, %v30793_v45  ;;  %v30795_v21 = vld [vmem:[#allocation23_spill] sm:$0xff]  ;;  %v30797_v63 = vld [vmem:[#allocation25_spill] sm:$0xff]  ;;  %v30802_v20 = vand.u32 4294901760, %v28858_v1 }
 0x7da   : > { %v29033_v9 = vpack.c.bf16 %v30790_v2, %v30788_v53  ;;  %23067 = vmatprep.subr.bf16.mxu1 %v23066_v30  ;;  %v17842_v42 = vand.u32 4294901760, %v29026_v55  ;;  %v30796_v48 = vand.u32 4294901760, %v30795_v21  ;;  %v30798_v60 = vand.u32 4294901760, %v30797_v63  ;;  %v30800_v0 = vld [vmem:[#allocation27_spill] sm:$0xff] }
 0x7db   : > { %v29040_v17 = vpack.c.bf16 %v30794_v50, %v30792_v35  ;;  %v30799_v30 = vand.u32 4294901760, %v28615_v39  ;;  %v30801_v62 = vand.u32 4294901760, %v30800_v0  ;;  %v23070_v53 = vpack.c.bf16 %v30678_v37, %v30675_v6 }
 0x7dc   : > { %23029 = vmatpush3.bf16.msra.mxu0 %v29022_v61  ;;  %v29049_v59 = vpack.c.bf16 %v30798_v60, %v30796_v48  ;;  %v23072_v39 = vpack.c.bf16 %v30687_v26, %v30685_v47  ;;  %v23074_v2 = vpack.c.bf16 %v30694_v54, %v30692_v33  ;;  %v23076_v6 = vpack.c.bf16 %v30700_v22, %v30698_v3 }
 0x7dd   : > { %23069 = vmatpush3.bf16.msra.mxu1 %v23068_v18  ;;  %23031 = vmatprep.subr.bf16.mxu0 %v29033_v9  ;;  %v29057_v49 = vpack.c.bf16 %v30801_v62, %v30799_v30  ;;  %v17843_v18 = vsub.f32 %v29026_v55, %v17842_v42  ;;  %v23078_v37 = vpack.c.bf16 %v30704_v31, %v30702_v23 }
 0x7de   : > { %23103 = vmatprep.subr.bf16.mxu1 %v28882_v24  ;;  %v23080_v47 = vpack.c.bf16 %v30708_v10, %v30706_v58  ;;  %v23082_v26 = vpack.c.bf16 %v30713_v41, %v30711_v51  ;;  %v23084_v33 = vpack.c.bf16 %v30723_v13, %v30721_v29  ;;  %v23086_v54 = vpack.c.bf16 %v28518_v56, %v28513_v27  ;;  %v30803_v13 = vld [vmem:[#allocation43_spill] sm:$0xff]  ;;  %v30814_v58 = vld [vmem:[#allocation118_spill] sm:$0xff]  ;;  %v30820_v29 = vld [vmem:[#allocation124_spill] sm:$0xff] }
 0x7df   : > { %v17844_v38 = vand.u32 4294901760, %v17843_v18  ;;  %v23088_v3 = vpack.c.bf16 %v28532_v32, %v28527_v25  ;;  %v23090_v22 = vpack.c.bf16 %v28558_v8, %v28553_v43  ;;  %v23092_v23 = vpack.c.bf16 %v30803_v13, %v28605_v40  ;;  %v30804_v25 = vld [vmem:[#allocation67_spill] sm:$0xff]  ;;  %v30805_v8 = vld [vmem:[#allocation69_spill] sm:$0xff]  ;;  %v30815_v10 = vld [vmem:[#allocation122_spill] sm:$0xff] }
 0x7e0   : > { %18077 = vmatmul.mubr.f32.vlgmr.msra.gmra.mrb[72].mxu1 %v29014_v4  ;;  %23033 = vmatpush3.bf16.msra.mxu0 %v29040_v17  ;;  %v23094_v27 = vpack.c.bf16 %v28652_v16, %v28647_v11  ;;  %v23096_v56 = vpack.c.bf16 %v30804_v25, %v28669_v57  ;;  %v30806_v32 = vld [vmem:[#allocation123_spill] sm:$0xff]  ;;  %v30807_v43 = vld [vmem:[#allocation125_spill] sm:$0xff]  ;;  %v30810_v16 = vld [vmem:[#allocation68_spill] sm:$0xff] }
 0x7e1   : > { %23105 = vmatpush3.bf16.msra.mxu1 %v28905_v12  ;;  %18319 = vmatprep.mubr.f32.mxu1 %v30802_v20  ;;  %v23098_v40 = vpack.c.bf16 %v30806_v32, %v30805_v8  ;;  %v23100_v31 = vpack.c.bf16 %v28708_v46, %v30807_v43  ;;  %v30808_v11 = vld [vmem:[#allocation53_spill] sm:$0xff]  ;;  %v30811_v46 = vld [vmem:[#allocation79_spill] sm:$0xff] }
 0x7e2   : > { %23035 = vmatprep.subr.bf16.mxu0 %v29049_v59  ;;  %23107 = vmatprep.subr.bf16.mxu1 %v28912_v28  ;;  %v30809_v57 = vld [vmem:[#allocation65_spill] sm:$0xff]  ;;  %v30817_v51 = vld [vmem:[#allocation35_spill] sm:$0xff] }
 0x7e3   : > { %v30818_v41 = vld [vmem:[#allocation59_spill] sm:$0xff] }
 0x7e4   : > { %23037 = vmatpush3.bf16.msra.mxu0 %v29057_v49 }
 0x7e5   : > { %23109 = vmatpush3.bf16.msra.mxu1 %v28932_v14  ;;  %23071 = vmatprep.subr.bf16.mxu0 %v23070_v53 }
 0x7e6   : > { %23111 = vmatprep.subr.bf16.mxu1 %v28946_v7 }
 0x7e7   : > { %17845 = vmatmul.mubr.f32.vlgmr.msra.gmra.mrb[72].mxu0 %v17844_v38 }
 0x7e8   : > { %23073 = vmatpush3.bf16.msra.mxu0 %v23072_v39  ;;  %18212 = vmatprep.mubr.f32.mxu0 %v28858_v1  ;;  %v30813_v1 = vld [vmem:[#allocation111_spill] sm:$0xff] }
 0x7e9   : > { %23113 = vmatpush3.bf16.msra.mxu1 %v28958_v34  ;;  %23075 = vmatprep.subr.bf16.mxu0 %v23074_v2 }
 0x7ea   : > { %23115 = vmatprep.subr.bf16.mxu1 %v28965_v19 }
 0x7ec   : > { %23077 = vmatpush3.bf16.msra.mxu0 %v23076_v6 }
 0x7ed   : > { %23117 = vmatpush3.bf16.msra.mxu1 %v28985_v15  ;;  %23079 = vmatprep.subr.bf16.mxu0 %v23078_v37 }
 0x7ee   : > { %23119 = vmatprep.subr.bf16.mxu1 %v28991_v44 }
 0x7f0   : > { %23081 = vmatpush3.bf16.msra.mxu0 %v23080_v47 }
 0x7f1   : > { %23121 = vmatpush3.bf16.msra.mxu1 %v29005_v52  ;;  %23083 = vmatprep.subr.bf16.mxu0 %v23082_v26 }
 0x7f2   : > { %23123 = vmatprep.subr.bf16.mxu1 %v29011_v5 }
 0x7f4   : > { %23085 = vmatpush3.bf16.msra.mxu0 %v23084_v33 }
 0x7f5   : > { %23125 = vmatpush3.bf16.msra.mxu1 %v29022_v61  ;;  %23087 = vmatprep.subr.bf16.mxu0 %v23086_v54 }
 0x7f6   : > { %23127 = vmatprep.subr.bf16.mxu1 %v29033_v9 }
 0x7f8   : > { %23089 = vmatpush3.bf16.msra.mxu0 %v23088_v3 }
 0x7f9   : > { %23129 = vmatpush3.bf16.msra.mxu1 %v29040_v17  ;;  %23091 = vmatprep.subr.bf16.mxu0 %v23090_v22 }
 0x7fa   : > { %23131 = vmatprep.subr.bf16.mxu1 %v29049_v59 }
 0x7fc   : > { %23093 = vmatpush3.bf16.msra.mxu0 %v23092_v23 }
 0x7fd   : > { %23133 = vmatpush3.bf16.msra.mxu1 %v29057_v49  ;;  %23095 = vmatprep.subr.bf16.mxu0 %v23094_v27 }
 0x7fe   : > { %23167 = vmatprep.subr.bf16.mxu1 %v28882_v24  ;;  %v30819_v24 = vld [vmem:[#allocation66_spill] sm:$0xff] }
 0x800   : > { %18323 = vmatmul.mubr.f32.vlgmr.msra.gmra.mrb[74].mxu1 %v17842_v42  ;;  %23097 = vmatpush3.bf16.msra.mxu0 %v23096_v56 }
 0x801   : > { %23169 = vmatpush3.bf16.msra.mxu1 %v28905_v12  ;;  %18593 = vmatprep.mubr.f32.mxu1 %v30808_v11  ;;  %v30822_v12 = vld [vmem:[#allocation127_spill] sm:$0xff] }
 0x802   : > { %23099 = vmatprep.subr.bf16.mxu0 %v23098_v40  ;;  %23171 = vmatprep.subr.bf16.mxu1 %v28912_v28  ;;  %v30812_v28 = vld [vmem:[#allocation90_spill] sm:$0xff] }
 0x804   : > { %23101 = vmatpush3.bf16.msra.mxu0 %v23100_v31 }
 0x805   : > { %23173 = vmatpush3.bf16.msra.mxu1 %v28932_v14  ;;  %23135 = vmatprep.subr.bf16.mxu0 %v30809_v57  ;;  %v30823_v14 = vld [vmem:[#allocation128_spill] sm:$0xff] }
 0x806   : > { %23175 = vmatprep.subr.bf16.mxu1 %v28946_v7  ;;  %v30824_v7 = vld [vmem:[#allocation129_spill] sm:$0xff] }
 0x807   : > { %18215 = vmatmul.mubr.f32.vlgmr.msra.gmra.mrb[74].mxu0 %v29026_v55 }
 0x808   : > { %23137 = vmatpush3.bf16.msra.mxu0 %v30810_v16  ;;  %18489 = vmatprep.mubr.f32.mxu0 %v30808_v11 }
 0x809   : > { %23177 = vmatpush3.bf16.msra.mxu1 %v28958_v34  ;;  %23139 = vmatprep.subr.bf16.mxu0 %v30811_v46  ;;  %v30816_v34 = vld [vmem:[#allocation21_spill] sm:$0xff] }
 0x80a   : > { %23179 = vmatprep.subr.bf16.mxu1 %v28965_v19 }
 0x80c   : > { %23141 = vmatpush3.bf16.msra.mxu0 %v30812_v28 }
 0x80d   : > { %23181 = vmatpush3.bf16.msra.mxu1 %v28985_v15  ;;  %23143 = vmatprep.subr.bf16.mxu0 %v30813_v1 }
 0x80e   : > { %23183 = vmatprep.subr.bf16.mxu1 %v28991_v44 }
 0x810   : > { %23145 = vmatpush3.bf16.msra.mxu0 %v30814_v58 }
 0x811   : > { %23185 = vmatpush3.bf16.msra.mxu1 %v29005_v52  ;;  %23147 = vmatprep.subr.bf16.mxu0 %v30815_v10 }
 0x812   : > { %23187 = vmatprep.subr.bf16.mxu1 %v29011_v5  ;;  %v30821_v5 = vld [vmem:[#allocation126_spill] sm:$0xff] }
 0x814   : > { %23149 = vmatpush3.bf16.msra.mxu0 %v30816_v34 }
 0x815   : > { %23189 = vmatpush3.bf16.msra.mxu1 %v29022_v61  ;;  %23151 = vmatprep.subr.bf16.mxu0 %v30817_v51  ;;  %v18693_v61 = vld [vmem:[%s29209_s9] ss:$0 sm:$0xff] }
 0x816   : > { %23191 = vmatprep.subr.bf16.mxu1 %v29033_v9 }
 0x818   : > { %23153 = vmatpush3.bf16.msra.mxu0 %v30818_v41 }
 0x819   : > { %23193 = vmatpush3.bf16.msra.mxu1 %v29040_v17  ;;  %23155 = vmatprep.subr.bf16.mxu0 %v30819_v24 }
 0x81a   : > { %23195 = vmatprep.subr.bf16.mxu1 %v29049_v59 }
 0x81c   : > { %23157 = vmatpush3.bf16.msra.mxu0 %v30820_v29 }
 0x81d   : > { %23197 = vmatpush3.bf16.msra.mxu1 %v29057_v49  ;;  %23159 = vmatprep.subr.bf16.mxu0 %v30821_v5 }
 0x820   : > { %18595 = vmatmul.mubr.f32.vlgmr.msra.gmra.mrb[76].mxu1 %v29014_v4  ;;  %23161 = vmatpush3.bf16.msra.mxu0 %v30822_v12 }
 0x821   : > { %23163 = vmatprep.subr.bf16.mxu0 %v30823_v14 }
 0x824   : > { %23165 = vmatpush3.bf16.msra.mxu0 %v30824_v7 }
 0x827   : > { %18491 = vmatmul.mubr.f32.vlgmr.msra.gmra.mrb[76].mxu0 %v29014_v4 }
 0x84b   : > { %v20445_v19 = vpop.f32.mrb[66].mxu1 }
 0x84c   : > { %v20446_v15 = vpop.f32.mrb[67].mxu1 }
 0x84d   : > { %v20447_v44 = vadd.f32 %v20446_v15, %v20445_v19 }
 0x853   : > { %v20410_v52 = vpop.f32.mrb[66].mxu0 }
 0x854   : > { %v20411_v55 = vpop.f32.mrb[67].mxu0 }
 0x855   : > { %v20412_v9 = vadd.f32 %v20411_v55, %v20410_v52 }
 0x857   : > { %v16985_v36 = vadd.f32 %v20412_v9, %v18693_v61 }
 0x859   : > { %v17217_v35 = vadd.f32 %v20447_v44, %v16985_v36 }
 0x873   : > { %v20515_v45 = vpop.f32.mrb[68].mxu1 }
 0x874   : > { %v20516_v50 = vpop.f32.mrb[69].mxu1 }
 0x875   : > { %v20517_v17 = vadd.f32 %v20516_v50, %v20515_v45 }
 0x87a   : > { %v20480_v42 = vpop.f32.mrb[68].mxu0 }
 0x87b   : > { %v20481_v21 = vpop.f32.mrb[69].mxu0 }
 0x87c   : > { %v20482_v48 = vadd.f32 %v20481_v21, %v20480_v42 }
 0x87e   : > { %v17355_v63 = vadd.f32 %v20482_v48, %v17217_v35 }
 0x880   : > { %v17463_v4 = vadd.f32 %v20517_v17, %v17355_v63 }
 0x893   : > { %v20585_v60 = vpop.f32.mrb[70].mxu1 }
 0x894   : > { %v20586_v59 = vpop.f32.mrb[71].mxu1 }
 0x895   : > { %v20587_v30 = vadd.f32 %v20586_v59, %v20585_v60 }
 0x89a   : > { %v20550_v0 = vpop.f32.mrb[70].mxu0 }
 0x89b   : > { %v20551_v62 = vpop.f32.mrb[71].mxu0 }
 0x89c   : > { %v20552_v49 = vadd.f32 %v20551_v62, %v20550_v0 }
 0x89e   : > { %v17631_v20 = vadd.f32 %v20552_v49, %v17463_v4 }
 0x8a0   : > { %v17735_v18 = vadd.f32 %v20587_v30, %v17631_v20 }
 0x8b3   : > { %v20655_v53 = vpop.f32.mrb[72].mxu1 }
 0x8b4   : > { %v20656_v39 = vpop.f32.mrb[73].mxu1 }
 0x8b5   : > { %v20657_v38 = vadd.f32 %v20656_v39, %v20655_v53 }
 0x8ba   : > { %v20620_v2 = vpop.f32.mrb[72].mxu0 }
 0x8bb   : > { %v20621_v6 = vpop.f32.mrb[73].mxu0 }
 0x8bc   : > { %v20622_v37 = vadd.f32 %v20621_v6, %v20620_v2 }
 0x8be   : > { %v17847_v47 = vadd.f32 %v20622_v37, %v17735_v18 }
 0x8c0   : > { %v18079_v26 = vadd.f32 %v20657_v38, %v17847_v47 }
 0x8d3   : > { %v20725_v33 = vpop.f32.mrb[74].mxu1 }
 0x8d4   : > { %v20726_v54 = vpop.f32.mrb[75].mxu1 }
 0x8d5   : > { %v20727_v3 = vadd.f32 %v20726_v54, %v20725_v33 }
 0x8da   : > { %v20690_v22 = vpop.f32.mrb[74].mxu0 }
 0x8db   : > { %v20691_v13 = vpop.f32.mrb[75].mxu0 }
 0x8dc   : > { %v20692_v23 = vadd.f32 %v20691_v13, %v20690_v22 }
 0x8de   : > { %v18217_v27 = vadd.f32 %v20692_v23, %v18079_v26 }
 0x8e0   : > { %v18325_v25 = vadd.f32 %v20727_v3, %v18217_v27 }
 0x8f3   : > { %v20795_v56 = vpop.f32.mrb[76].mxu1 }
 0x8f4   : > { %v20796_v8 = vpop.f32.mrb[77].mxu1 }
 0x8f5   : > { %v20797_v32 = vadd.f32 %v20796_v8, %v20795_v56 }
 0x8fa   : > { %v20760_v40 = vpop.f32.mrb[76].mxu0 }
 0x8fb   : > { %v20761_v43 = vpop.f32.mrb[77].mxu0 }
 0x8fc   : > { %v20762_v31 = vadd.f32 %v20761_v43, %v20760_v40 }
 0x8fe   : > { %v18493_v11 = vadd.f32 %v20762_v31, %v18325_v25 }
 0x900   : > { %v18597_v57 = vadd.f32 %v20797_v32, %v18493_v11 }
 0x902   : > { %18600 = vst.msk [vmem:[%s363_s27] sm:$0xff] %vm485_vm0, %v18597_v57 }
 0x903   : > { %23463 = shalt.err (!%p23460_p3)
}
 0x904   : > { %s23464_s29 = scalar_lea.hbm %s29157_s21, 128  ;;  %s23468_s18 = scalar_lea.hbm %s29210_s10, 256 }
 0x905   : > { %p23465_p4 = scmp.ne.s32.totalorder %s29157_s21, %s23464_s29  ;;  %p23469_p9 = scmp.lt.u32.totalorder %s29157_s21, %s29210_s10 }
 0x906   : > { %p23470_p10 = scmp.lt.u32.totalorder %s23468_s18, %s23464_s29  ;;  %p23472_p12 = scmp.lt.u32.totalorder %s23464_s29, %s29157_s21 }
 0x907   : > { %p23466_p7 = pnand %p23465_p4, %p23609_p5 }
 0x908   : > { %p23471_p11 = por %p23470_p10, %p23469_p9 }
 0x909   : > { %p23467_p8 = pneg %p23466_p7 }
 0x90a   : > { %p23473_p13 = por %p23472_p12, %p23471_p11 }
 0x90c   : > { %p23474_p0 = pnand %p23473_p13, %p23467_p8 }
 0x90e   : > { %23477 = shalt.err (!%p23474_p0)
}
 0x90f   : > { %23398 = dma.vmem_to_hbm [thread:$0]  (%p23609_p5), %s29159_s30, 128, %s29157_s21, %s18602_s25  }
 0x910 PF: > { %p23404_p1 = scmp.ge.s32.totalorder %s23512_s16, 2  ;;  %s18627_s26 = sand.u32 1, %s23500_s13  }
 0x911   : > { %s18628_s28 = scalar_lea.sflag [#allocation3], %s18627_s26 }
 0x912   : > { %p23401_p2 = pnand %p23404_p1, %p23613_p6 }
 0x914   : > { %23495 = dma.done.wait (!%p23401_p2), %s18628_s28, 128  }
 0x915   : > { %23497 = vsyncadd (!%p23401_p2), %s18628_s28, 4294967168  ;;  %p20_p3 = scmp.ge.s32.totalorder %s23596_s19, 4   ;;  %s30825_s13 = smov %s23504_s14 }
 0x916   : > { %s30826_s14 = smov %s23508_s15  ;;  %s30827_s15 = smov %s23607_s22 }
 0x917   : > { %s30828_s16 = smov %s23596_s19  ;;  %22 = sbr.rel (!%p20_p3) target bundleno = 3 (0x3), region = 98 }
 0x91e   :  { %18633 = vsyncpa [#allocation3], 1 }
 0x91f   :  { %18635 = vsyncpa [#allocation3 + $0x1], 1 }

</bundles_post_ra>
